<compile_context>
chip_gen: v5e
topology: v5e:2x2
jax: 0.10.0
libtpu: 0.0.40
codegen_flags: <defaults>
</compile_context>

<pallas_src>
import functools

import jax
import jax.numpy as jnp
from jax.experimental import pallas as pl
from jax.experimental.pallas import tpu as pltpu


LANE = 128
# Max bytes of live operands for the fully-VMEM-resident (grid=(1,)) conv path.
VMEM_SINGLE_BLOCK_BUDGET = 6 * 1024 * 1024
# (kernel, stride, pad, in_ch, out_ch) for conv1..conv4 of the PyTorch module.
CONV_CFG = (
    (5, 2, 1, 4, 32),
    (3, 2, 1, 32, 64),
    (3, 1, 1, 64, 128),
    (3, 1, 1, 128, 128),
)


def _round_up(x, m):
    return ((x + m - 1) // m) * m


# ----------------------------------------------------------------------------
# Pallas kernel 1: conv-as-matmul  out = act(patches @ W + bias)
#   (conv + folded BatchNorm + ReLU, expressed as im2col matmul)
# ----------------------------------------------------------------------------
def _mm_bias_epilogue(acc, bias, relu, out_dtype):
    y = acc + bias
    if relu:
        y = jnp.maximum(y, 0.0)
    return y.astype(out_dtype)


def _mm_bias_2d_kernel(a_ref, w_ref, b_ref, o_ref, *, relu):
    # Whole problem resident in VMEM, single grid step.
    acc = jnp.dot(a_ref[...], w_ref[...], preferred_element_type=jnp.float32)
    o_ref[...] = _mm_bias_epilogue(acc, b_ref[...], relu, o_ref.dtype)


def _mm_bias_batched_kernel(a_ref, w_ref, b_ref, o_ref, *, relu):
    # One image per grid step (fallback for large activations).
    acc = jnp.dot(a_ref[0], w_ref[...], preferred_element_type=jnp.float32)
    o_ref[0] = _mm_bias_epilogue(acc, b_ref[...], relu, o_ref.dtype)


def batched_matmul_bias(a, w, bias, *, relu, out_dtype):
    """a: (B, M, K) bf16, w: (K, N) bf16, bias: (1, N) f32 -> (B, M, N)."""
    B, M, K = a.shape
    K2, N = w.shape
    assert K == K2, (K, K2)
    out_bytes = B * M * N * jnp.dtype(out_dtype).itemsize
    in_bytes = (a.size * a.dtype.itemsize + w.size * w.dtype.itemsize
                + bias.size * bias.dtype.itemsize)
    cost = pl.CostEstimate(flops=2 * B * M * K * N, transcendentals=0,
                           bytes_accessed=in_bytes + out_bytes)

    if in_bytes + out_bytes <= VMEM_SINGLE_BLOCK_BUDGET:
        # Flatten (batch*stack, spatial) rows into one VMEM-resident matmul.
        a2d = a.reshape(B * M, K)                      # contiguous -> free
        out = pl.pallas_call(
            functools.partial(_mm_bias_2d_kernel, relu=relu),
            out_shape=jax.ShapeDtypeStruct((B * M, N), out_dtype),
            grid=(1,),
            in_specs=[
                # full-extent blocks -> exempt from the (8,128) tiling rule
                pl.BlockSpec((B * M, K), lambda i: (0, 0)),
                pl.BlockSpec((K, N), lambda i: (0, 0)),
                pl.BlockSpec((1, N), lambda i: (0, 0)),
            ],
            out_specs=pl.BlockSpec((B * M, N), lambda i: (0, 0)),
            compiler_params=pltpu.CompilerParams(
                dimension_semantics=("arbitrary",),
                vmem_limit_bytes=32 * 1024 * 1024),
            cost_estimate=cost,
        )(a2d, w, bias)
        return out.reshape(B, M, N)

    # Fallback: grid over images, weights stay resident across the grid.
    return pl.pallas_call(
        functools.partial(_mm_bias_batched_kernel, relu=relu),
        out_shape=jax.ShapeDtypeStruct((B, M, N), out_dtype),
        grid=(B,),
        in_specs=[
            pl.BlockSpec((1, M, K), lambda b: (b, 0, 0)),
            pl.BlockSpec((K, N), lambda b: (0, 0)),
            pl.BlockSpec((1, N), lambda b: (0, 0)),
        ],
        out_specs=pl.BlockSpec((1, M, N), lambda b: (b, 0, 0)),
        compiler_params=pltpu.CompilerParams(
            dimension_semantics=("parallel",),
            vmem_limit_bytes=32 * 1024 * 1024),
        cost_estimate=cost,
    )(a, w, bias)


# ----------------------------------------------------------------------------
# Pallas kernel 2: fused FC head   out = relu(h @ W1 + b1) @ W2 + b2
# ----------------------------------------------------------------------------
def _fc_fused_kernel(h_ref, w1_ref, b1_ref, w2_ref, b2_ref, o_ref):
    z1 = jnp.dot(h_ref[...], w1_ref[...], preferred_element_type=jnp.float32)
    z1 = jnp.maximum(z1 + b1_ref[...], 0.0)
    z2 = jnp.dot(z1.astype(jnp.bfloat16), w2_ref[...],
                 preferred_element_type=jnp.float32)
    o_ref[...] = z2 + b2_ref[...]


def fc_head(h, w1, b1, w2, b2):
    """h: (B, K1) bf16 -> (B, n_actions) f32, fc1+ReLU+fc2 in one kernel."""
    B, K1 = h.shape
    K1b, H1 = w1.shape
    H1b, A = w2.shape
    assert K1 == K1b and H1 == H1b
    flops = 2 * B * (K1 * H1 + H1 * A)
    bytes_accessed = (h.size * 2 + w1.size * 2 + w2.size * 2
                      + b1.size * 4 + b2.size * 4 + B * A * 4)
    return pl.pallas_call(
        _fc_fused_kernel,
        out_shape=jax.ShapeDtypeStruct((B, A), jnp.float32),
        grid=(1,),
        in_specs=[
            pl.BlockSpec((B, K1), lambda i: (0, 0)),
            pl.BlockSpec((K1, H1), lambda i: (0, 0)),
            pl.BlockSpec((1, H1), lambda i: (0, 0)),
            pl.BlockSpec((H1, A), lambda i: (0, 0)),
            pl.BlockSpec((1, A), lambda i: (0, 0)),
        ],
        out_specs=pl.BlockSpec((B, A), lambda i: (0, 0)),
        compiler_params=pltpu.CompilerParams(
            dimension_semantics=("arbitrary",),
            vmem_limit_bytes=16 * 1024 * 1024),
        cost_estimate=pl.CostEstimate(
            flops=flops, transcendentals=0, bytes_accessed=bytes_accessed),
    )(h, w1, b1, w2, b2)


# ----------------------------------------------------------------------------
# JAX glue (NHWC, fused under jit): im2col, 2x2 max-pool
# ----------------------------------------------------------------------------
def im2col_nhwc(x, kh, kw, stride, pad, k_pad_to):
    """x: (N, H, W, C) -> patches (N, Ho*Wo, k_pad_to), Ho, Wo."""
    N, H, W, C = x.shape
    xp = jnp.pad(x, ((0, 0), (pad, pad), (pad, pad), (0, 0)))
    Ho = (H - kh + 2 * pad) // stride + 1
    Wo = (W - kw + 2 * pad) // stride + 1
    cols = []
    for i in range(kh):
        for j in range(kw):
            cols.append(
                xp[:, i:i + stride * Ho:stride, j:j + stride * Wo:stride, :])
    p = jnp.stack(cols, axis=3)                     # (N, Ho, Wo, kh*kw, C)
    p = p.reshape(N, Ho * Wo, kh * kw * C)          # NHWC -> free reshape
    K = kh * kw * C
    if k_pad_to > K:                                # zero-pad contraction dim
        p = jnp.pad(p, ((0, 0), (0, 0), (0, k_pad_to - K)))
    return p, Ho, Wo


def maxpool2_nhwc(x):
    """2x2 / stride-2 max pool with floor semantics (like F.max_pool2d)."""
    N, H, W, C = x.shape
    Hp, Wp = H // 2, W // 2
    x = x[:, :Hp * 2, :Wp * 2, :].reshape(N, Hp, 2, Wp, 2, C)
    return x.max(axis=(2, 4))


def conv_bn_relu_pool(x, cfg, p):
    kh, stride, pad, _, out_ch = cfg
    kp = p["w"].shape[0]                            # lane-padded contraction dim
    patches, Ho, Wo = im2col_nhwc(x, kh, kh, stride, pad, kp)
    y = batched_matmul_bias(patches, p["w"], p["b"], relu=True,
                            out_dtype=jnp.bfloat16)
    y = y.reshape(x.shape[0], Ho, Wo, out_ch)
    return maxpool2_nhwc(y)


# ----------------------------------------------------------------------------
# Full DQN forward
# ----------------------------------------------------------------------------
def dqn_forward(params, x, relative_position):
    """x: (B, S, H, W) int tokens in [0, 10]; relative_position: (B, S)."""
    B, S, H, W = x.shape
    BS = B * S

    tok = x.reshape(BS, H, W).astype(jnp.int32)
    feat = jnp.take(params["embed"], tok, axis=0)        # (BS, H, W, 4) bf16 NHWC

    for idx, cfg in enumerate(CONV_CFG):
        feat = conv_bn_relu_pool(feat, cfg, params[f"conv{idx + 1}"])

    # NHWC flatten == NCHW flatten here: final spatial dims are 1x1.
    feat = feat.reshape(B, S, -1).astype(jnp.float32).mean(axis=1)   # (B, 128)

    rp = (relative_position + 1).astype(jnp.int32).reshape(BS)
    rpe = jnp.take(params["rel_embed"], rp, axis=0)                  # (BS, 4)
    rpe = rpe.reshape(B, S, -1).mean(axis=1)                         # (B, 4)

    k1 = params["fc1_w"].shape[0]
    pad = k1 - feat.shape[1] - rpe.shape[1]
    h = jnp.concatenate(
        [feat.astype(jnp.bfloat16), rpe.astype(jnp.bfloat16),
         jnp.zeros((B, pad), jnp.bfloat16)], axis=1)                 # (B, k1)

    return fc_head(h, params["fc1_w"], params["fc1_b"],
                   params["fc2_w"], params["fc2_b"])


# ----------------------------------------------------------------------------
# Parameters: raw (PyTorch-like, f32) + one-time folding/prep
# ----------------------------------------------------------------------------
def make_params(key, h, w, n_actions, embedding_dim=4):
    def conv_params(key, o, c, k):
        k0, k1, k2, k3, k4, k5 = jax.random.split(key, 6)
        return {
            "w": 0.05 * jax.random.normal(k0, (o, c, k, k), jnp.float32),
            "b": 0.01 * jax.random.normal(k1, (o,), jnp.float32),
            "gamma": 1.0 + 0.01 * jax.random.normal(k2, (o,), jnp.float32),
            "beta": 0.01 * jax.random.normal(k3, (o,), jnp.float32),
            "mean": 0.01 * jax.random.normal(k4, (o,), jnp.float32),
            "var": 1.0 + 0.1 * jnp.abs(jax.random.normal(k5, (o,), jnp.float32)),
        }

    def conv_out(s, k, st, p):
        return (s - k + 2 * p) // st + 1

    def sized(s):
        for (k, st, p, _, _) in CONV_CFG:
            s = conv_out(s, k, st, p) // 2
        return s

    linear_input_size = 128 * sized(h) * sized(w)

    keys = jax.random.split(key, 8)
    params = {
        "embed": 0.1 * jax.random.normal(keys[0], (11, embedding_dim), jnp.float32),
        "rel_embed": 0.1 * jax.random.normal(keys[1], (3, embedding_dim), jnp.float32),
        "conv1": conv_params(keys[2], 32, embedding_dim, 5),
        "conv2": conv_params(keys[3], 64, 32, 3),
        "conv3": conv_params(keys[4], 128, 64, 3),
        "conv4": conv_params(keys[5], 128, 128, 3),
        # stored (in_features, out_features) so forward is h @ W
        "fc1_w": 0.02 * jax.random.normal(
            keys[6], (linear_input_size + embedding_dim, 512), jnp.float32),
        "fc1_b": jnp.zeros((512,), jnp.float32),
        "fc2_w": 0.02 * jax.random.normal(keys[7], (512, n_actions), jnp.float32),
        "fc2_b": jnp.zeros((n_actions,), jnp.float32),
    }
    return params, linear_input_size


def prepare_params(raw):
    """One-time prep: fold eval-mode BN into weights/bias, transpose conv
    weights to (kh*kw*C, O) matching NHWC im2col order, lane-pad the
    contraction dim, cast matmul operands to bf16 (biases stay f32)."""
    prepped = {
        "embed": raw["embed"].astype(jnp.bfloat16),
        "rel_embed": raw["rel_embed"].astype(jnp.float32),
    }
    for idx, (k, _, _, c_in, o) in enumerate(CONV_CFG):
        p = raw[f"conv{idx + 1}"]
        kk = k * k * c_in
        w_mat = p["w"].transpose(2, 3, 1, 0).reshape(kk, o)   # (kh,kw,C,O) flat
        scale = p["gamma"] / jnp.sqrt(p["var"] + 1e-5)
        w_mat = w_mat * scale[None, :]                        # exact BN fold
        bias = scale * (p["b"] - p["mean"]) + p["beta"]
        kp = _round_up(kk, LANE)
        w_mat = jnp.pad(w_mat, ((0, kp - kk), (0, 0)))
        prepped[f"conv{idx + 1}"] = {
            "w": w_mat.astype(jnp.bfloat16),
            "b": bias.reshape(1, o).astype(jnp.float32),
        }
    k1 = raw["fc1_w"].shape[0]
    k1p = _round_up(k1, LANE)
    prepped["fc1_w"] = jnp.pad(
        raw["fc1_w"], ((0, k1p - k1), (0, 0))).astype(jnp.bfloat16)
    prepped["fc1_b"] = raw["fc1_b"].reshape(1, -1).astype(jnp.float32)
    prepped["fc2_w"] = raw["fc2_w"].astype(jnp.bfloat16)
    prepped["fc2_b"] = raw["fc2_b"].reshape(1, -1).astype(jnp.float32)
    return prepped


# ----------------------------------------------------------------------------
if __name__ == "__main__":
    # H=W=64 survives the 4 conv+pool stages (final spatial 1x1,
    # linear_input_size = 128), matching the PyTorch module's size math.
    B, S, H, W, N_ACTIONS = 2, 2, 64, 64, 6

    key = jax.random.PRNGKey(0)
    kp, kx, kr = jax.random.split(key, 3)
    raw_params, lin_size = make_params(kp, H, W, N_ACTIONS)
    assert lin_size == 128, lin_size
    params = prepare_params(raw_params)

    x = jax.random.randint(kx, (B, S, H, W), 0, 11, dtype=jnp.int32)
    relative_position = jax.random.randint(kr, (B, S), -1, 2, dtype=jnp.int32)

    fwd = jax.jit(dqn_forward)
    out = jax.block_until_ready(fwd(params, x, relative_position))
    assert out.shape == (B, N_ACTIONS), out.shape
    assert bool(jnp.all(jnp.isfinite(out)))
    print("KERNEL_OK")
</pallas_src>

<mosaic_0001>
module attributes {stable_mosaic.version = 11 : i64} {
  func.func @_mm_bias_2d_kernel(%arg0: i32, %arg1: memref<3844x128xbf16, #tpu.memory_space<vmem>>, %arg2: memref<128x32xbf16, #tpu.memory_space<vmem>>, %arg3: memref<1x32xf32, #tpu.memory_space<vmem>>, %arg4: memref<3844x32xbf16, #tpu.memory_space<vmem>>) attributes {dimension_semantics = [#tpu.dimension_semantics<arbitrary>], iteration_bounds = array<i64: 1>, scalar_prefetch = 0 : i64, scratch_operands = 0 : i64, tpu.core_type = #tpu.core_type<tc>, window_params = [{pipeline_mode = #tpu.pipeline_mode<synchronous>, transform_indices = @transform_0, window_bounds = array<i64: 3844, 128>}, {pipeline_mode = #tpu.pipeline_mode<synchronous>, transform_indices = @transform_1, window_bounds = array<i64: 128, 32>}, {pipeline_mode = #tpu.pipeline_mode<synchronous>, transform_indices = @transform_2, window_bounds = array<i64: 1, 32>}, {pipeline_mode = #tpu.pipeline_mode<synchronous>, transform_indices = @transform_3, window_bounds = array<i64: 3844, 32>}]} {
    %c0 = arith.constant 0 : index
    %c0_0 = arith.constant 0 : index
    %0 = vector.load %arg1[%c0, %c0_0] : memref<3844x128xbf16, #tpu.memory_space<vmem>>, vector<3844x128xbf16>
    %c0_1 = arith.constant 0 : index
    %c0_2 = arith.constant 0 : index
    %1 = vector.load %arg2[%c0_1, %c0_2] : memref<128x32xbf16, #tpu.memory_space<vmem>>, vector<128x32xbf16>
    %cst = arith.constant dense<0.000000e+00> : vector<3844x32xf32>
    %2 = tpu.matmul %0, %1, %cst {dimension_numbers = #tpu.dot_dimension_numbers<[1], [0], [0], [1], [0, 0, 1, 1], [], []>} : vector<3844x128xbf16>, vector<128x32xbf16>, vector<3844x32xf32> -> vector<3844x32xf32>
    %c0_3 = arith.constant 0 : index
    %c0_4 = arith.constant 0 : index
    %3 = vector.load %arg3[%c0_3, %c0_4] : memref<1x32xf32, #tpu.memory_space<vmem>>, vector<1x32xf32>
    %4 = vector.broadcast %3 : vector<1x32xf32> to vector<3844x32xf32>
    %5 = arith.addf %2, %4 : vector<3844x32xf32>
    %cst_5 = arith.constant 0.000000e+00 : f32
    %6 = vector.broadcast %cst_5 : f32 to vector<3844x32xf32>
    %7 = arith.maximumf %5, %6 : vector<3844x32xf32>
    %8 = arith.truncf %7 : vector<3844x32xf32> to vector<3844x32xbf16>
    %c0_6 = arith.constant 0 : index
    %c0_7 = arith.constant 0 : index
    %9 = vector.load %arg4[%c0_6, %c0_7] : memref<3844x32xbf16, #tpu.memory_space<vmem>>, vector<3844x32xbf16>
    tpu.vector_store %arg4[%c0_6, %c0_7], %8 {strides = array<i32>} : memref<3844x32xbf16, #tpu.memory_space<vmem>>, vector<3844x32xbf16>,
    return
  }
  func.func @transform_0(%arg0: i32) -> (i32, i32) {
    %c0_i32 = arith.constant 0 : i32
    %c0_i32_0 = arith.constant 0 : i32
    %c0_i32_1 = arith.constant 0 : i32
    return %c0_i32, %c0_i32_0 : i32, i32
  }
  func.func @transform_1(%arg0: i32) -> (i32, i32) {
    %c0_i32 = arith.constant 0 : i32
    %c0_i32_0 = arith.constant 0 : i32
    %c0_i32_1 = arith.constant 0 : i32
    return %c0_i32, %c0_i32_0 : i32, i32
  }
  func.func @transform_2(%arg0: i32) -> (i32, i32) {
    %c0_i32 = arith.constant 0 : i32
    %c0_i32_0 = arith.constant 0 : i32
    %c0_i32_1 = arith.constant 0 : i32
    return %c0_i32, %c0_i32_0 : i32, i32
  }
  func.func @transform_3(%arg0: i32) -> (i32, i32) {
    %c0_i32 = arith.constant 0 : i32
    %c0_i32_0 = arith.constant 0 : i32
    %c0_i32_1 = arith.constant 0 : i32
    return %c0_i32, %c0_i32_0 : i32, i32
  }
}

module attributes {stable_mosaic.version = 11 : i64} {
  func.func @_mm_bias_2d_kernel(%arg0: i32, %arg1: memref<256x384xbf16, #tpu.memory_space<vmem>>, %arg2: memref<384x64xbf16, #tpu.memory_space<vmem>>, %arg3: memref<1x64xf32, #tpu.memory_space<vmem>>, %arg4: memref<256x64xbf16, #tpu.memory_space<vmem>>) attributes {dimension_semantics = [#tpu.dimension_semantics<arbitrary>], iteration_bounds = array<i64: 1>, scalar_prefetch = 0 : i64, scratch_operands = 0 : i64, tpu.core_type = #tpu.core_type<tc>, window_params = [{pipeline_mode = #tpu.pipeline_mode<synchronous>, transform_indices = @transform_0, window_bounds = array<i64: 256, 384>}, {pipeline_mode = #tpu.pipeline_mode<synchronous>, transform_indices = @transform_1, window_bounds = array<i64: 384, 64>}, {pipeline_mode = #tpu.pipeline_mode<synchronous>, transform_indices = @transform_2, window_bounds = array<i64: 1, 64>}, {pipeline_mode = #tpu.pipeline_mode<synchronous>, transform_indices = @transform_3, window_bounds = array<i64: 256, 64>}]} {
    %c0 = arith.constant 0 : index
    %c0_0 = arith.constant 0 : index
    %0 = vector.load %arg1[%c0, %c0_0] : memref<256x384xbf16, #tpu.memory_space<vmem>>, vector<256x384xbf16>
    %c0_1 = arith.constant 0 : index
    %c0_2 = arith.constant 0 : index
    %1 = vector.load %arg2[%c0_1, %c0_2] : memref<384x64xbf16, #tpu.memory_space<vmem>>, vector<384x64xbf16>
    %cst = arith.constant dense<0.000000e+00> : vector<256x64xf32>
    %2 = tpu.matmul %0, %1, %cst {dimension_numbers = #tpu.dot_dimension_numbers<[1], [0], [0], [1], [0, 0, 1, 1], [], []>} : vector<256x384xbf16>, vector<384x64xbf16>, vector<256x64xf32> -> vector<256x64xf32>
    %c0_3 = arith.constant 0 : index
    %c0_4 = arith.constant 0 : index
    %3 = vector.load %arg3[%c0_3, %c0_4] : memref<1x64xf32, #tpu.memory_space<vmem>>, vector<1x64xf32>
    %4 = vector.broadcast %3 : vector<1x64xf32> to vector<256x64xf32>
    %5 = arith.addf %2, %4 : vector<256x64xf32>
    %cst_5 = arith.constant 0.000000e+00 : f32
    %6 = vector.broadcast %cst_5 : f32 to vector<256x64xf32>
    %7 = arith.maximumf %5, %6 : vector<256x64xf32>
    %8 = arith.truncf %7 : vector<256x64xf32> to vector<256x64xbf16>
    %c0_6 = arith.constant 0 : index
    %c0_7 = arith.constant 0 : index
    %9 = vector.load %arg4[%c0_6, %c0_7] : memref<256x64xbf16, #tpu.memory_space<vmem>>, vector<256x64xbf16>
    tpu.vector_store %arg4[%c0_6, %c0_7], %8 {strides = array<i32>} : memref<256x64xbf16, #tpu.memory_space<vmem>>, vector<256x64xbf16>,
    return
  }
  func.func @transform_0(%arg0: i32) -> (i32, i32) {
    %c0_i32 = arith.constant 0 : i32
    %c0_i32_0 = arith.constant 0 : i32
    %c0_i32_1 = arith.constant 0 : i32
    return %c0_i32, %c0_i32_0 : i32, i32
  }
  func.func @transform_1(%arg0: i32) -> (i32, i32) {
    %c0_i32 = arith.constant 0 : i32
    %c0_i32_0 = arith.constant 0 : i32
    %c0_i32_1 = arith.constant 0 : i32
    return %c0_i32, %c0_i32_0 : i32, i32
  }
  func.func @transform_2(%arg0: i32) -> (i32, i32) {
    %c0_i32 = arith.constant 0 : i32
    %c0_i32_0 = arith.constant 0 : i32
    %c0_i32_1 = arith.constant 0 : i32
    return %c0_i32, %c0_i32_0 : i32, i32
  }
  func.func @transform_3(%arg0: i32) -> (i32, i32) {
    %c0_i32 = arith.constant 0 : i32
    %c0_i32_0 = arith.constant 0 : i32
    %c0_i32_1 = arith.constant 0 : i32
    return %c0_i32, %c0_i32_0 : i32, i32
  }
}

module attributes {stable_mosaic.version = 11 : i64} {
  func.func @_mm_bias_2d_kernel(%arg0: i32, %arg1: memref<64x640xbf16, #tpu.memory_space<vmem>>, %arg2: memref<640x128xbf16, #tpu.memory_space<vmem>>, %arg3: memref<1x128xf32, #tpu.memory_space<vmem>>, %arg4: memref<64x128xbf16, #tpu.memory_space<vmem>>) attributes {dimension_semantics = [#tpu.dimension_semantics<arbitrary>], iteration_bounds = array<i64: 1>, scalar_prefetch = 0 : i64, scratch_operands = 0 : i64, tpu.core_type = #tpu.core_type<tc>, window_params = [{pipeline_mode = #tpu.pipeline_mode<synchronous>, transform_indices = @transform_0, window_bounds = array<i64: 64, 640>}, {pipeline_mode = #tpu.pipeline_mode<synchronous>, transform_indices = @transform_1, window_bounds = array<i64: 640, 128>}, {pipeline_mode = #tpu.pipeline_mode<synchronous>, transform_indices = @transform_2, window_bounds = array<i64: 1, 128>}, {pipeline_mode = #tpu.pipeline_mode<synchronous>, transform_indices = @transform_3, window_bounds = array<i64: 64, 128>}]} {
    %c0 = arith.constant 0 : index
    %c0_0 = arith.constant 0 : index
    %0 = vector.load %arg1[%c0, %c0_0] : memref<64x640xbf16, #tpu.memory_space<vmem>>, vector<64x640xbf16>
    %c0_1 = arith.constant 0 : index
    %c0_2 = arith.constant 0 : index
    %1 = vector.load %arg2[%c0_1, %c0_2] : memref<640x128xbf16, #tpu.memory_space<vmem>>, vector<640x128xbf16>
    %cst = arith.constant dense<0.000000e+00> : vector<64x128xf32>
    %2 = tpu.matmul %0, %1, %cst {dimension_numbers = #tpu.dot_dimension_numbers<[1], [0], [0], [1], [0, 0, 1, 1], [], []>} : vector<64x640xbf16>, vector<640x128xbf16>, vector<64x128xf32> -> vector<64x128xf32>
    %c0_3 = arith.constant 0 : index
    %c0_4 = arith.constant 0 : index
    %3 = vector.load %arg3[%c0_3, %c0_4] : memref<1x128xf32, #tpu.memory_space<vmem>>, vector<1x128xf32>
    %4 = vector.broadcast %3 : vector<1x128xf32> to vector<64x128xf32>
    %5 = arith.addf %2, %4 : vector<64x128xf32>
    %cst_5 = arith.constant 0.000000e+00 : f32
    %6 = vector.broadcast %cst_5 : f32 to vector<64x128xf32>
    %7 = arith.maximumf %5, %6 : vector<64x128xf32>
    %8 = arith.truncf %7 : vector<64x128xf32> to vector<64x128xbf16>
    %c0_6 = arith.constant 0 : index
    %c0_7 = arith.constant 0 : index
    %9 = vector.load %arg4[%c0_6, %c0_7] : memref<64x128xbf16, #tpu.memory_space<vmem>>, vector<64x128xbf16>
    tpu.vector_store %arg4[%c0_6, %c0_7], %8 {strides = array<i32>} : memref<64x128xbf16, #tpu.memory_space<vmem>>, vector<64x128xbf16>,
    return
  }
  func.func @transform_0(%arg0: i32) -> (i32, i32) {
    %c0_i32 = arith.constant 0 : i32
    %c0_i32_0 = arith.constant 0 : i32
    %c0_i32_1 = arith.constant 0 : i32
    return %c0_i32, %c0_i32_0 : i32, i32
  }
  func.func @transform_1(%arg0: i32) -> (i32, i32) {
    %c0_i32 = arith.constant 0 : i32
    %c0_i32_0 = arith.constant 0 : i32
    %c0_i32_1 = arith.constant 0 : i32
    return %c0_i32, %c0_i32_0 : i32, i32
  }
  func.func @transform_2(%arg0: i32) -> (i32, i32) {
    %c0_i32 = arith.constant 0 : i32
    %c0_i32_0 = arith.constant 0 : i32
    %c0_i32_1 = arith.constant 0 : i32
    return %c0_i32, %c0_i32_0 : i32, i32
  }
  func.func @transform_3(%arg0: i32) -> (i32, i32) {
    %c0_i32 = arith.constant 0 : i32
    %c0_i32_0 = arith.constant 0 : i32
    %c0_i32_1 = arith.constant 0 : i32
    return %c0_i32, %c0_i32_0 : i32, i32
  }
}

module attributes {stable_mosaic.version = 11 : i64} {
  func.func @_mm_bias_2d_kernel(%arg0: i32, %arg1: memref<16x1152xbf16, #tpu.memory_space<vmem>>, %arg2: memref<1152x128xbf16, #tpu.memory_space<vmem>>, %arg3: memref<1x128xf32, #tpu.memory_space<vmem>>, %arg4: memref<16x128xbf16, #tpu.memory_space<vmem>>) attributes {dimension_semantics = [#tpu.dimension_semantics<arbitrary>], iteration_bounds = array<i64: 1>, scalar_prefetch = 0 : i64, scratch_operands = 0 : i64, tpu.core_type = #tpu.core_type<tc>, window_params = [{pipeline_mode = #tpu.pipeline_mode<synchronous>, transform_indices = @transform_0, window_bounds = array<i64: 16, 1152>}, {pipeline_mode = #tpu.pipeline_mode<synchronous>, transform_indices = @transform_1, window_bounds = array<i64: 1152, 128>}, {pipeline_mode = #tpu.pipeline_mode<synchronous>, transform_indices = @transform_2, window_bounds = array<i64: 1, 128>}, {pipeline_mode = #tpu.pipeline_mode<synchronous>, transform_indices = @transform_3, window_bounds = array<i64: 16, 128>}]} {
    %c0 = arith.constant 0 : index
    %c0_0 = arith.constant 0 : index
    %0 = vector.load %arg1[%c0, %c0_0] : memref<16x1152xbf16, #tpu.memory_space<vmem>>, vector<16x1152xbf16>
    %c0_1 = arith.constant 0 : index
    %c0_2 = arith.constant 0 : index
    %1 = vector.load %arg2[%c0_1, %c0_2] : memref<1152x128xbf16, #tpu.memory_space<vmem>>, vector<1152x128xbf16>
    %cst = arith.constant dense<0.000000e+00> : vector<16x128xf32>
    %2 = tpu.matmul %0, %1, %cst {dimension_numbers = #tpu.dot_dimension_numbers<[1], [0], [0], [1], [0, 0, 1, 1], [], []>} : vector<16x1152xbf16>, vector<1152x128xbf16>, vector<16x128xf32> -> vector<16x128xf32>
    %c0_3 = arith.constant 0 : index
    %c0_4 = arith.constant 0 : index
    %3 = vector.load %arg3[%c0_3, %c0_4] : memref<1x128xf32, #tpu.memory_space<vmem>>, vector<1x128xf32>
    %4 = vector.broadcast %3 : vector<1x128xf32> to vector<16x128xf32>
    %5 = arith.addf %2, %4 : vector<16x128xf32>
    %cst_5 = arith.constant 0.000000e+00 : f32
    %6 = vector.broadcast %cst_5 : f32 to vector<16x128xf32>
    %7 = arith.maximumf %5, %6 : vector<16x128xf32>
    %8 = arith.truncf %7 : vector<16x128xf32> to vector<16x128xbf16>
    %c0_6 = arith.constant 0 : index
    %c0_7 = arith.constant 0 : index
    %9 = vector.load %arg4[%c0_6, %c0_7] : memref<16x128xbf16, #tpu.memory_space<vmem>>, vector<16x128xbf16>
    tpu.vector_store %arg4[%c0_6, %c0_7], %8 {strides = array<i32>} : memref<16x128xbf16, #tpu.memory_space<vmem>>, vector<16x128xbf16>,
    return
  }
  func.func @transform_0(%arg0: i32) -> (i32, i32) {
    %c0_i32 = arith.constant 0 : i32
    %c0_i32_0 = arith.constant 0 : i32
    %c0_i32_1 = arith.constant 0 : i32
    return %c0_i32, %c0_i32_0 : i32, i32
  }
  func.func @transform_1(%arg0: i32) -> (i32, i32) {
    %c0_i32 = arith.constant 0 : i32
    %c0_i32_0 = arith.constant 0 : i32
    %c0_i32_1 = arith.constant 0 : i32
    return %c0_i32, %c0_i32_0 : i32, i32
  }
  func.func @transform_2(%arg0: i32) -> (i32, i32) {
    %c0_i32 = arith.constant 0 : i32
    %c0_i32_0 = arith.constant 0 : i32
    %c0_i32_1 = arith.constant 0 : i32
    return %c0_i32, %c0_i32_0 : i32, i32
  }
  func.func @transform_3(%arg0: i32) -> (i32, i32) {
    %c0_i32 = arith.constant 0 : i32
    %c0_i32_0 = arith.constant 0 : i32
    %c0_i32_1 = arith.constant 0 : i32
    return %c0_i32, %c0_i32_0 : i32, i32
  }
}

module attributes {stable_mosaic.version = 11 : i64} {
  func.func @_fc_fused_kernel(%arg0: i32, %arg1: memref<2x256xbf16, #tpu.memory_space<vmem>>, %arg2: memref<256x512xbf16, #tpu.memory_space<vmem>>, %arg3: memref<1x512xf32, #tpu.memory_space<vmem>>, %arg4: memref<512x6xbf16, #tpu.memory_space<vmem>>, %arg5: memref<1x6xf32, #tpu.memory_space<vmem>>, %arg6: memref<2x6xf32, #tpu.memory_space<vmem>>) attributes {dimension_semantics = [#tpu.dimension_semantics<arbitrary>], iteration_bounds = array<i64: 1>, scalar_prefetch = 0 : i64, scratch_operands = 0 : i64, tpu.core_type = #tpu.core_type<tc>, window_params = [{pipeline_mode = #tpu.pipeline_mode<synchronous>, transform_indices = @transform_0, window_bounds = array<i64: 2, 256>}, {pipeline_mode = #tpu.pipeline_mode<synchronous>, transform_indices = @transform_1, window_bounds = array<i64: 256, 512>}, {pipeline_mode = #tpu.pipeline_mode<synchronous>, transform_indices = @transform_2, window_bounds = array<i64: 1, 512>}, {pipeline_mode = #tpu.pipeline_mode<synchronous>, transform_indices = @transform_3, window_bounds = array<i64: 512, 6>}, {pipeline_mode = #tpu.pipeline_mode<synchronous>, transform_indices = @transform_4, window_bounds = array<i64: 1, 6>}, {pipeline_mode = #tpu.pipeline_mode<synchronous>, transform_indices = @transform_5, window_bounds = array<i64: 2, 6>}]} {
    %c0 = arith.constant 0 : index
    %c0_0 = arith.constant 0 : index
    %0 = vector.load %arg1[%c0, %c0_0] : memref<2x256xbf16, #tpu.memory_space<vmem>>, vector<2x256xbf16>
    %c0_1 = arith.constant 0 : index
    %c0_2 = arith.constant 0 : index
    %1 = vector.load %arg2[%c0_1, %c0_2] : memref<256x512xbf16, #tpu.memory_space<vmem>>, vector<256x512xbf16>
    %cst = arith.constant dense<0.000000e+00> : vector<2x512xf32>
    %2 = tpu.matmul %0, %1, %cst {dimension_numbers = #tpu.dot_dimension_numbers<[1], [0], [0], [1], [0, 0, 1, 1], [], []>} : vector<2x256xbf16>, vector<256x512xbf16>, vector<2x512xf32> -> vector<2x512xf32>
    %c0_3 = arith.constant 0 : index
    %c0_4 = arith.constant 0 : index
    %3 = vector.load %arg3[%c0_3, %c0_4] : memref<1x512xf32, #tpu.memory_space<vmem>>, vector<1x512xf32>
    %4 = vector.broadcast %3 : vector<1x512xf32> to vector<2x512xf32>
    %5 = arith.addf %2, %4 : vector<2x512xf32>
    %cst_5 = arith.constant 0.000000e+00 : f32
    %6 = vector.broadcast %cst_5 : f32 to vector<2x512xf32>
    %7 = arith.maximumf %5, %6 : vector<2x512xf32>
    %8 = arith.truncf %7 : vector<2x512xf32> to vector<2x512xbf16>
    %c0_6 = arith.constant 0 : index
    %c0_7 = arith.constant 0 : index
    %9 = vector.load %arg4[%c0_6, %c0_7] : memref<512x6xbf16, #tpu.memory_space<vmem>>, vector<512x6xbf16>
    %cst_8 = arith.constant dense<0.000000e+00> : vector<2x6xf32>
    %10 = tpu.matmul %8, %9, %cst_8 {dimension_numbers = #tpu.dot_dimension_numbers<[1], [0], [0], [1], [0, 0, 1, 1], [], []>} : vector<2x512xbf16>, vector<512x6xbf16>, vector<2x6xf32> -> vector<2x6xf32>
    %c0_9 = arith.constant 0 : index
    %c0_10 = arith.constant 0 : index
    %11 = vector.load %arg5[%c0_9, %c0_10] : memref<1x6xf32, #tpu.memory_space<vmem>>, vector<1x6xf32>
    %12 = vector.broadcast %11 : vector<1x6xf32> to vector<2x6xf32>
    %13 = arith.addf %10, %12 : vector<2x6xf32>
    %c0_11 = arith.constant 0 : index
    %c0_12 = arith.constant 0 : index
    %14 = vector.load %arg6[%c0_11, %c0_12] : memref<2x6xf32, #tpu.memory_space<vmem>>, vector<2x6xf32>
    tpu.vector_store %arg6[%c0_11, %c0_12], %13 {strides = array<i32>} : memref<2x6xf32, #tpu.memory_space<vmem>>, vector<2x6xf32>,
    return
  }
  func.func @transform_0(%arg0: i32) -> (i32, i32) {
    %c0_i32 = arith.constant 0 : i32
    %c0_i32_0 = arith.constant 0 : i32
    %c0_i32_1 = arith.constant 0 : i32
    return %c0_i32, %c0_i32_0 : i32, i32
  }
  func.func @transform_1(%arg0: i32) -> (i32, i32) {
    %c0_i32 = arith.constant 0 : i32
    %c0_i32_0 = arith.constant 0 : i32
    %c0_i32_1 = arith.constant 0 : i32
    return %c0_i32, %c0_i32_0 : i32, i32
  }
  func.func @transform_2(%arg0: i32) -> (i32, i32) {
    %c0_i32 = arith.constant 0 : i32
    %c0_i32_0 = arith.constant 0 : i32
    %c0_i32_1 = arith.constant 0 : i32
    return %c0_i32, %c0_i32_0 : i32, i32
  }
  func.func @transform_3(%arg0: i32) -> (i32, i32) {
    %c0_i32 = arith.constant 0 : i32
    %c0_i32_0 = arith.constant 0 : i32
    %c0_i32_1 = arith.constant 0 : i32
    return %c0_i32, %c0_i32_0 : i32, i32
  }
  func.func @transform_4(%arg0: i32) -> (i32, i32) {
    %c0_i32 = arith.constant 0 : i32
    %c0_i32_0 = arith.constant 0 : i32
    %c0_i32_1 = arith.constant 0 : i32
    return %c0_i32, %c0_i32_0 : i32, i32
  }
  func.func @transform_5(%arg0: i32) -> (i32, i32) {
    %c0_i32 = arith.constant 0 : i32
    %c0_i32_0 = arith.constant 0 : i32
    %c0_i32_1 = arith.constant 0 : i32
    return %c0_i32, %c0_i32_0 : i32, i32
  }
}

</mosaic_0001>

<bundles_post_ra>
// kernel: dqn_forward.5
= control target key start
LH: loop header
LB: loop body
LE: loop exit
PB: predicated region body
PF: predicated region fallthrough
CT: control target
= control target key end

     0   :  { %vm4182_vm0 = vcmask 257024   ;;  %vm4663_vm1 = vcmask 254976   ;;  %s9140_s1 = inlined_call_operand.vmem [shape: bf16[128,32], index: 1, kind: input, shape index: {}]   ;;  %s9141_s0 = inlined_call_operand.vmem [shape: bf16[3844,128], index: 0, kind: input, shape index: {}]   ;;  %s9142_s2 = inlined_call_operand.vmem [shape: f32[1,32], index: 2, kind: input, shape index: {}]   ;;  %s9143_s3 = inlined_call_operand.vmem [shape: bf16[3844,32], index: 3, kind: output, shape index: {}]  }
   0x1   :  { %v5908_v0 = vld [vmem:[%s9140_s1 + $0x38] sm:$0xff]  ;;  %v5907_v1 = vld [vmem:[%s9140_s1 + $0x30] sm:$0xff]  ;;  %v5906_v2 = vld [vmem:[%s9140_s1 + $0x28] sm:$0xff] }
   0x2   :  { %5910 = vmatpush.bf16.msra.mxu2 %v5908_v0  ;;  %2007 = vmatpush.bf16.msra.mxu0 %v5908_v0  ;;  %v5905_v3 = vld [vmem:[%s9140_s1 + $0x20] sm:$0xff]  ;;  %v5904_v4 = vld [vmem:[%s9140_s1 + $0x18] sm:$0xff]  ;;  %v5903_v5 = vld [vmem:[%s9140_s1 + $0x10] sm:$0xff] }
   0x3   :  { %5909 = vmatpush.bf16.msra.mxu1 %v5908_v0  ;;  %5911 = vmatpush.bf16.msra.mxu3 %v5908_v0  ;;  %v5902_v6 = vld [vmem:[%s9140_s1 + $0x8] sm:$0xff]  ;;  %v5901_v7 = vld [vmem:[%s9140_s1] sm:$0xff]  ;;  %v5843_v15 = vld [vmem:[%s9141_s0 + $0x5b0] sm:$0xff] }
   0x4   :  { %v5781_v8 = vld [vmem:[%s9141_s0 + $0x3c0] sm:$0xff]  ;;  %v5842_v11 = vld [vmem:[%s9141_s0 + $0x5a8] sm:$0xff]  ;;  %v5783_v16 = vld [vmem:[%s9141_s0 + $0x3d0] sm:$0xff] }
   0x5   :  { %v5661_v9 = vld [vmem:[%s9141_s0] sm:$0xff]  ;;  %v5782_v12 = vld [vmem:[%s9141_s0 + $0x3c8] sm:$0xff]  ;;  %v5663_v17 = vld [vmem:[%s9141_s0 + $0x10] sm:$0xff] }
   0x6   :  { %5913 = vmatpush.bf16.msra.mxu2 %v5907_v1  ;;  %2008 = vmatpush.bf16.msra.mxu0 %v5907_v1  ;;  %v5721_v10 = vld [vmem:[%s9141_s0 + $0x1e0] sm:$0xff]  ;;  %v5662_v13 = vld [vmem:[%s9141_s0 + $0x8] sm:$0xff]  ;;  %v5723_v18 = vld [vmem:[%s9141_s0 + $0x1f0] sm:$0xff] }
   0x7   :  { %5912 = vmatpush.bf16.msra.mxu1 %v5907_v1  ;;  %5914 = vmatpush.bf16.msra.mxu3 %v5907_v1  ;;  %v5722_v14 = vld [vmem:[%s9141_s0 + $0x1e8] sm:$0xff]  ;;  %v5844_v19 = vld [vmem:[%s9141_s0 + $0x5b8] sm:$0xff]  ;;  %v5845_v23 = vld [vmem:[%s9141_s0 + $0x5c0] sm:$0xff] }
   0x8   :  { %v5784_v20 = vld [vmem:[%s9141_s0 + $0x3d8] sm:$0xff]  ;;  %v5785_v24 = vld [vmem:[%s9141_s0 + $0x3e0] sm:$0xff]  ;;  %v5846_v27 = vld [vmem:[%s9141_s0 + $0x5c8] sm:$0xff] }
   0x9   :  { %v5664_v21 = vld [vmem:[%s9141_s0 + $0x18] sm:$0xff]  ;;  %v5665_v25 = vld [vmem:[%s9141_s0 + $0x20] sm:$0xff]  ;;  %v5786_v28 = vld [vmem:[%s9141_s0 + $0x3e8] sm:$0xff] }
   0xa   :  { %5916 = vmatpush.bf16.msra.mxu2 %v5906_v2  ;;  %2009 = vmatpush.bf16.msra.mxu0 %v5906_v2  ;;  %v5724_v22 = vld [vmem:[%s9141_s0 + $0x1f8] sm:$0xff]  ;;  %v5725_v26 = vld [vmem:[%s9141_s0 + $0x200] sm:$0xff]  ;;  %v5666_v29 = vld [vmem:[%s9141_s0 + $0x28] sm:$0xff] }
   0xb   :  { %5915 = vmatpush.bf16.msra.mxu1 %v5906_v2  ;;  %5917 = vmatpush.bf16.msra.mxu3 %v5906_v2  ;;  %v5726_v30 = vld [vmem:[%s9141_s0 + $0x208] sm:$0xff]  ;;  %v5847_v31 = vld [vmem:[%s9141_s0 + $0x5d0] sm:$0xff]  ;;  %v5848_v35 = vld [vmem:[%s9141_s0 + $0x5d8] sm:$0xff] }
   0xc   :  { %v5787_v32 = vld [vmem:[%s9141_s0 + $0x3f0] sm:$0xff]  ;;  %v5788_v36 = vld [vmem:[%s9141_s0 + $0x3f8] sm:$0xff]  ;;  %v5849_v39 = vld [vmem:[%s9141_s0 + $0x5e0] sm:$0xff] }
   0xd   :  { %v5667_v33 = vld [vmem:[%s9141_s0 + $0x30] sm:$0xff]  ;;  %v5668_v37 = vld [vmem:[%s9141_s0 + $0x38] sm:$0xff]  ;;  %v5789_v40 = vld [vmem:[%s9141_s0 + $0x400] sm:$0xff] }
   0xe   :  { %5919 = vmatpush.bf16.msra.mxu2 %v5905_v3  ;;  %2010 = vmatpush.bf16.msra.mxu0 %v5905_v3  ;;  %v5727_v34 = vld [vmem:[%s9141_s0 + $0x210] sm:$0xff]  ;;  %v5728_v38 = vld [vmem:[%s9141_s0 + $0x218] sm:$0xff]  ;;  %v6085_v41 = vld [vmem:[%s9142_s2] ss:$0 sm:$0xff] }
   0xf   :  { %5918 = vmatpush.bf16.msra.mxu1 %v5905_v3  ;;  %5920 = vmatpush.bf16.msra.mxu3 %v5905_v3  ;;  %v5669_v42 = vld [vmem:[%s9141_s0 + $0x40] sm:$0xff]  ;;  %v5850_v45 = vld [vmem:[%s9141_s0 + $0x5e8] sm:$0xff] }
  0x10   :  { %v5729_v44 = vld [vmem:[%s9141_s0 + $0x220] sm:$0xff] }
  0x12   :  { %5922 = vmatpush.bf16.msra.mxu2 %v5904_v4  ;;  %2011 = vmatpush.bf16.msra.mxu0 %v5904_v4 }
  0x13   :  { %5921 = vmatpush.bf16.msra.mxu1 %v5904_v4  ;;  %5923 = vmatpush.bf16.msra.mxu3 %v5904_v4 }
  0x16   :  { %5925 = vmatpush.bf16.msra.mxu2 %v5903_v5  ;;  %2012 = vmatpush.bf16.msra.mxu0 %v5903_v5 }
  0x17   :  { %5924 = vmatpush.bf16.msra.mxu1 %v5903_v5  ;;  %5926 = vmatpush.bf16.msra.mxu3 %v5903_v5 }
  0x1a   :  { %5928 = vmatpush.bf16.msra.mxu2 %v5902_v6  ;;  %2013 = vmatpush.bf16.msra.mxu0 %v5902_v6 }
  0x1b   :  { %5927 = vmatpush.bf16.msra.mxu1 %v5902_v6  ;;  %5929 = vmatpush.bf16.msra.mxu3 %v5902_v6 }
  0x1e   :  { %5931 = vmatpush.bf16.msra.mxu2 %v5901_v7  ;;  %2014 = vmatpush.bf16.msra.mxu0 %v5901_v7 }
  0x1f   :  { %5930 = vmatpush.bf16.msra.mxu1 %v5901_v7  ;;  %5932 = vmatpush.bf16.msra.mxu3 %v5901_v7  ;;  %v5790_v7 = vld [vmem:[%s9141_s0 + $0x408] sm:$0xff] }
  0x21   :  { %2615 = vmatmul.bf16.vlgmr.msra.gmra.mxu2 %v5781_v8  ;;  %2015 = vmatmul.bf16.vlgmr.msra.gmra.mxu0 %v5661_v9  ;;  %v5670_v9 = vld [vmem:[%s9141_s0 + $0x48] sm:$0xff] }
  0x22   :  { %2315 = vmatmul.bf16.vlgmr.msra.gmra.mxu1 %v5721_v10  ;;  %2920 = vmatmul.bf16.vlgmr.msra.gmra.mxu3 %v5842_v11 }
  0x31   :  { %2620 = vmatmul.bf16.gmra.mxu2 %v5782_v12  ;;  %2020 = vmatmul.bf16.gmra.mxu0 %v5662_v13  ;;  %v5730_v12 = vld [vmem:[%s9141_s0 + $0x228] sm:$0xff]  ;;  %v5851_v13 = vld [vmem:[%s9141_s0 + $0x5f0] sm:$0xff] }
  0x32   :  { %2320 = vmatmul.bf16.gmra.mxu1 %v5722_v14  ;;  %2925 = vmatmul.bf16.gmra.mxu3 %v5843_v15 }
  0x41   :  { %2625 = vmatmul.bf16.gmra.mxu2 %v5783_v16  ;;  %2025 = vmatmul.bf16.gmra.mxu0 %v5663_v17 }
  0x42   :  { %2325 = vmatmul.bf16.gmra.mxu1 %v5723_v18  ;;  %2930 = vmatmul.bf16.gmra.mxu3 %v5844_v19 }
  0x51   :  { %2630 = vmatmul.bf16.gmra.mxu2 %v5784_v20  ;;  %2030 = vmatmul.bf16.gmra.mxu0 %v5664_v21 }
  0x52   :  { %2330 = vmatmul.bf16.gmra.mxu1 %v5724_v22  ;;  %2935 = vmatmul.bf16.gmra.mxu3 %v5845_v23 }
  0x61   :  { %2635 = vmatmul.bf16.gmra.mxu2 %v5785_v24  ;;  %2035 = vmatmul.bf16.gmra.mxu0 %v5665_v25 }
  0x62   :  { %2335 = vmatmul.bf16.gmra.mxu1 %v5725_v26  ;;  %2940 = vmatmul.bf16.gmra.mxu3 %v5846_v27 }
  0x71   :  { %2640 = vmatmul.bf16.gmra.mxu2 %v5786_v28  ;;  %2040 = vmatmul.bf16.gmra.mxu0 %v5666_v29 }
  0x72   :  { %2340 = vmatmul.bf16.gmra.mxu1 %v5726_v30  ;;  %2945 = vmatmul.bf16.gmra.mxu3 %v5847_v31 }
  0x81   :  { %2645 = vmatmul.bf16.gmra.mxu2 %v5787_v32  ;;  %2045 = vmatmul.bf16.gmra.mxu0 %v5667_v33 }
  0x82   :  { %2345 = vmatmul.bf16.gmra.mxu1 %v5727_v34  ;;  %2950 = vmatmul.bf16.gmra.mxu3 %v5848_v35 }
  0x91   :  { %2650 = vmatmul.bf16.gmra.mxu2 %v5788_v36  ;;  %2050 = vmatmul.bf16.gmra.mxu0 %v5668_v37 }
  0x92   :  { %2350 = vmatmul.bf16.gmra.mxu1 %v5728_v38  ;;  %2955 = vmatmul.bf16.gmra.mxu3 %v5849_v39 }
  0x9e   :  { %v2016_v43 = vpop.f32.mrf.mxu0 }
  0x9f   :  { %v2017_v46 = vadd.f32 %v6085_v41, %v2016_v43  ;;  %v2316_v47 = vpop.f32.mrf.mxu1 }
  0xa0   :  { %v2317_v48 = vadd.f32 %v6085_v41, %v2316_v47 }
  0xa1   :  { %2655 = vmatmul.bf16.gmra.mxu2 %v5789_v40  ;;  %v3220_v49 = vmax.f32 %v2017_v46, 0.0  ;;  %2055 = vmatmul.bf16.gmra.mxu0 %v5669_v42  ;;  %v5671_v46 = vld [vmem:[%s9141_s0 + $0x50] sm:$0xff] }
  0xa2   :  { %v3340_v50 = vmax.f32 %v2317_v48, 0.0  ;;  %2355 = vmatmul.bf16.gmra.mxu1 %v5729_v44  ;;  %2960 = vmatmul.bf16.gmra.mxu3 %v5850_v45  ;;  %v5791_v44 = vld [vmem:[%s9141_s0 + $0x410] sm:$0xff] }
  0xa3   :  { %v3701_v51 = vpack.c.bf16 %v3220_v49, %v3220_v49  ;;  %v5731_v49 = vld [vmem:[%s9141_s0 + $0x230] sm:$0xff] }
  0xa4   :  { %v2616_v52 = vpop.f32.mrf.mxu2  ;;  %v3821_v53 = vpack.c.bf16 %v3340_v50, %v3340_v50  ;;  %v5852_v50 = vld [vmem:[%s9141_s0 + $0x5f8] sm:$0xff] }
  0xa5   :  { %v2617_v54 = vadd.f32 %v6085_v41, %v2616_v52  ;;  %4183 = vst.msk [vmem:[%s9143_s3] sm:$0xf] %vm4182_vm0, %v3701_v51  ;;  %v2921_v55 = vpop.f32.mrf.mxu3 }
  0xa6   :  { %4303 = vst.msk [vmem:[%s9143_s3 + $0x1e0] sm:$0xf] %vm4182_vm0, %v3821_v53  ;;  %v2922_v56 = vadd.f32 %v6085_v41, %v2921_v55  ;;  %v2018_v57 = vpop.f32.mrf.mxu0 }
  0xa7   :  { %v3460_v58 = vmax.f32 %v2617_v54, 0.0  ;;  %v2019_v59 = vadd.f32 %v6085_v41, %v2018_v57  ;;  %v2318_v60 = vpop.f32.mrf.mxu1 }
  0xa8   :  { %v3582_v61 = vmax.f32 %v2922_v56, 0.0  ;;  %v2319_v62 = vadd.f32 %v6085_v41, %v2318_v60 }
  0xa9   :  { %v3941_v63 = vpack.c.bf16 %v3460_v58, %v3460_v58  ;;  %v3221_v0 = vmax.f32 %v2019_v59, 0.0 }
  0xaa   :  { %v4063_v1 = vpack.c.bf16 %v3582_v61, %v3582_v61  ;;  %v3341_v2 = vmax.f32 %v2319_v62, 0.0 }
  0xab   :  { %4423 = vst.msk [vmem:[%s9143_s3 + $0x3c0] sm:$0xf] %vm4182_vm0, %v3941_v63  ;;  %v3702_v3 = vpack.c.bf16 %v3221_v0, %v3221_v0 }
  0xac   :  { %v2618_v4 = vpop.f32.mrf.mxu2  ;;  %4545 = vst.msk [vmem:[%s9143_s3 + $0x5a8] sm:$0xf] %vm4182_vm0, %v4063_v1  ;;  %v3822_v5 = vpack.c.bf16 %v3341_v2, %v3341_v2 }
  0xad   :  { %v2619_v6 = vadd.f32 %v6085_v41, %v2618_v4  ;;  %4184 = vst.msk [vmem:[%s9143_s3 + $0x4] sm:$0xf] %vm4182_vm0, %v3702_v3  ;;  %v2923_v8 = vpop.f32.mrf.mxu3 }
  0xae   :  { %4304 = vst.msk [vmem:[%s9143_s3 + $0x1e4] sm:$0xf] %vm4182_vm0, %v3822_v5  ;;  %v2924_v10 = vadd.f32 %v6085_v41, %v2923_v8  ;;  %v2021_v11 = vpop.f32.mrf.mxu0 }
  0xaf   :  { %v3461_v14 = vmax.f32 %v2619_v6, 0.0  ;;  %v2022_v15 = vadd.f32 %v6085_v41, %v2021_v11  ;;  %v2321_v16 = vpop.f32.mrf.mxu1 }
  0xb0   :  { %v3583_v17 = vmax.f32 %v2924_v10, 0.0  ;;  %v2322_v18 = vadd.f32 %v6085_v41, %v2321_v16  ;;  %v5792_v16 = vld [vmem:[%s9141_s0 + $0x418] sm:$0xff] }
  0xb1   :  { %v3942_v19 = vpack.c.bf16 %v3461_v14, %v3461_v14  ;;  %2660 = vmatmul.bf16.gmra.mxu2 %v5790_v7  ;;  %v3222_v20 = vmax.f32 %v2022_v15, 0.0  ;;  %2060 = vmatmul.bf16.gmra.mxu0 %v5670_v9 }
  0xb2   :  { %v4064_v21 = vpack.c.bf16 %v3583_v17, %v3583_v17  ;;  %v3342_v22 = vmax.f32 %v2322_v18, 0.0  ;;  %2360 = vmatmul.bf16.gmra.mxu1 %v5730_v12  ;;  %2965 = vmatmul.bf16.gmra.mxu3 %v5851_v13  ;;  %v5672_v18 = vld [vmem:[%s9141_s0 + $0x58] sm:$0xff] }
  0xb3   :  { %4424 = vst.msk [vmem:[%s9143_s3 + $0x3c4] sm:$0xf] %vm4182_vm0, %v3942_v19  ;;  %v3703_v23 = vpack.c.bf16 %v3222_v20, %v3222_v20 }
  0xb4   :  { %v2621_v24 = vpop.f32.mrf.mxu2  ;;  %4546 = vst.msk [vmem:[%s9143_s3 + $0x5ac] sm:$0xf] %vm4182_vm0, %v4064_v21  ;;  %v3823_v25 = vpack.c.bf16 %v3342_v22, %v3342_v22  ;;  %v5732_v21 = vld [vmem:[%s9141_s0 + $0x238] sm:$0xff]  ;;  %v5853_v22 = vld [vmem:[%s9141_s0 + $0x600] sm:$0xff] }
  0xb5   :  { %v2622_v26 = vadd.f32 %v6085_v41, %v2621_v24  ;;  %4185 = vst.msk [vmem:[%s9143_s3 + $0x8] sm:$0xf] %vm4182_vm0, %v3703_v23  ;;  %v2926_v27 = vpop.f32.mrf.mxu3 }
  0xb6   :  { %4305 = vst.msk [vmem:[%s9143_s3 + $0x1e8] sm:$0xf] %vm4182_vm0, %v3823_v25  ;;  %v2927_v28 = vadd.f32 %v6085_v41, %v2926_v27  ;;  %v2023_v29 = vpop.f32.mrf.mxu0 }
  0xb7   :  { %v3462_v30 = vmax.f32 %v2622_v26, 0.0  ;;  %v2024_v31 = vadd.f32 %v6085_v41, %v2023_v29  ;;  %v2323_v32 = vpop.f32.mrf.mxu1 }
  0xb8   :  { %v3584_v33 = vmax.f32 %v2927_v28, 0.0  ;;  %v2324_v34 = vadd.f32 %v6085_v41, %v2323_v32 }
  0xb9   :  { %v3943_v35 = vpack.c.bf16 %v3462_v30, %v3462_v30  ;;  %v3223_v36 = vmax.f32 %v2024_v31, 0.0 }
  0xba   :  { %v4065_v37 = vpack.c.bf16 %v3584_v33, %v3584_v33  ;;  %v3343_v38 = vmax.f32 %v2324_v34, 0.0 }
  0xbb   :  { %4425 = vst.msk [vmem:[%s9143_s3 + $0x3c8] sm:$0xf] %vm4182_vm0, %v3943_v35  ;;  %v3704_v39 = vpack.c.bf16 %v3223_v36, %v3223_v36 }
  0xbc   :  { %v2623_v40 = vpop.f32.mrf.mxu2  ;;  %4547 = vst.msk [vmem:[%s9143_s3 + $0x5b0] sm:$0xf] %vm4182_vm0, %v4065_v37  ;;  %v3824_v42 = vpack.c.bf16 %v3343_v38, %v3343_v38 }
  0xbd   :  { %v2624_v43 = vadd.f32 %v6085_v41, %v2623_v40  ;;  %4186 = vst.msk [vmem:[%s9143_s3 + $0xc] sm:$0xf] %vm4182_vm0, %v3704_v39  ;;  %v2928_v45 = vpop.f32.mrf.mxu3 }
  0xbe   :  { %4306 = vst.msk [vmem:[%s9143_s3 + $0x1ec] sm:$0xf] %vm4182_vm0, %v3824_v42  ;;  %v2929_v47 = vadd.f32 %v6085_v41, %v2928_v45  ;;  %v2026_v48 = vpop.f32.mrf.mxu0 }
  0xbf   :  { %v3463_v51 = vmax.f32 %v2624_v43, 0.0  ;;  %v2027_v52 = vadd.f32 %v6085_v41, %v2026_v48  ;;  %v2326_v53 = vpop.f32.mrf.mxu1 }
  0xc0   :  { %v3585_v54 = vmax.f32 %v2929_v47, 0.0  ;;  %v2327_v55 = vadd.f32 %v6085_v41, %v2326_v53  ;;  %v5793_v53 = vld [vmem:[%s9141_s0 + $0x420] sm:$0xff] }
  0xc1   :  { %v3944_v56 = vpack.c.bf16 %v3463_v51, %v3463_v51  ;;  %2665 = vmatmul.bf16.gmra.mxu2 %v5791_v44  ;;  %v3224_v57 = vmax.f32 %v2027_v52, 0.0  ;;  %2065 = vmatmul.bf16.gmra.mxu0 %v5671_v46 }
  0xc2   :  { %v4066_v58 = vpack.c.bf16 %v3585_v54, %v3585_v54  ;;  %v3344_v59 = vmax.f32 %v2327_v55, 0.0  ;;  %2365 = vmatmul.bf16.gmra.mxu1 %v5731_v49  ;;  %2970 = vmatmul.bf16.gmra.mxu3 %v5852_v50  ;;  %v5673_v55 = vld [vmem:[%s9141_s0 + $0x60] sm:$0xff] }
  0xc3   :  { %4426 = vst.msk [vmem:[%s9143_s3 + $0x3cc] sm:$0xf] %vm4182_vm0, %v3944_v56  ;;  %v3705_v60 = vpack.c.bf16 %v3224_v57, %v3224_v57 }
  0xc4   :  { %v2626_v61 = vpop.f32.mrf.mxu2  ;;  %4548 = vst.msk [vmem:[%s9143_s3 + $0x5b4] sm:$0xf] %vm4182_vm0, %v4066_v58  ;;  %v3825_v62 = vpack.c.bf16 %v3344_v59, %v3344_v59  ;;  %v5733_v58 = vld [vmem:[%s9141_s0 + $0x240] sm:$0xff]  ;;  %v5854_v59 = vld [vmem:[%s9141_s0 + $0x608] sm:$0xff] }
  0xc5   :  { %v2627_v63 = vadd.f32 %v6085_v41, %v2626_v61  ;;  %4187 = vst.msk [vmem:[%s9143_s3 + $0x10] sm:$0xf] %vm4182_vm0, %v3705_v60  ;;  %v2931_v0 = vpop.f32.mrf.mxu3 }
  0xc6   :  { %4307 = vst.msk [vmem:[%s9143_s3 + $0x1f0] sm:$0xf] %vm4182_vm0, %v3825_v62  ;;  %v2932_v1 = vadd.f32 %v6085_v41, %v2931_v0  ;;  %v2028_v2 = vpop.f32.mrf.mxu0 }
  0xc7   :  { %v3464_v3 = vmax.f32 %v2627_v63, 0.0  ;;  %v2029_v4 = vadd.f32 %v6085_v41, %v2028_v2  ;;  %v2328_v5 = vpop.f32.mrf.mxu1 }
  0xc8   :  { %v3586_v6 = vmax.f32 %v2932_v1, 0.0  ;;  %v2329_v7 = vadd.f32 %v6085_v41, %v2328_v5 }
  0xc9   :  { %v3945_v8 = vpack.c.bf16 %v3464_v3, %v3464_v3  ;;  %v3225_v9 = vmax.f32 %v2029_v4, 0.0 }
  0xca   :  { %v4067_v10 = vpack.c.bf16 %v3586_v6, %v3586_v6  ;;  %v3345_v11 = vmax.f32 %v2329_v7, 0.0 }
  0xcb   :  { %4427 = vst.msk [vmem:[%s9143_s3 + $0x3d0] sm:$0xf] %vm4182_vm0, %v3945_v8  ;;  %v3706_v12 = vpack.c.bf16 %v3225_v9, %v3225_v9 }
  0xcc   :  { %v2628_v13 = vpop.f32.mrf.mxu2  ;;  %4549 = vst.msk [vmem:[%s9143_s3 + $0x5b8] sm:$0xf] %vm4182_vm0, %v4067_v10  ;;  %v3826_v14 = vpack.c.bf16 %v3345_v11, %v3345_v11 }
  0xcd   :  { %v2629_v15 = vadd.f32 %v6085_v41, %v2628_v13  ;;  %4188 = vst.msk [vmem:[%s9143_s3 + $0x14] sm:$0xf] %vm4182_vm0, %v3706_v12  ;;  %v2933_v17 = vpop.f32.mrf.mxu3 }
  0xce   :  { %4308 = vst.msk [vmem:[%s9143_s3 + $0x1f4] sm:$0xf] %vm4182_vm0, %v3826_v14  ;;  %v2934_v19 = vadd.f32 %v6085_v41, %v2933_v17  ;;  %v2031_v20 = vpop.f32.mrf.mxu0 }
  0xcf   :  { %v3465_v23 = vmax.f32 %v2629_v15, 0.0  ;;  %v2032_v24 = vadd.f32 %v6085_v41, %v2031_v20  ;;  %v2331_v25 = vpop.f32.mrf.mxu1 }
  0xd0   :  { %v3587_v26 = vmax.f32 %v2934_v19, 0.0  ;;  %v2332_v27 = vadd.f32 %v6085_v41, %v2331_v25  ;;  %v5794_v25 = vld [vmem:[%s9141_s0 + $0x428] sm:$0xff] }
  0xd1   :  { %v3946_v28 = vpack.c.bf16 %v3465_v23, %v3465_v23  ;;  %2670 = vmatmul.bf16.gmra.mxu2 %v5792_v16  ;;  %v3226_v29 = vmax.f32 %v2032_v24, 0.0  ;;  %2070 = vmatmul.bf16.gmra.mxu0 %v5672_v18 }
  0xd2   :  { %v4068_v30 = vpack.c.bf16 %v3587_v26, %v3587_v26  ;;  %v3346_v31 = vmax.f32 %v2332_v27, 0.0  ;;  %2370 = vmatmul.bf16.gmra.mxu1 %v5732_v21  ;;  %2975 = vmatmul.bf16.gmra.mxu3 %v5853_v22  ;;  %v5674_v27 = vld [vmem:[%s9141_s0 + $0x68] sm:$0xff] }
  0xd3   :  { %4428 = vst.msk [vmem:[%s9143_s3 + $0x3d4] sm:$0xf] %vm4182_vm0, %v3946_v28  ;;  %v3707_v32 = vpack.c.bf16 %v3226_v29, %v3226_v29 }
  0xd4   :  { %v2631_v33 = vpop.f32.mrf.mxu2  ;;  %4550 = vst.msk [vmem:[%s9143_s3 + $0x5bc] sm:$0xf] %vm4182_vm0, %v4068_v30  ;;  %v3827_v34 = vpack.c.bf16 %v3346_v31, %v3346_v31  ;;  %v5734_v30 = vld [vmem:[%s9141_s0 + $0x248] sm:$0xff]  ;;  %v5855_v31 = vld [vmem:[%s9141_s0 + $0x610] sm:$0xff] }
  0xd5   :  { %v2632_v35 = vadd.f32 %v6085_v41, %v2631_v33  ;;  %4189 = vst.msk [vmem:[%s9143_s3 + $0x18] sm:$0xf] %vm4182_vm0, %v3707_v32  ;;  %v2936_v36 = vpop.f32.mrf.mxu3 }
  0xd6   :  { %4309 = vst.msk [vmem:[%s9143_s3 + $0x1f8] sm:$0xf] %vm4182_vm0, %v3827_v34  ;;  %v2937_v37 = vadd.f32 %v6085_v41, %v2936_v36  ;;  %v2033_v38 = vpop.f32.mrf.mxu0 }
  0xd7   :  { %v3466_v39 = vmax.f32 %v2632_v35, 0.0  ;;  %v2034_v40 = vadd.f32 %v6085_v41, %v2033_v38  ;;  %v2333_v42 = vpop.f32.mrf.mxu1 }
  0xd8   :  { %v3588_v43 = vmax.f32 %v2937_v37, 0.0  ;;  %v2334_v44 = vadd.f32 %v6085_v41, %v2333_v42 }
  0xd9   :  { %v3947_v45 = vpack.c.bf16 %v3466_v39, %v3466_v39  ;;  %v3227_v46 = vmax.f32 %v2034_v40, 0.0 }
  0xda   :  { %v4069_v47 = vpack.c.bf16 %v3588_v43, %v3588_v43  ;;  %v3347_v48 = vmax.f32 %v2334_v44, 0.0 }
  0xdb   :  { %4429 = vst.msk [vmem:[%s9143_s3 + $0x3d8] sm:$0xf] %vm4182_vm0, %v3947_v45  ;;  %v3708_v49 = vpack.c.bf16 %v3227_v46, %v3227_v46 }
  0xdc   :  { %v2633_v50 = vpop.f32.mrf.mxu2  ;;  %4551 = vst.msk [vmem:[%s9143_s3 + $0x5c0] sm:$0xf] %vm4182_vm0, %v4069_v47  ;;  %v3828_v51 = vpack.c.bf16 %v3347_v48, %v3347_v48 }
  0xdd   :  { %v2634_v52 = vadd.f32 %v6085_v41, %v2633_v50  ;;  %4190 = vst.msk [vmem:[%s9143_s3 + $0x1c] sm:$0xf] %vm4182_vm0, %v3708_v49  ;;  %v2938_v54 = vpop.f32.mrf.mxu3 }
  0xde   :  { %4310 = vst.msk [vmem:[%s9143_s3 + $0x1fc] sm:$0xf] %vm4182_vm0, %v3828_v51  ;;  %v2939_v56 = vadd.f32 %v6085_v41, %v2938_v54  ;;  %v2036_v57 = vpop.f32.mrf.mxu0 }
  0xdf   :  { %v3467_v60 = vmax.f32 %v2634_v52, 0.0  ;;  %v2037_v61 = vadd.f32 %v6085_v41, %v2036_v57  ;;  %v2336_v62 = vpop.f32.mrf.mxu1 }
  0xe0   :  { %v3589_v63 = vmax.f32 %v2939_v56, 0.0  ;;  %v2337_v0 = vadd.f32 %v6085_v41, %v2336_v62  ;;  %v5795_v62 = vld [vmem:[%s9141_s0 + $0x430] sm:$0xff] }
  0xe1   :  { %v3948_v1 = vpack.c.bf16 %v3467_v60, %v3467_v60  ;;  %2675 = vmatmul.bf16.gmra.mxu2 %v5793_v53  ;;  %v3228_v2 = vmax.f32 %v2037_v61, 0.0  ;;  %2075 = vmatmul.bf16.gmra.mxu0 %v5673_v55 }
  0xe2   :  { %v4070_v3 = vpack.c.bf16 %v3589_v63, %v3589_v63  ;;  %v3348_v4 = vmax.f32 %v2337_v0, 0.0  ;;  %2375 = vmatmul.bf16.gmra.mxu1 %v5733_v58  ;;  %2980 = vmatmul.bf16.gmra.mxu3 %v5854_v59  ;;  %v5675_v0 = vld [vmem:[%s9141_s0 + $0x70] sm:$0xff] }
  0xe3   :  { %4430 = vst.msk [vmem:[%s9143_s3 + $0x3dc] sm:$0xf] %vm4182_vm0, %v3948_v1  ;;  %v3709_v5 = vpack.c.bf16 %v3228_v2, %v3228_v2 }
  0xe4   :  { %v2636_v6 = vpop.f32.mrf.mxu2  ;;  %4552 = vst.msk [vmem:[%s9143_s3 + $0x5c4] sm:$0xf] %vm4182_vm0, %v4070_v3  ;;  %v3829_v7 = vpack.c.bf16 %v3348_v4, %v3348_v4  ;;  %v5735_v3 = vld [vmem:[%s9141_s0 + $0x250] sm:$0xff]  ;;  %v5856_v4 = vld [vmem:[%s9141_s0 + $0x618] sm:$0xff] }
  0xe5   :  { %v2637_v8 = vadd.f32 %v6085_v41, %v2636_v6  ;;  %4191 = vst.msk [vmem:[%s9143_s3 + $0x20] sm:$0xf] %vm4182_vm0, %v3709_v5  ;;  %v2941_v9 = vpop.f32.mrf.mxu3 }
  0xe6   :  { %4311 = vst.msk [vmem:[%s9143_s3 + $0x200] sm:$0xf] %vm4182_vm0, %v3829_v7  ;;  %v2942_v10 = vadd.f32 %v6085_v41, %v2941_v9  ;;  %v2038_v11 = vpop.f32.mrf.mxu0 }
  0xe7   :  { %v3468_v12 = vmax.f32 %v2637_v8, 0.0  ;;  %v2039_v13 = vadd.f32 %v6085_v41, %v2038_v11  ;;  %v2338_v14 = vpop.f32.mrf.mxu1 }
  0xe8   :  { %v3590_v15 = vmax.f32 %v2942_v10, 0.0  ;;  %v2339_v16 = vadd.f32 %v6085_v41, %v2338_v14 }
  0xe9   :  { %v3949_v17 = vpack.c.bf16 %v3468_v12, %v3468_v12  ;;  %v3229_v18 = vmax.f32 %v2039_v13, 0.0 }
  0xea   :  { %v4071_v19 = vpack.c.bf16 %v3590_v15, %v3590_v15  ;;  %v3349_v20 = vmax.f32 %v2339_v16, 0.0 }
  0xeb   :  { %4431 = vst.msk [vmem:[%s9143_s3 + $0x3e0] sm:$0xf] %vm4182_vm0, %v3949_v17  ;;  %v3710_v21 = vpack.c.bf16 %v3229_v18, %v3229_v18 }
  0xec   :  { %v2638_v22 = vpop.f32.mrf.mxu2  ;;  %4553 = vst.msk [vmem:[%s9143_s3 + $0x5c8] sm:$0xf] %vm4182_vm0, %v4071_v19  ;;  %v3830_v23 = vpack.c.bf16 %v3349_v20, %v3349_v20 }
  0xed   :  { %v2639_v24 = vadd.f32 %v6085_v41, %v2638_v22  ;;  %4192 = vst.msk [vmem:[%s9143_s3 + $0x24] sm:$0xf] %vm4182_vm0, %v3710_v21  ;;  %v2943_v26 = vpop.f32.mrf.mxu3 }
  0xee   :  { %4312 = vst.msk [vmem:[%s9143_s3 + $0x204] sm:$0xf] %vm4182_vm0, %v3830_v23  ;;  %v2944_v28 = vadd.f32 %v6085_v41, %v2943_v26  ;;  %v2041_v29 = vpop.f32.mrf.mxu0 }
  0xef   :  { %v3469_v32 = vmax.f32 %v2639_v24, 0.0  ;;  %v2042_v33 = vadd.f32 %v6085_v41, %v2041_v29  ;;  %v2341_v34 = vpop.f32.mrf.mxu1 }
  0xf0   :  { %v3591_v35 = vmax.f32 %v2944_v28, 0.0  ;;  %v2342_v36 = vadd.f32 %v6085_v41, %v2341_v34  ;;  %v5796_v34 = vld [vmem:[%s9141_s0 + $0x438] sm:$0xff] }
  0xf1   :  { %v3950_v37 = vpack.c.bf16 %v3469_v32, %v3469_v32  ;;  %2680 = vmatmul.bf16.gmra.mxu2 %v5794_v25  ;;  %v3230_v38 = vmax.f32 %v2042_v33, 0.0  ;;  %2080 = vmatmul.bf16.gmra.mxu0 %v5674_v27 }
  0xf2   :  { %v4072_v39 = vpack.c.bf16 %v3591_v35, %v3591_v35  ;;  %v3350_v40 = vmax.f32 %v2342_v36, 0.0  ;;  %2380 = vmatmul.bf16.gmra.mxu1 %v5734_v30  ;;  %2985 = vmatmul.bf16.gmra.mxu3 %v5855_v31  ;;  %v5676_v36 = vld [vmem:[%s9141_s0 + $0x78] sm:$0xff] }
  0xf3   :  { %4432 = vst.msk [vmem:[%s9143_s3 + $0x3e4] sm:$0xf] %vm4182_vm0, %v3950_v37  ;;  %v3711_v42 = vpack.c.bf16 %v3230_v38, %v3230_v38 }
  0xf4   :  { %v2641_v43 = vpop.f32.mrf.mxu2  ;;  %4554 = vst.msk [vmem:[%s9143_s3 + $0x5cc] sm:$0xf] %vm4182_vm0, %v4072_v39  ;;  %v3831_v44 = vpack.c.bf16 %v3350_v40, %v3350_v40  ;;  %v5736_v39 = vld [vmem:[%s9141_s0 + $0x258] sm:$0xff]  ;;  %v5857_v40 = vld [vmem:[%s9141_s0 + $0x620] sm:$0xff] }
  0xf5   :  { %v2642_v45 = vadd.f32 %v6085_v41, %v2641_v43  ;;  %4193 = vst.msk [vmem:[%s9143_s3 + $0x28] sm:$0xf] %vm4182_vm0, %v3711_v42  ;;  %v2946_v46 = vpop.f32.mrf.mxu3 }
  0xf6   :  { %4313 = vst.msk [vmem:[%s9143_s3 + $0x208] sm:$0xf] %vm4182_vm0, %v3831_v44  ;;  %v2947_v47 = vadd.f32 %v6085_v41, %v2946_v46  ;;  %v2043_v48 = vpop.f32.mrf.mxu0 }
  0xf7   :  { %v3470_v49 = vmax.f32 %v2642_v45, 0.0  ;;  %v2044_v50 = vadd.f32 %v6085_v41, %v2043_v48  ;;  %v2343_v51 = vpop.f32.mrf.mxu1 }
  0xf8   :  { %v3592_v52 = vmax.f32 %v2947_v47, 0.0  ;;  %v2344_v53 = vadd.f32 %v6085_v41, %v2343_v51 }
  0xf9   :  { %v3951_v54 = vpack.c.bf16 %v3470_v49, %v3470_v49  ;;  %v3231_v55 = vmax.f32 %v2044_v50, 0.0 }
  0xfa   :  { %v4073_v56 = vpack.c.bf16 %v3592_v52, %v3592_v52  ;;  %v3351_v57 = vmax.f32 %v2344_v53, 0.0 }
  0xfb   :  { %4433 = vst.msk [vmem:[%s9143_s3 + $0x3e8] sm:$0xf] %vm4182_vm0, %v3951_v54  ;;  %v3712_v58 = vpack.c.bf16 %v3231_v55, %v3231_v55 }
  0xfc   :  { %v2643_v59 = vpop.f32.mrf.mxu2  ;;  %4555 = vst.msk [vmem:[%s9143_s3 + $0x5d0] sm:$0xf] %vm4182_vm0, %v4073_v56  ;;  %v3832_v60 = vpack.c.bf16 %v3351_v57, %v3351_v57 }
  0xfd   :  { %v2644_v61 = vadd.f32 %v6085_v41, %v2643_v59  ;;  %4194 = vst.msk [vmem:[%s9143_s3 + $0x2c] sm:$0xf] %vm4182_vm0, %v3712_v58  ;;  %v2948_v63 = vpop.f32.mrf.mxu3 }
  0xfe   :  { %4314 = vst.msk [vmem:[%s9143_s3 + $0x20c] sm:$0xf] %vm4182_vm0, %v3832_v60  ;;  %v2949_v1 = vadd.f32 %v6085_v41, %v2948_v63  ;;  %v2046_v2 = vpop.f32.mrf.mxu0 }
  0xff   :  { %v3471_v5 = vmax.f32 %v2644_v61, 0.0  ;;  %v2047_v6 = vadd.f32 %v6085_v41, %v2046_v2  ;;  %v2346_v7 = vpop.f32.mrf.mxu1 }
 0x100   :  { %v3593_v8 = vmax.f32 %v2949_v1, 0.0  ;;  %v2347_v9 = vadd.f32 %v6085_v41, %v2346_v7  ;;  %v5797_v7 = vld [vmem:[%s9141_s0 + $0x440] sm:$0xff] }
 0x101   :  { %v3952_v10 = vpack.c.bf16 %v3471_v5, %v3471_v5  ;;  %2685 = vmatmul.bf16.gmra.mxu2 %v5795_v62  ;;  %v3232_v11 = vmax.f32 %v2047_v6, 0.0  ;;  %2085 = vmatmul.bf16.gmra.mxu0 %v5675_v0 }
 0x102   :  { %v4074_v12 = vpack.c.bf16 %v3593_v8, %v3593_v8  ;;  %v3352_v13 = vmax.f32 %v2347_v9, 0.0  ;;  %2385 = vmatmul.bf16.gmra.mxu1 %v5735_v3  ;;  %2990 = vmatmul.bf16.gmra.mxu3 %v5856_v4  ;;  %v5677_v9 = vld [vmem:[%s9141_s0 + $0x80] sm:$0xff] }
 0x103   :  { %4434 = vst.msk [vmem:[%s9143_s3 + $0x3ec] sm:$0xf] %vm4182_vm0, %v3952_v10  ;;  %v3713_v14 = vpack.c.bf16 %v3232_v11, %v3232_v11 }
 0x104   :  { %v2646_v15 = vpop.f32.mrf.mxu2  ;;  %4556 = vst.msk [vmem:[%s9143_s3 + $0x5d4] sm:$0xf] %vm4182_vm0, %v4074_v12  ;;  %v3833_v16 = vpack.c.bf16 %v3352_v13, %v3352_v13  ;;  %v5737_v12 = vld [vmem:[%s9141_s0 + $0x260] sm:$0xff]  ;;  %v5858_v13 = vld [vmem:[%s9141_s0 + $0x628] sm:$0xff] }
 0x105   :  { %v2647_v17 = vadd.f32 %v6085_v41, %v2646_v15  ;;  %4195 = vst.msk [vmem:[%s9143_s3 + $0x30] sm:$0xf] %vm4182_vm0, %v3713_v14  ;;  %v2951_v18 = vpop.f32.mrf.mxu3 }
 0x106   :  { %4315 = vst.msk [vmem:[%s9143_s3 + $0x210] sm:$0xf] %vm4182_vm0, %v3833_v16  ;;  %v2952_v19 = vadd.f32 %v6085_v41, %v2951_v18  ;;  %v2048_v20 = vpop.f32.mrf.mxu0 }
 0x107   :  { %v3472_v21 = vmax.f32 %v2647_v17, 0.0  ;;  %v2049_v22 = vadd.f32 %v6085_v41, %v2048_v20  ;;  %v2348_v23 = vpop.f32.mrf.mxu1 }
 0x108   :  { %v3594_v24 = vmax.f32 %v2952_v19, 0.0  ;;  %v2349_v25 = vadd.f32 %v6085_v41, %v2348_v23 }
 0x109   :  { %v3953_v26 = vpack.c.bf16 %v3472_v21, %v3472_v21  ;;  %v3233_v27 = vmax.f32 %v2049_v22, 0.0 }
 0x10a   :  { %v4075_v28 = vpack.c.bf16 %v3594_v24, %v3594_v24  ;;  %v3353_v29 = vmax.f32 %v2349_v25, 0.0 }
 0x10b   :  { %4435 = vst.msk [vmem:[%s9143_s3 + $0x3f0] sm:$0xf] %vm4182_vm0, %v3953_v26  ;;  %v3714_v30 = vpack.c.bf16 %v3233_v27, %v3233_v27 }
 0x10c   :  { %v2648_v31 = vpop.f32.mrf.mxu2  ;;  %4557 = vst.msk [vmem:[%s9143_s3 + $0x5d8] sm:$0xf] %vm4182_vm0, %v4075_v28  ;;  %v3834_v32 = vpack.c.bf16 %v3353_v29, %v3353_v29 }
 0x10d   :  { %v2649_v33 = vadd.f32 %v6085_v41, %v2648_v31  ;;  %4196 = vst.msk [vmem:[%s9143_s3 + $0x34] sm:$0xf] %vm4182_vm0, %v3714_v30  ;;  %v2953_v35 = vpop.f32.mrf.mxu3 }
 0x10e   :  { %4316 = vst.msk [vmem:[%s9143_s3 + $0x214] sm:$0xf] %vm4182_vm0, %v3834_v32  ;;  %v2954_v37 = vadd.f32 %v6085_v41, %v2953_v35  ;;  %v2051_v38 = vpop.f32.mrf.mxu0 }
 0x10f   :  { %v3473_v42 = vmax.f32 %v2649_v33, 0.0  ;;  %v2052_v43 = vadd.f32 %v6085_v41, %v2051_v38  ;;  %v2351_v44 = vpop.f32.mrf.mxu1 }
 0x110   :  { %v3595_v45 = vmax.f32 %v2954_v37, 0.0  ;;  %v2352_v46 = vadd.f32 %v6085_v41, %v2351_v44  ;;  %v5798_v44 = vld [vmem:[%s9141_s0 + $0x448] sm:$0xff] }
 0x111   :  { %v3954_v47 = vpack.c.bf16 %v3473_v42, %v3473_v42  ;;  %2690 = vmatmul.bf16.gmra.mxu2 %v5796_v34  ;;  %v3234_v48 = vmax.f32 %v2052_v43, 0.0  ;;  %2090 = vmatmul.bf16.gmra.mxu0 %v5676_v36 }
 0x112   :  { %v4076_v49 = vpack.c.bf16 %v3595_v45, %v3595_v45  ;;  %v3354_v50 = vmax.f32 %v2352_v46, 0.0  ;;  %2390 = vmatmul.bf16.gmra.mxu1 %v5736_v39  ;;  %2995 = vmatmul.bf16.gmra.mxu3 %v5857_v40  ;;  %v5678_v46 = vld [vmem:[%s9141_s0 + $0x88] sm:$0xff] }
 0x113   :  { %4436 = vst.msk [vmem:[%s9143_s3 + $0x3f4] sm:$0xf] %vm4182_vm0, %v3954_v47  ;;  %v3715_v51 = vpack.c.bf16 %v3234_v48, %v3234_v48 }
 0x114   :  { %v2651_v52 = vpop.f32.mrf.mxu2  ;;  %4558 = vst.msk [vmem:[%s9143_s3 + $0x5dc] sm:$0xf] %vm4182_vm0, %v4076_v49  ;;  %v3835_v53 = vpack.c.bf16 %v3354_v50, %v3354_v50  ;;  %v5738_v49 = vld [vmem:[%s9141_s0 + $0x268] sm:$0xff]  ;;  %v5859_v50 = vld [vmem:[%s9141_s0 + $0x630] sm:$0xff] }
 0x115   :  { %v2652_v54 = vadd.f32 %v6085_v41, %v2651_v52  ;;  %4197 = vst.msk [vmem:[%s9143_s3 + $0x38] sm:$0xf] %vm4182_vm0, %v3715_v51  ;;  %v2956_v55 = vpop.f32.mrf.mxu3 }
 0x116   :  { %4317 = vst.msk [vmem:[%s9143_s3 + $0x218] sm:$0xf] %vm4182_vm0, %v3835_v53  ;;  %v2957_v56 = vadd.f32 %v6085_v41, %v2956_v55  ;;  %v2053_v57 = vpop.f32.mrf.mxu0 }
 0x117   :  { %v3474_v58 = vmax.f32 %v2652_v54, 0.0  ;;  %v2054_v59 = vadd.f32 %v6085_v41, %v2053_v57  ;;  %v2353_v60 = vpop.f32.mrf.mxu1 }
 0x118   :  { %v3596_v61 = vmax.f32 %v2957_v56, 0.0  ;;  %v2354_v62 = vadd.f32 %v6085_v41, %v2353_v60 }
 0x119   :  { %v3955_v63 = vpack.c.bf16 %v3474_v58, %v3474_v58  ;;  %v3235_v0 = vmax.f32 %v2054_v59, 0.0 }
 0x11a   :  { %v4077_v1 = vpack.c.bf16 %v3596_v61, %v3596_v61  ;;  %v3355_v2 = vmax.f32 %v2354_v62, 0.0 }
 0x11b   :  { %4437 = vst.msk [vmem:[%s9143_s3 + $0x3f8] sm:$0xf] %vm4182_vm0, %v3955_v63  ;;  %v3716_v3 = vpack.c.bf16 %v3235_v0, %v3235_v0 }
 0x11c   :  { %v2653_v4 = vpop.f32.mrf.mxu2  ;;  %4559 = vst.msk [vmem:[%s9143_s3 + $0x5e0] sm:$0xf] %vm4182_vm0, %v4077_v1  ;;  %v3836_v5 = vpack.c.bf16 %v3355_v2, %v3355_v2 }
 0x11d   :  { %v2654_v6 = vadd.f32 %v6085_v41, %v2653_v4  ;;  %4198 = vst.msk [vmem:[%s9143_s3 + $0x3c] sm:$0xf] %vm4182_vm0, %v3716_v3  ;;  %v2958_v8 = vpop.f32.mrf.mxu3 }
 0x11e   :  { %4318 = vst.msk [vmem:[%s9143_s3 + $0x21c] sm:$0xf] %vm4182_vm0, %v3836_v5  ;;  %v2959_v10 = vadd.f32 %v6085_v41, %v2958_v8  ;;  %v2056_v11 = vpop.f32.mrf.mxu0 }
 0x11f   :  { %v3475_v14 = vmax.f32 %v2654_v6, 0.0  ;;  %v2057_v15 = vadd.f32 %v6085_v41, %v2056_v11  ;;  %v2356_v16 = vpop.f32.mrf.mxu1 }
 0x120   :  { %v3597_v17 = vmax.f32 %v2959_v10, 0.0  ;;  %v2357_v18 = vadd.f32 %v6085_v41, %v2356_v16  ;;  %v5799_v16 = vld [vmem:[%s9141_s0 + $0x450] sm:$0xff] }
 0x121   :  { %v3956_v19 = vpack.c.bf16 %v3475_v14, %v3475_v14  ;;  %2695 = vmatmul.bf16.gmra.mxu2 %v5797_v7  ;;  %v3236_v20 = vmax.f32 %v2057_v15, 0.0  ;;  %2095 = vmatmul.bf16.gmra.mxu0 %v5677_v9 }
 0x122   :  { %v4078_v21 = vpack.c.bf16 %v3597_v17, %v3597_v17  ;;  %v3356_v22 = vmax.f32 %v2357_v18, 0.0  ;;  %2395 = vmatmul.bf16.gmra.mxu1 %v5737_v12  ;;  %3000 = vmatmul.bf16.gmra.mxu3 %v5858_v13  ;;  %v5679_v18 = vld [vmem:[%s9141_s0 + $0x90] sm:$0xff] }
 0x123   :  { %4438 = vst.msk [vmem:[%s9143_s3 + $0x3fc] sm:$0xf] %vm4182_vm0, %v3956_v19  ;;  %v3717_v23 = vpack.c.bf16 %v3236_v20, %v3236_v20 }
 0x124   :  { %v2656_v24 = vpop.f32.mrf.mxu2  ;;  %4560 = vst.msk [vmem:[%s9143_s3 + $0x5e4] sm:$0xf] %vm4182_vm0, %v4078_v21  ;;  %v3837_v25 = vpack.c.bf16 %v3356_v22, %v3356_v22  ;;  %v5739_v21 = vld [vmem:[%s9141_s0 + $0x270] sm:$0xff]  ;;  %v5860_v22 = vld [vmem:[%s9141_s0 + $0x638] sm:$0xff] }
 0x125   :  { %v2657_v26 = vadd.f32 %v6085_v41, %v2656_v24  ;;  %4199 = vst.msk [vmem:[%s9143_s3 + $0x40] sm:$0xf] %vm4182_vm0, %v3717_v23  ;;  %v2961_v27 = vpop.f32.mrf.mxu3 }
 0x126   :  { %4319 = vst.msk [vmem:[%s9143_s3 + $0x220] sm:$0xf] %vm4182_vm0, %v3837_v25  ;;  %v2962_v28 = vadd.f32 %v6085_v41, %v2961_v27  ;;  %v2058_v29 = vpop.f32.mrf.mxu0 }
 0x127   :  { %v3476_v30 = vmax.f32 %v2657_v26, 0.0  ;;  %v2059_v31 = vadd.f32 %v6085_v41, %v2058_v29  ;;  %v2358_v32 = vpop.f32.mrf.mxu1 }
 0x128   :  { %v3598_v33 = vmax.f32 %v2962_v28, 0.0  ;;  %v2359_v34 = vadd.f32 %v6085_v41, %v2358_v32 }
 0x129   :  { %v3957_v35 = vpack.c.bf16 %v3476_v30, %v3476_v30  ;;  %v3237_v36 = vmax.f32 %v2059_v31, 0.0 }
 0x12a   :  { %v4079_v37 = vpack.c.bf16 %v3598_v33, %v3598_v33  ;;  %v3357_v38 = vmax.f32 %v2359_v34, 0.0 }
 0x12b   :  { %4439 = vst.msk [vmem:[%s9143_s3 + $0x400] sm:$0xf] %vm4182_vm0, %v3957_v35  ;;  %v3718_v39 = vpack.c.bf16 %v3237_v36, %v3237_v36 }
 0x12c   :  { %v2658_v40 = vpop.f32.mrf.mxu2  ;;  %4561 = vst.msk [vmem:[%s9143_s3 + $0x5e8] sm:$0xf] %vm4182_vm0, %v4079_v37  ;;  %v3838_v42 = vpack.c.bf16 %v3357_v38, %v3357_v38 }
 0x12d   :  { %v2659_v43 = vadd.f32 %v6085_v41, %v2658_v40  ;;  %4200 = vst.msk [vmem:[%s9143_s3 + $0x44] sm:$0xf] %vm4182_vm0, %v3718_v39  ;;  %v2963_v45 = vpop.f32.mrf.mxu3 }
 0x12e   :  { %4320 = vst.msk [vmem:[%s9143_s3 + $0x224] sm:$0xf] %vm4182_vm0, %v3838_v42  ;;  %v2964_v47 = vadd.f32 %v6085_v41, %v2963_v45  ;;  %v2061_v48 = vpop.f32.mrf.mxu0 }
 0x12f   :  { %v3477_v51 = vmax.f32 %v2659_v43, 0.0  ;;  %v2062_v52 = vadd.f32 %v6085_v41, %v2061_v48  ;;  %v2361_v53 = vpop.f32.mrf.mxu1 }
 0x130   :  { %v3599_v54 = vmax.f32 %v2964_v47, 0.0  ;;  %v2362_v55 = vadd.f32 %v6085_v41, %v2361_v53  ;;  %v5800_v53 = vld [vmem:[%s9141_s0 + $0x458] sm:$0xff] }
 0x131   :  { %v3958_v56 = vpack.c.bf16 %v3477_v51, %v3477_v51  ;;  %2700 = vmatmul.bf16.gmra.mxu2 %v5798_v44  ;;  %v3238_v57 = vmax.f32 %v2062_v52, 0.0  ;;  %2100 = vmatmul.bf16.gmra.mxu0 %v5678_v46 }
 0x132   :  { %v4080_v58 = vpack.c.bf16 %v3599_v54, %v3599_v54  ;;  %v3358_v59 = vmax.f32 %v2362_v55, 0.0  ;;  %2400 = vmatmul.bf16.gmra.mxu1 %v5738_v49  ;;  %3005 = vmatmul.bf16.gmra.mxu3 %v5859_v50  ;;  %v5680_v55 = vld [vmem:[%s9141_s0 + $0x98] sm:$0xff] }
 0x133   :  { %4440 = vst.msk [vmem:[%s9143_s3 + $0x404] sm:$0xf] %vm4182_vm0, %v3958_v56  ;;  %v3719_v60 = vpack.c.bf16 %v3238_v57, %v3238_v57 }
 0x134   :  { %v2661_v61 = vpop.f32.mrf.mxu2  ;;  %4562 = vst.msk [vmem:[%s9143_s3 + $0x5ec] sm:$0xf] %vm4182_vm0, %v4080_v58  ;;  %v3839_v62 = vpack.c.bf16 %v3358_v59, %v3358_v59  ;;  %v5740_v58 = vld [vmem:[%s9141_s0 + $0x278] sm:$0xff]  ;;  %v5861_v59 = vld [vmem:[%s9141_s0 + $0x640] sm:$0xff] }
 0x135   :  { %v2662_v63 = vadd.f32 %v6085_v41, %v2661_v61  ;;  %4201 = vst.msk [vmem:[%s9143_s3 + $0x48] sm:$0xf] %vm4182_vm0, %v3719_v60  ;;  %v2966_v0 = vpop.f32.mrf.mxu3 }
 0x136   :  { %4321 = vst.msk [vmem:[%s9143_s3 + $0x228] sm:$0xf] %vm4182_vm0, %v3839_v62  ;;  %v2967_v1 = vadd.f32 %v6085_v41, %v2966_v0  ;;  %v2063_v2 = vpop.f32.mrf.mxu0 }
 0x137   :  { %v3478_v3 = vmax.f32 %v2662_v63, 0.0  ;;  %v2064_v4 = vadd.f32 %v6085_v41, %v2063_v2  ;;  %v2363_v5 = vpop.f32.mrf.mxu1 }
 0x138   :  { %v3600_v6 = vmax.f32 %v2967_v1, 0.0  ;;  %v2364_v7 = vadd.f32 %v6085_v41, %v2363_v5 }
 0x139   :  { %v3959_v8 = vpack.c.bf16 %v3478_v3, %v3478_v3  ;;  %v3239_v9 = vmax.f32 %v2064_v4, 0.0 }
 0x13a   :  { %v4081_v10 = vpack.c.bf16 %v3600_v6, %v3600_v6  ;;  %v3359_v11 = vmax.f32 %v2364_v7, 0.0 }
 0x13b   :  { %4441 = vst.msk [vmem:[%s9143_s3 + $0x408] sm:$0xf] %vm4182_vm0, %v3959_v8  ;;  %v3720_v12 = vpack.c.bf16 %v3239_v9, %v3239_v9 }
 0x13c   :  { %v2663_v13 = vpop.f32.mrf.mxu2  ;;  %4563 = vst.msk [vmem:[%s9143_s3 + $0x5f0] sm:$0xf] %vm4182_vm0, %v4081_v10  ;;  %v3840_v14 = vpack.c.bf16 %v3359_v11, %v3359_v11 }
 0x13d   :  { %v2664_v15 = vadd.f32 %v6085_v41, %v2663_v13  ;;  %4202 = vst.msk [vmem:[%s9143_s3 + $0x4c] sm:$0xf] %vm4182_vm0, %v3720_v12  ;;  %v2968_v17 = vpop.f32.mrf.mxu3 }
 0x13e   :  { %4322 = vst.msk [vmem:[%s9143_s3 + $0x22c] sm:$0xf] %vm4182_vm0, %v3840_v14  ;;  %v2969_v19 = vadd.f32 %v6085_v41, %v2968_v17  ;;  %v2066_v20 = vpop.f32.mrf.mxu0 }
 0x13f   :  { %v3479_v23 = vmax.f32 %v2664_v15, 0.0  ;;  %v2067_v24 = vadd.f32 %v6085_v41, %v2066_v20  ;;  %v2366_v25 = vpop.f32.mrf.mxu1 }
 0x140   :  { %v3601_v26 = vmax.f32 %v2969_v19, 0.0  ;;  %v2367_v27 = vadd.f32 %v6085_v41, %v2366_v25  ;;  %v5801_v25 = vld [vmem:[%s9141_s0 + $0x460] sm:$0xff] }
 0x141   :  { %v3960_v28 = vpack.c.bf16 %v3479_v23, %v3479_v23  ;;  %2705 = vmatmul.bf16.gmra.mxu2 %v5799_v16  ;;  %v3240_v29 = vmax.f32 %v2067_v24, 0.0  ;;  %2105 = vmatmul.bf16.gmra.mxu0 %v5679_v18 }
 0x142   :  { %v4082_v30 = vpack.c.bf16 %v3601_v26, %v3601_v26  ;;  %v3360_v31 = vmax.f32 %v2367_v27, 0.0  ;;  %2405 = vmatmul.bf16.gmra.mxu1 %v5739_v21  ;;  %3010 = vmatmul.bf16.gmra.mxu3 %v5860_v22  ;;  %v5681_v27 = vld [vmem:[%s9141_s0 + $0xa0] sm:$0xff] }
 0x143   :  { %4442 = vst.msk [vmem:[%s9143_s3 + $0x40c] sm:$0xf] %vm4182_vm0, %v3960_v28  ;;  %v3721_v32 = vpack.c.bf16 %v3240_v29, %v3240_v29 }
 0x144   :  { %v2666_v33 = vpop.f32.mrf.mxu2  ;;  %4564 = vst.msk [vmem:[%s9143_s3 + $0x5f4] sm:$0xf] %vm4182_vm0, %v4082_v30  ;;  %v3841_v34 = vpack.c.bf16 %v3360_v31, %v3360_v31  ;;  %v5741_v30 = vld [vmem:[%s9141_s0 + $0x280] sm:$0xff]  ;;  %v5862_v31 = vld [vmem:[%s9141_s0 + $0x648] sm:$0xff] }
 0x145   :  { %v2667_v35 = vadd.f32 %v6085_v41, %v2666_v33  ;;  %4203 = vst.msk [vmem:[%s9143_s3 + $0x50] sm:$0xf] %vm4182_vm0, %v3721_v32  ;;  %v2971_v36 = vpop.f32.mrf.mxu3 }
 0x146   :  { %4323 = vst.msk [vmem:[%s9143_s3 + $0x230] sm:$0xf] %vm4182_vm0, %v3841_v34  ;;  %v2972_v37 = vadd.f32 %v6085_v41, %v2971_v36  ;;  %v2068_v38 = vpop.f32.mrf.mxu0 }
 0x147   :  { %v3480_v39 = vmax.f32 %v2667_v35, 0.0  ;;  %v2069_v40 = vadd.f32 %v6085_v41, %v2068_v38  ;;  %v2368_v42 = vpop.f32.mrf.mxu1 }
 0x148   :  { %v3602_v43 = vmax.f32 %v2972_v37, 0.0  ;;  %v2369_v44 = vadd.f32 %v6085_v41, %v2368_v42  ;;  %v6641_v41 = vld [vmem:[%s9142_s2] ss:$0 sm:$0xff] }
 0x149   :  { %v3961_v45 = vpack.c.bf16 %v3480_v39, %v3480_v39  ;;  %v3241_v46 = vmax.f32 %v2069_v40, 0.0 }
 0x14a   :  { %v4083_v47 = vpack.c.bf16 %v3602_v43, %v3602_v43  ;;  %v3361_v48 = vmax.f32 %v2369_v44, 0.0 }
 0x14b   :  { %4443 = vst.msk [vmem:[%s9143_s3 + $0x410] sm:$0xf] %vm4182_vm0, %v3961_v45  ;;  %v3722_v49 = vpack.c.bf16 %v3241_v46, %v3241_v46 }
 0x14c   :  { %v2668_v50 = vpop.f32.mrf.mxu2  ;;  %4565 = vst.msk [vmem:[%s9143_s3 + $0x5f8] sm:$0xf] %vm4182_vm0, %v4083_v47  ;;  %v3842_v51 = vpack.c.bf16 %v3361_v48, %v3361_v48 }
 0x14d   :  { %v2669_v52 = vadd.f32 %v6641_v41, %v2668_v50  ;;  %4204 = vst.msk [vmem:[%s9143_s3 + $0x54] sm:$0xf] %vm4182_vm0, %v3722_v49  ;;  %v2973_v54 = vpop.f32.mrf.mxu3 }
 0x14e   :  { %4324 = vst.msk [vmem:[%s9143_s3 + $0x234] sm:$0xf] %vm4182_vm0, %v3842_v51  ;;  %v2974_v56 = vadd.f32 %v6641_v41, %v2973_v54  ;;  %v2071_v57 = vpop.f32.mrf.mxu0 }
 0x14f   :  { %v3481_v60 = vmax.f32 %v2669_v52, 0.0  ;;  %v2072_v61 = vadd.f32 %v6641_v41, %v2071_v57  ;;  %v2371_v62 = vpop.f32.mrf.mxu1 }
 0x150   :  { %v3603_v63 = vmax.f32 %v2974_v56, 0.0  ;;  %v2372_v0 = vadd.f32 %v6641_v41, %v2371_v62  ;;  %v5802_v62 = vld [vmem:[%s9141_s0 + $0x468] sm:$0xff] }
 0x151   :  { %v3962_v1 = vpack.c.bf16 %v3481_v60, %v3481_v60  ;;  %2710 = vmatmul.bf16.gmra.mxu2 %v5800_v53  ;;  %v3242_v2 = vmax.f32 %v2072_v61, 0.0  ;;  %2110 = vmatmul.bf16.gmra.mxu0 %v5680_v55 }
 0x152   :  { %v4084_v3 = vpack.c.bf16 %v3603_v63, %v3603_v63  ;;  %v3362_v4 = vmax.f32 %v2372_v0, 0.0  ;;  %2410 = vmatmul.bf16.gmra.mxu1 %v5740_v58  ;;  %3015 = vmatmul.bf16.gmra.mxu3 %v5861_v59  ;;  %v5682_v0 = vld [vmem:[%s9141_s0 + $0xa8] sm:$0xff] }
 0x153   :  { %4444 = vst.msk [vmem:[%s9143_s3 + $0x414] sm:$0xf] %vm4182_vm0, %v3962_v1  ;;  %v3723_v5 = vpack.c.bf16 %v3242_v2, %v3242_v2 }
 0x154   :  { %v2671_v6 = vpop.f32.mrf.mxu2  ;;  %4566 = vst.msk [vmem:[%s9143_s3 + $0x5fc] sm:$0xf] %vm4182_vm0, %v4084_v3  ;;  %v3843_v7 = vpack.c.bf16 %v3362_v4, %v3362_v4  ;;  %v5742_v3 = vld [vmem:[%s9141_s0 + $0x288] sm:$0xff]  ;;  %v5863_v4 = vld [vmem:[%s9141_s0 + $0x650] sm:$0xff] }
 0x155   :  { %v2672_v8 = vadd.f32 %v6641_v41, %v2671_v6  ;;  %4205 = vst.msk [vmem:[%s9143_s3 + $0x58] sm:$0xf] %vm4182_vm0, %v3723_v5  ;;  %v2976_v9 = vpop.f32.mrf.mxu3 }
 0x156   :  { %4325 = vst.msk [vmem:[%s9143_s3 + $0x238] sm:$0xf] %vm4182_vm0, %v3843_v7  ;;  %v2977_v10 = vadd.f32 %v6641_v41, %v2976_v9  ;;  %v2073_v11 = vpop.f32.mrf.mxu0 }
 0x157   :  { %v3482_v12 = vmax.f32 %v2672_v8, 0.0  ;;  %v2074_v13 = vadd.f32 %v6641_v41, %v2073_v11  ;;  %v2373_v14 = vpop.f32.mrf.mxu1 }
 0x158   :  { %v3604_v15 = vmax.f32 %v2977_v10, 0.0  ;;  %v2374_v16 = vadd.f32 %v6641_v41, %v2373_v14 }
 0x159   :  { %v3963_v17 = vpack.c.bf16 %v3482_v12, %v3482_v12  ;;  %v3243_v18 = vmax.f32 %v2074_v13, 0.0 }
 0x15a   :  { %v4085_v19 = vpack.c.bf16 %v3604_v15, %v3604_v15  ;;  %v3363_v20 = vmax.f32 %v2374_v16, 0.0 }
 0x15b   :  { %4445 = vst.msk [vmem:[%s9143_s3 + $0x418] sm:$0xf] %vm4182_vm0, %v3963_v17  ;;  %v3724_v21 = vpack.c.bf16 %v3243_v18, %v3243_v18 }
 0x15c   :  { %v2673_v22 = vpop.f32.mrf.mxu2  ;;  %4567 = vst.msk [vmem:[%s9143_s3 + $0x600] sm:$0xf] %vm4182_vm0, %v4085_v19  ;;  %v3844_v23 = vpack.c.bf16 %v3363_v20, %v3363_v20 }
 0x15d   :  { %v2674_v24 = vadd.f32 %v6641_v41, %v2673_v22  ;;  %4206 = vst.msk [vmem:[%s9143_s3 + $0x5c] sm:$0xf] %vm4182_vm0, %v3724_v21  ;;  %v2978_v26 = vpop.f32.mrf.mxu3 }
 0x15e   :  { %4326 = vst.msk [vmem:[%s9143_s3 + $0x23c] sm:$0xf] %vm4182_vm0, %v3844_v23  ;;  %v2979_v28 = vadd.f32 %v6641_v41, %v2978_v26  ;;  %v2076_v29 = vpop.f32.mrf.mxu0 }
 0x15f   :  { %v3483_v32 = vmax.f32 %v2674_v24, 0.0  ;;  %v2077_v33 = vadd.f32 %v6641_v41, %v2076_v29  ;;  %v2376_v34 = vpop.f32.mrf.mxu1 }
 0x160   :  { %v3605_v35 = vmax.f32 %v2979_v28, 0.0  ;;  %v2377_v36 = vadd.f32 %v6641_v41, %v2376_v34  ;;  %v5803_v34 = vld [vmem:[%s9141_s0 + $0x470] sm:$0xff] }
 0x161   :  { %v3964_v37 = vpack.c.bf16 %v3483_v32, %v3483_v32  ;;  %2715 = vmatmul.bf16.gmra.mxu2 %v5801_v25  ;;  %v3244_v38 = vmax.f32 %v2077_v33, 0.0  ;;  %2115 = vmatmul.bf16.gmra.mxu0 %v5681_v27 }
 0x162   :  { %v4086_v39 = vpack.c.bf16 %v3605_v35, %v3605_v35  ;;  %v3364_v40 = vmax.f32 %v2377_v36, 0.0  ;;  %2415 = vmatmul.bf16.gmra.mxu1 %v5741_v30  ;;  %3020 = vmatmul.bf16.gmra.mxu3 %v5862_v31  ;;  %v5683_v36 = vld [vmem:[%s9141_s0 + $0xb0] sm:$0xff] }
 0x163   :  { %4446 = vst.msk [vmem:[%s9143_s3 + $0x41c] sm:$0xf] %vm4182_vm0, %v3964_v37  ;;  %v3725_v42 = vpack.c.bf16 %v3244_v38, %v3244_v38 }
 0x164   :  { %v2676_v43 = vpop.f32.mrf.mxu2  ;;  %4568 = vst.msk [vmem:[%s9143_s3 + $0x604] sm:$0xf] %vm4182_vm0, %v4086_v39  ;;  %v3845_v44 = vpack.c.bf16 %v3364_v40, %v3364_v40  ;;  %v5743_v39 = vld [vmem:[%s9141_s0 + $0x290] sm:$0xff]  ;;  %v5864_v40 = vld [vmem:[%s9141_s0 + $0x658] sm:$0xff] }
 0x165   :  { %v2677_v45 = vadd.f32 %v6641_v41, %v2676_v43  ;;  %4207 = vst.msk [vmem:[%s9143_s3 + $0x60] sm:$0xf] %vm4182_vm0, %v3725_v42  ;;  %v2981_v46 = vpop.f32.mrf.mxu3 }
 0x166   :  { %4327 = vst.msk [vmem:[%s9143_s3 + $0x240] sm:$0xf] %vm4182_vm0, %v3845_v44  ;;  %v2982_v47 = vadd.f32 %v6641_v41, %v2981_v46  ;;  %v2078_v48 = vpop.f32.mrf.mxu0 }
 0x167   :  { %v3484_v49 = vmax.f32 %v2677_v45, 0.0  ;;  %v2079_v50 = vadd.f32 %v6641_v41, %v2078_v48  ;;  %v2378_v51 = vpop.f32.mrf.mxu1 }
 0x168   :  { %v3606_v52 = vmax.f32 %v2982_v47, 0.0  ;;  %v2379_v53 = vadd.f32 %v6641_v41, %v2378_v51 }
 0x169   :  { %v3965_v54 = vpack.c.bf16 %v3484_v49, %v3484_v49  ;;  %v3245_v55 = vmax.f32 %v2079_v50, 0.0 }
 0x16a   :  { %v4087_v56 = vpack.c.bf16 %v3606_v52, %v3606_v52  ;;  %v3365_v57 = vmax.f32 %v2379_v53, 0.0 }
 0x16b   :  { %4447 = vst.msk [vmem:[%s9143_s3 + $0x420] sm:$0xf] %vm4182_vm0, %v3965_v54  ;;  %v3726_v58 = vpack.c.bf16 %v3245_v55, %v3245_v55 }
 0x16c   :  { %v2678_v59 = vpop.f32.mrf.mxu2  ;;  %4569 = vst.msk [vmem:[%s9143_s3 + $0x608] sm:$0xf] %vm4182_vm0, %v4087_v56  ;;  %v3846_v60 = vpack.c.bf16 %v3365_v57, %v3365_v57 }
 0x16d   :  { %v2679_v61 = vadd.f32 %v6641_v41, %v2678_v59  ;;  %4208 = vst.msk [vmem:[%s9143_s3 + $0x64] sm:$0xf] %vm4182_vm0, %v3726_v58  ;;  %v2983_v63 = vpop.f32.mrf.mxu3 }
 0x16e   :  { %4328 = vst.msk [vmem:[%s9143_s3 + $0x244] sm:$0xf] %vm4182_vm0, %v3846_v60  ;;  %v2984_v1 = vadd.f32 %v6641_v41, %v2983_v63  ;;  %v2081_v2 = vpop.f32.mrf.mxu0 }
 0x16f   :  { %v3485_v5 = vmax.f32 %v2679_v61, 0.0  ;;  %v2082_v6 = vadd.f32 %v6641_v41, %v2081_v2  ;;  %v2381_v7 = vpop.f32.mrf.mxu1 }
 0x170   :  { %v3607_v8 = vmax.f32 %v2984_v1, 0.0  ;;  %v2382_v9 = vadd.f32 %v6641_v41, %v2381_v7  ;;  %v5804_v7 = vld [vmem:[%s9141_s0 + $0x478] sm:$0xff] }
 0x171   :  { %v3966_v10 = vpack.c.bf16 %v3485_v5, %v3485_v5  ;;  %2720 = vmatmul.bf16.gmra.mxu2 %v5802_v62  ;;  %v3246_v11 = vmax.f32 %v2082_v6, 0.0  ;;  %2120 = vmatmul.bf16.gmra.mxu0 %v5682_v0 }
 0x172   :  { %v4088_v12 = vpack.c.bf16 %v3607_v8, %v3607_v8  ;;  %v3366_v13 = vmax.f32 %v2382_v9, 0.0  ;;  %2420 = vmatmul.bf16.gmra.mxu1 %v5742_v3  ;;  %3025 = vmatmul.bf16.gmra.mxu3 %v5863_v4  ;;  %v5684_v9 = vld [vmem:[%s9141_s0 + $0xb8] sm:$0xff] }
 0x173   :  { %4448 = vst.msk [vmem:[%s9143_s3 + $0x424] sm:$0xf] %vm4182_vm0, %v3966_v10  ;;  %v3727_v14 = vpack.c.bf16 %v3246_v11, %v3246_v11 }
 0x174   :  { %v2681_v15 = vpop.f32.mrf.mxu2  ;;  %4570 = vst.msk [vmem:[%s9143_s3 + $0x60c] sm:$0xf] %vm4182_vm0, %v4088_v12  ;;  %v3847_v16 = vpack.c.bf16 %v3366_v13, %v3366_v13  ;;  %v5744_v12 = vld [vmem:[%s9141_s0 + $0x298] sm:$0xff]  ;;  %v5865_v13 = vld [vmem:[%s9141_s0 + $0x660] sm:$0xff] }
 0x175   :  { %v2682_v17 = vadd.f32 %v6641_v41, %v2681_v15  ;;  %4209 = vst.msk [vmem:[%s9143_s3 + $0x68] sm:$0xf] %vm4182_vm0, %v3727_v14  ;;  %v2986_v18 = vpop.f32.mrf.mxu3 }
 0x176   :  { %4329 = vst.msk [vmem:[%s9143_s3 + $0x248] sm:$0xf] %vm4182_vm0, %v3847_v16  ;;  %v2987_v19 = vadd.f32 %v6641_v41, %v2986_v18  ;;  %v2083_v20 = vpop.f32.mrf.mxu0 }
 0x177   :  { %v3486_v21 = vmax.f32 %v2682_v17, 0.0  ;;  %v2084_v22 = vadd.f32 %v6641_v41, %v2083_v20  ;;  %v2383_v23 = vpop.f32.mrf.mxu1 }
 0x178   :  { %v3608_v24 = vmax.f32 %v2987_v19, 0.0  ;;  %v2384_v25 = vadd.f32 %v6641_v41, %v2383_v23 }
 0x179   :  { %v3967_v26 = vpack.c.bf16 %v3486_v21, %v3486_v21  ;;  %v3247_v27 = vmax.f32 %v2084_v22, 0.0 }
 0x17a   :  { %v4089_v28 = vpack.c.bf16 %v3608_v24, %v3608_v24  ;;  %v3367_v29 = vmax.f32 %v2384_v25, 0.0 }
 0x17b   :  { %4449 = vst.msk [vmem:[%s9143_s3 + $0x428] sm:$0xf] %vm4182_vm0, %v3967_v26  ;;  %v3728_v30 = vpack.c.bf16 %v3247_v27, %v3247_v27 }
 0x17c   :  { %v2683_v31 = vpop.f32.mrf.mxu2  ;;  %4571 = vst.msk [vmem:[%s9143_s3 + $0x610] sm:$0xf] %vm4182_vm0, %v4089_v28  ;;  %v3848_v32 = vpack.c.bf16 %v3367_v29, %v3367_v29 }
 0x17d   :  { %v2684_v33 = vadd.f32 %v6641_v41, %v2683_v31  ;;  %4210 = vst.msk [vmem:[%s9143_s3 + $0x6c] sm:$0xf] %vm4182_vm0, %v3728_v30  ;;  %v2988_v35 = vpop.f32.mrf.mxu3 }
 0x17e   :  { %4330 = vst.msk [vmem:[%s9143_s3 + $0x24c] sm:$0xf] %vm4182_vm0, %v3848_v32  ;;  %v2989_v37 = vadd.f32 %v6641_v41, %v2988_v35  ;;  %v2086_v38 = vpop.f32.mrf.mxu0 }
 0x17f   :  { %v3487_v42 = vmax.f32 %v2684_v33, 0.0  ;;  %v2087_v43 = vadd.f32 %v6641_v41, %v2086_v38  ;;  %v2386_v44 = vpop.f32.mrf.mxu1 }
 0x180   :  { %v3609_v45 = vmax.f32 %v2989_v37, 0.0  ;;  %v2387_v46 = vadd.f32 %v6641_v41, %v2386_v44  ;;  %v5805_v44 = vld [vmem:[%s9141_s0 + $0x480] sm:$0xff] }
 0x181   :  { %v3968_v47 = vpack.c.bf16 %v3487_v42, %v3487_v42  ;;  %2725 = vmatmul.bf16.gmra.mxu2 %v5803_v34  ;;  %v3248_v48 = vmax.f32 %v2087_v43, 0.0  ;;  %2125 = vmatmul.bf16.gmra.mxu0 %v5683_v36 }
 0x182   :  { %v4090_v49 = vpack.c.bf16 %v3609_v45, %v3609_v45  ;;  %v3368_v50 = vmax.f32 %v2387_v46, 0.0  ;;  %2425 = vmatmul.bf16.gmra.mxu1 %v5743_v39  ;;  %3030 = vmatmul.bf16.gmra.mxu3 %v5864_v40  ;;  %v5685_v46 = vld [vmem:[%s9141_s0 + $0xc0] sm:$0xff] }
 0x183   :  { %4450 = vst.msk [vmem:[%s9143_s3 + $0x42c] sm:$0xf] %vm4182_vm0, %v3968_v47  ;;  %v3729_v51 = vpack.c.bf16 %v3248_v48, %v3248_v48 }
 0x184   :  { %v2686_v52 = vpop.f32.mrf.mxu2  ;;  %4572 = vst.msk [vmem:[%s9143_s3 + $0x614] sm:$0xf] %vm4182_vm0, %v4090_v49  ;;  %v3849_v53 = vpack.c.bf16 %v3368_v50, %v3368_v50  ;;  %v5745_v49 = vld [vmem:[%s9141_s0 + $0x2a0] sm:$0xff]  ;;  %v5866_v50 = vld [vmem:[%s9141_s0 + $0x668] sm:$0xff] }
 0x185   :  { %v2687_v54 = vadd.f32 %v6641_v41, %v2686_v52  ;;  %4211 = vst.msk [vmem:[%s9143_s3 + $0x70] sm:$0xf] %vm4182_vm0, %v3729_v51  ;;  %v2991_v55 = vpop.f32.mrf.mxu3 }
 0x186   :  { %4331 = vst.msk [vmem:[%s9143_s3 + $0x250] sm:$0xf] %vm4182_vm0, %v3849_v53  ;;  %v2992_v56 = vadd.f32 %v6641_v41, %v2991_v55  ;;  %v2088_v57 = vpop.f32.mrf.mxu0 }
 0x187   :  { %v3488_v58 = vmax.f32 %v2687_v54, 0.0  ;;  %v2089_v59 = vadd.f32 %v6641_v41, %v2088_v57  ;;  %v2388_v60 = vpop.f32.mrf.mxu1 }
 0x188   :  { %v3610_v61 = vmax.f32 %v2992_v56, 0.0  ;;  %v2389_v62 = vadd.f32 %v6641_v41, %v2388_v60 }
 0x189   :  { %v3969_v63 = vpack.c.bf16 %v3488_v58, %v3488_v58  ;;  %v3249_v0 = vmax.f32 %v2089_v59, 0.0 }
 0x18a   :  { %v4091_v1 = vpack.c.bf16 %v3610_v61, %v3610_v61  ;;  %v3369_v2 = vmax.f32 %v2389_v62, 0.0 }
 0x18b   :  { %4451 = vst.msk [vmem:[%s9143_s3 + $0x430] sm:$0xf] %vm4182_vm0, %v3969_v63  ;;  %v3730_v3 = vpack.c.bf16 %v3249_v0, %v3249_v0 }
 0x18c   :  { %v2688_v4 = vpop.f32.mrf.mxu2  ;;  %4573 = vst.msk [vmem:[%s9143_s3 + $0x618] sm:$0xf] %vm4182_vm0, %v4091_v1  ;;  %v3850_v5 = vpack.c.bf16 %v3369_v2, %v3369_v2 }
 0x18d   :  { %v2689_v6 = vadd.f32 %v6641_v41, %v2688_v4  ;;  %4212 = vst.msk [vmem:[%s9143_s3 + $0x74] sm:$0xf] %vm4182_vm0, %v3730_v3  ;;  %v2993_v8 = vpop.f32.mrf.mxu3 }
 0x18e   :  { %4332 = vst.msk [vmem:[%s9143_s3 + $0x254] sm:$0xf] %vm4182_vm0, %v3850_v5  ;;  %v2994_v10 = vadd.f32 %v6641_v41, %v2993_v8  ;;  %v2091_v11 = vpop.f32.mrf.mxu0 }
 0x18f   :  { %v3489_v14 = vmax.f32 %v2689_v6, 0.0  ;;  %v2092_v15 = vadd.f32 %v6641_v41, %v2091_v11  ;;  %v2391_v16 = vpop.f32.mrf.mxu1 }
 0x190   :  { %v3611_v17 = vmax.f32 %v2994_v10, 0.0  ;;  %v2392_v18 = vadd.f32 %v6641_v41, %v2391_v16  ;;  %v5806_v16 = vld [vmem:[%s9141_s0 + $0x488] sm:$0xff] }
 0x191   :  { %v3970_v19 = vpack.c.bf16 %v3489_v14, %v3489_v14  ;;  %2730 = vmatmul.bf16.gmra.mxu2 %v5804_v7  ;;  %v3250_v20 = vmax.f32 %v2092_v15, 0.0  ;;  %2130 = vmatmul.bf16.gmra.mxu0 %v5684_v9 }
 0x192   :  { %v4092_v21 = vpack.c.bf16 %v3611_v17, %v3611_v17  ;;  %v3370_v22 = vmax.f32 %v2392_v18, 0.0  ;;  %2430 = vmatmul.bf16.gmra.mxu1 %v5744_v12  ;;  %3035 = vmatmul.bf16.gmra.mxu3 %v5865_v13  ;;  %v5686_v18 = vld [vmem:[%s9141_s0 + $0xc8] sm:$0xff] }
 0x193   :  { %4452 = vst.msk [vmem:[%s9143_s3 + $0x434] sm:$0xf] %vm4182_vm0, %v3970_v19  ;;  %v3731_v23 = vpack.c.bf16 %v3250_v20, %v3250_v20 }
 0x194   :  { %v2691_v24 = vpop.f32.mrf.mxu2  ;;  %4574 = vst.msk [vmem:[%s9143_s3 + $0x61c] sm:$0xf] %vm4182_vm0, %v4092_v21  ;;  %v3851_v25 = vpack.c.bf16 %v3370_v22, %v3370_v22  ;;  %v5746_v21 = vld [vmem:[%s9141_s0 + $0x2a8] sm:$0xff]  ;;  %v5867_v22 = vld [vmem:[%s9141_s0 + $0x670] sm:$0xff] }
 0x195   :  { %v2692_v26 = vadd.f32 %v6641_v41, %v2691_v24  ;;  %4213 = vst.msk [vmem:[%s9143_s3 + $0x78] sm:$0xf] %vm4182_vm0, %v3731_v23  ;;  %v2996_v27 = vpop.f32.mrf.mxu3 }
 0x196   :  { %4333 = vst.msk [vmem:[%s9143_s3 + $0x258] sm:$0xf] %vm4182_vm0, %v3851_v25  ;;  %v2997_v28 = vadd.f32 %v6641_v41, %v2996_v27  ;;  %v2093_v29 = vpop.f32.mrf.mxu0 }
 0x197   :  { %v3490_v30 = vmax.f32 %v2692_v26, 0.0  ;;  %v2094_v31 = vadd.f32 %v6641_v41, %v2093_v29  ;;  %v2393_v32 = vpop.f32.mrf.mxu1 }
 0x198   :  { %v3612_v33 = vmax.f32 %v2997_v28, 0.0  ;;  %v2394_v34 = vadd.f32 %v6641_v41, %v2393_v32 }
 0x199   :  { %v3971_v35 = vpack.c.bf16 %v3490_v30, %v3490_v30  ;;  %v3251_v36 = vmax.f32 %v2094_v31, 0.0 }
 0x19a   :  { %v4093_v37 = vpack.c.bf16 %v3612_v33, %v3612_v33  ;;  %v3371_v38 = vmax.f32 %v2394_v34, 0.0 }
 0x19b   :  { %4453 = vst.msk [vmem:[%s9143_s3 + $0x438] sm:$0xf] %vm4182_vm0, %v3971_v35  ;;  %v3732_v39 = vpack.c.bf16 %v3251_v36, %v3251_v36 }
 0x19c   :  { %v2693_v40 = vpop.f32.mrf.mxu2  ;;  %4575 = vst.msk [vmem:[%s9143_s3 + $0x620] sm:$0xf] %vm4182_vm0, %v4093_v37  ;;  %v3852_v42 = vpack.c.bf16 %v3371_v38, %v3371_v38 }
 0x19d   :  { %v2694_v43 = vadd.f32 %v6641_v41, %v2693_v40  ;;  %4214 = vst.msk [vmem:[%s9143_s3 + $0x7c] sm:$0xf] %vm4182_vm0, %v3732_v39  ;;  %v2998_v45 = vpop.f32.mrf.mxu3 }
 0x19e   :  { %4334 = vst.msk [vmem:[%s9143_s3 + $0x25c] sm:$0xf] %vm4182_vm0, %v3852_v42  ;;  %v2999_v47 = vadd.f32 %v6641_v41, %v2998_v45  ;;  %v2096_v48 = vpop.f32.mrf.mxu0 }
 0x19f   :  { %v3491_v51 = vmax.f32 %v2694_v43, 0.0  ;;  %v2097_v52 = vadd.f32 %v6641_v41, %v2096_v48  ;;  %v2396_v53 = vpop.f32.mrf.mxu1 }
 0x1a0   :  { %v3613_v54 = vmax.f32 %v2999_v47, 0.0  ;;  %v2397_v55 = vadd.f32 %v6641_v41, %v2396_v53  ;;  %v5807_v53 = vld [vmem:[%s9141_s0 + $0x490] sm:$0xff] }
 0x1a1   :  { %v3972_v56 = vpack.c.bf16 %v3491_v51, %v3491_v51  ;;  %2735 = vmatmul.bf16.gmra.mxu2 %v5805_v44  ;;  %v3252_v57 = vmax.f32 %v2097_v52, 0.0  ;;  %2135 = vmatmul.bf16.gmra.mxu0 %v5685_v46 }
 0x1a2   :  { %v4094_v58 = vpack.c.bf16 %v3613_v54, %v3613_v54  ;;  %v3372_v59 = vmax.f32 %v2397_v55, 0.0  ;;  %2435 = vmatmul.bf16.gmra.mxu1 %v5745_v49  ;;  %3040 = vmatmul.bf16.gmra.mxu3 %v5866_v50  ;;  %v5687_v55 = vld [vmem:[%s9141_s0 + $0xd0] sm:$0xff] }
 0x1a3   :  { %4454 = vst.msk [vmem:[%s9143_s3 + $0x43c] sm:$0xf] %vm4182_vm0, %v3972_v56  ;;  %v3733_v60 = vpack.c.bf16 %v3252_v57, %v3252_v57 }
 0x1a4   :  { %v2696_v61 = vpop.f32.mrf.mxu2  ;;  %4576 = vst.msk [vmem:[%s9143_s3 + $0x624] sm:$0xf] %vm4182_vm0, %v4094_v58  ;;  %v3853_v62 = vpack.c.bf16 %v3372_v59, %v3372_v59  ;;  %v5747_v58 = vld [vmem:[%s9141_s0 + $0x2b0] sm:$0xff]  ;;  %v5868_v59 = vld [vmem:[%s9141_s0 + $0x678] sm:$0xff] }
 0x1a5   :  { %v2697_v63 = vadd.f32 %v6641_v41, %v2696_v61  ;;  %4215 = vst.msk [vmem:[%s9143_s3 + $0x80] sm:$0xf] %vm4182_vm0, %v3733_v60  ;;  %v3001_v0 = vpop.f32.mrf.mxu3 }
 0x1a6   :  { %4335 = vst.msk [vmem:[%s9143_s3 + $0x260] sm:$0xf] %vm4182_vm0, %v3853_v62  ;;  %v3002_v1 = vadd.f32 %v6641_v41, %v3001_v0  ;;  %v2098_v2 = vpop.f32.mrf.mxu0 }
 0x1a7   :  { %v3492_v3 = vmax.f32 %v2697_v63, 0.0  ;;  %v2099_v4 = vadd.f32 %v6641_v41, %v2098_v2  ;;  %v2398_v5 = vpop.f32.mrf.mxu1 }
 0x1a8   :  { %v3614_v6 = vmax.f32 %v3002_v1, 0.0  ;;  %v2399_v7 = vadd.f32 %v6641_v41, %v2398_v5 }
 0x1a9   :  { %v3973_v8 = vpack.c.bf16 %v3492_v3, %v3492_v3  ;;  %v3253_v9 = vmax.f32 %v2099_v4, 0.0 }
 0x1aa   :  { %v4095_v10 = vpack.c.bf16 %v3614_v6, %v3614_v6  ;;  %v3373_v11 = vmax.f32 %v2399_v7, 0.0 }
 0x1ab   :  { %4455 = vst.msk [vmem:[%s9143_s3 + $0x440] sm:$0xf] %vm4182_vm0, %v3973_v8  ;;  %v3734_v12 = vpack.c.bf16 %v3253_v9, %v3253_v9 }
 0x1ac   :  { %v2698_v13 = vpop.f32.mrf.mxu2  ;;  %4577 = vst.msk [vmem:[%s9143_s3 + $0x628] sm:$0xf] %vm4182_vm0, %v4095_v10  ;;  %v3854_v14 = vpack.c.bf16 %v3373_v11, %v3373_v11 }
 0x1ad   :  { %v2699_v15 = vadd.f32 %v6641_v41, %v2698_v13  ;;  %4216 = vst.msk [vmem:[%s9143_s3 + $0x84] sm:$0xf] %vm4182_vm0, %v3734_v12  ;;  %v3003_v17 = vpop.f32.mrf.mxu3 }
 0x1ae   :  { %4336 = vst.msk [vmem:[%s9143_s3 + $0x264] sm:$0xf] %vm4182_vm0, %v3854_v14  ;;  %v3004_v19 = vadd.f32 %v6641_v41, %v3003_v17  ;;  %v2101_v20 = vpop.f32.mrf.mxu0 }
 0x1af   :  { %v3493_v23 = vmax.f32 %v2699_v15, 0.0  ;;  %v2102_v24 = vadd.f32 %v6641_v41, %v2101_v20  ;;  %v2401_v25 = vpop.f32.mrf.mxu1 }
 0x1b0   :  { %v3615_v26 = vmax.f32 %v3004_v19, 0.0  ;;  %v2402_v27 = vadd.f32 %v6641_v41, %v2401_v25  ;;  %v5808_v25 = vld [vmem:[%s9141_s0 + $0x498] sm:$0xff] }
 0x1b1   :  { %v3974_v28 = vpack.c.bf16 %v3493_v23, %v3493_v23  ;;  %2740 = vmatmul.bf16.gmra.mxu2 %v5806_v16  ;;  %v3254_v29 = vmax.f32 %v2102_v24, 0.0  ;;  %2140 = vmatmul.bf16.gmra.mxu0 %v5686_v18 }
 0x1b2   :  { %v4096_v30 = vpack.c.bf16 %v3615_v26, %v3615_v26  ;;  %v3374_v31 = vmax.f32 %v2402_v27, 0.0  ;;  %2440 = vmatmul.bf16.gmra.mxu1 %v5746_v21  ;;  %3045 = vmatmul.bf16.gmra.mxu3 %v5867_v22  ;;  %v5688_v27 = vld [vmem:[%s9141_s0 + $0xd8] sm:$0xff] }
 0x1b3   :  { %4456 = vst.msk [vmem:[%s9143_s3 + $0x444] sm:$0xf] %vm4182_vm0, %v3974_v28  ;;  %v3735_v32 = vpack.c.bf16 %v3254_v29, %v3254_v29 }
 0x1b4   :  { %v2701_v33 = vpop.f32.mrf.mxu2  ;;  %4578 = vst.msk [vmem:[%s9143_s3 + $0x62c] sm:$0xf] %vm4182_vm0, %v4096_v30  ;;  %v3855_v34 = vpack.c.bf16 %v3374_v31, %v3374_v31  ;;  %v5748_v30 = vld [vmem:[%s9141_s0 + $0x2b8] sm:$0xff]  ;;  %v5869_v31 = vld [vmem:[%s9141_s0 + $0x680] sm:$0xff] }
 0x1b5   :  { %v2702_v35 = vadd.f32 %v6641_v41, %v2701_v33  ;;  %4217 = vst.msk [vmem:[%s9143_s3 + $0x88] sm:$0xf] %vm4182_vm0, %v3735_v32  ;;  %v3006_v36 = vpop.f32.mrf.mxu3 }
 0x1b6   :  { %4337 = vst.msk [vmem:[%s9143_s3 + $0x268] sm:$0xf] %vm4182_vm0, %v3855_v34  ;;  %v3007_v37 = vadd.f32 %v6641_v41, %v3006_v36  ;;  %v2103_v38 = vpop.f32.mrf.mxu0 }
 0x1b7   :  { %v3494_v39 = vmax.f32 %v2702_v35, 0.0  ;;  %v2104_v40 = vadd.f32 %v6641_v41, %v2103_v38  ;;  %v2403_v42 = vpop.f32.mrf.mxu1 }
 0x1b8   :  { %v3616_v43 = vmax.f32 %v3007_v37, 0.0  ;;  %v2404_v44 = vadd.f32 %v6641_v41, %v2403_v42 }
 0x1b9   :  { %v3975_v45 = vpack.c.bf16 %v3494_v39, %v3494_v39  ;;  %v3255_v46 = vmax.f32 %v2104_v40, 0.0 }
 0x1ba   :  { %v4097_v47 = vpack.c.bf16 %v3616_v43, %v3616_v43  ;;  %v3375_v48 = vmax.f32 %v2404_v44, 0.0 }
 0x1bb   :  { %4457 = vst.msk [vmem:[%s9143_s3 + $0x448] sm:$0xf] %vm4182_vm0, %v3975_v45  ;;  %v3736_v49 = vpack.c.bf16 %v3255_v46, %v3255_v46 }
 0x1bc   :  { %v2703_v50 = vpop.f32.mrf.mxu2  ;;  %4579 = vst.msk [vmem:[%s9143_s3 + $0x630] sm:$0xf] %vm4182_vm0, %v4097_v47  ;;  %v3856_v51 = vpack.c.bf16 %v3375_v48, %v3375_v48 }
 0x1bd   :  { %v2704_v52 = vadd.f32 %v6641_v41, %v2703_v50  ;;  %4218 = vst.msk [vmem:[%s9143_s3 + $0x8c] sm:$0xf] %vm4182_vm0, %v3736_v49  ;;  %v3008_v54 = vpop.f32.mrf.mxu3 }
 0x1be   :  { %4338 = vst.msk [vmem:[%s9143_s3 + $0x26c] sm:$0xf] %vm4182_vm0, %v3856_v51  ;;  %v3009_v56 = vadd.f32 %v6641_v41, %v3008_v54  ;;  %v2106_v57 = vpop.f32.mrf.mxu0 }
 0x1bf   :  { %v3495_v60 = vmax.f32 %v2704_v52, 0.0  ;;  %v2107_v61 = vadd.f32 %v6641_v41, %v2106_v57  ;;  %v2406_v62 = vpop.f32.mrf.mxu1 }
 0x1c0   :  { %v3617_v63 = vmax.f32 %v3009_v56, 0.0  ;;  %v2407_v0 = vadd.f32 %v6641_v41, %v2406_v62  ;;  %v5809_v62 = vld [vmem:[%s9141_s0 + $0x4a0] sm:$0xff] }
 0x1c1   :  { %v3976_v1 = vpack.c.bf16 %v3495_v60, %v3495_v60  ;;  %2745 = vmatmul.bf16.gmra.mxu2 %v5807_v53  ;;  %v3256_v2 = vmax.f32 %v2107_v61, 0.0  ;;  %2145 = vmatmul.bf16.gmra.mxu0 %v5687_v55 }
 0x1c2   :  { %v4098_v3 = vpack.c.bf16 %v3617_v63, %v3617_v63  ;;  %v3376_v4 = vmax.f32 %v2407_v0, 0.0  ;;  %2445 = vmatmul.bf16.gmra.mxu1 %v5747_v58  ;;  %3050 = vmatmul.bf16.gmra.mxu3 %v5868_v59  ;;  %v5689_v0 = vld [vmem:[%s9141_s0 + $0xe0] sm:$0xff] }
 0x1c3   :  { %4458 = vst.msk [vmem:[%s9143_s3 + $0x44c] sm:$0xf] %vm4182_vm0, %v3976_v1  ;;  %v3737_v5 = vpack.c.bf16 %v3256_v2, %v3256_v2 }
 0x1c4   :  { %v2706_v6 = vpop.f32.mrf.mxu2  ;;  %4580 = vst.msk [vmem:[%s9143_s3 + $0x634] sm:$0xf] %vm4182_vm0, %v4098_v3  ;;  %v3857_v7 = vpack.c.bf16 %v3376_v4, %v3376_v4  ;;  %v5749_v3 = vld [vmem:[%s9141_s0 + $0x2c0] sm:$0xff]  ;;  %v5870_v4 = vld [vmem:[%s9141_s0 + $0x688] sm:$0xff] }
 0x1c5   :  { %v2707_v8 = vadd.f32 %v6641_v41, %v2706_v6  ;;  %4219 = vst.msk [vmem:[%s9143_s3 + $0x90] sm:$0xf] %vm4182_vm0, %v3737_v5  ;;  %v3011_v9 = vpop.f32.mrf.mxu3 }
 0x1c6   :  { %4339 = vst.msk [vmem:[%s9143_s3 + $0x270] sm:$0xf] %vm4182_vm0, %v3857_v7  ;;  %v3012_v10 = vadd.f32 %v6641_v41, %v3011_v9  ;;  %v2108_v11 = vpop.f32.mrf.mxu0 }
 0x1c7   :  { %v3496_v12 = vmax.f32 %v2707_v8, 0.0  ;;  %v2109_v13 = vadd.f32 %v6641_v41, %v2108_v11  ;;  %v2408_v14 = vpop.f32.mrf.mxu1 }
 0x1c8   :  { %v3618_v15 = vmax.f32 %v3012_v10, 0.0  ;;  %v2409_v16 = vadd.f32 %v6641_v41, %v2408_v14 }
 0x1c9   :  { %v3977_v17 = vpack.c.bf16 %v3496_v12, %v3496_v12  ;;  %v3257_v18 = vmax.f32 %v2109_v13, 0.0 }
 0x1ca   :  { %v4099_v19 = vpack.c.bf16 %v3618_v15, %v3618_v15  ;;  %v3377_v20 = vmax.f32 %v2409_v16, 0.0 }
 0x1cb   :  { %4459 = vst.msk [vmem:[%s9143_s3 + $0x450] sm:$0xf] %vm4182_vm0, %v3977_v17  ;;  %v3738_v21 = vpack.c.bf16 %v3257_v18, %v3257_v18 }
 0x1cc   :  { %v2708_v22 = vpop.f32.mrf.mxu2  ;;  %4581 = vst.msk [vmem:[%s9143_s3 + $0x638] sm:$0xf] %vm4182_vm0, %v4099_v19  ;;  %v3858_v23 = vpack.c.bf16 %v3377_v20, %v3377_v20 }
 0x1cd   :  { %v2709_v24 = vadd.f32 %v6641_v41, %v2708_v22  ;;  %4220 = vst.msk [vmem:[%s9143_s3 + $0x94] sm:$0xf] %vm4182_vm0, %v3738_v21  ;;  %v3013_v26 = vpop.f32.mrf.mxu3 }
 0x1ce   :  { %4340 = vst.msk [vmem:[%s9143_s3 + $0x274] sm:$0xf] %vm4182_vm0, %v3858_v23  ;;  %v3014_v28 = vadd.f32 %v6641_v41, %v3013_v26  ;;  %v2111_v29 = vpop.f32.mrf.mxu0 }
 0x1cf   :  { %v3497_v32 = vmax.f32 %v2709_v24, 0.0  ;;  %v2112_v33 = vadd.f32 %v6641_v41, %v2111_v29  ;;  %v2411_v34 = vpop.f32.mrf.mxu1 }
 0x1d0   :  { %v3619_v35 = vmax.f32 %v3014_v28, 0.0  ;;  %v2412_v36 = vadd.f32 %v6641_v41, %v2411_v34  ;;  %v5810_v34 = vld [vmem:[%s9141_s0 + $0x4a8] sm:$0xff] }
 0x1d1   :  { %v3978_v37 = vpack.c.bf16 %v3497_v32, %v3497_v32  ;;  %2750 = vmatmul.bf16.gmra.mxu2 %v5808_v25  ;;  %v3258_v38 = vmax.f32 %v2112_v33, 0.0  ;;  %2150 = vmatmul.bf16.gmra.mxu0 %v5688_v27 }
 0x1d2   :  { %v4100_v39 = vpack.c.bf16 %v3619_v35, %v3619_v35  ;;  %v3378_v40 = vmax.f32 %v2412_v36, 0.0  ;;  %2450 = vmatmul.bf16.gmra.mxu1 %v5748_v30  ;;  %3055 = vmatmul.bf16.gmra.mxu3 %v5869_v31  ;;  %v5690_v36 = vld [vmem:[%s9141_s0 + $0xe8] sm:$0xff] }
 0x1d3   :  { %4460 = vst.msk [vmem:[%s9143_s3 + $0x454] sm:$0xf] %vm4182_vm0, %v3978_v37  ;;  %v3739_v42 = vpack.c.bf16 %v3258_v38, %v3258_v38 }
 0x1d4   :  { %v2711_v43 = vpop.f32.mrf.mxu2  ;;  %4582 = vst.msk [vmem:[%s9143_s3 + $0x63c] sm:$0xf] %vm4182_vm0, %v4100_v39  ;;  %v3859_v44 = vpack.c.bf16 %v3378_v40, %v3378_v40  ;;  %v5750_v39 = vld [vmem:[%s9141_s0 + $0x2c8] sm:$0xff]  ;;  %v5871_v40 = vld [vmem:[%s9141_s0 + $0x690] sm:$0xff] }
 0x1d5   :  { %v2712_v45 = vadd.f32 %v6641_v41, %v2711_v43  ;;  %4221 = vst.msk [vmem:[%s9143_s3 + $0x98] sm:$0xf] %vm4182_vm0, %v3739_v42  ;;  %v3016_v46 = vpop.f32.mrf.mxu3 }
 0x1d6   :  { %4341 = vst.msk [vmem:[%s9143_s3 + $0x278] sm:$0xf] %vm4182_vm0, %v3859_v44  ;;  %v3017_v47 = vadd.f32 %v6641_v41, %v3016_v46  ;;  %v2113_v48 = vpop.f32.mrf.mxu0 }
 0x1d7   :  { %v3498_v49 = vmax.f32 %v2712_v45, 0.0  ;;  %v2114_v50 = vadd.f32 %v6641_v41, %v2113_v48  ;;  %v2413_v51 = vpop.f32.mrf.mxu1 }
 0x1d8   :  { %v3620_v52 = vmax.f32 %v3017_v47, 0.0  ;;  %v2414_v53 = vadd.f32 %v6641_v41, %v2413_v51 }
 0x1d9   :  { %v3979_v54 = vpack.c.bf16 %v3498_v49, %v3498_v49  ;;  %v3259_v55 = vmax.f32 %v2114_v50, 0.0 }
 0x1da   :  { %v4101_v56 = vpack.c.bf16 %v3620_v52, %v3620_v52  ;;  %v3379_v57 = vmax.f32 %v2414_v53, 0.0 }
 0x1db   :  { %4461 = vst.msk [vmem:[%s9143_s3 + $0x458] sm:$0xf] %vm4182_vm0, %v3979_v54  ;;  %v3740_v58 = vpack.c.bf16 %v3259_v55, %v3259_v55 }
 0x1dc   :  { %v2713_v59 = vpop.f32.mrf.mxu2  ;;  %4583 = vst.msk [vmem:[%s9143_s3 + $0x640] sm:$0xf] %vm4182_vm0, %v4101_v56  ;;  %v3860_v60 = vpack.c.bf16 %v3379_v57, %v3379_v57  ;;  %v7207_v56 = vld [vmem:[%s9142_s2] ss:$0 sm:$0xff] }
 0x1dd   :  { %v2714_v61 = vadd.f32 %v6641_v41, %v2713_v59  ;;  %4222 = vst.msk [vmem:[%s9143_s3 + $0x9c] sm:$0xf] %vm4182_vm0, %v3740_v58  ;;  %v3018_v63 = vpop.f32.mrf.mxu3 }
 0x1de   :  { %4342 = vst.msk [vmem:[%s9143_s3 + $0x27c] sm:$0xf] %vm4182_vm0, %v3860_v60  ;;  %v3019_v1 = vadd.f32 %v6641_v41, %v3018_v63  ;;  %v2116_v2 = vpop.f32.mrf.mxu0 }
 0x1df   :  { %v3499_v5 = vmax.f32 %v2714_v61, 0.0  ;;  %v2117_v6 = vadd.f32 %v6641_v41, %v2116_v2  ;;  %v2416_v7 = vpop.f32.mrf.mxu1 }
 0x1e0   :  { %v3621_v8 = vmax.f32 %v3019_v1, 0.0  ;;  %v2417_v9 = vadd.f32 %v6641_v41, %v2416_v7  ;;  %v5811_v7 = vld [vmem:[%s9141_s0 + $0x4b0] sm:$0xff] }
 0x1e1   :  { %v3980_v10 = vpack.c.bf16 %v3499_v5, %v3499_v5  ;;  %2755 = vmatmul.bf16.gmra.mxu2 %v5809_v62  ;;  %v3260_v11 = vmax.f32 %v2117_v6, 0.0  ;;  %2155 = vmatmul.bf16.gmra.mxu0 %v5689_v0 }
 0x1e2   :  { %v4102_v12 = vpack.c.bf16 %v3621_v8, %v3621_v8  ;;  %v3380_v13 = vmax.f32 %v2417_v9, 0.0  ;;  %2455 = vmatmul.bf16.gmra.mxu1 %v5749_v3  ;;  %3060 = vmatmul.bf16.gmra.mxu3 %v5870_v4  ;;  %v5691_v9 = vld [vmem:[%s9141_s0 + $0xf0] sm:$0xff] }
 0x1e3   :  { %4462 = vst.msk [vmem:[%s9143_s3 + $0x45c] sm:$0xf] %vm4182_vm0, %v3980_v10  ;;  %v3741_v14 = vpack.c.bf16 %v3260_v11, %v3260_v11 }
 0x1e4   :  { %v2716_v15 = vpop.f32.mrf.mxu2  ;;  %4584 = vst.msk [vmem:[%s9143_s3 + $0x644] sm:$0xf] %vm4182_vm0, %v4102_v12  ;;  %v3861_v16 = vpack.c.bf16 %v3380_v13, %v3380_v13  ;;  %v5751_v12 = vld [vmem:[%s9141_s0 + $0x2d0] sm:$0xff]  ;;  %v5872_v13 = vld [vmem:[%s9141_s0 + $0x698] sm:$0xff] }
 0x1e5   :  { %v2717_v17 = vadd.f32 %v6641_v41, %v2716_v15  ;;  %4223 = vst.msk [vmem:[%s9143_s3 + $0xa0] sm:$0xf] %vm4182_vm0, %v3741_v14  ;;  %v3021_v18 = vpop.f32.mrf.mxu3 }
 0x1e6   :  { %4343 = vst.msk [vmem:[%s9143_s3 + $0x280] sm:$0xf] %vm4182_vm0, %v3861_v16  ;;  %v3022_v19 = vadd.f32 %v6641_v41, %v3021_v18  ;;  %v2118_v20 = vpop.f32.mrf.mxu0 }
 0x1e7   :  { %v3500_v21 = vmax.f32 %v2717_v17, 0.0  ;;  %v2119_v22 = vadd.f32 %v6641_v41, %v2118_v20  ;;  %v2418_v23 = vpop.f32.mrf.mxu1 }
 0x1e8   :  { %v3622_v24 = vmax.f32 %v3022_v19, 0.0  ;;  %v2419_v25 = vadd.f32 %v6641_v41, %v2418_v23 }
 0x1e9   :  { %v3981_v26 = vpack.c.bf16 %v3500_v21, %v3500_v21  ;;  %v3261_v27 = vmax.f32 %v2119_v22, 0.0 }
 0x1ea   :  { %v4103_v28 = vpack.c.bf16 %v3622_v24, %v3622_v24  ;;  %v3381_v29 = vmax.f32 %v2419_v25, 0.0 }
 0x1eb   :  { %4463 = vst.msk [vmem:[%s9143_s3 + $0x460] sm:$0xf] %vm4182_vm0, %v3981_v26  ;;  %v3742_v30 = vpack.c.bf16 %v3261_v27, %v3261_v27 }
 0x1ec   :  { %v2718_v31 = vpop.f32.mrf.mxu2  ;;  %4585 = vst.msk [vmem:[%s9143_s3 + $0x648] sm:$0xf] %vm4182_vm0, %v4103_v28  ;;  %v3862_v32 = vpack.c.bf16 %v3381_v29, %v3381_v29 }
 0x1ed   :  { %v2719_v33 = vadd.f32 %v6641_v41, %v2718_v31  ;;  %4224 = vst.msk [vmem:[%s9143_s3 + $0xa4] sm:$0xf] %vm4182_vm0, %v3742_v30  ;;  %v3023_v35 = vpop.f32.mrf.mxu3 }
 0x1ee   :  { %4344 = vst.msk [vmem:[%s9143_s3 + $0x284] sm:$0xf] %vm4182_vm0, %v3862_v32  ;;  %v3024_v37 = vadd.f32 %v6641_v41, %v3023_v35  ;;  %v2121_v38 = vpop.f32.mrf.mxu0 }
 0x1ef   :  { %v3501_v42 = vmax.f32 %v2719_v33, 0.0  ;;  %v2122_v43 = vadd.f32 %v6641_v41, %v2121_v38  ;;  %v2421_v44 = vpop.f32.mrf.mxu1 }
 0x1f0   :  { %v3623_v45 = vmax.f32 %v3024_v37, 0.0  ;;  %v2422_v46 = vadd.f32 %v6641_v41, %v2421_v44  ;;  %v5812_v44 = vld [vmem:[%s9141_s0 + $0x4b8] sm:$0xff] }
 0x1f1   :  { %v3982_v47 = vpack.c.bf16 %v3501_v42, %v3501_v42  ;;  %2760 = vmatmul.bf16.gmra.mxu2 %v5810_v34  ;;  %v3262_v48 = vmax.f32 %v2122_v43, 0.0  ;;  %2160 = vmatmul.bf16.gmra.mxu0 %v5690_v36 }
 0x1f2   :  { %v4104_v49 = vpack.c.bf16 %v3623_v45, %v3623_v45  ;;  %v3382_v50 = vmax.f32 %v2422_v46, 0.0  ;;  %2460 = vmatmul.bf16.gmra.mxu1 %v5750_v39  ;;  %3065 = vmatmul.bf16.gmra.mxu3 %v5871_v40  ;;  %v5692_v46 = vld [vmem:[%s9141_s0 + $0xf8] sm:$0xff] }
 0x1f3   :  { %4464 = vst.msk [vmem:[%s9143_s3 + $0x464] sm:$0xf] %vm4182_vm0, %v3982_v47  ;;  %v3743_v51 = vpack.c.bf16 %v3262_v48, %v3262_v48 }
 0x1f4   :  { %v2721_v52 = vpop.f32.mrf.mxu2  ;;  %4586 = vst.msk [vmem:[%s9143_s3 + $0x64c] sm:$0xf] %vm4182_vm0, %v4104_v49  ;;  %v3863_v53 = vpack.c.bf16 %v3382_v50, %v3382_v50  ;;  %v5752_v49 = vld [vmem:[%s9141_s0 + $0x2d8] sm:$0xff]  ;;  %v5873_v50 = vld [vmem:[%s9141_s0 + $0x6a0] sm:$0xff] }
 0x1f5   :  { %v2722_v54 = vadd.f32 %v6641_v41, %v2721_v52  ;;  %4225 = vst.msk [vmem:[%s9143_s3 + $0xa8] sm:$0xf] %vm4182_vm0, %v3743_v51  ;;  %v3026_v55 = vpop.f32.mrf.mxu3 }
 0x1f6   :  { %4345 = vst.msk [vmem:[%s9143_s3 + $0x288] sm:$0xf] %vm4182_vm0, %v3863_v53  ;;  %v3027_v57 = vadd.f32 %v7207_v56, %v3026_v55  ;;  %v2123_v58 = vpop.f32.mrf.mxu0 }
 0x1f7   :  { %v3502_v41 = vmax.f32 %v2722_v54, 0.0  ;;  %v2124_v59 = vadd.f32 %v7207_v56, %v2123_v58  ;;  %v2423_v60 = vpop.f32.mrf.mxu1 }
 0x1f8   :  { %v3624_v61 = vmax.f32 %v3027_v57, 0.0  ;;  %v2424_v62 = vadd.f32 %v7207_v56, %v2423_v60 }
 0x1f9   :  { %v3983_v63 = vpack.c.bf16 %v3502_v41, %v3502_v41  ;;  %v3263_v0 = vmax.f32 %v2124_v59, 0.0 }
 0x1fa   :  { %v4105_v1 = vpack.c.bf16 %v3624_v61, %v3624_v61  ;;  %v3383_v2 = vmax.f32 %v2424_v62, 0.0 }
 0x1fb   :  { %4465 = vst.msk [vmem:[%s9143_s3 + $0x468] sm:$0xf] %vm4182_vm0, %v3983_v63  ;;  %v3744_v3 = vpack.c.bf16 %v3263_v0, %v3263_v0 }
 0x1fc   :  { %v2723_v4 = vpop.f32.mrf.mxu2  ;;  %4587 = vst.msk [vmem:[%s9143_s3 + $0x650] sm:$0xf] %vm4182_vm0, %v4105_v1  ;;  %v3864_v5 = vpack.c.bf16 %v3383_v2, %v3383_v2 }
 0x1fd   :  { %v2724_v6 = vadd.f32 %v7207_v56, %v2723_v4  ;;  %4226 = vst.msk [vmem:[%s9143_s3 + $0xac] sm:$0xf] %vm4182_vm0, %v3744_v3  ;;  %v3028_v8 = vpop.f32.mrf.mxu3 }
 0x1fe   :  { %4346 = vst.msk [vmem:[%s9143_s3 + $0x28c] sm:$0xf] %vm4182_vm0, %v3864_v5  ;;  %v3029_v10 = vadd.f32 %v7207_v56, %v3028_v8  ;;  %v2126_v11 = vpop.f32.mrf.mxu0 }
 0x1ff   :  { %v3503_v14 = vmax.f32 %v2724_v6, 0.0  ;;  %v2127_v15 = vadd.f32 %v7207_v56, %v2126_v11  ;;  %v2426_v16 = vpop.f32.mrf.mxu1 }
 0x200   :  { %v3625_v17 = vmax.f32 %v3029_v10, 0.0  ;;  %v2427_v18 = vadd.f32 %v7207_v56, %v2426_v16  ;;  %v5813_v16 = vld [vmem:[%s9141_s0 + $0x4c0] sm:$0xff] }
 0x201   :  { %v3984_v19 = vpack.c.bf16 %v3503_v14, %v3503_v14  ;;  %2765 = vmatmul.bf16.gmra.mxu2 %v5811_v7  ;;  %v3264_v20 = vmax.f32 %v2127_v15, 0.0  ;;  %2165 = vmatmul.bf16.gmra.mxu0 %v5691_v9 }
 0x202   :  { %v4106_v21 = vpack.c.bf16 %v3625_v17, %v3625_v17  ;;  %v3384_v22 = vmax.f32 %v2427_v18, 0.0  ;;  %2465 = vmatmul.bf16.gmra.mxu1 %v5751_v12  ;;  %3070 = vmatmul.bf16.gmra.mxu3 %v5872_v13  ;;  %v5693_v18 = vld [vmem:[%s9141_s0 + $0x100] sm:$0xff] }
 0x203   :  { %4466 = vst.msk [vmem:[%s9143_s3 + $0x46c] sm:$0xf] %vm4182_vm0, %v3984_v19  ;;  %v3745_v23 = vpack.c.bf16 %v3264_v20, %v3264_v20 }
 0x204   :  { %v2726_v24 = vpop.f32.mrf.mxu2  ;;  %4588 = vst.msk [vmem:[%s9143_s3 + $0x654] sm:$0xf] %vm4182_vm0, %v4106_v21  ;;  %v3865_v25 = vpack.c.bf16 %v3384_v22, %v3384_v22  ;;  %v5753_v21 = vld [vmem:[%s9141_s0 + $0x2e0] sm:$0xff]  ;;  %v5874_v22 = vld [vmem:[%s9141_s0 + $0x6a8] sm:$0xff] }
 0x205   :  { %v2727_v26 = vadd.f32 %v7207_v56, %v2726_v24  ;;  %4227 = vst.msk [vmem:[%s9143_s3 + $0xb0] sm:$0xf] %vm4182_vm0, %v3745_v23  ;;  %v3031_v27 = vpop.f32.mrf.mxu3 }
 0x206   :  { %4347 = vst.msk [vmem:[%s9143_s3 + $0x290] sm:$0xf] %vm4182_vm0, %v3865_v25  ;;  %v3032_v28 = vadd.f32 %v7207_v56, %v3031_v27  ;;  %v2128_v29 = vpop.f32.mrf.mxu0 }
 0x207   :  { %v3504_v30 = vmax.f32 %v2727_v26, 0.0  ;;  %v2129_v31 = vadd.f32 %v7207_v56, %v2128_v29  ;;  %v2428_v32 = vpop.f32.mrf.mxu1 }
 0x208   :  { %v3626_v33 = vmax.f32 %v3032_v28, 0.0  ;;  %v2429_v34 = vadd.f32 %v7207_v56, %v2428_v32 }
 0x209   :  { %v3985_v35 = vpack.c.bf16 %v3504_v30, %v3504_v30  ;;  %v3265_v36 = vmax.f32 %v2129_v31, 0.0 }
 0x20a   :  { %v4107_v37 = vpack.c.bf16 %v3626_v33, %v3626_v33  ;;  %v3385_v38 = vmax.f32 %v2429_v34, 0.0 }
 0x20b   :  { %4467 = vst.msk [vmem:[%s9143_s3 + $0x470] sm:$0xf] %vm4182_vm0, %v3985_v35  ;;  %v3746_v39 = vpack.c.bf16 %v3265_v36, %v3265_v36 }
 0x20c   :  { %v2728_v40 = vpop.f32.mrf.mxu2  ;;  %4589 = vst.msk [vmem:[%s9143_s3 + $0x658] sm:$0xf] %vm4182_vm0, %v4107_v37  ;;  %v3866_v42 = vpack.c.bf16 %v3385_v38, %v3385_v38 }
 0x20d   :  { %v2729_v43 = vadd.f32 %v7207_v56, %v2728_v40  ;;  %4228 = vst.msk [vmem:[%s9143_s3 + $0xb4] sm:$0xf] %vm4182_vm0, %v3746_v39  ;;  %v3033_v45 = vpop.f32.mrf.mxu3 }
 0x20e   :  { %4348 = vst.msk [vmem:[%s9143_s3 + $0x294] sm:$0xf] %vm4182_vm0, %v3866_v42  ;;  %v3034_v47 = vadd.f32 %v7207_v56, %v3033_v45  ;;  %v2131_v48 = vpop.f32.mrf.mxu0 }
 0x20f   :  { %v3505_v51 = vmax.f32 %v2729_v43, 0.0  ;;  %v2132_v52 = vadd.f32 %v7207_v56, %v2131_v48  ;;  %v2431_v53 = vpop.f32.mrf.mxu1 }
 0x210   :  { %v3627_v54 = vmax.f32 %v3034_v47, 0.0  ;;  %v2432_v55 = vadd.f32 %v7207_v56, %v2431_v53  ;;  %v5814_v53 = vld [vmem:[%s9141_s0 + $0x4c8] sm:$0xff] }
 0x211   :  { %v3986_v57 = vpack.c.bf16 %v3505_v51, %v3505_v51  ;;  %2770 = vmatmul.bf16.gmra.mxu2 %v5812_v44  ;;  %v3266_v58 = vmax.f32 %v2132_v52, 0.0  ;;  %2170 = vmatmul.bf16.gmra.mxu0 %v5692_v46 }
 0x212   :  { %v4108_v41 = vpack.c.bf16 %v3627_v54, %v3627_v54  ;;  %v3386_v59 = vmax.f32 %v2432_v55, 0.0  ;;  %2470 = vmatmul.bf16.gmra.mxu1 %v5752_v49  ;;  %3075 = vmatmul.bf16.gmra.mxu3 %v5873_v50  ;;  %v5694_v55 = vld [vmem:[%s9141_s0 + $0x108] sm:$0xff] }
 0x213   :  { %4468 = vst.msk [vmem:[%s9143_s3 + $0x474] sm:$0xf] %vm4182_vm0, %v3986_v57  ;;  %v3747_v60 = vpack.c.bf16 %v3266_v58, %v3266_v58 }
 0x214   :  { %v2731_v61 = vpop.f32.mrf.mxu2  ;;  %4590 = vst.msk [vmem:[%s9143_s3 + $0x65c] sm:$0xf] %vm4182_vm0, %v4108_v41  ;;  %v3867_v62 = vpack.c.bf16 %v3386_v59, %v3386_v59  ;;  %v5754_v41 = vld [vmem:[%s9141_s0 + $0x2e8] sm:$0xff]  ;;  %v5875_v59 = vld [vmem:[%s9141_s0 + $0x6b0] sm:$0xff] }
 0x215   :  { %v2732_v63 = vadd.f32 %v7207_v56, %v2731_v61  ;;  %4229 = vst.msk [vmem:[%s9143_s3 + $0xb8] sm:$0xf] %vm4182_vm0, %v3747_v60  ;;  %v3036_v0 = vpop.f32.mrf.mxu3 }
 0x216   :  { %4349 = vst.msk [vmem:[%s9143_s3 + $0x298] sm:$0xf] %vm4182_vm0, %v3867_v62  ;;  %v3037_v1 = vadd.f32 %v7207_v56, %v3036_v0  ;;  %v2133_v2 = vpop.f32.mrf.mxu0 }
 0x217   :  { %v3506_v3 = vmax.f32 %v2732_v63, 0.0  ;;  %v2134_v4 = vadd.f32 %v7207_v56, %v2133_v2  ;;  %v2433_v5 = vpop.f32.mrf.mxu1 }
 0x218   :  { %v3628_v6 = vmax.f32 %v3037_v1, 0.0  ;;  %v2434_v7 = vadd.f32 %v7207_v56, %v2433_v5 }
 0x219   :  { %v3987_v8 = vpack.c.bf16 %v3506_v3, %v3506_v3  ;;  %v3267_v9 = vmax.f32 %v2134_v4, 0.0 }
 0x21a   :  { %v4109_v10 = vpack.c.bf16 %v3628_v6, %v3628_v6  ;;  %v3387_v11 = vmax.f32 %v2434_v7, 0.0 }
 0x21b   :  { %4469 = vst.msk [vmem:[%s9143_s3 + $0x478] sm:$0xf] %vm4182_vm0, %v3987_v8  ;;  %v3748_v12 = vpack.c.bf16 %v3267_v9, %v3267_v9 }
 0x21c   :  { %v2733_v13 = vpop.f32.mrf.mxu2  ;;  %4591 = vst.msk [vmem:[%s9143_s3 + $0x660] sm:$0xf] %vm4182_vm0, %v4109_v10  ;;  %v3868_v14 = vpack.c.bf16 %v3387_v11, %v3387_v11 }
 0x21d   :  { %v2734_v15 = vadd.f32 %v7207_v56, %v2733_v13  ;;  %4230 = vst.msk [vmem:[%s9143_s3 + $0xbc] sm:$0xf] %vm4182_vm0, %v3748_v12  ;;  %v3038_v17 = vpop.f32.mrf.mxu3 }
 0x21e   :  { %4350 = vst.msk [vmem:[%s9143_s3 + $0x29c] sm:$0xf] %vm4182_vm0, %v3868_v14  ;;  %v3039_v19 = vadd.f32 %v7207_v56, %v3038_v17  ;;  %v2136_v20 = vpop.f32.mrf.mxu0 }
 0x21f   :  { %v3507_v23 = vmax.f32 %v2734_v15, 0.0  ;;  %v2137_v24 = vadd.f32 %v7207_v56, %v2136_v20  ;;  %v2436_v25 = vpop.f32.mrf.mxu1 }
 0x220   :  { %v3629_v26 = vmax.f32 %v3039_v19, 0.0  ;;  %v2437_v27 = vadd.f32 %v7207_v56, %v2436_v25  ;;  %v5815_v25 = vld [vmem:[%s9141_s0 + $0x4d0] sm:$0xff] }
 0x221   :  { %v3988_v28 = vpack.c.bf16 %v3507_v23, %v3507_v23  ;;  %2775 = vmatmul.bf16.gmra.mxu2 %v5813_v16  ;;  %v3268_v29 = vmax.f32 %v2137_v24, 0.0  ;;  %2175 = vmatmul.bf16.gmra.mxu0 %v5693_v18 }
 0x222   :  { %v4110_v30 = vpack.c.bf16 %v3629_v26, %v3629_v26  ;;  %v3388_v31 = vmax.f32 %v2437_v27, 0.0  ;;  %2475 = vmatmul.bf16.gmra.mxu1 %v5753_v21  ;;  %3080 = vmatmul.bf16.gmra.mxu3 %v5874_v22  ;;  %v5695_v27 = vld [vmem:[%s9141_s0 + $0x110] sm:$0xff] }
 0x223   :  { %4470 = vst.msk [vmem:[%s9143_s3 + $0x47c] sm:$0xf] %vm4182_vm0, %v3988_v28  ;;  %v3749_v32 = vpack.c.bf16 %v3268_v29, %v3268_v29 }
 0x224   :  { %v2736_v33 = vpop.f32.mrf.mxu2  ;;  %4592 = vst.msk [vmem:[%s9143_s3 + $0x664] sm:$0xf] %vm4182_vm0, %v4110_v30  ;;  %v3869_v34 = vpack.c.bf16 %v3388_v31, %v3388_v31  ;;  %v5755_v30 = vld [vmem:[%s9141_s0 + $0x2f0] sm:$0xff]  ;;  %v5876_v31 = vld [vmem:[%s9141_s0 + $0x6b8] sm:$0xff] }
 0x225   :  { %v2737_v35 = vadd.f32 %v7207_v56, %v2736_v33  ;;  %4231 = vst.msk [vmem:[%s9143_s3 + $0xc0] sm:$0xf] %vm4182_vm0, %v3749_v32  ;;  %v3041_v36 = vpop.f32.mrf.mxu3 }
 0x226   :  { %4351 = vst.msk [vmem:[%s9143_s3 + $0x2a0] sm:$0xf] %vm4182_vm0, %v3869_v34  ;;  %v3042_v37 = vadd.f32 %v7207_v56, %v3041_v36  ;;  %v2138_v38 = vpop.f32.mrf.mxu0 }
 0x227   :  { %v3508_v39 = vmax.f32 %v2737_v35, 0.0  ;;  %v2139_v40 = vadd.f32 %v7207_v56, %v2138_v38  ;;  %v2438_v42 = vpop.f32.mrf.mxu1 }
 0x228   :  { %v3630_v43 = vmax.f32 %v3042_v37, 0.0  ;;  %v2439_v44 = vadd.f32 %v7207_v56, %v2438_v42 }
 0x229   :  { %v3989_v45 = vpack.c.bf16 %v3508_v39, %v3508_v39  ;;  %v3269_v46 = vmax.f32 %v2139_v40, 0.0 }
 0x22a   :  { %v4111_v47 = vpack.c.bf16 %v3630_v43, %v3630_v43  ;;  %v3389_v48 = vmax.f32 %v2439_v44, 0.0 }
 0x22b   :  { %4471 = vst.msk [vmem:[%s9143_s3 + $0x480] sm:$0xf] %vm4182_vm0, %v3989_v45  ;;  %v3750_v49 = vpack.c.bf16 %v3269_v46, %v3269_v46 }
 0x22c   :  { %v2738_v50 = vpop.f32.mrf.mxu2  ;;  %4593 = vst.msk [vmem:[%s9143_s3 + $0x668] sm:$0xf] %vm4182_vm0, %v4111_v47  ;;  %v3870_v51 = vpack.c.bf16 %v3389_v48, %v3389_v48 }
 0x22d   :  { %v2739_v52 = vadd.f32 %v7207_v56, %v2738_v50  ;;  %4232 = vst.msk [vmem:[%s9143_s3 + $0xc4] sm:$0xf] %vm4182_vm0, %v3750_v49  ;;  %v3043_v54 = vpop.f32.mrf.mxu3 }
 0x22e   :  { %4352 = vst.msk [vmem:[%s9143_s3 + $0x2a4] sm:$0xf] %vm4182_vm0, %v3870_v51  ;;  %v3044_v57 = vadd.f32 %v7207_v56, %v3043_v54  ;;  %v2141_v58 = vpop.f32.mrf.mxu0 }
 0x22f   :  { %v3509_v60 = vmax.f32 %v2739_v52, 0.0  ;;  %v2142_v61 = vadd.f32 %v7207_v56, %v2141_v58  ;;  %v2441_v62 = vpop.f32.mrf.mxu1 }
 0x230   :  { %v3631_v63 = vmax.f32 %v3044_v57, 0.0  ;;  %v2442_v0 = vadd.f32 %v7207_v56, %v2441_v62  ;;  %v5816_v62 = vld [vmem:[%s9141_s0 + $0x4d8] sm:$0xff] }
 0x231   :  { %v3990_v1 = vpack.c.bf16 %v3509_v60, %v3509_v60  ;;  %2780 = vmatmul.bf16.gmra.mxu2 %v5814_v53  ;;  %v3270_v2 = vmax.f32 %v2142_v61, 0.0  ;;  %2180 = vmatmul.bf16.gmra.mxu0 %v5694_v55 }
 0x232   :  { %v4112_v3 = vpack.c.bf16 %v3631_v63, %v3631_v63  ;;  %v3390_v4 = vmax.f32 %v2442_v0, 0.0  ;;  %2480 = vmatmul.bf16.gmra.mxu1 %v5754_v41  ;;  %3085 = vmatmul.bf16.gmra.mxu3 %v5875_v59  ;;  %v5696_v0 = vld [vmem:[%s9141_s0 + $0x118] sm:$0xff] }
 0x233   :  { %4472 = vst.msk [vmem:[%s9143_s3 + $0x484] sm:$0xf] %vm4182_vm0, %v3990_v1  ;;  %v3751_v5 = vpack.c.bf16 %v3270_v2, %v3270_v2 }
 0x234   :  { %v2741_v6 = vpop.f32.mrf.mxu2  ;;  %4594 = vst.msk [vmem:[%s9143_s3 + $0x66c] sm:$0xf] %vm4182_vm0, %v4112_v3  ;;  %v3871_v7 = vpack.c.bf16 %v3390_v4, %v3390_v4  ;;  %v5756_v3 = vld [vmem:[%s9141_s0 + $0x2f8] sm:$0xff]  ;;  %v5877_v4 = vld [vmem:[%s9141_s0 + $0x6c0] sm:$0xff] }
 0x235   :  { %v2742_v8 = vadd.f32 %v7207_v56, %v2741_v6  ;;  %4233 = vst.msk [vmem:[%s9143_s3 + $0xc8] sm:$0xf] %vm4182_vm0, %v3751_v5  ;;  %v3046_v9 = vpop.f32.mrf.mxu3 }
 0x236   :  { %4353 = vst.msk [vmem:[%s9143_s3 + $0x2a8] sm:$0xf] %vm4182_vm0, %v3871_v7  ;;  %v3047_v10 = vadd.f32 %v7207_v56, %v3046_v9  ;;  %v2143_v11 = vpop.f32.mrf.mxu0 }
 0x237   :  { %v3510_v12 = vmax.f32 %v2742_v8, 0.0  ;;  %v2144_v13 = vadd.f32 %v7207_v56, %v2143_v11  ;;  %v2443_v14 = vpop.f32.mrf.mxu1 }
 0x238   :  { %v3632_v15 = vmax.f32 %v3047_v10, 0.0  ;;  %v2444_v16 = vadd.f32 %v7207_v56, %v2443_v14 }
 0x239   :  { %v3991_v17 = vpack.c.bf16 %v3510_v12, %v3510_v12  ;;  %v3271_v18 = vmax.f32 %v2144_v13, 0.0 }
 0x23a   :  { %v4113_v19 = vpack.c.bf16 %v3632_v15, %v3632_v15  ;;  %v3391_v20 = vmax.f32 %v2444_v16, 0.0 }
 0x23b   :  { %4473 = vst.msk [vmem:[%s9143_s3 + $0x488] sm:$0xf] %vm4182_vm0, %v3991_v17  ;;  %v3752_v21 = vpack.c.bf16 %v3271_v18, %v3271_v18 }
 0x23c   :  { %v2743_v22 = vpop.f32.mrf.mxu2  ;;  %4595 = vst.msk [vmem:[%s9143_s3 + $0x670] sm:$0xf] %vm4182_vm0, %v4113_v19  ;;  %v3872_v23 = vpack.c.bf16 %v3391_v20, %v3391_v20 }
 0x23d   :  { %v2744_v24 = vadd.f32 %v7207_v56, %v2743_v22  ;;  %4234 = vst.msk [vmem:[%s9143_s3 + $0xcc] sm:$0xf] %vm4182_vm0, %v3752_v21  ;;  %v3048_v26 = vpop.f32.mrf.mxu3 }
 0x23e   :  { %4354 = vst.msk [vmem:[%s9143_s3 + $0x2ac] sm:$0xf] %vm4182_vm0, %v3872_v23  ;;  %v3049_v28 = vadd.f32 %v7207_v56, %v3048_v26  ;;  %v2146_v29 = vpop.f32.mrf.mxu0 }
 0x23f   :  { %v3511_v32 = vmax.f32 %v2744_v24, 0.0  ;;  %v2147_v33 = vadd.f32 %v7207_v56, %v2146_v29  ;;  %v2446_v34 = vpop.f32.mrf.mxu1 }
 0x240   :  { %v3633_v35 = vmax.f32 %v3049_v28, 0.0  ;;  %v2447_v36 = vadd.f32 %v7207_v56, %v2446_v34  ;;  %v5817_v34 = vld [vmem:[%s9141_s0 + $0x4e0] sm:$0xff] }
 0x241   :  { %v3992_v37 = vpack.c.bf16 %v3511_v32, %v3511_v32  ;;  %2785 = vmatmul.bf16.gmra.mxu2 %v5815_v25  ;;  %v3272_v38 = vmax.f32 %v2147_v33, 0.0  ;;  %2185 = vmatmul.bf16.gmra.mxu0 %v5695_v27 }
 0x242   :  { %v4114_v39 = vpack.c.bf16 %v3633_v35, %v3633_v35  ;;  %v3392_v40 = vmax.f32 %v2447_v36, 0.0  ;;  %2485 = vmatmul.bf16.gmra.mxu1 %v5755_v30  ;;  %3090 = vmatmul.bf16.gmra.mxu3 %v5876_v31  ;;  %v5697_v36 = vld [vmem:[%s9141_s0 + $0x120] sm:$0xff] }
 0x243   :  { %4474 = vst.msk [vmem:[%s9143_s3 + $0x48c] sm:$0xf] %vm4182_vm0, %v3992_v37  ;;  %v3753_v42 = vpack.c.bf16 %v3272_v38, %v3272_v38 }
 0x244   :  { %v2746_v43 = vpop.f32.mrf.mxu2  ;;  %4596 = vst.msk [vmem:[%s9143_s3 + $0x674] sm:$0xf] %vm4182_vm0, %v4114_v39  ;;  %v3873_v44 = vpack.c.bf16 %v3392_v40, %v3392_v40  ;;  %v5757_v39 = vld [vmem:[%s9141_s0 + $0x300] sm:$0xff]  ;;  %v5878_v40 = vld [vmem:[%s9141_s0 + $0x6c8] sm:$0xff] }
 0x245   :  { %v2747_v45 = vadd.f32 %v7207_v56, %v2746_v43  ;;  %4235 = vst.msk [vmem:[%s9143_s3 + $0xd0] sm:$0xf] %vm4182_vm0, %v3753_v42  ;;  %v3051_v46 = vpop.f32.mrf.mxu3 }
 0x246   :  { %4355 = vst.msk [vmem:[%s9143_s3 + $0x2b0] sm:$0xf] %vm4182_vm0, %v3873_v44  ;;  %v3052_v47 = vadd.f32 %v7207_v56, %v3051_v46  ;;  %v2148_v48 = vpop.f32.mrf.mxu0 }
 0x247   :  { %v3512_v49 = vmax.f32 %v2747_v45, 0.0  ;;  %v2149_v50 = vadd.f32 %v7207_v56, %v2148_v48  ;;  %v2448_v51 = vpop.f32.mrf.mxu1 }
 0x248   :  { %v3634_v52 = vmax.f32 %v3052_v47, 0.0  ;;  %v2449_v53 = vadd.f32 %v7207_v56, %v2448_v51 }
 0x249   :  { %v3993_v54 = vpack.c.bf16 %v3512_v49, %v3512_v49  ;;  %v3273_v55 = vmax.f32 %v2149_v50, 0.0 }
 0x24a   :  { %v4115_v57 = vpack.c.bf16 %v3634_v52, %v3634_v52  ;;  %v3393_v58 = vmax.f32 %v2449_v53, 0.0 }
 0x24b   :  { %4475 = vst.msk [vmem:[%s9143_s3 + $0x490] sm:$0xf] %vm4182_vm0, %v3993_v54  ;;  %v3754_v41 = vpack.c.bf16 %v3273_v55, %v3273_v55 }
 0x24c   :  { %v2748_v59 = vpop.f32.mrf.mxu2  ;;  %4597 = vst.msk [vmem:[%s9143_s3 + $0x678] sm:$0xf] %vm4182_vm0, %v4115_v57  ;;  %v3874_v60 = vpack.c.bf16 %v3393_v58, %v3393_v58 }
 0x24d   :  { %v2749_v61 = vadd.f32 %v7207_v56, %v2748_v59  ;;  %4236 = vst.msk [vmem:[%s9143_s3 + $0xd4] sm:$0xf] %vm4182_vm0, %v3754_v41  ;;  %v3053_v63 = vpop.f32.mrf.mxu3 }
 0x24e   :  { %4356 = vst.msk [vmem:[%s9143_s3 + $0x2b4] sm:$0xf] %vm4182_vm0, %v3874_v60  ;;  %v3054_v1 = vadd.f32 %v7207_v56, %v3053_v63  ;;  %v2151_v2 = vpop.f32.mrf.mxu0 }
 0x24f   :  { %v3513_v5 = vmax.f32 %v2749_v61, 0.0  ;;  %v2152_v6 = vadd.f32 %v7207_v56, %v2151_v2  ;;  %v2451_v7 = vpop.f32.mrf.mxu1 }
 0x250   :  { %v3635_v8 = vmax.f32 %v3054_v1, 0.0  ;;  %v2452_v9 = vadd.f32 %v7207_v56, %v2451_v7  ;;  %v5818_v7 = vld [vmem:[%s9141_s0 + $0x4e8] sm:$0xff] }
 0x251   :  { %v3994_v10 = vpack.c.bf16 %v3513_v5, %v3513_v5  ;;  %2790 = vmatmul.bf16.gmra.mxu2 %v5816_v62  ;;  %v3274_v11 = vmax.f32 %v2152_v6, 0.0  ;;  %2190 = vmatmul.bf16.gmra.mxu0 %v5696_v0 }
 0x252   :  { %v4116_v12 = vpack.c.bf16 %v3635_v8, %v3635_v8  ;;  %v3394_v13 = vmax.f32 %v2452_v9, 0.0  ;;  %2490 = vmatmul.bf16.gmra.mxu1 %v5756_v3  ;;  %3095 = vmatmul.bf16.gmra.mxu3 %v5877_v4  ;;  %v5698_v9 = vld [vmem:[%s9141_s0 + $0x128] sm:$0xff] }
 0x253   :  { %4476 = vst.msk [vmem:[%s9143_s3 + $0x494] sm:$0xf] %vm4182_vm0, %v3994_v10  ;;  %v3755_v14 = vpack.c.bf16 %v3274_v11, %v3274_v11 }
 0x254   :  { %v2751_v15 = vpop.f32.mrf.mxu2  ;;  %4598 = vst.msk [vmem:[%s9143_s3 + $0x67c] sm:$0xf] %vm4182_vm0, %v4116_v12  ;;  %v3875_v16 = vpack.c.bf16 %v3394_v13, %v3394_v13  ;;  %v5758_v12 = vld [vmem:[%s9141_s0 + $0x308] sm:$0xff]  ;;  %v5879_v13 = vld [vmem:[%s9141_s0 + $0x6d0] sm:$0xff] }
 0x255   :  { %v2752_v17 = vadd.f32 %v7207_v56, %v2751_v15  ;;  %4237 = vst.msk [vmem:[%s9143_s3 + $0xd8] sm:$0xf] %vm4182_vm0, %v3755_v14  ;;  %v3056_v18 = vpop.f32.mrf.mxu3 }
 0x256   :  { %4357 = vst.msk [vmem:[%s9143_s3 + $0x2b8] sm:$0xf] %vm4182_vm0, %v3875_v16  ;;  %v3057_v19 = vadd.f32 %v7207_v56, %v3056_v18  ;;  %v2153_v20 = vpop.f32.mrf.mxu0 }
 0x257   :  { %v3514_v21 = vmax.f32 %v2752_v17, 0.0  ;;  %v2154_v22 = vadd.f32 %v7207_v56, %v2153_v20  ;;  %v2453_v23 = vpop.f32.mrf.mxu1 }
 0x258   :  { %v3636_v24 = vmax.f32 %v3057_v19, 0.0  ;;  %v2454_v25 = vadd.f32 %v7207_v56, %v2453_v23 }
 0x259   :  { %v3995_v26 = vpack.c.bf16 %v3514_v21, %v3514_v21  ;;  %v3275_v27 = vmax.f32 %v2154_v22, 0.0 }
 0x25a   :  { %v4117_v28 = vpack.c.bf16 %v3636_v24, %v3636_v24  ;;  %v3395_v29 = vmax.f32 %v2454_v25, 0.0 }
 0x25b   :  { %4477 = vst.msk [vmem:[%s9143_s3 + $0x498] sm:$0xf] %vm4182_vm0, %v3995_v26  ;;  %v3756_v30 = vpack.c.bf16 %v3275_v27, %v3275_v27 }
 0x25c   :  { %v2753_v31 = vpop.f32.mrf.mxu2  ;;  %4599 = vst.msk [vmem:[%s9143_s3 + $0x680] sm:$0xf] %vm4182_vm0, %v4117_v28  ;;  %v3876_v32 = vpack.c.bf16 %v3395_v29, %v3395_v29 }
 0x25d   :  { %v2754_v33 = vadd.f32 %v7207_v56, %v2753_v31  ;;  %4238 = vst.msk [vmem:[%s9143_s3 + $0xdc] sm:$0xf] %vm4182_vm0, %v3756_v30  ;;  %v3058_v35 = vpop.f32.mrf.mxu3 }
 0x25e   :  { %4358 = vst.msk [vmem:[%s9143_s3 + $0x2bc] sm:$0xf] %vm4182_vm0, %v3876_v32  ;;  %v3059_v37 = vadd.f32 %v7207_v56, %v3058_v35  ;;  %v2156_v38 = vpop.f32.mrf.mxu0 }
 0x25f   :  { %v3515_v42 = vmax.f32 %v2754_v33, 0.0  ;;  %v2157_v43 = vadd.f32 %v7207_v56, %v2156_v38  ;;  %v2456_v44 = vpop.f32.mrf.mxu1 }
 0x260   :  { %v3637_v45 = vmax.f32 %v3059_v37, 0.0  ;;  %v2457_v46 = vadd.f32 %v7207_v56, %v2456_v44  ;;  %v5819_v44 = vld [vmem:[%s9141_s0 + $0x4f0] sm:$0xff] }
 0x261   :  { %v3996_v47 = vpack.c.bf16 %v3515_v42, %v3515_v42  ;;  %2795 = vmatmul.bf16.gmra.mxu2 %v5817_v34  ;;  %v3276_v48 = vmax.f32 %v2157_v43, 0.0  ;;  %2195 = vmatmul.bf16.gmra.mxu0 %v5697_v36 }
 0x262   :  { %v4118_v49 = vpack.c.bf16 %v3637_v45, %v3637_v45  ;;  %v3396_v50 = vmax.f32 %v2457_v46, 0.0  ;;  %2495 = vmatmul.bf16.gmra.mxu1 %v5757_v39  ;;  %3100 = vmatmul.bf16.gmra.mxu3 %v5878_v40  ;;  %v5699_v46 = vld [vmem:[%s9141_s0 + $0x130] sm:$0xff] }
 0x263   :  { %4478 = vst.msk [vmem:[%s9143_s3 + $0x49c] sm:$0xf] %vm4182_vm0, %v3996_v47  ;;  %v3757_v51 = vpack.c.bf16 %v3276_v48, %v3276_v48 }
 0x264   :  { %v2756_v52 = vpop.f32.mrf.mxu2  ;;  %4600 = vst.msk [vmem:[%s9143_s3 + $0x684] sm:$0xf] %vm4182_vm0, %v4118_v49  ;;  %v3877_v53 = vpack.c.bf16 %v3396_v50, %v3396_v50  ;;  %v5759_v49 = vld [vmem:[%s9141_s0 + $0x310] sm:$0xff]  ;;  %v5880_v50 = vld [vmem:[%s9141_s0 + $0x6d8] sm:$0xff] }
 0x265   :  { %v2757_v54 = vadd.f32 %v7207_v56, %v2756_v52  ;;  %4239 = vst.msk [vmem:[%s9143_s3 + $0xe0] sm:$0xf] %vm4182_vm0, %v3757_v51  ;;  %v3061_v55 = vpop.f32.mrf.mxu3 }
 0x266   :  { %4359 = vst.msk [vmem:[%s9143_s3 + $0x2c0] sm:$0xf] %vm4182_vm0, %v3877_v53  ;;  %v3062_v57 = vadd.f32 %v7207_v56, %v3061_v55  ;;  %v2158_v58 = vpop.f32.mrf.mxu0 }
 0x267   :  { %v3516_v41 = vmax.f32 %v2757_v54, 0.0  ;;  %v2159_v59 = vadd.f32 %v7207_v56, %v2158_v58  ;;  %v2458_v60 = vpop.f32.mrf.mxu1 }
 0x268   :  { %v3638_v61 = vmax.f32 %v3062_v57, 0.0  ;;  %v2459_v62 = vadd.f32 %v7207_v56, %v2458_v60 }
 0x269   :  { %v3997_v63 = vpack.c.bf16 %v3516_v41, %v3516_v41  ;;  %v3277_v0 = vmax.f32 %v2159_v59, 0.0 }
 0x26a   :  { %v4119_v1 = vpack.c.bf16 %v3638_v61, %v3638_v61  ;;  %v3397_v2 = vmax.f32 %v2459_v62, 0.0 }
 0x26b   :  { %4479 = vst.msk [vmem:[%s9143_s3 + $0x4a0] sm:$0xf] %vm4182_vm0, %v3997_v63  ;;  %v3758_v3 = vpack.c.bf16 %v3277_v0, %v3277_v0 }
 0x26c   :  { %v2758_v4 = vpop.f32.mrf.mxu2  ;;  %4601 = vst.msk [vmem:[%s9143_s3 + $0x688] sm:$0xf] %vm4182_vm0, %v4119_v1  ;;  %v3878_v5 = vpack.c.bf16 %v3397_v2, %v3397_v2 }
 0x26d   :  { %v2759_v6 = vadd.f32 %v7207_v56, %v2758_v4  ;;  %4240 = vst.msk [vmem:[%s9143_s3 + $0xe4] sm:$0xf] %vm4182_vm0, %v3758_v3  ;;  %v3063_v8 = vpop.f32.mrf.mxu3 }
 0x26e   :  { %4360 = vst.msk [vmem:[%s9143_s3 + $0x2c4] sm:$0xf] %vm4182_vm0, %v3878_v5  ;;  %v3064_v10 = vadd.f32 %v7207_v56, %v3063_v8  ;;  %v2161_v11 = vpop.f32.mrf.mxu0 }
 0x26f   :  { %v3517_v14 = vmax.f32 %v2759_v6, 0.0  ;;  %v2162_v15 = vadd.f32 %v7207_v56, %v2161_v11  ;;  %v2461_v16 = vpop.f32.mrf.mxu1 }
 0x270   :  { %v3639_v17 = vmax.f32 %v3064_v10, 0.0  ;;  %v2462_v18 = vadd.f32 %v7207_v56, %v2461_v16  ;;  %v5820_v16 = vld [vmem:[%s9141_s0 + $0x4f8] sm:$0xff] }
 0x271   :  { %v3998_v19 = vpack.c.bf16 %v3517_v14, %v3517_v14  ;;  %2800 = vmatmul.bf16.gmra.mxu2 %v5818_v7  ;;  %v3278_v20 = vmax.f32 %v2162_v15, 0.0  ;;  %2200 = vmatmul.bf16.gmra.mxu0 %v5698_v9 }
 0x272   :  { %v4120_v21 = vpack.c.bf16 %v3639_v17, %v3639_v17  ;;  %v3398_v22 = vmax.f32 %v2462_v18, 0.0  ;;  %2500 = vmatmul.bf16.gmra.mxu1 %v5758_v12  ;;  %3105 = vmatmul.bf16.gmra.mxu3 %v5879_v13  ;;  %v5700_v18 = vld [vmem:[%s9141_s0 + $0x138] sm:$0xff] }
 0x273   :  { %4480 = vst.msk [vmem:[%s9143_s3 + $0x4a4] sm:$0xf] %vm4182_vm0, %v3998_v19  ;;  %v3759_v23 = vpack.c.bf16 %v3278_v20, %v3278_v20 }
 0x274   :  { %v2761_v24 = vpop.f32.mrf.mxu2  ;;  %4602 = vst.msk [vmem:[%s9143_s3 + $0x68c] sm:$0xf] %vm4182_vm0, %v4120_v21  ;;  %v3879_v25 = vpack.c.bf16 %v3398_v22, %v3398_v22  ;;  %v5760_v21 = vld [vmem:[%s9141_s0 + $0x318] sm:$0xff]  ;;  %v5881_v22 = vld [vmem:[%s9141_s0 + $0x6e0] sm:$0xff] }
 0x275   :  { %v2762_v26 = vadd.f32 %v7207_v56, %v2761_v24  ;;  %4241 = vst.msk [vmem:[%s9143_s3 + $0xe8] sm:$0xf] %vm4182_vm0, %v3759_v23  ;;  %v3066_v27 = vpop.f32.mrf.mxu3 }
 0x276   :  { %4361 = vst.msk [vmem:[%s9143_s3 + $0x2c8] sm:$0xf] %vm4182_vm0, %v3879_v25  ;;  %v3067_v28 = vadd.f32 %v7207_v56, %v3066_v27  ;;  %v2163_v29 = vpop.f32.mrf.mxu0 }
 0x277   :  { %v3518_v30 = vmax.f32 %v2762_v26, 0.0  ;;  %v2164_v31 = vadd.f32 %v7207_v56, %v2163_v29  ;;  %v2463_v32 = vpop.f32.mrf.mxu1 }
 0x278   :  { %v3640_v33 = vmax.f32 %v3067_v28, 0.0  ;;  %v2464_v34 = vadd.f32 %v7207_v56, %v2463_v32 }
 0x279   :  { %v3999_v35 = vpack.c.bf16 %v3518_v30, %v3518_v30  ;;  %v3279_v36 = vmax.f32 %v2164_v31, 0.0 }
 0x27a   :  { %v4121_v37 = vpack.c.bf16 %v3640_v33, %v3640_v33  ;;  %v3399_v38 = vmax.f32 %v2464_v34, 0.0 }
 0x27b   :  { %4481 = vst.msk [vmem:[%s9143_s3 + $0x4a8] sm:$0xf] %vm4182_vm0, %v3999_v35  ;;  %v3760_v39 = vpack.c.bf16 %v3279_v36, %v3279_v36 }
 0x27c   :  { %v2763_v40 = vpop.f32.mrf.mxu2  ;;  %4603 = vst.msk [vmem:[%s9143_s3 + $0x690] sm:$0xf] %vm4182_vm0, %v4121_v37  ;;  %v3880_v42 = vpack.c.bf16 %v3399_v38, %v3399_v38 }
 0x27d   :  { %v2764_v43 = vadd.f32 %v7207_v56, %v2763_v40  ;;  %4242 = vst.msk [vmem:[%s9143_s3 + $0xec] sm:$0xf] %vm4182_vm0, %v3760_v39  ;;  %v3068_v45 = vpop.f32.mrf.mxu3 }
 0x27e   :  { %4362 = vst.msk [vmem:[%s9143_s3 + $0x2cc] sm:$0xf] %vm4182_vm0, %v3880_v42  ;;  %v3069_v47 = vadd.f32 %v7207_v56, %v3068_v45  ;;  %v2166_v48 = vpop.f32.mrf.mxu0 }
 0x27f   :  { %v3519_v51 = vmax.f32 %v2764_v43, 0.0  ;;  %v2167_v52 = vadd.f32 %v7207_v56, %v2166_v48  ;;  %v2466_v53 = vpop.f32.mrf.mxu1 }
 0x280   :  { %v3641_v54 = vmax.f32 %v3069_v47, 0.0  ;;  %v2467_v55 = vadd.f32 %v7207_v56, %v2466_v53  ;;  %v5821_v53 = vld [vmem:[%s9141_s0 + $0x500] sm:$0xff] }
 0x281   :  { %v4000_v57 = vpack.c.bf16 %v3519_v51, %v3519_v51  ;;  %2805 = vmatmul.bf16.gmra.mxu2 %v5819_v44  ;;  %v3280_v58 = vmax.f32 %v2167_v52, 0.0  ;;  %2205 = vmatmul.bf16.gmra.mxu0 %v5699_v46 }
 0x282   :  { %v4122_v41 = vpack.c.bf16 %v3641_v54, %v3641_v54  ;;  %v3400_v59 = vmax.f32 %v2467_v55, 0.0  ;;  %2505 = vmatmul.bf16.gmra.mxu1 %v5759_v49  ;;  %3110 = vmatmul.bf16.gmra.mxu3 %v5880_v50  ;;  %v5701_v55 = vld [vmem:[%s9141_s0 + $0x140] sm:$0xff] }
 0x283   :  { %4482 = vst.msk [vmem:[%s9143_s3 + $0x4ac] sm:$0xf] %vm4182_vm0, %v4000_v57  ;;  %v3761_v60 = vpack.c.bf16 %v3280_v58, %v3280_v58 }
 0x284   :  { %v2766_v61 = vpop.f32.mrf.mxu2  ;;  %4604 = vst.msk [vmem:[%s9143_s3 + $0x694] sm:$0xf] %vm4182_vm0, %v4122_v41  ;;  %v3881_v62 = vpack.c.bf16 %v3400_v59, %v3400_v59  ;;  %v5761_v41 = vld [vmem:[%s9141_s0 + $0x320] sm:$0xff]  ;;  %v5882_v59 = vld [vmem:[%s9141_s0 + $0x6e8] sm:$0xff] }
 0x285   :  { %v2767_v63 = vadd.f32 %v7207_v56, %v2766_v61  ;;  %4243 = vst.msk [vmem:[%s9143_s3 + $0xf0] sm:$0xf] %vm4182_vm0, %v3761_v60  ;;  %v3071_v0 = vpop.f32.mrf.mxu3 }
 0x286   :  { %4363 = vst.msk [vmem:[%s9143_s3 + $0x2d0] sm:$0xf] %vm4182_vm0, %v3881_v62  ;;  %v3072_v1 = vadd.f32 %v7207_v56, %v3071_v0  ;;  %v2168_v2 = vpop.f32.mrf.mxu0 }
 0x287   :  { %v3520_v3 = vmax.f32 %v2767_v63, 0.0  ;;  %v2169_v4 = vadd.f32 %v7207_v56, %v2168_v2  ;;  %v2468_v5 = vpop.f32.mrf.mxu1 }
 0x288   :  { %v3642_v6 = vmax.f32 %v3072_v1, 0.0  ;;  %v2469_v7 = vadd.f32 %v7207_v56, %v2468_v5 }
 0x289   :  { %v4001_v8 = vpack.c.bf16 %v3520_v3, %v3520_v3  ;;  %v3281_v9 = vmax.f32 %v2169_v4, 0.0 }
 0x28a   :  { %v4123_v10 = vpack.c.bf16 %v3642_v6, %v3642_v6  ;;  %v3401_v11 = vmax.f32 %v2469_v7, 0.0  ;;  %v7775_v7 = vld [vmem:[%s9142_s2] ss:$0 sm:$0xff] }
 0x28b   :  { %4483 = vst.msk [vmem:[%s9143_s3 + $0x4b0] sm:$0xf] %vm4182_vm0, %v4001_v8  ;;  %v3762_v12 = vpack.c.bf16 %v3281_v9, %v3281_v9 }
 0x28c   :  { %v2768_v13 = vpop.f32.mrf.mxu2  ;;  %4605 = vst.msk [vmem:[%s9143_s3 + $0x698] sm:$0xf] %vm4182_vm0, %v4123_v10  ;;  %v3882_v14 = vpack.c.bf16 %v3401_v11, %v3401_v11 }
 0x28d   :  { %v2769_v15 = vadd.f32 %v7207_v56, %v2768_v13  ;;  %4244 = vst.msk [vmem:[%s9143_s3 + $0xf4] sm:$0xf] %vm4182_vm0, %v3762_v12  ;;  %v3073_v17 = vpop.f32.mrf.mxu3 }
 0x28e   :  { %4364 = vst.msk [vmem:[%s9143_s3 + $0x2d4] sm:$0xf] %vm4182_vm0, %v3882_v14  ;;  %v3074_v19 = vadd.f32 %v7207_v56, %v3073_v17  ;;  %v2171_v20 = vpop.f32.mrf.mxu0 }
 0x28f   :  { %v3521_v23 = vmax.f32 %v2769_v15, 0.0  ;;  %v2172_v24 = vadd.f32 %v7207_v56, %v2171_v20  ;;  %v2471_v25 = vpop.f32.mrf.mxu1 }
 0x290   :  { %v3643_v26 = vmax.f32 %v3074_v19, 0.0  ;;  %v2472_v27 = vadd.f32 %v7207_v56, %v2471_v25  ;;  %v5822_v25 = vld [vmem:[%s9141_s0 + $0x508] sm:$0xff] }
 0x291   :  { %v4002_v28 = vpack.c.bf16 %v3521_v23, %v3521_v23  ;;  %2810 = vmatmul.bf16.gmra.mxu2 %v5820_v16  ;;  %v3282_v29 = vmax.f32 %v2172_v24, 0.0  ;;  %2210 = vmatmul.bf16.gmra.mxu0 %v5700_v18 }
 0x292   :  { %v4124_v30 = vpack.c.bf16 %v3643_v26, %v3643_v26  ;;  %v3402_v31 = vmax.f32 %v2472_v27, 0.0  ;;  %2510 = vmatmul.bf16.gmra.mxu1 %v5760_v21  ;;  %3115 = vmatmul.bf16.gmra.mxu3 %v5881_v22  ;;  %v5702_v27 = vld [vmem:[%s9141_s0 + $0x148] sm:$0xff] }
 0x293   :  { %4484 = vst.msk [vmem:[%s9143_s3 + $0x4b4] sm:$0xf] %vm4182_vm0, %v4002_v28  ;;  %v3763_v32 = vpack.c.bf16 %v3282_v29, %v3282_v29 }
 0x294   :  { %v2771_v33 = vpop.f32.mrf.mxu2  ;;  %4606 = vst.msk [vmem:[%s9143_s3 + $0x69c] sm:$0xf] %vm4182_vm0, %v4124_v30  ;;  %v3883_v34 = vpack.c.bf16 %v3402_v31, %v3402_v31  ;;  %v5762_v30 = vld [vmem:[%s9141_s0 + $0x328] sm:$0xff]  ;;  %v5883_v31 = vld [vmem:[%s9141_s0 + $0x6f0] sm:$0xff] }
 0x295   :  { %v2772_v35 = vadd.f32 %v7207_v56, %v2771_v33  ;;  %4245 = vst.msk [vmem:[%s9143_s3 + $0xf8] sm:$0xf] %vm4182_vm0, %v3763_v32  ;;  %v3076_v36 = vpop.f32.mrf.mxu3 }
 0x296   :  { %4365 = vst.msk [vmem:[%s9143_s3 + $0x2d8] sm:$0xf] %vm4182_vm0, %v3883_v34  ;;  %v3077_v37 = vadd.f32 %v7207_v56, %v3076_v36  ;;  %v2173_v38 = vpop.f32.mrf.mxu0 }
 0x297   :  { %v3522_v39 = vmax.f32 %v2772_v35, 0.0  ;;  %v2174_v40 = vadd.f32 %v7207_v56, %v2173_v38  ;;  %v2473_v42 = vpop.f32.mrf.mxu1 }
 0x298   :  { %v3644_v43 = vmax.f32 %v3077_v37, 0.0  ;;  %v2474_v44 = vadd.f32 %v7207_v56, %v2473_v42 }
 0x299   :  { %v4003_v45 = vpack.c.bf16 %v3522_v39, %v3522_v39  ;;  %v3283_v46 = vmax.f32 %v2174_v40, 0.0 }
 0x29a   :  { %v4125_v47 = vpack.c.bf16 %v3644_v43, %v3644_v43  ;;  %v3403_v48 = vmax.f32 %v2474_v44, 0.0 }
 0x29b   :  { %4485 = vst.msk [vmem:[%s9143_s3 + $0x4b8] sm:$0xf] %vm4182_vm0, %v4003_v45  ;;  %v3764_v49 = vpack.c.bf16 %v3283_v46, %v3283_v46 }
 0x29c   :  { %v2773_v50 = vpop.f32.mrf.mxu2  ;;  %4607 = vst.msk [vmem:[%s9143_s3 + $0x6a0] sm:$0xf] %vm4182_vm0, %v4125_v47  ;;  %v3884_v51 = vpack.c.bf16 %v3403_v48, %v3403_v48 }
 0x29d   :  { %v2774_v52 = vadd.f32 %v7207_v56, %v2773_v50  ;;  %4246 = vst.msk [vmem:[%s9143_s3 + $0xfc] sm:$0xf] %vm4182_vm0, %v3764_v49  ;;  %v3078_v54 = vpop.f32.mrf.mxu3 }
 0x29e   :  { %4366 = vst.msk [vmem:[%s9143_s3 + $0x2dc] sm:$0xf] %vm4182_vm0, %v3884_v51  ;;  %v3079_v57 = vadd.f32 %v7207_v56, %v3078_v54  ;;  %v2176_v58 = vpop.f32.mrf.mxu0 }
 0x29f   :  { %v3523_v60 = vmax.f32 %v2774_v52, 0.0  ;;  %v2177_v61 = vadd.f32 %v7207_v56, %v2176_v58  ;;  %v2476_v62 = vpop.f32.mrf.mxu1 }
 0x2a0   :  { %v3645_v63 = vmax.f32 %v3079_v57, 0.0  ;;  %v2477_v0 = vadd.f32 %v7207_v56, %v2476_v62  ;;  %v5823_v62 = vld [vmem:[%s9141_s0 + $0x510] sm:$0xff] }
 0x2a1   :  { %v4004_v1 = vpack.c.bf16 %v3523_v60, %v3523_v60  ;;  %2815 = vmatmul.bf16.gmra.mxu2 %v5821_v53  ;;  %v3284_v2 = vmax.f32 %v2177_v61, 0.0  ;;  %2215 = vmatmul.bf16.gmra.mxu0 %v5701_v55 }
 0x2a2   :  { %v4126_v3 = vpack.c.bf16 %v3645_v63, %v3645_v63  ;;  %v3404_v4 = vmax.f32 %v2477_v0, 0.0  ;;  %2515 = vmatmul.bf16.gmra.mxu1 %v5761_v41  ;;  %3120 = vmatmul.bf16.gmra.mxu3 %v5882_v59  ;;  %v5703_v0 = vld [vmem:[%s9141_s0 + $0x150] sm:$0xff] }
 0x2a3   :  { %4486 = vst.msk [vmem:[%s9143_s3 + $0x4bc] sm:$0xf] %vm4182_vm0, %v4004_v1  ;;  %v3765_v5 = vpack.c.bf16 %v3284_v2, %v3284_v2 }
 0x2a4   :  { %v2776_v6 = vpop.f32.mrf.mxu2  ;;  %4608 = vst.msk [vmem:[%s9143_s3 + $0x6a4] sm:$0xf] %vm4182_vm0, %v4126_v3  ;;  %v3885_v56 = vpack.c.bf16 %v3404_v4, %v3404_v4  ;;  %v5763_v3 = vld [vmem:[%s9141_s0 + $0x330] sm:$0xff]  ;;  %v5884_v4 = vld [vmem:[%s9141_s0 + $0x6f8] sm:$0xff] }
 0x2a5   :  { %v2777_v8 = vadd.f32 %v7775_v7, %v2776_v6  ;;  %4247 = vst.msk [vmem:[%s9143_s3 + $0x100] sm:$0xf] %vm4182_vm0, %v3765_v5  ;;  %v3081_v9 = vpop.f32.mrf.mxu3 }
 0x2a6   :  { %4367 = vst.msk [vmem:[%s9143_s3 + $0x2e0] sm:$0xf] %vm4182_vm0, %v3885_v56  ;;  %v3082_v10 = vadd.f32 %v7775_v7, %v3081_v9  ;;  %v2178_v11 = vpop.f32.mrf.mxu0 }
 0x2a7   :  { %v3524_v12 = vmax.f32 %v2777_v8, 0.0  ;;  %v2179_v13 = vadd.f32 %v7775_v7, %v2178_v11  ;;  %v2478_v14 = vpop.f32.mrf.mxu1 }
 0x2a8   :  { %v3646_v15 = vmax.f32 %v3082_v10, 0.0  ;;  %v2479_v16 = vadd.f32 %v7775_v7, %v2478_v14 }
 0x2a9   :  { %v4005_v17 = vpack.c.bf16 %v3524_v12, %v3524_v12  ;;  %v3285_v18 = vmax.f32 %v2179_v13, 0.0 }
 0x2aa   :  { %v4127_v19 = vpack.c.bf16 %v3646_v15, %v3646_v15  ;;  %v3405_v20 = vmax.f32 %v2479_v16, 0.0 }
 0x2ab   :  { %4487 = vst.msk [vmem:[%s9143_s3 + $0x4c0] sm:$0xf] %vm4182_vm0, %v4005_v17  ;;  %v3766_v21 = vpack.c.bf16 %v3285_v18, %v3285_v18 }
 0x2ac   :  { %v2778_v22 = vpop.f32.mrf.mxu2  ;;  %4609 = vst.msk [vmem:[%s9143_s3 + $0x6a8] sm:$0xf] %vm4182_vm0, %v4127_v19  ;;  %v3886_v23 = vpack.c.bf16 %v3405_v20, %v3405_v20 }
 0x2ad   :  { %v2779_v24 = vadd.f32 %v7775_v7, %v2778_v22  ;;  %4248 = vst.msk [vmem:[%s9143_s3 + $0x104] sm:$0xf] %vm4182_vm0, %v3766_v21  ;;  %v3083_v26 = vpop.f32.mrf.mxu3 }
 0x2ae   :  { %4368 = vst.msk [vmem:[%s9143_s3 + $0x2e4] sm:$0xf] %vm4182_vm0, %v3886_v23  ;;  %v3084_v28 = vadd.f32 %v7775_v7, %v3083_v26  ;;  %v2181_v29 = vpop.f32.mrf.mxu0 }
 0x2af   :  { %v3525_v32 = vmax.f32 %v2779_v24, 0.0  ;;  %v2182_v33 = vadd.f32 %v7775_v7, %v2181_v29  ;;  %v2481_v34 = vpop.f32.mrf.mxu1 }
 0x2b0   :  { %v3647_v35 = vmax.f32 %v3084_v28, 0.0  ;;  %v2482_v36 = vadd.f32 %v7775_v7, %v2481_v34  ;;  %v5824_v34 = vld [vmem:[%s9141_s0 + $0x518] sm:$0xff] }
 0x2b1   :  { %v4006_v37 = vpack.c.bf16 %v3525_v32, %v3525_v32  ;;  %2820 = vmatmul.bf16.gmra.mxu2 %v5822_v25  ;;  %v3286_v38 = vmax.f32 %v2182_v33, 0.0  ;;  %2220 = vmatmul.bf16.gmra.mxu0 %v5702_v27 }
 0x2b2   :  { %v4128_v39 = vpack.c.bf16 %v3647_v35, %v3647_v35  ;;  %v3406_v40 = vmax.f32 %v2482_v36, 0.0  ;;  %2520 = vmatmul.bf16.gmra.mxu1 %v5762_v30  ;;  %3125 = vmatmul.bf16.gmra.mxu3 %v5883_v31  ;;  %v5704_v36 = vld [vmem:[%s9141_s0 + $0x158] sm:$0xff] }
 0x2b3   :  { %4488 = vst.msk [vmem:[%s9143_s3 + $0x4c4] sm:$0xf] %vm4182_vm0, %v4006_v37  ;;  %v3767_v42 = vpack.c.bf16 %v3286_v38, %v3286_v38 }
 0x2b4   :  { %v2781_v43 = vpop.f32.mrf.mxu2  ;;  %4610 = vst.msk [vmem:[%s9143_s3 + $0x6ac] sm:$0xf] %vm4182_vm0, %v4128_v39  ;;  %v3887_v44 = vpack.c.bf16 %v3406_v40, %v3406_v40  ;;  %v5764_v39 = vld [vmem:[%s9141_s0 + $0x338] sm:$0xff]  ;;  %v5885_v40 = vld [vmem:[%s9141_s0 + $0x700] sm:$0xff] }
 0x2b5   :  { %v2782_v45 = vadd.f32 %v7775_v7, %v2781_v43  ;;  %4249 = vst.msk [vmem:[%s9143_s3 + $0x108] sm:$0xf] %vm4182_vm0, %v3767_v42  ;;  %v3086_v46 = vpop.f32.mrf.mxu3 }
 0x2b6   :  { %4369 = vst.msk [vmem:[%s9143_s3 + $0x2e8] sm:$0xf] %vm4182_vm0, %v3887_v44  ;;  %v3087_v47 = vadd.f32 %v7775_v7, %v3086_v46  ;;  %v2183_v48 = vpop.f32.mrf.mxu0 }
 0x2b7   :  { %v3526_v49 = vmax.f32 %v2782_v45, 0.0  ;;  %v2184_v50 = vadd.f32 %v7775_v7, %v2183_v48  ;;  %v2483_v51 = vpop.f32.mrf.mxu1 }
 0x2b8   :  { %v3648_v52 = vmax.f32 %v3087_v47, 0.0  ;;  %v2484_v53 = vadd.f32 %v7775_v7, %v2483_v51 }
 0x2b9   :  { %v4007_v54 = vpack.c.bf16 %v3526_v49, %v3526_v49  ;;  %v3287_v55 = vmax.f32 %v2184_v50, 0.0 }
 0x2ba   :  { %v4129_v57 = vpack.c.bf16 %v3648_v52, %v3648_v52  ;;  %v3407_v58 = vmax.f32 %v2484_v53, 0.0 }
 0x2bb   :  { %4489 = vst.msk [vmem:[%s9143_s3 + $0x4c8] sm:$0xf] %vm4182_vm0, %v4007_v54  ;;  %v3768_v41 = vpack.c.bf16 %v3287_v55, %v3287_v55 }
 0x2bc   :  { %v2783_v59 = vpop.f32.mrf.mxu2  ;;  %4611 = vst.msk [vmem:[%s9143_s3 + $0x6b0] sm:$0xf] %vm4182_vm0, %v4129_v57  ;;  %v3888_v60 = vpack.c.bf16 %v3407_v58, %v3407_v58 }
 0x2bd   :  { %v2784_v61 = vadd.f32 %v7775_v7, %v2783_v59  ;;  %4250 = vst.msk [vmem:[%s9143_s3 + $0x10c] sm:$0xf] %vm4182_vm0, %v3768_v41  ;;  %v3088_v63 = vpop.f32.mrf.mxu3 }
 0x2be   :  { %4370 = vst.msk [vmem:[%s9143_s3 + $0x2ec] sm:$0xf] %vm4182_vm0, %v3888_v60  ;;  %v3089_v1 = vadd.f32 %v7775_v7, %v3088_v63  ;;  %v2186_v2 = vpop.f32.mrf.mxu0 }
 0x2bf   :  { %v3527_v5 = vmax.f32 %v2784_v61, 0.0  ;;  %v2187_v6 = vadd.f32 %v7775_v7, %v2186_v2  ;;  %v2486_v56 = vpop.f32.mrf.mxu1 }
 0x2c0   :  { %v3649_v8 = vmax.f32 %v3089_v1, 0.0  ;;  %v2487_v9 = vadd.f32 %v7775_v7, %v2486_v56  ;;  %v5825_v56 = vld [vmem:[%s9141_s0 + $0x520] sm:$0xff] }
 0x2c1   :  { %v4008_v10 = vpack.c.bf16 %v3527_v5, %v3527_v5  ;;  %2825 = vmatmul.bf16.gmra.mxu2 %v5823_v62  ;;  %v3288_v11 = vmax.f32 %v2187_v6, 0.0  ;;  %2225 = vmatmul.bf16.gmra.mxu0 %v5703_v0 }
 0x2c2   :  { %v4130_v12 = vpack.c.bf16 %v3649_v8, %v3649_v8  ;;  %v3408_v13 = vmax.f32 %v2487_v9, 0.0  ;;  %2525 = vmatmul.bf16.gmra.mxu1 %v5763_v3  ;;  %3130 = vmatmul.bf16.gmra.mxu3 %v5884_v4  ;;  %v5705_v9 = vld [vmem:[%s9141_s0 + $0x160] sm:$0xff] }
 0x2c3   :  { %4490 = vst.msk [vmem:[%s9143_s3 + $0x4cc] sm:$0xf] %vm4182_vm0, %v4008_v10  ;;  %v3769_v14 = vpack.c.bf16 %v3288_v11, %v3288_v11 }
 0x2c4   :  { %v2786_v15 = vpop.f32.mrf.mxu2  ;;  %4612 = vst.msk [vmem:[%s9143_s3 + $0x6b4] sm:$0xf] %vm4182_vm0, %v4130_v12  ;;  %v3889_v16 = vpack.c.bf16 %v3408_v13, %v3408_v13  ;;  %v5765_v12 = vld [vmem:[%s9141_s0 + $0x340] sm:$0xff]  ;;  %v5886_v13 = vld [vmem:[%s9141_s0 + $0x708] sm:$0xff] }
 0x2c5   :  { %v2787_v17 = vadd.f32 %v7775_v7, %v2786_v15  ;;  %4251 = vst.msk [vmem:[%s9143_s3 + $0x110] sm:$0xf] %vm4182_vm0, %v3769_v14  ;;  %v3091_v18 = vpop.f32.mrf.mxu3 }
 0x2c6   :  { %4371 = vst.msk [vmem:[%s9143_s3 + $0x2f0] sm:$0xf] %vm4182_vm0, %v3889_v16  ;;  %v3092_v19 = vadd.f32 %v7775_v7, %v3091_v18  ;;  %v2188_v20 = vpop.f32.mrf.mxu0 }
 0x2c7   :  { %v3528_v21 = vmax.f32 %v2787_v17, 0.0  ;;  %v2189_v22 = vadd.f32 %v7775_v7, %v2188_v20  ;;  %v2488_v23 = vpop.f32.mrf.mxu1 }
 0x2c8   :  { %v3650_v24 = vmax.f32 %v3092_v19, 0.0  ;;  %v2489_v25 = vadd.f32 %v7775_v7, %v2488_v23 }
 0x2c9   :  { %v4009_v26 = vpack.c.bf16 %v3528_v21, %v3528_v21  ;;  %v3289_v27 = vmax.f32 %v2189_v22, 0.0 }
 0x2ca   :  { %v4131_v28 = vpack.c.bf16 %v3650_v24, %v3650_v24  ;;  %v3409_v29 = vmax.f32 %v2489_v25, 0.0 }
 0x2cb   :  { %4491 = vst.msk [vmem:[%s9143_s3 + $0x4d0] sm:$0xf] %vm4182_vm0, %v4009_v26  ;;  %v3770_v30 = vpack.c.bf16 %v3289_v27, %v3289_v27 }
 0x2cc   :  { %v2788_v31 = vpop.f32.mrf.mxu2  ;;  %4613 = vst.msk [vmem:[%s9143_s3 + $0x6b8] sm:$0xf] %vm4182_vm0, %v4131_v28  ;;  %v3890_v32 = vpack.c.bf16 %v3409_v29, %v3409_v29 }
 0x2cd   :  { %v2789_v33 = vadd.f32 %v7775_v7, %v2788_v31  ;;  %4252 = vst.msk [vmem:[%s9143_s3 + $0x114] sm:$0xf] %vm4182_vm0, %v3770_v30  ;;  %v3093_v35 = vpop.f32.mrf.mxu3 }
 0x2ce   :  { %4372 = vst.msk [vmem:[%s9143_s3 + $0x2f4] sm:$0xf] %vm4182_vm0, %v3890_v32  ;;  %v3094_v37 = vadd.f32 %v7775_v7, %v3093_v35  ;;  %v2191_v38 = vpop.f32.mrf.mxu0 }
 0x2cf   :  { %v3529_v42 = vmax.f32 %v2789_v33, 0.0  ;;  %v2192_v43 = vadd.f32 %v7775_v7, %v2191_v38  ;;  %v2491_v44 = vpop.f32.mrf.mxu1 }
 0x2d0   :  { %v3651_v45 = vmax.f32 %v3094_v37, 0.0  ;;  %v2492_v46 = vadd.f32 %v7775_v7, %v2491_v44  ;;  %v5826_v44 = vld [vmem:[%s9141_s0 + $0x528] sm:$0xff] }
 0x2d1   :  { %v4010_v47 = vpack.c.bf16 %v3529_v42, %v3529_v42  ;;  %2830 = vmatmul.bf16.gmra.mxu2 %v5824_v34  ;;  %v3290_v48 = vmax.f32 %v2192_v43, 0.0  ;;  %2230 = vmatmul.bf16.gmra.mxu0 %v5704_v36 }
 0x2d2   :  { %v4132_v49 = vpack.c.bf16 %v3651_v45, %v3651_v45  ;;  %v3410_v50 = vmax.f32 %v2492_v46, 0.0  ;;  %2530 = vmatmul.bf16.gmra.mxu1 %v5764_v39  ;;  %3135 = vmatmul.bf16.gmra.mxu3 %v5885_v40  ;;  %v5706_v46 = vld [vmem:[%s9141_s0 + $0x168] sm:$0xff] }
 0x2d3   :  { %4492 = vst.msk [vmem:[%s9143_s3 + $0x4d4] sm:$0xf] %vm4182_vm0, %v4010_v47  ;;  %v3771_v51 = vpack.c.bf16 %v3290_v48, %v3290_v48 }
 0x2d4   :  { %v2791_v52 = vpop.f32.mrf.mxu2  ;;  %4614 = vst.msk [vmem:[%s9143_s3 + $0x6bc] sm:$0xf] %vm4182_vm0, %v4132_v49  ;;  %v3891_v53 = vpack.c.bf16 %v3410_v50, %v3410_v50  ;;  %v5766_v49 = vld [vmem:[%s9141_s0 + $0x348] sm:$0xff]  ;;  %v5887_v50 = vld [vmem:[%s9141_s0 + $0x710] sm:$0xff] }
 0x2d5   :  { %v2792_v54 = vadd.f32 %v7775_v7, %v2791_v52  ;;  %4253 = vst.msk [vmem:[%s9143_s3 + $0x118] sm:$0xf] %vm4182_vm0, %v3771_v51  ;;  %v3096_v55 = vpop.f32.mrf.mxu3 }
 0x2d6   :  { %4373 = vst.msk [vmem:[%s9143_s3 + $0x2f8] sm:$0xf] %vm4182_vm0, %v3891_v53  ;;  %v3097_v57 = vadd.f32 %v7775_v7, %v3096_v55  ;;  %v2193_v58 = vpop.f32.mrf.mxu0 }
 0x2d7   :  { %v3530_v41 = vmax.f32 %v2792_v54, 0.0  ;;  %v2194_v59 = vadd.f32 %v7775_v7, %v2193_v58  ;;  %v2493_v60 = vpop.f32.mrf.mxu1 }
 0x2d8   :  { %v3652_v61 = vmax.f32 %v3097_v57, 0.0  ;;  %v2494_v62 = vadd.f32 %v7775_v7, %v2493_v60 }
 0x2d9   :  { %v4011_v63 = vpack.c.bf16 %v3530_v41, %v3530_v41  ;;  %v3291_v0 = vmax.f32 %v2194_v59, 0.0 }
 0x2da   :  { %v4133_v1 = vpack.c.bf16 %v3652_v61, %v3652_v61  ;;  %v3411_v2 = vmax.f32 %v2494_v62, 0.0 }
 0x2db   :  { %4493 = vst.msk [vmem:[%s9143_s3 + $0x4d8] sm:$0xf] %vm4182_vm0, %v4011_v63  ;;  %v3772_v3 = vpack.c.bf16 %v3291_v0, %v3291_v0 }
 0x2dc   :  { %v2793_v4 = vpop.f32.mrf.mxu2  ;;  %4615 = vst.msk [vmem:[%s9143_s3 + $0x6c0] sm:$0xf] %vm4182_vm0, %v4133_v1  ;;  %v3892_v5 = vpack.c.bf16 %v3411_v2, %v3411_v2 }
 0x2dd   :  { %v2794_v6 = vadd.f32 %v7775_v7, %v2793_v4  ;;  %4254 = vst.msk [vmem:[%s9143_s3 + $0x11c] sm:$0xf] %vm4182_vm0, %v3772_v3  ;;  %v3098_v8 = vpop.f32.mrf.mxu3 }
 0x2de   :  { %4374 = vst.msk [vmem:[%s9143_s3 + $0x2fc] sm:$0xf] %vm4182_vm0, %v3892_v5  ;;  %v3099_v10 = vadd.f32 %v7775_v7, %v3098_v8  ;;  %v2196_v11 = vpop.f32.mrf.mxu0 }
 0x2df   :  { %v3531_v14 = vmax.f32 %v2794_v6, 0.0  ;;  %v2197_v15 = vadd.f32 %v7775_v7, %v2196_v11  ;;  %v2496_v16 = vpop.f32.mrf.mxu1 }
 0x2e0   :  { %v3653_v17 = vmax.f32 %v3099_v10, 0.0  ;;  %v2497_v18 = vadd.f32 %v7775_v7, %v2496_v16  ;;  %v5827_v16 = vld [vmem:[%s9141_s0 + $0x530] sm:$0xff] }
 0x2e1   :  { %v4012_v19 = vpack.c.bf16 %v3531_v14, %v3531_v14  ;;  %2835 = vmatmul.bf16.gmra.mxu2 %v5825_v56  ;;  %v3292_v20 = vmax.f32 %v2197_v15, 0.0  ;;  %2235 = vmatmul.bf16.gmra.mxu0 %v5705_v9 }
 0x2e2   :  { %v4134_v21 = vpack.c.bf16 %v3653_v17, %v3653_v17  ;;  %v3412_v22 = vmax.f32 %v2497_v18, 0.0  ;;  %2535 = vmatmul.bf16.gmra.mxu1 %v5765_v12  ;;  %3140 = vmatmul.bf16.gmra.mxu3 %v5886_v13  ;;  %v5707_v18 = vld [vmem:[%s9141_s0 + $0x170] sm:$0xff] }
 0x2e3   :  { %4494 = vst.msk [vmem:[%s9143_s3 + $0x4dc] sm:$0xf] %vm4182_vm0, %v4012_v19  ;;  %v3773_v23 = vpack.c.bf16 %v3292_v20, %v3292_v20 }
 0x2e4   :  { %v2796_v24 = vpop.f32.mrf.mxu2  ;;  %4616 = vst.msk [vmem:[%s9143_s3 + $0x6c4] sm:$0xf] %vm4182_vm0, %v4134_v21  ;;  %v3893_v25 = vpack.c.bf16 %v3412_v22, %v3412_v22  ;;  %v5767_v21 = vld [vmem:[%s9141_s0 + $0x350] sm:$0xff]  ;;  %v5888_v22 = vld [vmem:[%s9141_s0 + $0x718] sm:$0xff] }
 0x2e5   :  { %v2797_v26 = vadd.f32 %v7775_v7, %v2796_v24  ;;  %4255 = vst.msk [vmem:[%s9143_s3 + $0x120] sm:$0xf] %vm4182_vm0, %v3773_v23  ;;  %v3101_v27 = vpop.f32.mrf.mxu3 }
 0x2e6   :  { %4375 = vst.msk [vmem:[%s9143_s3 + $0x300] sm:$0xf] %vm4182_vm0, %v3893_v25  ;;  %v3102_v28 = vadd.f32 %v7775_v7, %v3101_v27  ;;  %v2198_v29 = vpop.f32.mrf.mxu0 }
 0x2e7   :  { %v3532_v30 = vmax.f32 %v2797_v26, 0.0  ;;  %v2199_v31 = vadd.f32 %v7775_v7, %v2198_v29  ;;  %v2498_v32 = vpop.f32.mrf.mxu1 }
 0x2e8   :  { %v3654_v33 = vmax.f32 %v3102_v28, 0.0  ;;  %v2499_v34 = vadd.f32 %v7775_v7, %v2498_v32 }
 0x2e9   :  { %v4013_v35 = vpack.c.bf16 %v3532_v30, %v3532_v30  ;;  %v3293_v36 = vmax.f32 %v2199_v31, 0.0 }
 0x2ea   :  { %v4135_v37 = vpack.c.bf16 %v3654_v33, %v3654_v33  ;;  %v3413_v38 = vmax.f32 %v2499_v34, 0.0 }
 0x2eb   :  { %4495 = vst.msk [vmem:[%s9143_s3 + $0x4e0] sm:$0xf] %vm4182_vm0, %v4013_v35  ;;  %v3774_v39 = vpack.c.bf16 %v3293_v36, %v3293_v36 }
 0x2ec   :  { %v2798_v40 = vpop.f32.mrf.mxu2  ;;  %4617 = vst.msk [vmem:[%s9143_s3 + $0x6c8] sm:$0xf] %vm4182_vm0, %v4135_v37  ;;  %v3894_v42 = vpack.c.bf16 %v3413_v38, %v3413_v38 }
 0x2ed   :  { %v2799_v43 = vadd.f32 %v7775_v7, %v2798_v40  ;;  %4256 = vst.msk [vmem:[%s9143_s3 + $0x124] sm:$0xf] %vm4182_vm0, %v3774_v39  ;;  %v3103_v45 = vpop.f32.mrf.mxu3 }
 0x2ee   :  { %4376 = vst.msk [vmem:[%s9143_s3 + $0x304] sm:$0xf] %vm4182_vm0, %v3894_v42  ;;  %v3104_v47 = vadd.f32 %v7775_v7, %v3103_v45  ;;  %v2201_v48 = vpop.f32.mrf.mxu0 }
 0x2ef   :  { %v3533_v51 = vmax.f32 %v2799_v43, 0.0  ;;  %v2202_v52 = vadd.f32 %v7775_v7, %v2201_v48  ;;  %v2501_v53 = vpop.f32.mrf.mxu1 }
 0x2f0   :  { %v3655_v54 = vmax.f32 %v3104_v47, 0.0  ;;  %v2502_v55 = vadd.f32 %v7775_v7, %v2501_v53  ;;  %v5828_v53 = vld [vmem:[%s9141_s0 + $0x538] sm:$0xff] }
 0x2f1   :  { %v4014_v57 = vpack.c.bf16 %v3533_v51, %v3533_v51  ;;  %2840 = vmatmul.bf16.gmra.mxu2 %v5826_v44  ;;  %v3294_v58 = vmax.f32 %v2202_v52, 0.0  ;;  %2240 = vmatmul.bf16.gmra.mxu0 %v5706_v46 }
 0x2f2   :  { %v4136_v41 = vpack.c.bf16 %v3655_v54, %v3655_v54  ;;  %v3414_v59 = vmax.f32 %v2502_v55, 0.0  ;;  %2540 = vmatmul.bf16.gmra.mxu1 %v5766_v49  ;;  %3145 = vmatmul.bf16.gmra.mxu3 %v5887_v50  ;;  %v5708_v55 = vld [vmem:[%s9141_s0 + $0x178] sm:$0xff] }
 0x2f3   :  { %4496 = vst.msk [vmem:[%s9143_s3 + $0x4e4] sm:$0xf] %vm4182_vm0, %v4014_v57  ;;  %v3775_v60 = vpack.c.bf16 %v3294_v58, %v3294_v58 }
 0x2f4   :  { %v2801_v61 = vpop.f32.mrf.mxu2  ;;  %4618 = vst.msk [vmem:[%s9143_s3 + $0x6cc] sm:$0xf] %vm4182_vm0, %v4136_v41  ;;  %v3895_v62 = vpack.c.bf16 %v3414_v59, %v3414_v59  ;;  %v5768_v41 = vld [vmem:[%s9141_s0 + $0x358] sm:$0xff]  ;;  %v5889_v59 = vld [vmem:[%s9141_s0 + $0x720] sm:$0xff] }
 0x2f5   :  { %v2802_v63 = vadd.f32 %v7775_v7, %v2801_v61  ;;  %4257 = vst.msk [vmem:[%s9143_s3 + $0x128] sm:$0xf] %vm4182_vm0, %v3775_v60  ;;  %v3106_v0 = vpop.f32.mrf.mxu3 }
 0x2f6   :  { %4377 = vst.msk [vmem:[%s9143_s3 + $0x308] sm:$0xf] %vm4182_vm0, %v3895_v62  ;;  %v3107_v1 = vadd.f32 %v7775_v7, %v3106_v0  ;;  %v2203_v2 = vpop.f32.mrf.mxu0 }
 0x2f7   :  { %v3534_v3 = vmax.f32 %v2802_v63, 0.0  ;;  %v2204_v4 = vadd.f32 %v7775_v7, %v2203_v2  ;;  %v2503_v5 = vpop.f32.mrf.mxu1 }
 0x2f8   :  { %v3656_v6 = vmax.f32 %v3107_v1, 0.0  ;;  %v2504_v56 = vadd.f32 %v7775_v7, %v2503_v5 }
 0x2f9   :  { %v4015_v8 = vpack.c.bf16 %v3534_v3, %v3534_v3  ;;  %v3295_v9 = vmax.f32 %v2204_v4, 0.0 }
 0x2fa   :  { %v4137_v10 = vpack.c.bf16 %v3656_v6, %v3656_v6  ;;  %v3415_v11 = vmax.f32 %v2504_v56, 0.0 }
 0x2fb   :  { %4497 = vst.msk [vmem:[%s9143_s3 + $0x4e8] sm:$0xf] %vm4182_vm0, %v4015_v8  ;;  %v3776_v12 = vpack.c.bf16 %v3295_v9, %v3295_v9 }
 0x2fc   :  { %v2803_v13 = vpop.f32.mrf.mxu2  ;;  %4619 = vst.msk [vmem:[%s9143_s3 + $0x6d0] sm:$0xf] %vm4182_vm0, %v4137_v10  ;;  %v3896_v14 = vpack.c.bf16 %v3415_v11, %v3415_v11 }
 0x2fd   :  { %v2804_v15 = vadd.f32 %v7775_v7, %v2803_v13  ;;  %4258 = vst.msk [vmem:[%s9143_s3 + $0x12c] sm:$0xf] %vm4182_vm0, %v3776_v12  ;;  %v3108_v17 = vpop.f32.mrf.mxu3 }
 0x2fe   :  { %4378 = vst.msk [vmem:[%s9143_s3 + $0x30c] sm:$0xf] %vm4182_vm0, %v3896_v14  ;;  %v3109_v19 = vadd.f32 %v7775_v7, %v3108_v17  ;;  %v2206_v20 = vpop.f32.mrf.mxu0 }
 0x2ff   :  { %v3535_v23 = vmax.f32 %v2804_v15, 0.0  ;;  %v2207_v24 = vadd.f32 %v7775_v7, %v2206_v20  ;;  %v2506_v25 = vpop.f32.mrf.mxu1 }
 0x300   :  { %v3657_v26 = vmax.f32 %v3109_v19, 0.0  ;;  %v2507_v27 = vadd.f32 %v7775_v7, %v2506_v25  ;;  %v5829_v25 = vld [vmem:[%s9141_s0 + $0x540] sm:$0xff] }
 0x301   :  { %v4016_v28 = vpack.c.bf16 %v3535_v23, %v3535_v23  ;;  %2845 = vmatmul.bf16.gmra.mxu2 %v5827_v16  ;;  %v3296_v29 = vmax.f32 %v2207_v24, 0.0  ;;  %2245 = vmatmul.bf16.gmra.mxu0 %v5707_v18 }
 0x302   :  { %v4138_v30 = vpack.c.bf16 %v3657_v26, %v3657_v26  ;;  %v3416_v31 = vmax.f32 %v2507_v27, 0.0  ;;  %2545 = vmatmul.bf16.gmra.mxu1 %v5767_v21  ;;  %3150 = vmatmul.bf16.gmra.mxu3 %v5888_v22  ;;  %v5709_v27 = vld [vmem:[%s9141_s0 + $0x180] sm:$0xff] }
 0x303   :  { %4498 = vst.msk [vmem:[%s9143_s3 + $0x4ec] sm:$0xf] %vm4182_vm0, %v4016_v28  ;;  %v3777_v32 = vpack.c.bf16 %v3296_v29, %v3296_v29 }
 0x304   :  { %v2806_v33 = vpop.f32.mrf.mxu2  ;;  %4620 = vst.msk [vmem:[%s9143_s3 + $0x6d4] sm:$0xf] %vm4182_vm0, %v4138_v30  ;;  %v3897_v34 = vpack.c.bf16 %v3416_v31, %v3416_v31  ;;  %v5769_v30 = vld [vmem:[%s9141_s0 + $0x360] sm:$0xff]  ;;  %v5890_v31 = vld [vmem:[%s9141_s0 + $0x728] sm:$0xff] }
 0x305   :  { %v2807_v35 = vadd.f32 %v7775_v7, %v2806_v33  ;;  %4259 = vst.msk [vmem:[%s9143_s3 + $0x130] sm:$0xf] %vm4182_vm0, %v3777_v32  ;;  %v3111_v36 = vpop.f32.mrf.mxu3 }
 0x306   :  { %4379 = vst.msk [vmem:[%s9143_s3 + $0x310] sm:$0xf] %vm4182_vm0, %v3897_v34  ;;  %v3112_v37 = vadd.f32 %v7775_v7, %v3111_v36  ;;  %v2208_v38 = vpop.f32.mrf.mxu0 }
 0x307   :  { %v3536_v39 = vmax.f32 %v2807_v35, 0.0  ;;  %v2209_v40 = vadd.f32 %v7775_v7, %v2208_v38  ;;  %v2508_v42 = vpop.f32.mrf.mxu1 }
 0x308   :  { %v3658_v43 = vmax.f32 %v3112_v37, 0.0  ;;  %v2509_v44 = vadd.f32 %v7775_v7, %v2508_v42 }
 0x309   :  { %v4017_v45 = vpack.c.bf16 %v3536_v39, %v3536_v39  ;;  %v3297_v46 = vmax.f32 %v2209_v40, 0.0 }
 0x30a   :  { %v4139_v47 = vpack.c.bf16 %v3658_v43, %v3658_v43  ;;  %v3417_v48 = vmax.f32 %v2509_v44, 0.0 }
 0x30b   :  { %4499 = vst.msk [vmem:[%s9143_s3 + $0x4f0] sm:$0xf] %vm4182_vm0, %v4017_v45  ;;  %v3778_v49 = vpack.c.bf16 %v3297_v46, %v3297_v46 }
 0x30c   :  { %v2808_v50 = vpop.f32.mrf.mxu2  ;;  %4621 = vst.msk [vmem:[%s9143_s3 + $0x6d8] sm:$0xf] %vm4182_vm0, %v4139_v47  ;;  %v3898_v51 = vpack.c.bf16 %v3417_v48, %v3417_v48 }
 0x30d   :  { %v2809_v52 = vadd.f32 %v7775_v7, %v2808_v50  ;;  %4260 = vst.msk [vmem:[%s9143_s3 + $0x134] sm:$0xf] %vm4182_vm0, %v3778_v49  ;;  %v3113_v54 = vpop.f32.mrf.mxu3 }
 0x30e   :  { %4380 = vst.msk [vmem:[%s9143_s3 + $0x314] sm:$0xf] %vm4182_vm0, %v3898_v51  ;;  %v3114_v57 = vadd.f32 %v7775_v7, %v3113_v54  ;;  %v2211_v58 = vpop.f32.mrf.mxu0 }
 0x30f   :  { %v3537_v60 = vmax.f32 %v2809_v52, 0.0  ;;  %v2212_v61 = vadd.f32 %v7775_v7, %v2211_v58  ;;  %v2511_v62 = vpop.f32.mrf.mxu1 }
 0x310   :  { %v3659_v63 = vmax.f32 %v3114_v57, 0.0  ;;  %v2512_v0 = vadd.f32 %v7775_v7, %v2511_v62  ;;  %v5830_v62 = vld [vmem:[%s9141_s0 + $0x548] sm:$0xff] }
 0x311   :  { %v4018_v1 = vpack.c.bf16 %v3537_v60, %v3537_v60  ;;  %2850 = vmatmul.bf16.gmra.mxu2 %v5828_v53  ;;  %v3298_v2 = vmax.f32 %v2212_v61, 0.0  ;;  %2250 = vmatmul.bf16.gmra.mxu0 %v5708_v55 }
 0x312   :  { %v4140_v3 = vpack.c.bf16 %v3659_v63, %v3659_v63  ;;  %v3418_v4 = vmax.f32 %v2512_v0, 0.0  ;;  %2550 = vmatmul.bf16.gmra.mxu1 %v5768_v41  ;;  %3155 = vmatmul.bf16.gmra.mxu3 %v5889_v59  ;;  %v5710_v0 = vld [vmem:[%s9141_s0 + $0x188] sm:$0xff] }
 0x313   :  { %4500 = vst.msk [vmem:[%s9143_s3 + $0x4f4] sm:$0xf] %vm4182_vm0, %v4018_v1  ;;  %v3779_v5 = vpack.c.bf16 %v3298_v2, %v3298_v2 }
 0x314   :  { %v2811_v6 = vpop.f32.mrf.mxu2  ;;  %4622 = vst.msk [vmem:[%s9143_s3 + $0x6dc] sm:$0xf] %vm4182_vm0, %v4140_v3  ;;  %v3899_v56 = vpack.c.bf16 %v3418_v4, %v3418_v4  ;;  %v5770_v3 = vld [vmem:[%s9141_s0 + $0x368] sm:$0xff]  ;;  %v5891_v4 = vld [vmem:[%s9141_s0 + $0x730] sm:$0xff] }
 0x315   :  { %v2812_v8 = vadd.f32 %v7775_v7, %v2811_v6  ;;  %4261 = vst.msk [vmem:[%s9143_s3 + $0x138] sm:$0xf] %vm4182_vm0, %v3779_v5  ;;  %v3116_v9 = vpop.f32.mrf.mxu3 }
 0x316   :  { %4381 = vst.msk [vmem:[%s9143_s3 + $0x318] sm:$0xf] %vm4182_vm0, %v3899_v56  ;;  %v3117_v10 = vadd.f32 %v7775_v7, %v3116_v9  ;;  %v2213_v11 = vpop.f32.mrf.mxu0 }
 0x317   :  { %v3538_v12 = vmax.f32 %v2812_v8, 0.0  ;;  %v2214_v13 = vadd.f32 %v7775_v7, %v2213_v11  ;;  %v2513_v14 = vpop.f32.mrf.mxu1 }
 0x318   :  { %v3660_v15 = vmax.f32 %v3117_v10, 0.0  ;;  %v2514_v16 = vadd.f32 %v7775_v7, %v2513_v14 }
 0x319   :  { %v4019_v17 = vpack.c.bf16 %v3538_v12, %v3538_v12  ;;  %v3299_v18 = vmax.f32 %v2214_v13, 0.0 }
 0x31a   :  { %v4141_v19 = vpack.c.bf16 %v3660_v15, %v3660_v15  ;;  %v3419_v20 = vmax.f32 %v2514_v16, 0.0 }
 0x31b   :  { %4501 = vst.msk [vmem:[%s9143_s3 + $0x4f8] sm:$0xf] %vm4182_vm0, %v4019_v17  ;;  %v3780_v21 = vpack.c.bf16 %v3299_v18, %v3299_v18 }
 0x31c   :  { %v2813_v22 = vpop.f32.mrf.mxu2  ;;  %4623 = vst.msk [vmem:[%s9143_s3 + $0x6e0] sm:$0xf] %vm4182_vm0, %v4141_v19  ;;  %v3900_v23 = vpack.c.bf16 %v3419_v20, %v3419_v20 }
 0x31d   :  { %v2814_v24 = vadd.f32 %v7775_v7, %v2813_v22  ;;  %4262 = vst.msk [vmem:[%s9143_s3 + $0x13c] sm:$0xf] %vm4182_vm0, %v3780_v21  ;;  %v3118_v26 = vpop.f32.mrf.mxu3 }
 0x31e   :  { %4382 = vst.msk [vmem:[%s9143_s3 + $0x31c] sm:$0xf] %vm4182_vm0, %v3900_v23  ;;  %v3119_v28 = vadd.f32 %v7775_v7, %v3118_v26  ;;  %v2216_v29 = vpop.f32.mrf.mxu0 }
 0x31f   :  { %v3539_v32 = vmax.f32 %v2814_v24, 0.0  ;;  %v2217_v33 = vadd.f32 %v7775_v7, %v2216_v29  ;;  %v2516_v34 = vpop.f32.mrf.mxu1 }
 0x320   :  { %v3661_v35 = vmax.f32 %v3119_v28, 0.0  ;;  %v2517_v36 = vadd.f32 %v7775_v7, %v2516_v34  ;;  %v5831_v34 = vld [vmem:[%s9141_s0 + $0x550] sm:$0xff] }
 0x321   :  { %v4020_v37 = vpack.c.bf16 %v3539_v32, %v3539_v32  ;;  %2855 = vmatmul.bf16.gmra.mxu2 %v5829_v25  ;;  %v3300_v38 = vmax.f32 %v2217_v33, 0.0  ;;  %2255 = vmatmul.bf16.gmra.mxu0 %v5709_v27 }
 0x322   :  { %v4142_v39 = vpack.c.bf16 %v3661_v35, %v3661_v35  ;;  %v3420_v40 = vmax.f32 %v2517_v36, 0.0  ;;  %2555 = vmatmul.bf16.gmra.mxu1 %v5769_v30  ;;  %3160 = vmatmul.bf16.gmra.mxu3 %v5890_v31  ;;  %v5711_v36 = vld [vmem:[%s9141_s0 + $0x190] sm:$0xff] }
 0x323   :  { %4502 = vst.msk [vmem:[%s9143_s3 + $0x4fc] sm:$0xf] %vm4182_vm0, %v4020_v37  ;;  %v3781_v42 = vpack.c.bf16 %v3300_v38, %v3300_v38 }
 0x324   :  { %v2816_v43 = vpop.f32.mrf.mxu2  ;;  %4624 = vst.msk [vmem:[%s9143_s3 + $0x6e4] sm:$0xf] %vm4182_vm0, %v4142_v39  ;;  %v3901_v44 = vpack.c.bf16 %v3420_v40, %v3420_v40  ;;  %v5771_v39 = vld [vmem:[%s9141_s0 + $0x370] sm:$0xff]  ;;  %v5892_v40 = vld [vmem:[%s9141_s0 + $0x738] sm:$0xff] }
 0x325   :  { %v2817_v45 = vadd.f32 %v7775_v7, %v2816_v43  ;;  %4263 = vst.msk [vmem:[%s9143_s3 + $0x140] sm:$0xf] %vm4182_vm0, %v3781_v42  ;;  %v3121_v46 = vpop.f32.mrf.mxu3 }
 0x326   :  { %4383 = vst.msk [vmem:[%s9143_s3 + $0x320] sm:$0xf] %vm4182_vm0, %v3901_v44  ;;  %v3122_v47 = vadd.f32 %v7775_v7, %v3121_v46  ;;  %v2218_v48 = vpop.f32.mrf.mxu0 }
 0x327   :  { %v3540_v49 = vmax.f32 %v2817_v45, 0.0  ;;  %v2219_v50 = vadd.f32 %v7775_v7, %v2218_v48  ;;  %v2518_v51 = vpop.f32.mrf.mxu1 }
 0x328   :  { %v3662_v52 = vmax.f32 %v3122_v47, 0.0  ;;  %v2519_v53 = vadd.f32 %v7775_v7, %v2518_v51 }
 0x329   :  { %v4021_v54 = vpack.c.bf16 %v3540_v49, %v3540_v49  ;;  %v3301_v55 = vmax.f32 %v2219_v50, 0.0 }
 0x32a   :  { %v4143_v57 = vpack.c.bf16 %v3662_v52, %v3662_v52  ;;  %v3421_v58 = vmax.f32 %v2519_v53, 0.0 }
 0x32b   :  { %4503 = vst.msk [vmem:[%s9143_s3 + $0x500] sm:$0xf] %vm4182_vm0, %v4021_v54  ;;  %v3782_v41 = vpack.c.bf16 %v3301_v55, %v3301_v55 }
 0x32c   :  { %v2818_v59 = vpop.f32.mrf.mxu2  ;;  %4625 = vst.msk [vmem:[%s9143_s3 + $0x6e8] sm:$0xf] %vm4182_vm0, %v4143_v57  ;;  %v3902_v60 = vpack.c.bf16 %v3421_v58, %v3421_v58 }
 0x32d   :  { %v2819_v61 = vadd.f32 %v7775_v7, %v2818_v59  ;;  %4264 = vst.msk [vmem:[%s9143_s3 + $0x144] sm:$0xf] %vm4182_vm0, %v3782_v41  ;;  %v3123_v63 = vpop.f32.mrf.mxu3 }
 0x32e   :  { %4384 = vst.msk [vmem:[%s9143_s3 + $0x324] sm:$0xf] %vm4182_vm0, %v3902_v60  ;;  %v3124_v1 = vadd.f32 %v7775_v7, %v3123_v63  ;;  %v2221_v2 = vpop.f32.mrf.mxu0 }
 0x32f   :  { %v3541_v5 = vmax.f32 %v2819_v61, 0.0  ;;  %v2222_v6 = vadd.f32 %v7775_v7, %v2221_v2  ;;  %v2521_v56 = vpop.f32.mrf.mxu1 }
 0x330   :  { %v3663_v8 = vmax.f32 %v3124_v1, 0.0  ;;  %v2522_v9 = vadd.f32 %v7775_v7, %v2521_v56  ;;  %v5832_v56 = vld [vmem:[%s9141_s0 + $0x558] sm:$0xff] }
 0x331   :  { %v4022_v10 = vpack.c.bf16 %v3541_v5, %v3541_v5  ;;  %2860 = vmatmul.bf16.gmra.mxu2 %v5830_v62  ;;  %v3302_v11 = vmax.f32 %v2222_v6, 0.0  ;;  %2260 = vmatmul.bf16.gmra.mxu0 %v5710_v0 }
 0x332   :  { %v4144_v12 = vpack.c.bf16 %v3663_v8, %v3663_v8  ;;  %v3422_v13 = vmax.f32 %v2522_v9, 0.0  ;;  %2560 = vmatmul.bf16.gmra.mxu1 %v5770_v3  ;;  %3165 = vmatmul.bf16.gmra.mxu3 %v5891_v4  ;;  %v5712_v9 = vld [vmem:[%s9141_s0 + $0x198] sm:$0xff] }
 0x333   :  { %4504 = vst.msk [vmem:[%s9143_s3 + $0x504] sm:$0xf] %vm4182_vm0, %v4022_v10  ;;  %v3783_v14 = vpack.c.bf16 %v3302_v11, %v3302_v11 }
 0x334   :  { %v2821_v15 = vpop.f32.mrf.mxu2  ;;  %4626 = vst.msk [vmem:[%s9143_s3 + $0x6ec] sm:$0xf] %vm4182_vm0, %v4144_v12  ;;  %v3903_v16 = vpack.c.bf16 %v3422_v13, %v3422_v13  ;;  %v5772_v12 = vld [vmem:[%s9141_s0 + $0x378] sm:$0xff]  ;;  %v5893_v13 = vld [vmem:[%s9141_s0 + $0x740] sm:$0xff] }
 0x335   :  { %v2822_v17 = vadd.f32 %v7775_v7, %v2821_v15  ;;  %4265 = vst.msk [vmem:[%s9143_s3 + $0x148] sm:$0xf] %vm4182_vm0, %v3783_v14  ;;  %v3126_v18 = vpop.f32.mrf.mxu3 }
 0x336   :  { %4385 = vst.msk [vmem:[%s9143_s3 + $0x328] sm:$0xf] %vm4182_vm0, %v3903_v16  ;;  %v3127_v19 = vadd.f32 %v7775_v7, %v3126_v18  ;;  %v2223_v20 = vpop.f32.mrf.mxu0  ;;  %v8343_v18 = vld [vmem:[%s9142_s2] ss:$0 sm:$0xff] }
 0x337   :  { %v3542_v21 = vmax.f32 %v2822_v17, 0.0  ;;  %v2224_v22 = vadd.f32 %v7775_v7, %v2223_v20  ;;  %v2523_v23 = vpop.f32.mrf.mxu1 }
 0x338   :  { %v3664_v24 = vmax.f32 %v3127_v19, 0.0  ;;  %v2524_v25 = vadd.f32 %v7775_v7, %v2523_v23 }
 0x339   :  { %v4023_v26 = vpack.c.bf16 %v3542_v21, %v3542_v21  ;;  %v3303_v27 = vmax.f32 %v2224_v22, 0.0 }
 0x33a   :  { %v4145_v28 = vpack.c.bf16 %v3664_v24, %v3664_v24  ;;  %v3423_v29 = vmax.f32 %v2524_v25, 0.0 }
 0x33b   :  { %4505 = vst.msk [vmem:[%s9143_s3 + $0x508] sm:$0xf] %vm4182_vm0, %v4023_v26  ;;  %v3784_v30 = vpack.c.bf16 %v3303_v27, %v3303_v27 }
 0x33c   :  { %v2823_v31 = vpop.f32.mrf.mxu2  ;;  %4627 = vst.msk [vmem:[%s9143_s3 + $0x6f0] sm:$0xf] %vm4182_vm0, %v4145_v28  ;;  %v3904_v32 = vpack.c.bf16 %v3423_v29, %v3423_v29 }
 0x33d   :  { %v2824_v33 = vadd.f32 %v7775_v7, %v2823_v31  ;;  %4266 = vst.msk [vmem:[%s9143_s3 + $0x14c] sm:$0xf] %vm4182_vm0, %v3784_v30  ;;  %v3128_v35 = vpop.f32.mrf.mxu3 }
 0x33e   :  { %4386 = vst.msk [vmem:[%s9143_s3 + $0x32c] sm:$0xf] %vm4182_vm0, %v3904_v32  ;;  %v3129_v37 = vadd.f32 %v7775_v7, %v3128_v35  ;;  %v2226_v38 = vpop.f32.mrf.mxu0 }
 0x33f   :  { %v3543_v42 = vmax.f32 %v2824_v33, 0.0  ;;  %v2227_v43 = vadd.f32 %v7775_v7, %v2226_v38  ;;  %v2526_v44 = vpop.f32.mrf.mxu1 }
 0x340   :  { %v3665_v45 = vmax.f32 %v3129_v37, 0.0  ;;  %v2527_v46 = vadd.f32 %v7775_v7, %v2526_v44  ;;  %v5833_v44 = vld [vmem:[%s9141_s0 + $0x560] sm:$0xff] }
 0x341   :  { %v4024_v47 = vpack.c.bf16 %v3543_v42, %v3543_v42  ;;  %2865 = vmatmul.bf16.gmra.mxu2 %v5831_v34  ;;  %v3304_v48 = vmax.f32 %v2227_v43, 0.0  ;;  %2265 = vmatmul.bf16.gmra.mxu0 %v5711_v36 }
 0x342   :  { %v4146_v49 = vpack.c.bf16 %v3665_v45, %v3665_v45  ;;  %v3424_v50 = vmax.f32 %v2527_v46, 0.0  ;;  %2565 = vmatmul.bf16.gmra.mxu1 %v5771_v39  ;;  %3170 = vmatmul.bf16.gmra.mxu3 %v5892_v40  ;;  %v5713_v46 = vld [vmem:[%s9141_s0 + $0x1a0] sm:$0xff] }
 0x343   :  { %4506 = vst.msk [vmem:[%s9143_s3 + $0x50c] sm:$0xf] %vm4182_vm0, %v4024_v47  ;;  %v3785_v51 = vpack.c.bf16 %v3304_v48, %v3304_v48 }
 0x344   :  { %v2826_v52 = vpop.f32.mrf.mxu2  ;;  %4628 = vst.msk [vmem:[%s9143_s3 + $0x6f4] sm:$0xf] %vm4182_vm0, %v4146_v49  ;;  %v3905_v53 = vpack.c.bf16 %v3424_v50, %v3424_v50  ;;  %v5773_v49 = vld [vmem:[%s9141_s0 + $0x380] sm:$0xff]  ;;  %v5894_v50 = vld [vmem:[%s9141_s0 + $0x748] sm:$0xff] }
 0x345   :  { %v2827_v54 = vadd.f32 %v7775_v7, %v2826_v52  ;;  %4267 = vst.msk [vmem:[%s9143_s3 + $0x150] sm:$0xf] %vm4182_vm0, %v3785_v51  ;;  %v3131_v55 = vpop.f32.mrf.mxu3 }
 0x346   :  { %4387 = vst.msk [vmem:[%s9143_s3 + $0x330] sm:$0xf] %vm4182_vm0, %v3905_v53  ;;  %v3132_v57 = vadd.f32 %v7775_v7, %v3131_v55  ;;  %v2228_v58 = vpop.f32.mrf.mxu0 }
 0x347   :  { %v3544_v41 = vmax.f32 %v2827_v54, 0.0  ;;  %v2229_v59 = vadd.f32 %v7775_v7, %v2228_v58  ;;  %v2528_v60 = vpop.f32.mrf.mxu1 }
 0x348   :  { %v3666_v61 = vmax.f32 %v3132_v57, 0.0  ;;  %v2529_v62 = vadd.f32 %v7775_v7, %v2528_v60 }
 0x349   :  { %v4025_v63 = vpack.c.bf16 %v3544_v41, %v3544_v41  ;;  %v3305_v0 = vmax.f32 %v2229_v59, 0.0 }
 0x34a   :  { %v4147_v1 = vpack.c.bf16 %v3666_v61, %v3666_v61  ;;  %v3425_v2 = vmax.f32 %v2529_v62, 0.0 }
 0x34b   :  { %4507 = vst.msk [vmem:[%s9143_s3 + $0x510] sm:$0xf] %vm4182_vm0, %v4025_v63  ;;  %v3786_v3 = vpack.c.bf16 %v3305_v0, %v3305_v0 }
 0x34c   :  { %v2828_v4 = vpop.f32.mrf.mxu2  ;;  %4629 = vst.msk [vmem:[%s9143_s3 + $0x6f8] sm:$0xf] %vm4182_vm0, %v4147_v1  ;;  %v3906_v5 = vpack.c.bf16 %v3425_v2, %v3425_v2 }
 0x34d   :  { %v2829_v6 = vadd.f32 %v7775_v7, %v2828_v4  ;;  %4268 = vst.msk [vmem:[%s9143_s3 + $0x154] sm:$0xf] %vm4182_vm0, %v3786_v3  ;;  %v3133_v8 = vpop.f32.mrf.mxu3 }
 0x34e   :  { %4388 = vst.msk [vmem:[%s9143_s3 + $0x334] sm:$0xf] %vm4182_vm0, %v3906_v5  ;;  %v3134_v10 = vadd.f32 %v7775_v7, %v3133_v8  ;;  %v2231_v11 = vpop.f32.mrf.mxu0 }
 0x34f   :  { %v3545_v14 = vmax.f32 %v2829_v6, 0.0  ;;  %v2232_v15 = vadd.f32 %v7775_v7, %v2231_v11  ;;  %v2531_v16 = vpop.f32.mrf.mxu1 }
 0x350   :  { %v3667_v17 = vmax.f32 %v3134_v10, 0.0  ;;  %v2532_v19 = vadd.f32 %v8343_v18, %v2531_v16  ;;  %v5834_v16 = vld [vmem:[%s9141_s0 + $0x568] sm:$0xff] }
 0x351   :  { %v4026_v20 = vpack.c.bf16 %v3545_v14, %v3545_v14  ;;  %2870 = vmatmul.bf16.gmra.mxu2 %v5832_v56  ;;  %v3306_v21 = vmax.f32 %v2232_v15, 0.0  ;;  %2270 = vmatmul.bf16.gmra.mxu0 %v5712_v9 }
 0x352   :  { %v4148_v22 = vpack.c.bf16 %v3667_v17, %v3667_v17  ;;  %v3426_v23 = vmax.f32 %v2532_v19, 0.0  ;;  %2570 = vmatmul.bf16.gmra.mxu1 %v5772_v12  ;;  %3175 = vmatmul.bf16.gmra.mxu3 %v5893_v13  ;;  %v5714_v19 = vld [vmem:[%s9141_s0 + $0x1a8] sm:$0xff] }
 0x353   :  { %4508 = vst.msk [vmem:[%s9143_s3 + $0x514] sm:$0xf] %vm4182_vm0, %v4026_v20  ;;  %v3787_v7 = vpack.c.bf16 %v3306_v21, %v3306_v21 }
 0x354   :  { %v2831_v24 = vpop.f32.mrf.mxu2  ;;  %4630 = vst.msk [vmem:[%s9143_s3 + $0x6fc] sm:$0xf] %vm4182_vm0, %v4148_v22  ;;  %v3907_v25 = vpack.c.bf16 %v3426_v23, %v3426_v23  ;;  %v5774_v22 = vld [vmem:[%s9141_s0 + $0x388] sm:$0xff]  ;;  %v5895_v23 = vld [vmem:[%s9141_s0 + $0x750] sm:$0xff] }
 0x355   :  { %v2832_v26 = vadd.f32 %v8343_v18, %v2831_v24  ;;  %4269 = vst.msk [vmem:[%s9143_s3 + $0x158] sm:$0xf] %vm4182_vm0, %v3787_v7  ;;  %v3136_v27 = vpop.f32.mrf.mxu3 }
 0x356   :  { %4389 = vst.msk [vmem:[%s9143_s3 + $0x338] sm:$0xf] %vm4182_vm0, %v3907_v25  ;;  %v3137_v28 = vadd.f32 %v8343_v18, %v3136_v27  ;;  %v2233_v29 = vpop.f32.mrf.mxu0 }
 0x357   :  { %v3546_v30 = vmax.f32 %v2832_v26, 0.0  ;;  %v2234_v31 = vadd.f32 %v8343_v18, %v2233_v29  ;;  %v2533_v32 = vpop.f32.mrf.mxu1 }
 0x358   :  { %v3668_v33 = vmax.f32 %v3137_v28, 0.0  ;;  %v2534_v34 = vadd.f32 %v8343_v18, %v2533_v32 }
 0x359   :  { %v4027_v35 = vpack.c.bf16 %v3546_v30, %v3546_v30  ;;  %v3307_v36 = vmax.f32 %v2234_v31, 0.0 }
 0x35a   :  { %v4149_v37 = vpack.c.bf16 %v3668_v33, %v3668_v33  ;;  %v3427_v38 = vmax.f32 %v2534_v34, 0.0 }
 0x35b   :  { %4509 = vst.msk [vmem:[%s9143_s3 + $0x518] sm:$0xf] %vm4182_vm0, %v4027_v35  ;;  %v3788_v39 = vpack.c.bf16 %v3307_v36, %v3307_v36 }
 0x35c   :  { %v2833_v40 = vpop.f32.mrf.mxu2  ;;  %4631 = vst.msk [vmem:[%s9143_s3 + $0x700] sm:$0xf] %vm4182_vm0, %v4149_v37  ;;  %v3908_v42 = vpack.c.bf16 %v3427_v38, %v3427_v38 }
 0x35d   :  { %v2834_v43 = vadd.f32 %v8343_v18, %v2833_v40  ;;  %4270 = vst.msk [vmem:[%s9143_s3 + $0x15c] sm:$0xf] %vm4182_vm0, %v3788_v39  ;;  %v3138_v45 = vpop.f32.mrf.mxu3 }
 0x35e   :  { %4390 = vst.msk [vmem:[%s9143_s3 + $0x33c] sm:$0xf] %vm4182_vm0, %v3908_v42  ;;  %v3139_v47 = vadd.f32 %v8343_v18, %v3138_v45  ;;  %v2236_v48 = vpop.f32.mrf.mxu0 }
 0x35f   :  { %v3547_v51 = vmax.f32 %v2834_v43, 0.0  ;;  %v2237_v52 = vadd.f32 %v8343_v18, %v2236_v48  ;;  %v2536_v53 = vpop.f32.mrf.mxu1 }
 0x360   :  { %v3669_v54 = vmax.f32 %v3139_v47, 0.0  ;;  %v2537_v55 = vadd.f32 %v8343_v18, %v2536_v53  ;;  %v5835_v53 = vld [vmem:[%s9141_s0 + $0x570] sm:$0xff] }
 0x361   :  { %v4028_v57 = vpack.c.bf16 %v3547_v51, %v3547_v51  ;;  %2875 = vmatmul.bf16.gmra.mxu2 %v5833_v44  ;;  %v3308_v58 = vmax.f32 %v2237_v52, 0.0  ;;  %2275 = vmatmul.bf16.gmra.mxu0 %v5713_v46 }
 0x362   :  { %v4150_v41 = vpack.c.bf16 %v3669_v54, %v3669_v54  ;;  %v3428_v59 = vmax.f32 %v2537_v55, 0.0  ;;  %2575 = vmatmul.bf16.gmra.mxu1 %v5773_v49  ;;  %3180 = vmatmul.bf16.gmra.mxu3 %v5894_v50  ;;  %v5715_v55 = vld [vmem:[%s9141_s0 + $0x1b0] sm:$0xff] }
 0x363   :  { %4510 = vst.msk [vmem:[%s9143_s3 + $0x51c] sm:$0xf] %vm4182_vm0, %v4028_v57  ;;  %v3789_v60 = vpack.c.bf16 %v3308_v58, %v3308_v58 }
 0x364   :  { %v2836_v61 = vpop.f32.mrf.mxu2  ;;  %4632 = vst.msk [vmem:[%s9143_s3 + $0x704] sm:$0xf] %vm4182_vm0, %v4150_v41  ;;  %v3909_v62 = vpack.c.bf16 %v3428_v59, %v3428_v59  ;;  %v5775_v41 = vld [vmem:[%s9141_s0 + $0x390] sm:$0xff]  ;;  %v5896_v59 = vld [vmem:[%s9141_s0 + $0x758] sm:$0xff] }
 0x365   :  { %v2837_v63 = vadd.f32 %v8343_v18, %v2836_v61  ;;  %4271 = vst.msk [vmem:[%s9143_s3 + $0x160] sm:$0xf] %vm4182_vm0, %v3789_v60  ;;  %v3141_v0 = vpop.f32.mrf.mxu3 }
 0x366   :  { %4391 = vst.msk [vmem:[%s9143_s3 + $0x340] sm:$0xf] %vm4182_vm0, %v3909_v62  ;;  %v3142_v1 = vadd.f32 %v8343_v18, %v3141_v0  ;;  %v2238_v2 = vpop.f32.mrf.mxu0 }
 0x367   :  { %v3548_v3 = vmax.f32 %v2837_v63, 0.0  ;;  %v2239_v4 = vadd.f32 %v8343_v18, %v2238_v2  ;;  %v2538_v5 = vpop.f32.mrf.mxu1 }
 0x368   :  { %v3670_v6 = vmax.f32 %v3142_v1, 0.0  ;;  %v2539_v56 = vadd.f32 %v8343_v18, %v2538_v5 }
 0x369   :  { %v4029_v8 = vpack.c.bf16 %v3548_v3, %v3548_v3  ;;  %v3309_v9 = vmax.f32 %v2239_v4, 0.0 }
 0x36a   :  { %v4151_v10 = vpack.c.bf16 %v3670_v6, %v3670_v6  ;;  %v3429_v11 = vmax.f32 %v2539_v56, 0.0 }
 0x36b   :  { %4511 = vst.msk [vmem:[%s9143_s3 + $0x520] sm:$0xf] %vm4182_vm0, %v4029_v8  ;;  %v3790_v12 = vpack.c.bf16 %v3309_v9, %v3309_v9 }
 0x36c   :  { %v2838_v13 = vpop.f32.mrf.mxu2  ;;  %4633 = vst.msk [vmem:[%s9143_s3 + $0x708] sm:$0xf] %vm4182_vm0, %v4151_v10  ;;  %v3910_v14 = vpack.c.bf16 %v3429_v11, %v3429_v11 }
 0x36d   :  { %v2839_v15 = vadd.f32 %v8343_v18, %v2838_v13  ;;  %4272 = vst.msk [vmem:[%s9143_s3 + $0x164] sm:$0xf] %vm4182_vm0, %v3790_v12  ;;  %v3143_v17 = vpop.f32.mrf.mxu3 }
 0x36e   :  { %4392 = vst.msk [vmem:[%s9143_s3 + $0x344] sm:$0xf] %vm4182_vm0, %v3910_v14  ;;  %v3144_v20 = vadd.f32 %v8343_v18, %v3143_v17  ;;  %v2241_v21 = vpop.f32.mrf.mxu0 }
 0x36f   :  { %v3549_v7 = vmax.f32 %v2839_v15, 0.0  ;;  %v2242_v24 = vadd.f32 %v8343_v18, %v2241_v21  ;;  %v2541_v25 = vpop.f32.mrf.mxu1 }
 0x370   :  { %v3671_v26 = vmax.f32 %v3144_v20, 0.0  ;;  %v2542_v27 = vadd.f32 %v8343_v18, %v2541_v25  ;;  %v5836_v25 = vld [vmem:[%s9141_s0 + $0x578] sm:$0xff] }
 0x371   :  { %v4030_v28 = vpack.c.bf16 %v3549_v7, %v3549_v7  ;;  %2880 = vmatmul.bf16.gmra.mxu2 %v5834_v16  ;;  %v3310_v29 = vmax.f32 %v2242_v24, 0.0  ;;  %2280 = vmatmul.bf16.gmra.mxu0 %v5714_v19 }
 0x372   :  { %v4152_v30 = vpack.c.bf16 %v3671_v26, %v3671_v26  ;;  %v3430_v31 = vmax.f32 %v2542_v27, 0.0  ;;  %2580 = vmatmul.bf16.gmra.mxu1 %v5774_v22  ;;  %3185 = vmatmul.bf16.gmra.mxu3 %v5895_v23  ;;  %v5716_v27 = vld [vmem:[%s9141_s0 + $0x1b8] sm:$0xff] }
 0x373   :  { %4512 = vst.msk [vmem:[%s9143_s3 + $0x524] sm:$0xf] %vm4182_vm0, %v4030_v28  ;;  %v3791_v32 = vpack.c.bf16 %v3310_v29, %v3310_v29 }
 0x374   :  { %v2841_v33 = vpop.f32.mrf.mxu2  ;;  %4634 = vst.msk [vmem:[%s9143_s3 + $0x70c] sm:$0xf] %vm4182_vm0, %v4152_v30  ;;  %v3911_v34 = vpack.c.bf16 %v3430_v31, %v3430_v31  ;;  %v5776_v30 = vld [vmem:[%s9141_s0 + $0x398] sm:$0xff]  ;;  %v5897_v31 = vld [vmem:[%s9141_s0 + $0x760] sm:$0xff] }
 0x375   :  { %v2842_v35 = vadd.f32 %v8343_v18, %v2841_v33  ;;  %4273 = vst.msk [vmem:[%s9143_s3 + $0x168] sm:$0xf] %vm4182_vm0, %v3791_v32  ;;  %v3146_v36 = vpop.f32.mrf.mxu3 }
 0x376   :  { %4393 = vst.msk [vmem:[%s9143_s3 + $0x348] sm:$0xf] %vm4182_vm0, %v3911_v34  ;;  %v3147_v37 = vadd.f32 %v8343_v18, %v3146_v36  ;;  %v2243_v38 = vpop.f32.mrf.mxu0 }
 0x377   :  { %v3550_v39 = vmax.f32 %v2842_v35, 0.0  ;;  %v2244_v40 = vadd.f32 %v8343_v18, %v2243_v38  ;;  %v2543_v42 = vpop.f32.mrf.mxu1 }
 0x378   :  { %v3672_v43 = vmax.f32 %v3147_v37, 0.0  ;;  %v2544_v44 = vadd.f32 %v8343_v18, %v2543_v42 }
 0x379   :  { %v4031_v45 = vpack.c.bf16 %v3550_v39, %v3550_v39  ;;  %v3311_v46 = vmax.f32 %v2244_v40, 0.0 }
 0x37a   :  { %v4153_v47 = vpack.c.bf16 %v3672_v43, %v3672_v43  ;;  %v3431_v48 = vmax.f32 %v2544_v44, 0.0 }
 0x37b   :  { %4513 = vst.msk [vmem:[%s9143_s3 + $0x528] sm:$0xf] %vm4182_vm0, %v4031_v45  ;;  %v3792_v49 = vpack.c.bf16 %v3311_v46, %v3311_v46 }
 0x37c   :  { %v2843_v50 = vpop.f32.mrf.mxu2  ;;  %4635 = vst.msk [vmem:[%s9143_s3 + $0x710] sm:$0xf] %vm4182_vm0, %v4153_v47  ;;  %v3912_v51 = vpack.c.bf16 %v3431_v48, %v3431_v48 }
 0x37d   :  { %v2844_v52 = vadd.f32 %v8343_v18, %v2843_v50  ;;  %4274 = vst.msk [vmem:[%s9143_s3 + $0x16c] sm:$0xf] %vm4182_vm0, %v3792_v49  ;;  %v3148_v54 = vpop.f32.mrf.mxu3 }
 0x37e   :  { %4394 = vst.msk [vmem:[%s9143_s3 + $0x34c] sm:$0xf] %vm4182_vm0, %v3912_v51  ;;  %v3149_v57 = vadd.f32 %v8343_v18, %v3148_v54  ;;  %v2246_v58 = vpop.f32.mrf.mxu0 }
 0x37f   :  { %v3551_v60 = vmax.f32 %v2844_v52, 0.0  ;;  %v2247_v61 = vadd.f32 %v8343_v18, %v2246_v58  ;;  %v2546_v62 = vpop.f32.mrf.mxu1 }
 0x380   :  { %v3673_v63 = vmax.f32 %v3149_v57, 0.0  ;;  %v2547_v0 = vadd.f32 %v8343_v18, %v2546_v62  ;;  %v5837_v62 = vld [vmem:[%s9141_s0 + $0x580] sm:$0xff] }
 0x381   :  { %v4032_v1 = vpack.c.bf16 %v3551_v60, %v3551_v60  ;;  %2885 = vmatmul.bf16.gmra.mxu2 %v5835_v53  ;;  %v3312_v2 = vmax.f32 %v2247_v61, 0.0  ;;  %2285 = vmatmul.bf16.gmra.mxu0 %v5715_v55 }
 0x382   :  { %v4154_v3 = vpack.c.bf16 %v3673_v63, %v3673_v63  ;;  %v3432_v4 = vmax.f32 %v2547_v0, 0.0  ;;  %2585 = vmatmul.bf16.gmra.mxu1 %v5775_v41  ;;  %3190 = vmatmul.bf16.gmra.mxu3 %v5896_v59  ;;  %v5717_v0 = vld [vmem:[%s9141_s0 + $0x1c0] sm:$0xff] }
 0x383   :  { %4514 = vst.msk [vmem:[%s9143_s3 + $0x52c] sm:$0xf] %vm4182_vm0, %v4032_v1  ;;  %v3793_v5 = vpack.c.bf16 %v3312_v2, %v3312_v2 }
 0x384   :  { %v2846_v6 = vpop.f32.mrf.mxu2  ;;  %4636 = vst.msk [vmem:[%s9143_s3 + $0x714] sm:$0xf] %vm4182_vm0, %v4154_v3  ;;  %v3913_v56 = vpack.c.bf16 %v3432_v4, %v3432_v4  ;;  %v5777_v3 = vld [vmem:[%s9141_s0 + $0x3a0] sm:$0xff]  ;;  %v5898_v4 = vld [vmem:[%s9141_s0 + $0x768] sm:$0xff] }
 0x385   :  { %v2847_v8 = vadd.f32 %v8343_v18, %v2846_v6  ;;  %4275 = vst.msk [vmem:[%s9143_s3 + $0x170] sm:$0xf] %vm4182_vm0, %v3793_v5  ;;  %v3151_v9 = vpop.f32.mrf.mxu3 }
 0x386   :  { %4395 = vst.msk [vmem:[%s9143_s3 + $0x350] sm:$0xf] %vm4182_vm0, %v3913_v56  ;;  %v3152_v10 = vadd.f32 %v8343_v18, %v3151_v9  ;;  %v2248_v11 = vpop.f32.mrf.mxu0 }
 0x387   :  { %v3552_v12 = vmax.f32 %v2847_v8, 0.0  ;;  %v2249_v13 = vadd.f32 %v8343_v18, %v2248_v11  ;;  %v2548_v14 = vpop.f32.mrf.mxu1 }
 0x388   :  { %v3674_v15 = vmax.f32 %v3152_v10, 0.0  ;;  %v2549_v16 = vadd.f32 %v8343_v18, %v2548_v14 }
 0x389   :  { %v4033_v17 = vpack.c.bf16 %v3552_v12, %v3552_v12  ;;  %v3313_v19 = vmax.f32 %v2249_v13, 0.0 }
 0x38a   :  { %v4155_v20 = vpack.c.bf16 %v3674_v15, %v3674_v15  ;;  %v3433_v21 = vmax.f32 %v2549_v16, 0.0 }
 0x38b   :  { %4515 = vst.msk [vmem:[%s9143_s3 + $0x530] sm:$0xf] %vm4182_vm0, %v4033_v17  ;;  %v3794_v22 = vpack.c.bf16 %v3313_v19, %v3313_v19 }
 0x38c   :  { %v2848_v23 = vpop.f32.mrf.mxu2  ;;  %4637 = vst.msk [vmem:[%s9143_s3 + $0x718] sm:$0xf] %vm4182_vm0, %v4155_v20  ;;  %v3914_v7 = vpack.c.bf16 %v3433_v21, %v3433_v21 }
 0x38d   :  { %v2849_v24 = vadd.f32 %v8343_v18, %v2848_v23  ;;  %4276 = vst.msk [vmem:[%s9143_s3 + $0x174] sm:$0xf] %vm4182_vm0, %v3794_v22  ;;  %v3153_v26 = vpop.f32.mrf.mxu3 }
 0x38e   :  { %4396 = vst.msk [vmem:[%s9143_s3 + $0x354] sm:$0xf] %vm4182_vm0, %v3914_v7  ;;  %v3154_v28 = vadd.f32 %v8343_v18, %v3153_v26  ;;  %v2251_v29 = vpop.f32.mrf.mxu0 }
 0x38f   :  { %v3553_v32 = vmax.f32 %v2849_v24, 0.0  ;;  %v2252_v33 = vadd.f32 %v8343_v18, %v2251_v29  ;;  %v2551_v34 = vpop.f32.mrf.mxu1 }
 0x390   :  { %v3675_v35 = vmax.f32 %v3154_v28, 0.0  ;;  %v2552_v36 = vadd.f32 %v8343_v18, %v2551_v34  ;;  %v5838_v34 = vld [vmem:[%s9141_s0 + $0x588] sm:$0xff] }
 0x391   :  { %v4034_v37 = vpack.c.bf16 %v3553_v32, %v3553_v32  ;;  %2890 = vmatmul.bf16.gmra.mxu2 %v5836_v25  ;;  %v3314_v38 = vmax.f32 %v2252_v33, 0.0  ;;  %2290 = vmatmul.bf16.gmra.mxu0 %v5716_v27 }
 0x392   :  { %v4156_v39 = vpack.c.bf16 %v3675_v35, %v3675_v35  ;;  %v3434_v40 = vmax.f32 %v2552_v36, 0.0  ;;  %2590 = vmatmul.bf16.gmra.mxu1 %v5776_v30  ;;  %3195 = vmatmul.bf16.gmra.mxu3 %v5897_v31  ;;  %v5718_v36 = vld [vmem:[%s9141_s0 + $0x1c8] sm:$0xff] }
 0x393   :  { %4516 = vst.msk [vmem:[%s9143_s3 + $0x534] sm:$0xf] %vm4182_vm0, %v4034_v37  ;;  %v3795_v42 = vpack.c.bf16 %v3314_v38, %v3314_v38 }
 0x394   :  { %v2851_v43 = vpop.f32.mrf.mxu2  ;;  %4638 = vst.msk [vmem:[%s9143_s3 + $0x71c] sm:$0xf] %vm4182_vm0, %v4156_v39  ;;  %v3915_v44 = vpack.c.bf16 %v3434_v40, %v3434_v40  ;;  %v5778_v39 = vld [vmem:[%s9141_s0 + $0x3a8] sm:$0xff]  ;;  %v5899_v40 = vld [vmem:[%s9141_s0 + $0x770] sm:$0xff] }
 0x395   :  { %v2852_v45 = vadd.f32 %v8343_v18, %v2851_v43  ;;  %4277 = vst.msk [vmem:[%s9143_s3 + $0x178] sm:$0xf] %vm4182_vm0, %v3795_v42  ;;  %v3156_v46 = vpop.f32.mrf.mxu3 }
 0x396   :  { %4397 = vst.msk [vmem:[%s9143_s3 + $0x358] sm:$0xf] %vm4182_vm0, %v3915_v44  ;;  %v3157_v47 = vadd.f32 %v8343_v18, %v3156_v46  ;;  %v2253_v48 = vpop.f32.mrf.mxu0 }
 0x397   :  { %v3554_v49 = vmax.f32 %v2852_v45, 0.0  ;;  %v2254_v50 = vadd.f32 %v8343_v18, %v2253_v48  ;;  %v2553_v51 = vpop.f32.mrf.mxu1 }
 0x398   :  { %v3676_v52 = vmax.f32 %v3157_v47, 0.0  ;;  %v2554_v53 = vadd.f32 %v8343_v18, %v2553_v51 }
 0x399   :  { %v4035_v54 = vpack.c.bf16 %v3554_v49, %v3554_v49  ;;  %v3315_v55 = vmax.f32 %v2254_v50, 0.0 }
 0x39a   :  { %v4157_v57 = vpack.c.bf16 %v3676_v52, %v3676_v52  ;;  %v3435_v58 = vmax.f32 %v2554_v53, 0.0 }
 0x39b   :  { %4517 = vst.msk [vmem:[%s9143_s3 + $0x538] sm:$0xf] %vm4182_vm0, %v4035_v54  ;;  %v3796_v41 = vpack.c.bf16 %v3315_v55, %v3315_v55 }
 0x39c   :  { %v2853_v59 = vpop.f32.mrf.mxu2  ;;  %4639 = vst.msk [vmem:[%s9143_s3 + $0x720] sm:$0xf] %vm4182_vm0, %v4157_v57  ;;  %v3916_v60 = vpack.c.bf16 %v3435_v58, %v3435_v58 }
 0x39d   :  { %v2854_v61 = vadd.f32 %v8343_v18, %v2853_v59  ;;  %4278 = vst.msk [vmem:[%s9143_s3 + $0x17c] sm:$0xf] %vm4182_vm0, %v3796_v41  ;;  %v3158_v63 = vpop.f32.mrf.mxu3 }
 0x39e   :  { %4398 = vst.msk [vmem:[%s9143_s3 + $0x35c] sm:$0xf] %vm4182_vm0, %v3916_v60  ;;  %v3159_v1 = vadd.f32 %v8343_v18, %v3158_v63  ;;  %v2256_v2 = vpop.f32.mrf.mxu0 }
 0x39f   :  { %v3555_v5 = vmax.f32 %v2854_v61, 0.0  ;;  %v2257_v6 = vadd.f32 %v8343_v18, %v2256_v2  ;;  %v2556_v56 = vpop.f32.mrf.mxu1 }
 0x3a0   :  { %v3677_v8 = vmax.f32 %v3159_v1, 0.0  ;;  %v2557_v9 = vadd.f32 %v8343_v18, %v2556_v56  ;;  %v5839_v56 = vld [vmem:[%s9141_s0 + $0x590] sm:$0xff] }
 0x3a1   :  { %v4036_v10 = vpack.c.bf16 %v3555_v5, %v3555_v5  ;;  %2895 = vmatmul.bf16.gmra.mxu2 %v5837_v62  ;;  %v3316_v11 = vmax.f32 %v2257_v6, 0.0  ;;  %2295 = vmatmul.bf16.gmra.mxu0 %v5717_v0 }
 0x3a2   :  { %v4158_v12 = vpack.c.bf16 %v3677_v8, %v3677_v8  ;;  %v3436_v13 = vmax.f32 %v2557_v9, 0.0  ;;  %2595 = vmatmul.bf16.gmra.mxu1 %v5777_v3  ;;  %3200 = vmatmul.bf16.gmra.mxu3 %v5898_v4  ;;  %v5719_v9 = vld [vmem:[%s9141_s0 + $0x1d0] sm:$0xff] }
 0x3a3   :  { %4518 = vst.msk [vmem:[%s9143_s3 + $0x53c] sm:$0xf] %vm4182_vm0, %v4036_v10  ;;  %v3797_v14 = vpack.c.bf16 %v3316_v11, %v3316_v11 }
 0x3a4   :  { %v2856_v15 = vpop.f32.mrf.mxu2  ;;  %4640 = vst.msk [vmem:[%s9143_s3 + $0x724] sm:$0xf] %vm4182_vm0, %v4158_v12  ;;  %v3917_v16 = vpack.c.bf16 %v3436_v13, %v3436_v13  ;;  %v5779_v12 = vld [vmem:[%s9141_s0 + $0x3b0] sm:$0xff]  ;;  %v5900_v13 = vld [vmem:[%s9141_s0 + $0x778] sm:$0xff] }
 0x3a5   :  { %v2857_v17 = vadd.f32 %v8343_v18, %v2856_v15  ;;  %4279 = vst.msk [vmem:[%s9143_s3 + $0x180] sm:$0xf] %vm4182_vm0, %v3797_v14  ;;  %v3161_v19 = vpop.f32.mrf.mxu3 }
 0x3a6   :  { %4399 = vst.msk [vmem:[%s9143_s3 + $0x360] sm:$0xf] %vm4182_vm0, %v3917_v16  ;;  %v3162_v20 = vadd.f32 %v8343_v18, %v3161_v19  ;;  %v2258_v21 = vpop.f32.mrf.mxu0 }
 0x3a7   :  { %v3556_v22 = vmax.f32 %v2857_v17, 0.0  ;;  %v2259_v23 = vadd.f32 %v8343_v18, %v2258_v21  ;;  %v2558_v7 = vpop.f32.mrf.mxu1 }
 0x3a8   :  { %v3678_v24 = vmax.f32 %v3162_v20, 0.0  ;;  %v2559_v25 = vadd.f32 %v8343_v18, %v2558_v7 }
 0x3a9   :  { %v4037_v26 = vpack.c.bf16 %v3556_v22, %v3556_v22  ;;  %v3317_v27 = vmax.f32 %v2259_v23, 0.0 }
 0x3aa   :  { %v4159_v28 = vpack.c.bf16 %v3678_v24, %v3678_v24  ;;  %v3437_v29 = vmax.f32 %v2559_v25, 0.0 }
 0x3ab   :  { %4519 = vst.msk [vmem:[%s9143_s3 + $0x540] sm:$0xf] %vm4182_vm0, %v4037_v26  ;;  %v3798_v30 = vpack.c.bf16 %v3317_v27, %v3317_v27 }
 0x3ac   :  { %v2858_v31 = vpop.f32.mrf.mxu2  ;;  %4641 = vst.msk [vmem:[%s9143_s3 + $0x728] sm:$0xf] %vm4182_vm0, %v4159_v28  ;;  %v3918_v32 = vpack.c.bf16 %v3437_v29, %v3437_v29 }
 0x3ad   :  { %v2859_v33 = vadd.f32 %v8343_v18, %v2858_v31  ;;  %4280 = vst.msk [vmem:[%s9143_s3 + $0x184] sm:$0xf] %vm4182_vm0, %v3798_v30  ;;  %v3163_v35 = vpop.f32.mrf.mxu3 }
 0x3ae   :  { %4400 = vst.msk [vmem:[%s9143_s3 + $0x364] sm:$0xf] %vm4182_vm0, %v3918_v32  ;;  %v3164_v37 = vadd.f32 %v8343_v18, %v3163_v35  ;;  %v2261_v38 = vpop.f32.mrf.mxu0 }
 0x3af   :  { %v3557_v42 = vmax.f32 %v2859_v33, 0.0  ;;  %v2262_v43 = vadd.f32 %v8343_v18, %v2261_v38  ;;  %v2561_v44 = vpop.f32.mrf.mxu1  ;;  %v494_v33 = vld [vmem:[%s9141_s0 + $0x780] sm:$0x3] }
 0x3b0   :  { %v3679_v45 = vmax.f32 %v3164_v37, 0.0  ;;  %v2562_v46 = vadd.f32 %v8343_v18, %v2561_v44 }
 0x3b1   :  { %v4038_v47 = vpack.c.bf16 %v3557_v42, %v3557_v42  ;;  %2900 = vmatmul.bf16.gmra.mxu2 %v5838_v34  ;;  %v3318_v48 = vmax.f32 %v2262_v43, 0.0  ;;  %2300 = vmatmul.bf16.gmra.mxu0 %v5718_v36 }
 0x3b2   :  { %v4160_v49 = vpack.c.bf16 %v3679_v45, %v3679_v45  ;;  %v3438_v50 = vmax.f32 %v2562_v46, 0.0  ;;  %2600 = vmatmul.bf16.gmra.mxu1 %v5778_v39  ;;  %3205 = vmatmul.bf16.gmra.mxu3 %v5899_v40  ;;  %v1476_v40 = vunpack.c.l.b16 %v494_v33  ;;  %v5840_v46 = vld [vmem:[%s9141_s0 + $0x598] sm:$0xff] }
 0x3b3   :  { %4520 = vst.msk [vmem:[%s9143_s3 + $0x544] sm:$0xf] %vm4182_vm0, %v4038_v47  ;;  %v3799_v51 = vpack.c.bf16 %v3318_v48, %v3318_v48  ;;  %v5720_v48 = vld [vmem:[%s9141_s0 + $0x1d8] sm:$0xff] }
 0x3b4   :  { %v2861_v52 = vpop.f32.mrf.mxu2  ;;  %4642 = vst.msk [vmem:[%s9143_s3 + $0x72c] sm:$0xf] %vm4182_vm0, %v4160_v49  ;;  %v3919_v53 = vpack.c.bf16 %v3438_v50, %v3438_v50 }
 0x3b5   :  { %v2862_v54 = vadd.f32 %v8343_v18, %v2861_v52  ;;  %4281 = vst.msk [vmem:[%s9143_s3 + $0x188] sm:$0xf] %vm4182_vm0, %v3799_v51  ;;  %v3166_v55 = vpop.f32.mrf.mxu3  ;;  %v5780_v51 = vld [vmem:[%s9141_s0 + $0x3b8] sm:$0xff]  ;;  %v1717_v52 = vpack.c.b16 %v1476_v40, %v1476_v40 }
 0x3b6   :  { %4401 = vst.msk [vmem:[%s9143_s3 + $0x368] sm:$0xf] %vm4182_vm0, %v3919_v53  ;;  %v3167_v57 = vadd.f32 %v8343_v18, %v3166_v55  ;;  %v2263_v58 = vpop.f32.mrf.mxu0 }
 0x3b7   :  { %v3558_v41 = vmax.f32 %v2862_v54, 0.0  ;;  %v2264_v59 = vadd.f32 %v8343_v18, %v2263_v58  ;;  %v2563_v60 = vpop.f32.mrf.mxu1 }
 0x3b8   :  { %v3680_v61 = vmax.f32 %v3167_v57, 0.0  ;;  %v2564_v62 = vadd.f32 %v8343_v18, %v2563_v60 }
 0x3b9   :  { %v4039_v63 = vpack.c.bf16 %v3558_v41, %v3558_v41  ;;  %v3319_v0 = vmax.f32 %v2264_v59, 0.0 }
 0x3ba   :  { %v4161_v1 = vpack.c.bf16 %v3680_v61, %v3680_v61  ;;  %v3439_v2 = vmax.f32 %v2564_v62, 0.0 }
 0x3bb   :  { %4521 = vst.msk [vmem:[%s9143_s3 + $0x548] sm:$0xf] %vm4182_vm0, %v4039_v63  ;;  %v3800_v3 = vpack.c.bf16 %v3319_v0, %v3319_v0 }
 0x3bc   :  { %v2863_v4 = vpop.f32.mrf.mxu2  ;;  %4643 = vst.msk [vmem:[%s9143_s3 + $0x730] sm:$0xf] %vm4182_vm0, %v4161_v1  ;;  %v3920_v5 = vpack.c.bf16 %v3439_v2, %v3439_v2 }
 0x3bd   :  { %v2864_v6 = vadd.f32 %v8343_v18, %v2863_v4  ;;  %4282 = vst.msk [vmem:[%s9143_s3 + $0x18c] sm:$0xf] %vm4182_vm0, %v3800_v3  ;;  %v3168_v8 = vpop.f32.mrf.mxu3 }
 0x3be   :  { %4402 = vst.msk [vmem:[%s9143_s3 + $0x36c] sm:$0xf] %vm4182_vm0, %v3920_v5  ;;  %v3169_v10 = vadd.f32 %v8343_v18, %v3168_v8  ;;  %v2266_v11 = vpop.f32.mrf.mxu0 }
 0x3bf   :  { %v3559_v14 = vmax.f32 %v2864_v6, 0.0  ;;  %v2267_v15 = vadd.f32 %v8343_v18, %v2266_v11  ;;  %v2566_v16 = vpop.f32.mrf.mxu1 }
 0x3c0   :  { %v3681_v17 = vmax.f32 %v3169_v10, 0.0  ;;  %v2567_v19 = vadd.f32 %v8343_v18, %v2566_v16 }
 0x3c1   :  { %v4040_v20 = vpack.c.bf16 %v3559_v14, %v3559_v14  ;;  %2905 = vmatmul.bf16.gmra.mxu2 %v5839_v56  ;;  %v3320_v21 = vmax.f32 %v2267_v15, 0.0  ;;  %2305 = vmatmul.bf16.gmra.mxu0 %v5719_v9 }
 0x3c2   :  { %v4162_v22 = vpack.c.bf16 %v3681_v17, %v3681_v17  ;;  %v3440_v23 = vmax.f32 %v2567_v19, 0.0  ;;  %2605 = vmatmul.bf16.gmra.mxu1 %v5779_v12  ;;  %3210 = vmatmul.bf16.gmra.mxu3 %v5900_v13  ;;  %v5841_v19 = vld [vmem:[%s9141_s0 + $0x5a0] sm:$0xff] }
 0x3c3   :  { %4522 = vst.msk [vmem:[%s9143_s3 + $0x54c] sm:$0xf] %vm4182_vm0, %v4040_v20  ;;  %v3801_v7 = vpack.c.bf16 %v3320_v21, %v3320_v21 }
 0x3c4   :  { %v2866_v24 = vpop.f32.mrf.mxu2  ;;  %4644 = vst.msk [vmem:[%s9143_s3 + $0x734] sm:$0xf] %vm4182_vm0, %v4162_v22  ;;  %v3921_v25 = vpack.c.bf16 %v3440_v23, %v3440_v23 }
 0x3c5   :  { %v2867_v26 = vadd.f32 %v8343_v18, %v2866_v24  ;;  %4283 = vst.msk [vmem:[%s9143_s3 + $0x190] sm:$0xf] %vm4182_vm0, %v3801_v7  ;;  %v3171_v27 = vpop.f32.mrf.mxu3 }
 0x3c6   :  { %4403 = vst.msk [vmem:[%s9143_s3 + $0x370] sm:$0xf] %vm4182_vm0, %v3921_v25  ;;  %v3172_v28 = vadd.f32 %v8343_v18, %v3171_v27  ;;  %v2268_v29 = vpop.f32.mrf.mxu0 }
 0x3c7   :  { %v3560_v30 = vmax.f32 %v2867_v26, 0.0  ;;  %v2269_v31 = vadd.f32 %v8343_v18, %v2268_v29  ;;  %v2568_v32 = vpop.f32.mrf.mxu1 }
 0x3c8   :  { %v3682_v34 = vmax.f32 %v3172_v28, 0.0  ;;  %v2569_v35 = vadd.f32 %v8343_v18, %v2568_v32 }
 0x3c9   :  { %v4041_v36 = vpack.c.bf16 %v3560_v30, %v3560_v30  ;;  %v3321_v37 = vmax.f32 %v2269_v31, 0.0 }
 0x3ca   :  { %v4163_v38 = vpack.c.bf16 %v3682_v34, %v3682_v34  ;;  %v3441_v39 = vmax.f32 %v2569_v35, 0.0 }
 0x3cb   :  { %4523 = vst.msk [vmem:[%s9143_s3 + $0x550] sm:$0xf] %vm4182_vm0, %v4041_v36  ;;  %v3802_v42 = vpack.c.bf16 %v3321_v37, %v3321_v37 }
 0x3cc   :  { %v2868_v43 = vpop.f32.mrf.mxu2  ;;  %4645 = vst.msk [vmem:[%s9143_s3 + $0x738] sm:$0xf] %vm4182_vm0, %v4163_v38  ;;  %v3922_v44 = vpack.c.bf16 %v3441_v39, %v3441_v39 }
 0x3cd   :  { %v2869_v45 = vadd.f32 %v8343_v18, %v2868_v43  ;;  %4284 = vst.msk [vmem:[%s9143_s3 + $0x194] sm:$0xf] %vm4182_vm0, %v3802_v42  ;;  %v3173_v47 = vpop.f32.mrf.mxu3 }
 0x3ce   :  { %4404 = vst.msk [vmem:[%s9143_s3 + $0x374] sm:$0xf] %vm4182_vm0, %v3922_v44  ;;  %v3174_v49 = vadd.f32 %v8343_v18, %v3173_v47  ;;  %v2271_v50 = vpop.f32.mrf.mxu0 }
 0x3cf   :  { %v3561_v53 = vmax.f32 %v2869_v45, 0.0  ;;  %v2272_v54 = vadd.f32 %v8343_v18, %v2271_v50  ;;  %v2571_v55 = vpop.f32.mrf.mxu1 }
 0x3d0   :  { %v3683_v57 = vmax.f32 %v3174_v49, 0.0  ;;  %v2572_v58 = vadd.f32 %v8343_v18, %v2571_v55 }
 0x3d1   :  { %v4042_v41 = vpack.c.bf16 %v3561_v53, %v3561_v53  ;;  %2910 = vmatmul.bf16.gmra.mxu2 %v5840_v46  ;;  %v3322_v59 = vmax.f32 %v2272_v54, 0.0  ;;  %2310 = vmatmul.bf16.gmra.mxu0 %v5720_v48 }
 0x3d2   :  { %v4164_v60 = vpack.c.bf16 %v3683_v57, %v3683_v57  ;;  %v3442_v61 = vmax.f32 %v2572_v58, 0.0  ;;  %2610 = vmatmul.bf16.gmra.mxu1 %v5780_v51  ;;  %3215 = vmatmul.bf16.gmra.mxu3 %v1717_v52 }
 0x3d3   :  { %4524 = vst.msk [vmem:[%s9143_s3 + $0x554] sm:$0xf] %vm4182_vm0, %v4042_v41  ;;  %v3803_v62 = vpack.c.bf16 %v3322_v59, %v3322_v59 }
 0x3d4   :  { %v2871_v63 = vpop.f32.mrf.mxu2  ;;  %4646 = vst.msk [vmem:[%s9143_s3 + $0x73c] sm:$0xf] %vm4182_vm0, %v4164_v60  ;;  %v3923_v0 = vpack.c.bf16 %v3442_v61, %v3442_v61 }
 0x3d5   :  { %v2872_v1 = vadd.f32 %v8343_v18, %v2871_v63  ;;  %4285 = vst.msk [vmem:[%s9143_s3 + $0x198] sm:$0xf] %vm4182_vm0, %v3803_v62  ;;  %v3176_v2 = vpop.f32.mrf.mxu3 }
 0x3d6   :  { %4405 = vst.msk [vmem:[%s9143_s3 + $0x378] sm:$0xf] %vm4182_vm0, %v3923_v0  ;;  %v3177_v3 = vadd.f32 %v8343_v18, %v3176_v2  ;;  %v2273_v4 = vpop.f32.mrf.mxu0 }
 0x3d7   :  { %v3562_v5 = vmax.f32 %v2872_v1, 0.0  ;;  %v2274_v6 = vadd.f32 %v8343_v18, %v2273_v4  ;;  %v2573_v56 = vpop.f32.mrf.mxu1 }
 0x3d8   :  { %v3684_v8 = vmax.f32 %v3177_v3, 0.0  ;;  %v2574_v9 = vadd.f32 %v8343_v18, %v2573_v56 }
 0x3d9   :  { %v4043_v10 = vpack.c.bf16 %v3562_v5, %v3562_v5  ;;  %v3323_v11 = vmax.f32 %v2274_v6, 0.0 }
 0x3da   :  { %v4165_v12 = vpack.c.bf16 %v3684_v8, %v3684_v8  ;;  %v3443_v13 = vmax.f32 %v2574_v9, 0.0 }
 0x3db   :  { %4525 = vst.msk [vmem:[%s9143_s3 + $0x558] sm:$0xf] %vm4182_vm0, %v4043_v10  ;;  %v3804_v14 = vpack.c.bf16 %v3323_v11, %v3323_v11 }
 0x3dc   :  { %v2873_v15 = vpop.f32.mrf.mxu2  ;;  %4647 = vst.msk [vmem:[%s9143_s3 + $0x740] sm:$0xf] %vm4182_vm0, %v4165_v12  ;;  %v3924_v16 = vpack.c.bf16 %v3443_v13, %v3443_v13 }
 0x3dd   :  { %v2874_v17 = vadd.f32 %v8343_v18, %v2873_v15  ;;  %4286 = vst.msk [vmem:[%s9143_s3 + $0x19c] sm:$0xf] %vm4182_vm0, %v3804_v14  ;;  %v3178_v20 = vpop.f32.mrf.mxu3 }
 0x3de   :  { %4406 = vst.msk [vmem:[%s9143_s3 + $0x37c] sm:$0xf] %vm4182_vm0, %v3924_v16  ;;  %v3179_v21 = vadd.f32 %v8343_v18, %v3178_v20  ;;  %v2276_v22 = vpop.f32.mrf.mxu0 }
 0x3df   :  { %v3563_v23 = vmax.f32 %v2874_v17, 0.0  ;;  %v2277_v7 = vadd.f32 %v8343_v18, %v2276_v22  ;;  %v2576_v24 = vpop.f32.mrf.mxu1 }
 0x3e0   :  { %v3685_v25 = vmax.f32 %v3179_v21, 0.0  ;;  %v2577_v26 = vadd.f32 %v8343_v18, %v2576_v24 }
 0x3e1   :  { %v4044_v27 = vpack.c.bf16 %v3563_v23, %v3563_v23  ;;  %2915 = vmatmul.bf16.gmra.mxu2 %v5841_v19  ;;  %v3324_v28 = vmax.f32 %v2277_v7, 0.0 }
 0x3e2   :  { %v4166_v29 = vpack.c.bf16 %v3685_v25, %v3685_v25  ;;  %v3444_v30 = vmax.f32 %v2577_v26, 0.0 }
 0x3e3   :  { %4526 = vst.msk [vmem:[%s9143_s3 + $0x55c] sm:$0xf] %vm4182_vm0, %v4044_v27  ;;  %v3805_v31 = vpack.c.bf16 %v3324_v28, %v3324_v28  ;;  %v8887_v27 = vld [vmem:[%s9142_s2] ss:$0 sm:$0xff] }
 0x3e4   :  { %v2876_v32 = vpop.f32.mrf.mxu2  ;;  %4648 = vst.msk [vmem:[%s9143_s3 + $0x744] sm:$0xf] %vm4182_vm0, %v4166_v29  ;;  %v3925_v33 = vpack.c.bf16 %v3444_v30, %v3444_v30 }
 0x3e5   :  { %v2877_v34 = vadd.f32 %v8343_v18, %v2876_v32  ;;  %4287 = vst.msk [vmem:[%s9143_s3 + $0x1a0] sm:$0xf] %vm4182_vm0, %v3805_v31  ;;  %v3181_v35 = vpop.f32.mrf.mxu3 }
 0x3e6   :  { %4407 = vst.msk [vmem:[%s9143_s3 + $0x380] sm:$0xf] %vm4182_vm0, %v3925_v33  ;;  %v3182_v36 = vadd.f32 %v8343_v18, %v3181_v35  ;;  %v2278_v37 = vpop.f32.mrf.mxu0 }
 0x3e7   :  { %v3564_v38 = vmax.f32 %v2877_v34, 0.0  ;;  %v2279_v39 = vadd.f32 %v8343_v18, %v2278_v37  ;;  %v2578_v40 = vpop.f32.mrf.mxu1 }
 0x3e8   :  { %v3686_v42 = vmax.f32 %v3182_v36, 0.0  ;;  %v2579_v43 = vadd.f32 %v8343_v18, %v2578_v40 }
 0x3e9   :  { %v4045_v44 = vpack.c.bf16 %v3564_v38, %v3564_v38  ;;  %v3325_v45 = vmax.f32 %v2279_v39, 0.0 }
 0x3ea   :  { %v4167_v46 = vpack.c.bf16 %v3686_v42, %v3686_v42  ;;  %v3445_v47 = vmax.f32 %v2579_v43, 0.0 }
 0x3eb   :  { %4527 = vst.msk [vmem:[%s9143_s3 + $0x560] sm:$0xf] %vm4182_vm0, %v4045_v44  ;;  %v3806_v48 = vpack.c.bf16 %v3325_v45, %v3325_v45 }
 0x3ec   :  { %v2878_v49 = vpop.f32.mrf.mxu2  ;;  %4649 = vst.msk [vmem:[%s9143_s3 + $0x748] sm:$0xf] %vm4182_vm0, %v4167_v46  ;;  %v3926_v50 = vpack.c.bf16 %v3445_v47, %v3445_v47 }
 0x3ed   :  { %v2879_v51 = vadd.f32 %v8343_v18, %v2878_v49  ;;  %4288 = vst.msk [vmem:[%s9143_s3 + $0x1a4] sm:$0xf] %vm4182_vm0, %v3806_v48  ;;  %v3183_v52 = vpop.f32.mrf.mxu3 }
 0x3ee   :  { %4408 = vst.msk [vmem:[%s9143_s3 + $0x384] sm:$0xf] %vm4182_vm0, %v3926_v50  ;;  %v3184_v53 = vadd.f32 %v8343_v18, %v3183_v52  ;;  %v2281_v54 = vpop.f32.mrf.mxu0 }
 0x3ef   :  { %v3565_v55 = vmax.f32 %v2879_v51, 0.0  ;;  %v2282_v57 = vadd.f32 %v8343_v18, %v2281_v54  ;;  %v2581_v58 = vpop.f32.mrf.mxu1 }
 0x3f0   :  { %v3687_v41 = vmax.f32 %v3184_v53, 0.0  ;;  %v2582_v59 = vadd.f32 %v8343_v18, %v2581_v58 }
 0x3f1   :  { %v4046_v60 = vpack.c.bf16 %v3565_v55, %v3565_v55  ;;  %v3326_v61 = vmax.f32 %v2282_v57, 0.0 }
 0x3f2   :  { %v4168_v62 = vpack.c.bf16 %v3687_v41, %v3687_v41  ;;  %v3446_v63 = vmax.f32 %v2582_v59, 0.0 }
 0x3f3   :  { %4528 = vst.msk [vmem:[%s9143_s3 + $0x564] sm:$0xf] %vm4182_vm0, %v4046_v60  ;;  %v3807_v0 = vpack.c.bf16 %v3326_v61, %v3326_v61 }
 0x3f4   :  { %v2881_v1 = vpop.f32.mrf.mxu2  ;;  %4650 = vst.msk [vmem:[%s9143_s3 + $0x74c] sm:$0xf] %vm4182_vm0, %v4168_v62  ;;  %v3927_v2 = vpack.c.bf16 %v3446_v63, %v3446_v63 }
 0x3f5   :  { %v2882_v3 = vadd.f32 %v8343_v18, %v2881_v1  ;;  %4289 = vst.msk [vmem:[%s9143_s3 + $0x1a8] sm:$0xf] %vm4182_vm0, %v3807_v0  ;;  %v3186_v4 = vpop.f32.mrf.mxu3 }
 0x3f6   :  { %4409 = vst.msk [vmem:[%s9143_s3 + $0x388] sm:$0xf] %vm4182_vm0, %v3927_v2  ;;  %v3187_v5 = vadd.f32 %v8343_v18, %v3186_v4  ;;  %v2283_v6 = vpop.f32.mrf.mxu0 }
 0x3f7   :  { %v3566_v56 = vmax.f32 %v2882_v3, 0.0  ;;  %v2284_v8 = vadd.f32 %v8343_v18, %v2283_v6  ;;  %v2583_v9 = vpop.f32.mrf.mxu1 }
 0x3f8   :  { %v3688_v10 = vmax.f32 %v3187_v5, 0.0  ;;  %v2584_v11 = vadd.f32 %v8343_v18, %v2583_v9 }
 0x3f9   :  { %v4047_v12 = vpack.c.bf16 %v3566_v56, %v3566_v56  ;;  %v3327_v13 = vmax.f32 %v2284_v8, 0.0 }
 0x3fa   :  { %v4169_v14 = vpack.c.bf16 %v3688_v10, %v3688_v10  ;;  %v3447_v15 = vmax.f32 %v2584_v11, 0.0 }
 0x3fb   :  { %4529 = vst.msk [vmem:[%s9143_s3 + $0x568] sm:$0xf] %vm4182_vm0, %v4047_v12  ;;  %v3808_v16 = vpack.c.bf16 %v3327_v13, %v3327_v13 }
 0x3fc   :  { %v2883_v17 = vpop.f32.mrf.mxu2  ;;  %4651 = vst.msk [vmem:[%s9143_s3 + $0x750] sm:$0xf] %vm4182_vm0, %v4169_v14  ;;  %v3928_v19 = vpack.c.bf16 %v3447_v15, %v3447_v15 }
 0x3fd   :  { %v2884_v20 = vadd.f32 %v8343_v18, %v2883_v17  ;;  %4290 = vst.msk [vmem:[%s9143_s3 + $0x1ac] sm:$0xf] %vm4182_vm0, %v3808_v16  ;;  %v3188_v21 = vpop.f32.mrf.mxu3 }
 0x3fe   :  { %4410 = vst.msk [vmem:[%s9143_s3 + $0x38c] sm:$0xf] %vm4182_vm0, %v3928_v19  ;;  %v3189_v22 = vadd.f32 %v8343_v18, %v3188_v21  ;;  %v2286_v23 = vpop.f32.mrf.mxu0 }
 0x3ff   :  { %v3567_v7 = vmax.f32 %v2884_v20, 0.0  ;;  %v2287_v24 = vadd.f32 %v8343_v18, %v2286_v23  ;;  %v2586_v25 = vpop.f32.mrf.mxu1 }
 0x400   :  { %v3689_v26 = vmax.f32 %v3189_v22, 0.0  ;;  %v2587_v28 = vadd.f32 %v8887_v27, %v2586_v25 }
 0x401   :  { %v4048_v29 = vpack.c.bf16 %v3567_v7, %v3567_v7  ;;  %v3328_v30 = vmax.f32 %v2287_v24, 0.0 }
 0x402   :  { %v4170_v31 = vpack.c.bf16 %v3689_v26, %v3689_v26  ;;  %v3448_v32 = vmax.f32 %v2587_v28, 0.0 }
 0x403   :  { %4530 = vst.msk [vmem:[%s9143_s3 + $0x56c] sm:$0xf] %vm4182_vm0, %v4048_v29  ;;  %v3809_v33 = vpack.c.bf16 %v3328_v30, %v3328_v30 }
 0x404   :  { %v2886_v18 = vpop.f32.mrf.mxu2  ;;  %4652 = vst.msk [vmem:[%s9143_s3 + $0x754] sm:$0xf] %vm4182_vm0, %v4170_v31  ;;  %v3929_v34 = vpack.c.bf16 %v3448_v32, %v3448_v32 }
 0x405   :  { %v2887_v35 = vadd.f32 %v8887_v27, %v2886_v18  ;;  %4291 = vst.msk [vmem:[%s9143_s3 + $0x1b0] sm:$0xf] %vm4182_vm0, %v3809_v33  ;;  %v3191_v36 = vpop.f32.mrf.mxu3 }
 0x406   :  { %4411 = vst.msk [vmem:[%s9143_s3 + $0x390] sm:$0xf] %vm4182_vm0, %v3929_v34  ;;  %v3192_v37 = vadd.f32 %v8887_v27, %v3191_v36  ;;  %v2288_v38 = vpop.f32.mrf.mxu0 }
 0x407   :  { %v3568_v39 = vmax.f32 %v2887_v35, 0.0  ;;  %v2289_v40 = vadd.f32 %v8887_v27, %v2288_v38  ;;  %v2588_v42 = vpop.f32.mrf.mxu1 }
 0x408   :  { %v3690_v43 = vmax.f32 %v3192_v37, 0.0  ;;  %v2589_v44 = vadd.f32 %v8887_v27, %v2588_v42 }
 0x409   :  { %v4049_v45 = vpack.c.bf16 %v3568_v39, %v3568_v39  ;;  %v3329_v46 = vmax.f32 %v2289_v40, 0.0 }
 0x40a   :  { %v4171_v47 = vpack.c.bf16 %v3690_v43, %v3690_v43  ;;  %v3449_v48 = vmax.f32 %v2589_v44, 0.0 }
 0x40b   :  { %4531 = vst.msk [vmem:[%s9143_s3 + $0x570] sm:$0xf] %vm4182_vm0, %v4049_v45  ;;  %v3810_v49 = vpack.c.bf16 %v3329_v46, %v3329_v46 }
 0x40c   :  { %v2888_v50 = vpop.f32.mrf.mxu2  ;;  %4653 = vst.msk [vmem:[%s9143_s3 + $0x758] sm:$0xf] %vm4182_vm0, %v4171_v47  ;;  %v3930_v51 = vpack.c.bf16 %v3449_v48, %v3449_v48 }
 0x40d   :  { %v2889_v52 = vadd.f32 %v8887_v27, %v2888_v50  ;;  %4292 = vst.msk [vmem:[%s9143_s3 + $0x1b4] sm:$0xf] %vm4182_vm0, %v3810_v49  ;;  %v3193_v53 = vpop.f32.mrf.mxu3 }
 0x40e   :  { %4412 = vst.msk [vmem:[%s9143_s3 + $0x394] sm:$0xf] %vm4182_vm0, %v3930_v51  ;;  %v3194_v54 = vadd.f32 %v8887_v27, %v3193_v53  ;;  %v2291_v55 = vpop.f32.mrf.mxu0 }
 0x40f   :  { %v3569_v57 = vmax.f32 %v2889_v52, 0.0  ;;  %v2292_v58 = vadd.f32 %v8887_v27, %v2291_v55  ;;  %v2591_v41 = vpop.f32.mrf.mxu1 }
 0x410   :  { %v3691_v59 = vmax.f32 %v3194_v54, 0.0  ;;  %v2592_v60 = vadd.f32 %v8887_v27, %v2591_v41 }
 0x411   :  { %v4050_v61 = vpack.c.bf16 %v3569_v57, %v3569_v57  ;;  %v3330_v62 = vmax.f32 %v2292_v58, 0.0 }
 0x412   :  { %v4172_v63 = vpack.c.bf16 %v3691_v59, %v3691_v59  ;;  %v3450_v0 = vmax.f32 %v2592_v60, 0.0 }
 0x413   :  { %4532 = vst.msk [vmem:[%s9143_s3 + $0x574] sm:$0xf] %vm4182_vm0, %v4050_v61  ;;  %v3811_v1 = vpack.c.bf16 %v3330_v62, %v3330_v62 }
 0x414   :  { %v2891_v2 = vpop.f32.mrf.mxu2  ;;  %4654 = vst.msk [vmem:[%s9143_s3 + $0x75c] sm:$0xf] %vm4182_vm0, %v4172_v63  ;;  %v3931_v3 = vpack.c.bf16 %v3450_v0, %v3450_v0 }
 0x415   :  { %v2892_v4 = vadd.f32 %v8887_v27, %v2891_v2  ;;  %4293 = vst.msk [vmem:[%s9143_s3 + $0x1b8] sm:$0xf] %vm4182_vm0, %v3811_v1  ;;  %v3196_v5 = vpop.f32.mrf.mxu3 }
 0x416   :  { %4413 = vst.msk [vmem:[%s9143_s3 + $0x398] sm:$0xf] %vm4182_vm0, %v3931_v3  ;;  %v3197_v6 = vadd.f32 %v8887_v27, %v3196_v5  ;;  %v2293_v56 = vpop.f32.mrf.mxu0 }
 0x417   :  { %v3570_v8 = vmax.f32 %v2892_v4, 0.0  ;;  %v2294_v9 = vadd.f32 %v8887_v27, %v2293_v56  ;;  %v2593_v10 = vpop.f32.mrf.mxu1 }
 0x418   :  { %v3692_v11 = vmax.f32 %v3197_v6, 0.0  ;;  %v2594_v12 = vadd.f32 %v8887_v27, %v2593_v10 }
 0x419   :  { %v4051_v13 = vpack.c.bf16 %v3570_v8, %v3570_v8  ;;  %v3331_v14 = vmax.f32 %v2294_v9, 0.0 }
 0x41a   :  { %v4173_v15 = vpack.c.bf16 %v3692_v11, %v3692_v11  ;;  %v3451_v16 = vmax.f32 %v2594_v12, 0.0 }
 0x41b   :  { %4533 = vst.msk [vmem:[%s9143_s3 + $0x578] sm:$0xf] %vm4182_vm0, %v4051_v13  ;;  %v3812_v17 = vpack.c.bf16 %v3331_v14, %v3331_v14 }
 0x41c   :  { %v2893_v19 = vpop.f32.mrf.mxu2  ;;  %4655 = vst.msk [vmem:[%s9143_s3 + $0x760] sm:$0xf] %vm4182_vm0, %v4173_v15  ;;  %v3932_v20 = vpack.c.bf16 %v3451_v16, %v3451_v16 }
 0x41d   :  { %v2894_v21 = vadd.f32 %v8887_v27, %v2893_v19  ;;  %4294 = vst.msk [vmem:[%s9143_s3 + $0x1bc] sm:$0xf] %vm4182_vm0, %v3812_v17  ;;  %v3198_v22 = vpop.f32.mrf.mxu3 }
 0x41e   :  { %4414 = vst.msk [vmem:[%s9143_s3 + $0x39c] sm:$0xf] %vm4182_vm0, %v3932_v20  ;;  %v3199_v23 = vadd.f32 %v8887_v27, %v3198_v22  ;;  %v2296_v7 = vpop.f32.mrf.mxu0 }
 0x41f   :  { %v3571_v24 = vmax.f32 %v2894_v21, 0.0  ;;  %v2297_v25 = vadd.f32 %v8887_v27, %v2296_v7  ;;  %v2596_v26 = vpop.f32.mrf.mxu1 }
 0x420   :  { %v3693_v28 = vmax.f32 %v3199_v23, 0.0  ;;  %v2597_v29 = vadd.f32 %v8887_v27, %v2596_v26 }
 0x421   :  { %v4052_v30 = vpack.c.bf16 %v3571_v24, %v3571_v24  ;;  %v3332_v31 = vmax.f32 %v2297_v25, 0.0 }
 0x422   :  { %v4174_v32 = vpack.c.bf16 %v3693_v28, %v3693_v28  ;;  %v3452_v33 = vmax.f32 %v2597_v29, 0.0 }
 0x423   :  { %4534 = vst.msk [vmem:[%s9143_s3 + $0x57c] sm:$0xf] %vm4182_vm0, %v4052_v30  ;;  %v3813_v18 = vpack.c.bf16 %v3332_v31, %v3332_v31 }
 0x424   :  { %v2896_v34 = vpop.f32.mrf.mxu2  ;;  %4656 = vst.msk [vmem:[%s9143_s3 + $0x764] sm:$0xf] %vm4182_vm0, %v4174_v32  ;;  %v3933_v35 = vpack.c.bf16 %v3452_v33, %v3452_v33 }
 0x425   :  { %v2897_v36 = vadd.f32 %v8887_v27, %v2896_v34  ;;  %4295 = vst.msk [vmem:[%s9143_s3 + $0x1c0] sm:$0xf] %vm4182_vm0, %v3813_v18  ;;  %v3201_v37 = vpop.f32.mrf.mxu3 }
 0x426   :  { %4415 = vst.msk [vmem:[%s9143_s3 + $0x3a0] sm:$0xf] %vm4182_vm0, %v3933_v35  ;;  %v3202_v38 = vadd.f32 %v8887_v27, %v3201_v37  ;;  %v2298_v39 = vpop.f32.mrf.mxu0 }
 0x427   :  { %v3572_v40 = vmax.f32 %v2897_v36, 0.0  ;;  %v2299_v42 = vadd.f32 %v8887_v27, %v2298_v39  ;;  %v2598_v43 = vpop.f32.mrf.mxu1 }
 0x428   :  { %v3694_v44 = vmax.f32 %v3202_v38, 0.0  ;;  %v2599_v45 = vadd.f32 %v8887_v27, %v2598_v43 }
 0x429   :  { %v4053_v46 = vpack.c.bf16 %v3572_v40, %v3572_v40  ;;  %v3333_v47 = vmax.f32 %v2299_v42, 0.0 }
 0x42a   :  { %v4175_v48 = vpack.c.bf16 %v3694_v44, %v3694_v44  ;;  %v3453_v49 = vmax.f32 %v2599_v45, 0.0 }
 0x42b   :  { %4535 = vst.msk [vmem:[%s9143_s3 + $0x580] sm:$0xf] %vm4182_vm0, %v4053_v46  ;;  %v3814_v50 = vpack.c.bf16 %v3333_v47, %v3333_v47 }
 0x42c   :  { %v2898_v51 = vpop.f32.mrf.mxu2  ;;  %4657 = vst.msk [vmem:[%s9143_s3 + $0x768] sm:$0xf] %vm4182_vm0, %v4175_v48  ;;  %v3934_v52 = vpack.c.bf16 %v3453_v49, %v3453_v49 }
 0x42d   :  { %v2899_v53 = vadd.f32 %v8887_v27, %v2898_v51  ;;  %4296 = vst.msk [vmem:[%s9143_s3 + $0x1c4] sm:$0xf] %vm4182_vm0, %v3814_v50  ;;  %v3203_v54 = vpop.f32.mrf.mxu3 }
 0x42e   :  { %4416 = vst.msk [vmem:[%s9143_s3 + $0x3a4] sm:$0xf] %vm4182_vm0, %v3934_v52  ;;  %v3204_v55 = vadd.f32 %v8887_v27, %v3203_v54  ;;  %v2301_v57 = vpop.f32.mrf.mxu0 }
 0x42f   :  { %v3573_v58 = vmax.f32 %v2899_v53, 0.0  ;;  %v2302_v41 = vadd.f32 %v8887_v27, %v2301_v57  ;;  %v2601_v59 = vpop.f32.mrf.mxu1 }
 0x430   :  { %v3695_v60 = vmax.f32 %v3204_v55, 0.0  ;;  %v2602_v61 = vadd.f32 %v8887_v27, %v2601_v59 }
 0x431   :  { %v4054_v62 = vpack.c.bf16 %v3573_v58, %v3573_v58  ;;  %v3334_v63 = vmax.f32 %v2302_v41, 0.0 }
 0x432   :  { %v4176_v0 = vpack.c.bf16 %v3695_v60, %v3695_v60  ;;  %v3454_v1 = vmax.f32 %v2602_v61, 0.0 }
 0x433   :  { %4536 = vst.msk [vmem:[%s9143_s3 + $0x584] sm:$0xf] %vm4182_vm0, %v4054_v62  ;;  %v3815_v2 = vpack.c.bf16 %v3334_v63, %v3334_v63 }
 0x434   :  { %v2901_v3 = vpop.f32.mrf.mxu2  ;;  %4658 = vst.msk [vmem:[%s9143_s3 + $0x76c] sm:$0xf] %vm4182_vm0, %v4176_v0  ;;  %v3935_v4 = vpack.c.bf16 %v3454_v1, %v3454_v1 }
 0x435   :  { %v2902_v5 = vadd.f32 %v8887_v27, %v2901_v3  ;;  %4297 = vst.msk [vmem:[%s9143_s3 + $0x1c8] sm:$0xf] %vm4182_vm0, %v3815_v2  ;;  %v3206_v6 = vpop.f32.mrf.mxu3 }
 0x436   :  { %4417 = vst.msk [vmem:[%s9143_s3 + $0x3a8] sm:$0xf] %vm4182_vm0, %v3935_v4  ;;  %v3207_v56 = vadd.f32 %v8887_v27, %v3206_v6  ;;  %v2303_v8 = vpop.f32.mrf.mxu0 }
 0x437   :  { %v3574_v9 = vmax.f32 %v2902_v5, 0.0  ;;  %v2304_v10 = vadd.f32 %v8887_v27, %v2303_v8  ;;  %v2603_v11 = vpop.f32.mrf.mxu1 }
 0x438   :  { %v3696_v12 = vmax.f32 %v3207_v56, 0.0  ;;  %v2604_v13 = vadd.f32 %v8887_v27, %v2603_v11 }
 0x439   :  { %v4055_v14 = vpack.c.bf16 %v3574_v9, %v3574_v9  ;;  %v3335_v15 = vmax.f32 %v2304_v10, 0.0 }
 0x43a   :  { %v4177_v16 = vpack.c.bf16 %v3696_v12, %v3696_v12  ;;  %v3455_v17 = vmax.f32 %v2604_v13, 0.0 }
 0x43b   :  { %4537 = vst.msk [vmem:[%s9143_s3 + $0x588] sm:$0xf] %vm4182_vm0, %v4055_v14  ;;  %v3816_v19 = vpack.c.bf16 %v3335_v15, %v3335_v15 }
 0x43c   :  { %v2903_v20 = vpop.f32.mrf.mxu2  ;;  %4659 = vst.msk [vmem:[%s9143_s3 + $0x770] sm:$0xf] %vm4182_vm0, %v4177_v16  ;;  %v3936_v21 = vpack.c.bf16 %v3455_v17, %v3455_v17 }
 0x43d   :  { %v2904_v22 = vadd.f32 %v8887_v27, %v2903_v20  ;;  %4298 = vst.msk [vmem:[%s9143_s3 + $0x1cc] sm:$0xf] %vm4182_vm0, %v3816_v19  ;;  %v3208_v23 = vpop.f32.mrf.mxu3 }
 0x43e   :  { %4418 = vst.msk [vmem:[%s9143_s3 + $0x3ac] sm:$0xf] %vm4182_vm0, %v3936_v21  ;;  %v3209_v7 = vadd.f32 %v8887_v27, %v3208_v23  ;;  %v2306_v24 = vpop.f32.mrf.mxu0 }
 0x43f   :  { %v3575_v25 = vmax.f32 %v2904_v22, 0.0  ;;  %v2307_v26 = vadd.f32 %v8887_v27, %v2306_v24  ;;  %v2606_v28 = vpop.f32.mrf.mxu1 }
 0x440   :  { %v3697_v29 = vmax.f32 %v3209_v7, 0.0  ;;  %v2607_v30 = vadd.f32 %v8887_v27, %v2606_v28 }
 0x441   :  { %v4056_v31 = vpack.c.bf16 %v3575_v25, %v3575_v25  ;;  %v3336_v32 = vmax.f32 %v2307_v26, 0.0 }
 0x442   :  { %v4178_v33 = vpack.c.bf16 %v3697_v29, %v3697_v29  ;;  %v3456_v18 = vmax.f32 %v2607_v30, 0.0 }
 0x443   :  { %4538 = vst.msk [vmem:[%s9143_s3 + $0x58c] sm:$0xf] %vm4182_vm0, %v4056_v31  ;;  %v3817_v34 = vpack.c.bf16 %v3336_v32, %v3336_v32 }
 0x444   :  { %v2906_v35 = vpop.f32.mrf.mxu2  ;;  %4660 = vst.msk [vmem:[%s9143_s3 + $0x774] sm:$0xf] %vm4182_vm0, %v4178_v33  ;;  %v3937_v36 = vpack.c.bf16 %v3456_v18, %v3456_v18 }
 0x445   :  { %v2907_v37 = vadd.f32 %v8887_v27, %v2906_v35  ;;  %4299 = vst.msk [vmem:[%s9143_s3 + $0x1d0] sm:$0xf] %vm4182_vm0, %v3817_v34  ;;  %v3211_v38 = vpop.f32.mrf.mxu3 }
 0x446   :  { %4419 = vst.msk [vmem:[%s9143_s3 + $0x3b0] sm:$0xf] %vm4182_vm0, %v3937_v36  ;;  %v3212_v39 = vadd.f32 %v8887_v27, %v3211_v38  ;;  %v2308_v40 = vpop.f32.mrf.mxu0 }
 0x447   :  { %v3576_v42 = vmax.f32 %v2907_v37, 0.0  ;;  %v2309_v43 = vadd.f32 %v8887_v27, %v2308_v40  ;;  %v2608_v44 = vpop.f32.mrf.mxu1 }
 0x448   :  { %v3698_v45 = vmax.f32 %v3212_v39, 0.0  ;;  %v2609_v46 = vadd.f32 %v8887_v27, %v2608_v44 }
 0x449   :  { %v4057_v47 = vpack.c.bf16 %v3576_v42, %v3576_v42  ;;  %v3337_v48 = vmax.f32 %v2309_v43, 0.0 }
 0x44a   :  { %v4179_v49 = vpack.c.bf16 %v3698_v45, %v3698_v45  ;;  %v3457_v50 = vmax.f32 %v2609_v46, 0.0 }
 0x44b   :  { %4539 = vst.msk [vmem:[%s9143_s3 + $0x590] sm:$0xf] %vm4182_vm0, %v4057_v47  ;;  %v3818_v51 = vpack.c.bf16 %v3337_v48, %v3337_v48 }
 0x44c   :  { %v2908_v52 = vpop.f32.mrf.mxu2  ;;  %4661 = vst.msk [vmem:[%s9143_s3 + $0x778] sm:$0xf] %vm4182_vm0, %v4179_v49  ;;  %v3938_v53 = vpack.c.bf16 %v3457_v50, %v3457_v50 }
 0x44d   :  { %v2909_v54 = vadd.f32 %v8887_v27, %v2908_v52  ;;  %4300 = vst.msk [vmem:[%s9143_s3 + $0x1d4] sm:$0xf] %vm4182_vm0, %v3818_v51  ;;  %v3213_v55 = vpop.f32.mrf.mxu3 }
 0x44e   :  { %4420 = vst.msk [vmem:[%s9143_s3 + $0x3b4] sm:$0xf] %vm4182_vm0, %v3938_v53  ;;  %v3214_v57 = vadd.f32 %v8887_v27, %v3213_v55  ;;  %v2311_v58 = vpop.f32.mrf.mxu0 }
 0x44f   :  { %v3577_v41 = vmax.f32 %v2909_v54, 0.0  ;;  %v2312_v59 = vadd.f32 %v8887_v27, %v2311_v58  ;;  %v2611_v60 = vpop.f32.mrf.mxu1 }
 0x450   :  { %v3699_v61 = vmax.f32 %v3214_v57, 0.0  ;;  %v2612_v62 = vadd.f32 %v8887_v27, %v2611_v60 }
 0x451   :  { %v4058_v63 = vpack.c.bf16 %v3577_v41, %v3577_v41  ;;  %v3338_v0 = vmax.f32 %v2312_v59, 0.0 }
 0x452   :  { %v4180_v1 = vpack.c.bf16 %v3699_v61, %v3699_v61  ;;  %v3458_v2 = vmax.f32 %v2612_v62, 0.0 }
 0x453   :  { %4540 = vst.msk [vmem:[%s9143_s3 + $0x594] sm:$0xf] %vm4182_vm0, %v4058_v63  ;;  %v3819_v3 = vpack.c.bf16 %v3338_v0, %v3338_v0 }
 0x454   :  { %v2911_v4 = vpop.f32.mrf.mxu2  ;;  %4662 = vst.msk [vmem:[%s9143_s3 + $0x77c] sm:$0xf] %vm4182_vm0, %v4180_v1  ;;  %v3939_v5 = vpack.c.bf16 %v3458_v2, %v3458_v2 }
 0x455   :  { %v2912_v6 = vadd.f32 %v8887_v27, %v2911_v4  ;;  %4301 = vst.msk [vmem:[%s9143_s3 + $0x1d8] sm:$0xf] %vm4182_vm0, %v3819_v3  ;;  %v3216_v56 = vpop.f32.mrf.mxu3 }
 0x456   :  { %4421 = vst.msk [vmem:[%s9143_s3 + $0x3b8] sm:$0xf] %vm4182_vm0, %v3939_v5  ;;  %v3217_v8 = vadd.f32 %v8887_v27, %v3216_v56  ;;  %v2313_v9 = vpop.f32.mrf.mxu0 }
 0x457   :  { %v3578_v10 = vmax.f32 %v2912_v6, 0.0  ;;  %v2314_v11 = vadd.f32 %v8887_v27, %v2313_v9  ;;  %v2613_v12 = vpop.f32.mrf.mxu1 }
 0x458   :  { %v3700_v13 = vmax.f32 %v3217_v8, 0.0  ;;  %v2614_v14 = vadd.f32 %v8887_v27, %v2613_v12 }
 0x459   :  { %v4059_v15 = vpack.c.bf16 %v3578_v10, %v3578_v10  ;;  %v3339_v16 = vmax.f32 %v2314_v11, 0.0 }
 0x45a   :  { %v4181_v17 = vpack.c.bf16 %v3700_v13, %v3700_v13  ;;  %v3459_v19 = vmax.f32 %v2614_v14, 0.0 }
 0x45b   :  { %4541 = vst.msk [vmem:[%s9143_s3 + $0x598] sm:$0xf] %vm4182_vm0, %v4059_v15  ;;  %v3820_v20 = vpack.c.bf16 %v3339_v16, %v3339_v16 }
 0x45c   :  { %v2913_v21 = vpop.f32.mrf.mxu2  ;;  %4664 = vst.msk [vmem:[%s9143_s3 + $0x780] sm:$0x3] %vm4663_vm1, %v4181_v17  ;;  %v3940_v22 = vpack.c.bf16 %v3459_v19, %v3459_v19 }
 0x45d   :  { %v2914_v23 = vadd.f32 %v8887_v27, %v2913_v21  ;;  %4302 = vst.msk [vmem:[%s9143_s3 + $0x1dc] sm:$0xf] %vm4182_vm0, %v3820_v20  ;;  %v3218_v7 = vpop.f32.mrf.mxu3 }
 0x45e   :  { %4422 = vst.msk [vmem:[%s9143_s3 + $0x3bc] sm:$0xf] %vm4182_vm0, %v3940_v22 }
 0x45f   :  { %v3579_v24 = vmax.f32 %v2914_v23, 0.0 }
 0x461   :  { %v4060_v25 = vpack.c.bf16 %v3579_v24, %v3579_v24 }
 0x463   :  { %4542 = vst.msk [vmem:[%s9143_s3 + $0x59c] sm:$0xf] %vm4182_vm0, %v4060_v25 }
 0x464   :  { %v2916_v26 = vpop.f32.mrf.mxu2 }
 0x465   :  { %v2917_v28 = vadd.f32 %v8887_v27, %v2916_v26 }
 0x467   :  { %v3580_v29 = vmax.f32 %v2917_v28, 0.0 }
 0x469   :  { %v4061_v30 = vpack.c.bf16 %v3580_v29, %v3580_v29 }
 0x46b   :  { %4543 = vst.msk [vmem:[%s9143_s3 + $0x5a0] sm:$0xf] %vm4182_vm0, %v4061_v30 }
 0x46c   :  { %v2918_v31 = vpop.f32.mrf.mxu2 }
 0x46d   :  { %v2919_v32 = vadd.f32 %v8887_v27, %v2918_v31 }
 0x46f   :  { %v3581_v33 = vmax.f32 %v2919_v32, 0.0 }
 0x471   :  { %v4062_v18 = vpack.c.bf16 %v3581_v33, %v3581_v33 }
 0x473   :  { %4544 = vst.msk [vmem:[%s9143_s3 + $0x5a4] sm:$0xf] %vm4182_vm0, %v4062_v18 }

// kernel: dqn_forward.6
= control target key start
LH: loop header
LB: loop body
LE: loop exit
PB: predicated region body
PF: predicated region fallthrough
CT: control target
= control target key end

     0   :  { %vm861_vm0 = vcmask 519168   ;;  %s1916_s1 = inlined_call_operand.vmem [shape: bf16[384,64], index: 1, kind: input, shape index: {}]   ;;  %s1917_s2 = inlined_call_operand.vmem [shape: f32[1,64], index: 2, kind: input, shape index: {}]   ;;  %s1918_s0 = inlined_call_operand.vmem [shape: bf16[256,384], index: 0, kind: input, shape index: {}]   ;;  %s1919_s3 = inlined_call_operand.vmem [shape: bf16[256,64], index: 3, kind: output, shape index: {}]  }
   0x1   :  { %v1241_v0 = vld [vmem:[%s1916_s1 + $0x38] sm:$0xff]  ;;  %v1240_v3 = vld [vmem:[%s1916_s1 + $0x30] sm:$0xff]  ;;  %v1239_v6 = vld [vmem:[%s1916_s1 + $0x28] sm:$0xff] }
   0x2   :  { %v1309_v1 = vld [vmem:[%s1916_s1 + $0x78] sm:$0xff]  ;;  %530 = vmatpush.bf16.msra.mxu0 %v1241_v0  ;;  %1258 = vmatpush.bf16.msra.mxu3 %v1241_v0  ;;  %v1324_v4 = vld [vmem:[%s1916_s1 + $0x70] sm:$0xff]  ;;  %v1247_v7 = vld [vmem:[%s1916_s1 + $0x68] sm:$0xff] }
   0x3   :  { %v1314_v2 = vld [vmem:[%s1916_s1 + $0xb8] sm:$0xff]  ;;  %619 = vmatpush.bf16.msra.mxu1 %v1309_v1  ;;  %v1329_v5 = vld [vmem:[%s1916_s1 + $0xb0] sm:$0xff]  ;;  %v1342_v8 = vld [vmem:[%s1916_s1 + $0xa8] sm:$0xff] }
   0x4   :  { %708 = vmatpush.bf16.msra.mxu2 %v1314_v2  ;;  %v1238_v9 = vld [vmem:[%s1916_s1 + $0x20] sm:$0xff]  ;;  %v1237_v12 = vld [vmem:[%s1916_s1 + $0x18] sm:$0xff]  ;;  %v1236_v15 = vld [vmem:[%s1916_s1 + $0x10] sm:$0xff] }
   0x5   :  { %v1246_v10 = vld [vmem:[%s1916_s1 + $0x60] sm:$0xff]  ;;  %v1245_v13 = vld [vmem:[%s1916_s1 + $0x58] sm:$0xff]  ;;  %v1244_v16 = vld [vmem:[%s1916_s1 + $0x50] sm:$0xff] }
   0x6   :  { %531 = vmatpush.bf16.msra.mxu0 %v1240_v3  ;;  %1259 = vmatpush.bf16.msra.mxu3 %v1240_v3  ;;  %v1354_v11 = vld [vmem:[%s1916_s1 + $0xa0] sm:$0xff]  ;;  %v1366_v14 = vld [vmem:[%s1916_s1 + $0x98] sm:$0xff]  ;;  %v1378_v17 = vld [vmem:[%s1916_s1 + $0x90] sm:$0xff] }
   0x7   :  { %620 = vmatpush.bf16.msra.mxu1 %v1324_v4  ;;  %v1235_v18 = vld [vmem:[%s1916_s1 + $0x8] sm:$0xff]  ;;  %v1234_v21 = vld [vmem:[%s1916_s1] sm:$0xff]  ;;  %v902_v29 = vld [vmem:[%s1918_s0 + $0xc] sm:$0xf0] }
   0x8   :  { %709 = vmatpush.bf16.msra.mxu2 %v1329_v5  ;;  %v1243_v19 = vld [vmem:[%s1916_s1 + $0x48] sm:$0xff]  ;;  %v1242_v22 = vld [vmem:[%s1916_s1 + $0x40] sm:$0xff]  ;;  %v1188_v31 = vld [vmem:[%s1918_s0 + $0x10] sm:$0xf0] }
   0x9   :  { %v1390_v20 = vld [vmem:[%s1916_s1 + $0x88] sm:$0xff]  ;;  %v1401_v23 = vld [vmem:[%s1916_s1 + $0x80] sm:$0xff]  ;;  %v912_v36 = vld [vmem:[%s1918_s0 + $0x18] sm:$0xf] }
   0xa   :  { %532 = vmatpush.bf16.msra.mxu0 %v1239_v6  ;;  %1260 = vmatpush.bf16.msra.mxu3 %v1239_v6  ;;  %v900_v24 = vld [vmem:[%s1918_s0] sm:$0xf]  ;;  %v1187_v25 = vld [vmem:[%s1918_s0 + $0x8] sm:$0xf0]  ;;  %v1186_v28 = vld [vmem:[%s1918_s0 + $0x4] sm:$0xf] }
   0xb   :  { %621 = vmatpush.bf16.msra.mxu1 %v1247_v7  ;;  %v1044_v26 = vld [vmem:[%s1918_s0 + $0x120] sm:$0xf]  ;;  %v1223_v27 = vld [vmem:[%s1918_s0 + $0x128] sm:$0xf0]  ;;  %v908_v30 = vld [vmem:[%s1918_s0 + $0x8] sm:$0xf]  ;;  %v901_v32 = vor.u32 %v1187_v25, %v900_v24  ;;  %v905_v34 = vor.u32 %v1186_v28, %v902_v29 }
   0xc   :  { %710 = vmatpush.bf16.msra.mxu2 %v1342_v8  ;;  %v1045_v33 = vor.u32 %v1223_v27, %v1044_v26  ;;  %v909_v35 = vor.u32 %v1188_v31, %v908_v30  ;;  %v1190_v37 = vld [vmem:[%s1918_s0 + $0x20] sm:$0xf0]  ;;  %v1056_v38 = vld [vmem:[%s1918_s0 + $0x138] sm:$0xf]  ;;  %v1189_v40 = vld [vmem:[%s1918_s0 + $0x1c] sm:$0xf] }
   0xd   :  { %v1226_v39 = vld [vmem:[%s1918_s0 + $0x140] sm:$0xf0]  ;;  %v914_v41 = vld [vmem:[%s1918_s0 + $0x24] sm:$0xf0]  ;;  %v920_v42 = vld [vmem:[%s1918_s0 + $0x20] sm:$0xf]  ;;  %v913_v44 = vor.u32 %v1190_v37, %v912_v36 }
   0xe   :  { %533 = vmatpush.bf16.msra.mxu0 %v1238_v9  ;;  %1261 = vmatpush.bf16.msra.mxu3 %v1238_v9  ;;  %v1191_v43 = vld [vmem:[%s1918_s0 + $0x28] sm:$0xf0]  ;;  %v1057_v45 = vor.u32 %v1226_v39, %v1056_v38  ;;  %v917_v46 = vor.u32 %v1189_v40, %v914_v41  ;;  %v924_v48 = vld [vmem:[%s1918_s0 + $0x30] sm:$0xf]  ;;  %v1193_v49 = vld [vmem:[%s1918_s0 + $0x38] sm:$0xf0] }
   0xf   :  { %622 = vmatpush.bf16.msra.mxu1 %v1246_v10  ;;  %v921_v47 = vor.u32 %v1191_v43, %v920_v42  ;;  %v1068_v50 = vld [vmem:[%s1918_s0 + $0x150] sm:$0xf]  ;;  %v1229_v51 = vld [vmem:[%s1918_s0 + $0x158] sm:$0xf0]  ;;  %v1192_v52 = vld [vmem:[%s1918_s0 + $0x34] sm:$0xf]  ;;  %v925_v56 = vor.u32 %v1193_v49, %v924_v48 }
  0x10   :  { %711 = vmatpush.bf16.msra.mxu2 %v1354_v11  ;;  %v926_v53 = vld [vmem:[%s1918_s0 + $0x3c] sm:$0xf0]  ;;  %v932_v54 = vld [vmem:[%s1918_s0 + $0x38] sm:$0xf]  ;;  %v1194_v55 = vld [vmem:[%s1918_s0 + $0x40] sm:$0xf0]  ;;  %v1069_v57 = vor.u32 %v1229_v51, %v1068_v50 }
  0x11   :  { %v929_v58 = vor.u32 %v1192_v52, %v926_v53  ;;  %v933_v59 = vor.u32 %v1194_v55, %v932_v54  ;;  %v936_v60 = vld [vmem:[%s1918_s0 + $0x48] sm:$0xf]  ;;  %v1196_v61 = vld [vmem:[%s1918_s0 + $0x50] sm:$0xf0]  ;;  %v1195_v0 = vld [vmem:[%s1918_s0 + $0x4c] sm:$0xf] }
  0x12   :  { %534 = vmatpush.bf16.msra.mxu0 %v1237_v12  ;;  %1262 = vmatpush.bf16.msra.mxu3 %v1237_v12  ;;  %v1080_v62 = vld [vmem:[%s1918_s0 + $0x168] sm:$0xf]  ;;  %v1232_v63 = vld [vmem:[%s1918_s0 + $0x170] sm:$0xf0]  ;;  %v1197_v3 = vld [vmem:[%s1918_s0 + $0x58] sm:$0xf0] }
  0x13   :  { %623 = vmatpush.bf16.msra.mxu1 %v1245_v13  ;;  %v1199_v9 = vld [vmem:[%s1918_s0 + $0x68] sm:$0xf0]  ;;  %v1046_v12 = vld [vmem:[%s1918_s0 + $0x12c] sm:$0xf0]  ;;  %v1058_v24 = vld [vmem:[%s1918_s0 + $0x144] sm:$0xf0] }
  0x14   :  { %712 = vmatpush.bf16.msra.mxu2 %v1366_v14  ;;  %v962_v25 = vld [vmem:[%s1918_s0 + $0x84] sm:$0xf0]  ;;  %v968_v26 = vld [vmem:[%s1918_s0 + $0x80] sm:$0xf]  ;;  %v1203_v27 = vld [vmem:[%s1918_s0 + $0x88] sm:$0xf0] }
  0x15   :  { %v969_v31 = vor.u32 %v1203_v27, %v968_v26  ;;  %v1070_v36 = vld [vmem:[%s1918_s0 + $0x15c] sm:$0xf0]  ;;  %v980_v38 = vld [vmem:[%s1918_s0 + $0x98] sm:$0xf]  ;;  %v1206_v39 = vld [vmem:[%s1918_s0 + $0xa0] sm:$0xf0] }
  0x16   :  { %535 = vmatpush.bf16.msra.mxu0 %v1236_v15  ;;  %1263 = vmatpush.bf16.msra.mxu3 %v1236_v15  ;;  %v1200_v15 = vld [vmem:[%s1918_s0 + $0x70] sm:$0xf0]  ;;  %v974_v37 = vld [vmem:[%s1918_s0 + $0x9c] sm:$0xf0]  ;;  %v981_v43 = vor.u32 %v1206_v39, %v980_v38  ;;  %v1082_v48 = vld [vmem:[%s1918_s0 + $0x174] sm:$0xf0] }
  0x17   :  { %624 = vmatpush.bf16.msra.mxu1 %v1244_v16  ;;  %v986_v49 = vld [vmem:[%s1918_s0 + $0xb4] sm:$0xf0]  ;;  %v992_v50 = vld [vmem:[%s1918_s0 + $0xb0] sm:$0xf]  ;;  %v1209_v51 = vld [vmem:[%s1918_s0 + $0xb8] sm:$0xf0] }
  0x18   :  { %713 = vmatpush.bf16.msra.mxu2 %v1378_v17  ;;  %v993_v55 = vor.u32 %v1209_v51, %v992_v50  ;;  %v1076_v50 = vld [vmem:[%s1918_s0 + $0x158] sm:$0xf]  ;;  %v1230_v51 = vld [vmem:[%s1918_s0 + $0x160] sm:$0xf0] }
  0x1a   :  { %536 = vmatpush.bf16.msra.mxu0 %v1235_v18  ;;  %1264 = vmatpush.bf16.msra.mxu3 %v1235_v18 }
  0x1b   :  { %625 = vmatpush.bf16.msra.mxu1 %v1243_v19 }
  0x1c   :  { %714 = vmatpush.bf16.msra.mxu2 %v1390_v20 }
  0x1e   :  { %537 = vmatpush.bf16.msra.mxu0 %v1234_v21  ;;  %1265 = vmatpush.bf16.msra.mxu3 %v1234_v21  ;;  %v1202_v21 = vld [vmem:[%s1918_s0 + $0x80] sm:$0xf0] }
  0x1f   :  { %626 = vmatpush.bf16.msra.mxu1 %v1242_v22 }
  0x20   :  { %715 = vmatpush.bf16.msra.mxu2 %v1401_v23 }
  0x21   :  { %538 = vmatmul.bf16.vlgmr.msra.gmra.mxu0 %v901_v32  ;;  %598 = vmatmul.bf16.vlgmr.msra.gmra.mxu3 %v1045_v33  ;;  %v972_v32 = vld [vmem:[%s1918_s0 + $0x90] sm:$0xf]  ;;  %v1205_v33 = vld [vmem:[%s1918_s0 + $0x98] sm:$0xf0] }
  0x22   :  { %1266 = vmatpush.bf16.msrb.mxu3 %v1309_v1  ;;  %627 = vmatmul.bf16.vlgmr.msra.gmra.mxu1 %v905_v34  ;;  %v938_v1 = vld [vmem:[%s1918_s0 + $0x54] sm:$0xf0]  ;;  %v1204_v34 = vld [vmem:[%s1918_s0 + $0x94] sm:$0xf]  ;;  %v973_v40 = vor.u32 %v1205_v33, %v972_v32 }
  0x23   :  { %716 = vmatmul.bf16.vlgmr.msra.gmra.mxu2 %v909_v35  ;;  %v941_v6 = vor.u32 %v1195_v0, %v938_v1  ;;  %v1228_v35 = vld [vmem:[%s1918_s0 + $0x154] sm:$0xf]  ;;  %v977_v42 = vor.u32 %v1204_v34, %v974_v37 }
  0x24   :  { %v1073_v41 = vor.u32 %v1228_v35, %v1070_v36  ;;  %v1212_v0 = vld [vmem:[%s1918_s0 + $0xd0] sm:$0xf0] }
  0x26   :  { %1267 = vmatpush.bf16.msrb.mxu3 %v1324_v4  ;;  %v937_v4 = vor.u32 %v1196_v61, %v936_v60  ;;  %v1052_v60 = vld [vmem:[%s1918_s0 + $0x128] sm:$0xf]  ;;  %v1224_v61 = vld [vmem:[%s1918_s0 + $0x130] sm:$0xf0] }
  0x2a   :  { %1268 = vmatpush.bf16.msrb.mxu3 %v1247_v7 }
  0x2e   :  { %1269 = vmatpush.bf16.msrb.mxu3 %v1246_v10  ;;  %v1198_v10 = vld [vmem:[%s1918_s0 + $0x64] sm:$0xf] }
  0x31   :  { %543 = vmatmul.bf16.gmra.mxu0 %v913_v44  ;;  %603 = vmatmul.bf16.gmra.mxu3 %v1057_v45  ;;  %v984_v44 = vld [vmem:[%s1918_s0 + $0xa8] sm:$0xf]  ;;  %v1208_v45 = vld [vmem:[%s1918_s0 + $0xb0] sm:$0xf0] }
  0x32   :  { %1270 = vmatpush.bf16.msrb.mxu3 %v1245_v13  ;;  %632 = vmatmul.bf16.gmra.mxu1 %v917_v46  ;;  %v950_v13 = vld [vmem:[%s1918_s0 + $0x6c] sm:$0xf0]  ;;  %v1207_v46 = vld [vmem:[%s1918_s0 + $0xac] sm:$0xf]  ;;  %v985_v52 = vor.u32 %v1208_v45, %v984_v44 }
  0x33   :  { %721 = vmatmul.bf16.gmra.mxu2 %v921_v47  ;;  %v953_v18 = vor.u32 %v1198_v10, %v950_v13  ;;  %v1231_v47 = vld [vmem:[%s1918_s0 + $0x16c] sm:$0xf]  ;;  %v989_v54 = vor.u32 %v1207_v46, %v986_v49  ;;  %v1020_v46 = vld [vmem:[%s1918_s0 + $0xf0] sm:$0xf]  ;;  %v1216_v49 = vld [vmem:[%s1918_s0 + $0xf4] sm:$0xf] }
  0x34   :  { %v1085_v53 = vor.u32 %v1231_v47, %v1082_v48  ;;  %v1217_v47 = vld [vmem:[%s1918_s0 + $0xf8] sm:$0xf0] }
  0x36   :  { %1271 = vmatpush.bf16.msrb.mxu3 %v1244_v16 }
  0x3a   :  { %1272 = vmatpush.bf16.msrb.mxu3 %v1243_v19 }
  0x3e   :  { %1273 = vmatpush.bf16.msrb.mxu3 %v1242_v22  ;;  %v1201_v22 = vld [vmem:[%s1918_s0 + $0x7c] sm:$0xf] }
  0x3f   :  { %v965_v30 = vor.u32 %v1201_v22, %v962_v25  ;;  %v1010_v22 = vld [vmem:[%s1918_s0 + $0xe4] sm:$0xf0] }
  0x41   :  { %548 = vmatmul.bf16.gmra.mxu0 %v925_v56  ;;  %608 = vmatmul.bf16.gmra.mxu3 %v1069_v57  ;;  %v1610_v56 = vld [vmem:[%s1917_s2] ss:$0 sm:$0xff] }
  0x42   :  { %1274 = vmatpush.bf16.msra.mxu3 %v1314_v2  ;;  %637 = vmatmul.bf16.gmra.mxu1 %v929_v58  ;;  %v944_v2 = vld [vmem:[%s1918_s0 + $0x50] sm:$0xf]  ;;  %v996_v57 = vld [vmem:[%s1918_s0 + $0xc0] sm:$0xf]  ;;  %v1211_v58 = vld [vmem:[%s1918_s0 + $0xc8] sm:$0xf0] }
  0x43   :  { %726 = vmatmul.bf16.gmra.mxu2 %v933_v59  ;;  %v945_v7 = vor.u32 %v1197_v3, %v944_v2  ;;  %v1210_v59 = vld [vmem:[%s1918_s0 + $0xc4] sm:$0xf]  ;;  %v997_v1 = vor.u32 %v1211_v58, %v996_v57  ;;  %v1053_v2 = vor.u32 %v1224_v61, %v1052_v60  ;;  %v1077_v60 = vor.u32 %v1230_v51, %v1076_v50 }
  0x46   :  { %1275 = vmatpush.bf16.msra.mxu3 %v1329_v5  ;;  %v1081_v5 = vor.u32 %v1232_v63, %v1080_v62  ;;  %v998_v62 = vld [vmem:[%s1918_s0 + $0xcc] sm:$0xf0]  ;;  %v1004_v63 = vld [vmem:[%s1918_s0 + $0xc8] sm:$0xf] }
  0x4a   :  { %1276 = vmatpush.bf16.msra.mxu3 %v1342_v8  ;;  %v948_v8 = vld [vmem:[%s1918_s0 + $0x60] sm:$0xf] }
  0x4b   :  { %v949_v16 = vor.u32 %v1199_v9, %v948_v8 }
  0x4e   :  { %1277 = vmatpush.bf16.msra.mxu3 %v1354_v11  ;;  %v1222_v11 = vld [vmem:[%s1918_s0 + $0x124] sm:$0xf] }
  0x51   :  { %553 = vmatmul.bf16.gmra.mxu0 %v937_v4  ;;  %613 = vmatmul.bf16.gmra.mxu3 %v1081_v5  ;;  %v1001_v4 = vor.u32 %v1210_v59, %v998_v62  ;;  %v1005_v5 = vor.u32 %v1212_v0, %v1004_v63  ;;  %v1021_v59 = vor.u32 %v1217_v47, %v1020_v46 }
  0x52   :  { %1278 = vmatpush.bf16.msra.mxu3 %v1366_v14  ;;  %642 = vmatmul.bf16.gmra.mxu1 %v941_v6  ;;  %v956_v14 = vld [vmem:[%s1918_s0 + $0x68] sm:$0xf] }
  0x53   :  { %731 = vmatmul.bf16.gmra.mxu2 %v945_v7  ;;  %v957_v19 = vor.u32 %v1200_v15, %v956_v14 }
  0x56   :  { %1279 = vmatpush.bf16.msra.mxu3 %v1378_v17  ;;  %v1049_v17 = vor.u32 %v1222_v11, %v1046_v12 }
  0x5a   :  { %1280 = vmatpush.bf16.msra.mxu3 %v1390_v20  ;;  %v960_v20 = vld [vmem:[%s1918_s0 + $0x78] sm:$0xf] }
  0x5b   :  { %v961_v28 = vor.u32 %v1202_v21, %v960_v20  ;;  %v1064_v20 = vld [vmem:[%s1918_s0 + $0x140] sm:$0xf]  ;;  %v1227_v21 = vld [vmem:[%s1918_s0 + $0x148] sm:$0xf0] }
  0x5e   :  { %1281 = vmatpush.bf16.msra.mxu3 %v1401_v23  ;;  %v1225_v23 = vld [vmem:[%s1918_s0 + $0x13c] sm:$0xf] }
  0x5f   :  { %v1061_v29 = vor.u32 %v1225_v23, %v1058_v24  ;;  %v1016_v23 = vld [vmem:[%s1918_s0 + $0xe0] sm:$0xf]  ;;  %v1215_v24 = vld [vmem:[%s1918_s0 + $0xe8] sm:$0xf0] }
  0x60   :  { %v1017_v33 = vor.u32 %v1215_v24, %v1016_v23 }
  0x61   :  { %558 = vmatmul.bf16.gmra.mxu0 %v949_v16  ;;  %687 = vmatmul.bf16.vlgmr.msrb.gmra.mxu3 %v1049_v17  ;;  %v1008_v16 = vld [vmem:[%s1918_s0 + $0xd8] sm:$0xf]  ;;  %v1214_v17 = vld [vmem:[%s1918_s0 + $0xe0] sm:$0xf0] }
  0x62   :  { %647 = vmatmul.bf16.gmra.mxu1 %v953_v18 }
  0x63   :  { %736 = vmatmul.bf16.gmra.mxu2 %v957_v19  ;;  %v1213_v19 = vld [vmem:[%s1918_s0 + $0xdc] sm:$0xf] }
  0x64   :  { %v1013_v32 = vor.u32 %v1213_v19, %v1010_v22  ;;  %v1233_v19 = vld [vmem:[%s1918_s0 + $0x178] sm:$0xf0] }
  0x65   :  { %v1221_v22 = vld [vmem:[%s1918_s0 + $0x118] sm:$0xf0] }
  0x71   :  { %563 = vmatmul.bf16.gmra.mxu0 %v961_v28  ;;  %692 = vmatmul.bf16.gmra.mxu3 %v1061_v29  ;;  %v1009_v28 = vor.u32 %v1214_v17, %v1008_v16  ;;  %v1065_v29 = vor.u32 %v1227_v21, %v1064_v20  ;;  %v1219_v17 = vld [vmem:[%s1918_s0 + $0x10c] sm:$0xf]  ;;  %v1034_v20 = vld [vmem:[%s1918_s0 + $0x114] sm:$0xf0]  ;;  %v1040_v21 = vld [vmem:[%s1918_s0 + $0x110] sm:$0xf] }
  0x72   :  { %652 = vmatmul.bf16.gmra.mxu1 %v965_v30 }
  0x73   :  { %741 = vmatmul.bf16.gmra.mxu2 %v969_v31 }
  0x81   :  { %568 = vmatmul.bf16.gmra.mxu0 %v973_v40  ;;  %697 = vmatmul.bf16.gmra.mxu3 %v1073_v41 }
  0x82   :  { %657 = vmatmul.bf16.gmra.mxu1 %v977_v42 }
  0x83   :  { %746 = vmatmul.bf16.gmra.mxu2 %v981_v43 }
  0x91   :  { %573 = vmatmul.bf16.gmra.mxu0 %v985_v52  ;;  %702 = vmatmul.bf16.gmra.mxu3 %v1085_v53  ;;  %v1022_v52 = vld [vmem:[%s1918_s0 + $0xfc] sm:$0xf0]  ;;  %v1028_v53 = vld [vmem:[%s1918_s0 + $0xf8] sm:$0xf] }
  0x92   :  { %662 = vmatmul.bf16.gmra.mxu1 %v989_v54  ;;  %v1218_v54 = vld [vmem:[%s1918_s0 + $0x100] sm:$0xf0]  ;;  %v1025_v63 = vor.u32 %v1216_v49, %v1022_v52 }
  0x93   :  { %751 = vmatmul.bf16.gmra.mxu2 %v993_v55  ;;  %v1029_v0 = vor.u32 %v1218_v54, %v1028_v53 }
  0x9e   :  { %v539_v3 = vpop.f32.mrf.mxu0 }
  0x9f   :  { %v540_v6 = vadd.f32 %v1610_v56, %v539_v3  ;;  %v628_v7 = vpop.f32.mrf.mxu1 }
  0xa1   :  { %578 = vmatmul.bf16.gmra.mxu0 %v997_v1  ;;  %776 = vmatmul.bf16.vlgmr.msra.gmra.mxu3 %v1053_v2  ;;  %v629_v8 = vadd.f32 %v628_v7, %v540_v6 }
  0xa2   :  { %667 = vmatmul.bf16.gmra.mxu1 %v1001_v4 }
  0xa3   :  { %756 = vmatmul.bf16.gmra.mxu2 %v1005_v5 }
  0xa4   :  { %v1637_v9 = vpop.f32.mrf.mxu3 }
  0xa6   :  { %v717_v10 = vpop.f32.mrf.mxu2  ;;  %v541_v12 = vpop.f32.mrf.mxu0 }
  0xa7   :  { %v718_v11 = vadd.f32 %v717_v10, %v629_v8  ;;  %v630_v13 = vpop.f32.mrf.mxu1  ;;  %v542_v15 = vadd.f32 %v1610_v56, %v541_v12 }
  0xa9   :  { %v797_v14 = vmax.f32 %v718_v11, 0.0  ;;  %v631_v25 = vadd.f32 %v630_v13, %v542_v15  ;;  %v1220_v15 = vld [vmem:[%s1918_s0 + $0x110] sm:$0xf0] }
  0xab   :  { %v829_v18 = vpack.c.bf16 %v797_v14, %v797_v14  ;;  %v1032_v14 = vld [vmem:[%s1918_s0 + $0x108] sm:$0xf] }
  0xac   :  { %v1668_v26 = vpop.f32.mrf.mxu3 }
  0xad   :  { %862 = vst.msk [vmem:[%s1919_s3] sm:$0xf] %vm861_vm0, %v829_v18  ;;  %v1088_v18 = vld [vmem:[%s1918_s0 + $0x170] sm:$0xf] }
  0xae   :  { %v719_v27 = vpop.f32.mrf.mxu2  ;;  %v544_v31 = vpop.f32.mrf.mxu0 }
  0xaf   :  { %v720_v30 = vadd.f32 %v719_v27, %v631_v25  ;;  %v545_v34 = vadd.f32 %v1610_v56, %v544_v31  ;;  %v633_v35 = vpop.f32.mrf.mxu1  ;;  %v1033_v27 = vor.u32 %v1220_v15, %v1032_v14  ;;  %v1037_v31 = vor.u32 %v1219_v17, %v1034_v20 }
  0xb1   :  { %v798_v36 = vmax.f32 %v720_v30, 0.0  ;;  %583 = vmatmul.bf16.gmra.mxu0 %v1009_v28  ;;  %781 = vmatmul.bf16.gmra.mxu3 %v1065_v29  ;;  %v634_v38 = vadd.f32 %v633_v35, %v545_v34  ;;  %v1089_v28 = vor.u32 %v1233_v19, %v1088_v18 }
  0xb2   :  { %672 = vmatmul.bf16.gmra.mxu1 %v1013_v32  ;;  %v1041_v32 = vor.u32 %v1221_v22, %v1040_v21 }
  0xb3   :  { %v830_v37 = vpack.c.bf16 %v798_v36, %v798_v36  ;;  %761 = vmatmul.bf16.gmra.mxu2 %v1017_v33 }
  0xb4   :  { %v1675_v39 = vpop.f32.mrf.mxu3 }
  0xb5   :  { %863 = vst.msk [vmem:[%s1919_s3 + $0x4] sm:$0xf] %vm861_vm0, %v830_v37 }
  0xb6   :  { %v722_v40 = vpop.f32.mrf.mxu2  ;;  %v546_v42 = vpop.f32.mrf.mxu0 }
  0xb7   :  { %v723_v41 = vadd.f32 %v722_v40, %v634_v38  ;;  %v635_v43 = vpop.f32.mrf.mxu1  ;;  %v547_v45 = vadd.f32 %v1610_v56, %v546_v42 }
  0xb9   :  { %v799_v44 = vmax.f32 %v723_v41, 0.0  ;;  %v636_v55 = vadd.f32 %v635_v43, %v547_v45 }
  0xbb   :  { %v831_v48 = vpack.c.bf16 %v799_v44, %v799_v44 }
  0xbc   :  { %v1706_v57 = vpop.f32.mrf.mxu3 }
  0xbd   :  { %864 = vst.msk [vmem:[%s1919_s3 + $0x8] sm:$0xf] %vm861_vm0, %v831_v48 }
  0xbe   :  { %v724_v58 = vpop.f32.mrf.mxu2  ;;  %v549_v62 = vpop.f32.mrf.mxu0 }
  0xbf   :  { %v725_v61 = vadd.f32 %v724_v58, %v636_v55  ;;  %v550_v1 = vadd.f32 %v1610_v56, %v549_v62  ;;  %v638_v2 = vpop.f32.mrf.mxu1 }
  0xc1   :  { %v800_v3 = vmax.f32 %v725_v61, 0.0  ;;  %588 = vmatmul.bf16.gmra.mxu0 %v1021_v59  ;;  %786 = vmatmul.bf16.gmra.mxu3 %v1077_v60  ;;  %v639_v5 = vadd.f32 %v638_v2, %v550_v1 }
  0xc2   :  { %677 = vmatmul.bf16.gmra.mxu1 %v1025_v63 }
  0xc3   :  { %v832_v4 = vpack.c.bf16 %v800_v3, %v800_v3  ;;  %766 = vmatmul.bf16.gmra.mxu2 %v1029_v0 }
  0xc4   :  { %v1713_v6 = vpop.f32.mrf.mxu3 }
  0xc5   :  { %865 = vst.msk [vmem:[%s1919_s3 + $0xc] sm:$0xf] %vm861_vm0, %v832_v4 }
  0xc6   :  { %v727_v7 = vpop.f32.mrf.mxu2  ;;  %v551_v10 = vpop.f32.mrf.mxu0 }
  0xc7   :  { %v728_v8 = vadd.f32 %v727_v7, %v639_v5  ;;  %v640_v11 = vpop.f32.mrf.mxu1  ;;  %v552_v13 = vadd.f32 %v1610_v56, %v551_v10 }
  0xc9   :  { %v801_v12 = vmax.f32 %v728_v8, 0.0  ;;  %v641_v23 = vadd.f32 %v640_v11, %v552_v13 }
  0xcb   :  { %v833_v16 = vpack.c.bf16 %v801_v12, %v801_v12 }
  0xcc   :  { %v1744_v24 = vpop.f32.mrf.mxu3 }
  0xcd   :  { %866 = vst.msk [vmem:[%s1919_s3 + $0x10] sm:$0xf] %vm861_vm0, %v833_v16 }
  0xce   :  { %v729_v25 = vpop.f32.mrf.mxu2  ;;  %v554_v30 = vpop.f32.mrf.mxu0 }
  0xcf   :  { %v730_v29 = vadd.f32 %v729_v25, %v641_v23  ;;  %v555_v33 = vadd.f32 %v1610_v56, %v554_v30  ;;  %v643_v34 = vpop.f32.mrf.mxu1 }
  0xd1   :  { %v802_v35 = vmax.f32 %v730_v29, 0.0  ;;  %593 = vmatmul.bf16.gmra.mxu0 %v1033_v27  ;;  %791 = vmatmul.bf16.gmra.mxu3 %v1089_v28  ;;  %v644_v37 = vadd.f32 %v643_v34, %v555_v33 }
  0xd2   :  { %682 = vmatmul.bf16.gmra.mxu1 %v1037_v31 }
  0xd3   :  { %v834_v36 = vpack.c.bf16 %v802_v35, %v802_v35  ;;  %771 = vmatmul.bf16.gmra.mxu2 %v1041_v32 }
  0xd4   :  { %v1751_v38 = vpop.f32.mrf.mxu3 }
  0xd5   :  { %867 = vst.msk [vmem:[%s1919_s3 + $0x14] sm:$0xf] %vm861_vm0, %v834_v36 }
  0xd6   :  { %v732_v40 = vpop.f32.mrf.mxu2  ;;  %v556_v42 = vpop.f32.mrf.mxu0 }
  0xd7   :  { %v733_v41 = vadd.f32 %v732_v40, %v644_v37  ;;  %v645_v43 = vpop.f32.mrf.mxu1  ;;  %v557_v45 = vadd.f32 %v1610_v56, %v556_v42 }
  0xd9   :  { %v803_v44 = vmax.f32 %v733_v41, 0.0  ;;  %v646_v47 = vadd.f32 %v645_v43, %v557_v45 }
  0xdb   :  { %v835_v46 = vpack.c.bf16 %v803_v44, %v803_v44 }
  0xdc   :  { %v1758_v48 = vpop.f32.mrf.mxu3 }
  0xdd   :  { %868 = vst.msk [vmem:[%s1919_s3 + $0x18] sm:$0xf] %vm861_vm0, %v835_v46 }
  0xde   :  { %v734_v49 = vpop.f32.mrf.mxu2  ;;  %v559_v51 = vpop.f32.mrf.mxu0 }
  0xdf   :  { %v735_v50 = vadd.f32 %v734_v49, %v646_v47  ;;  %v560_v52 = vadd.f32 %v1610_v56, %v559_v51  ;;  %v648_v53 = vpop.f32.mrf.mxu1 }
  0xe1   :  { %v804_v54 = vmax.f32 %v735_v50, 0.0  ;;  %v649_v58 = vadd.f32 %v648_v53, %v560_v52 }
  0xe3   :  { %v836_v55 = vpack.c.bf16 %v804_v54, %v804_v54 }
  0xe4   :  { %v1765_v59 = vpop.f32.mrf.mxu3 }
  0xe5   :  { %869 = vst.msk [vmem:[%s1919_s3 + $0x1c] sm:$0xf] %vm861_vm0, %v836_v55 }
  0xe6   :  { %v737_v60 = vpop.f32.mrf.mxu2  ;;  %v561_v62 = vpop.f32.mrf.mxu0 }
  0xe7   :  { %v738_v61 = vadd.f32 %v737_v60, %v649_v58  ;;  %v650_v63 = vpop.f32.mrf.mxu1  ;;  %v562_v1 = vadd.f32 %v1610_v56, %v561_v62 }
  0xe9   :  { %v805_v0 = vmax.f32 %v738_v61, 0.0  ;;  %v651_v3 = vadd.f32 %v650_v63, %v562_v1 }
  0xeb   :  { %v837_v2 = vpack.c.bf16 %v805_v0, %v805_v0 }
  0xec   :  { %v1772_v4 = vpop.f32.mrf.mxu3 }
  0xed   :  { %870 = vst.msk [vmem:[%s1919_s3 + $0x20] sm:$0xf] %vm861_vm0, %v837_v2 }
  0xee   :  { %v739_v5 = vpop.f32.mrf.mxu2  ;;  %v564_v8 = vpop.f32.mrf.mxu0 }
  0xef   :  { %v740_v7 = vadd.f32 %v739_v5, %v651_v3  ;;  %v565_v10 = vadd.f32 %v1610_v56, %v564_v8  ;;  %v653_v11 = vpop.f32.mrf.mxu1 }
  0xf1   :  { %v806_v12 = vmax.f32 %v740_v7, 0.0  ;;  %v654_v14 = vadd.f32 %v653_v11, %v565_v10 }
  0xf3   :  { %v838_v13 = vpack.c.bf16 %v806_v12, %v806_v12 }
  0xf4   :  { %v1779_v15 = vpop.f32.mrf.mxu3 }
  0xf5   :  { %871 = vst.msk [vmem:[%s1919_s3 + $0x24] sm:$0xf] %vm861_vm0, %v838_v13 }
  0xf6   :  { %v742_v16 = vpop.f32.mrf.mxu2  ;;  %v566_v18 = vpop.f32.mrf.mxu0 }
  0xf7   :  { %v743_v17 = vadd.f32 %v742_v16, %v654_v14  ;;  %v655_v19 = vpop.f32.mrf.mxu1  ;;  %v567_v21 = vadd.f32 %v1610_v56, %v566_v18  ;;  %v600_v14 = vadd.f32 %v1610_v56, %v1637_v9  ;;  %v602_v9 = vadd.f32 %v1610_v56, %v1668_v26 }
  0xf9   :  { %v807_v20 = vmax.f32 %v743_v17, 0.0  ;;  %v656_v23 = vadd.f32 %v655_v19, %v567_v21  ;;  %v689_v18 = vadd.f32 %v1765_v59, %v600_v14  ;;  %v610_v14 = vadd.f32 %v1610_v56, %v1713_v6 }
  0xfb   :  { %v839_v22 = vpack.c.bf16 %v807_v20, %v807_v20 }
  0xfc   :  { %v1786_v25 = vpop.f32.mrf.mxu3 }
  0xfd   :  { %872 = vst.msk [vmem:[%s1919_s3 + $0x28] sm:$0xf] %vm861_vm0, %v839_v22 }
  0xfe   :  { %v744_v27 = vpop.f32.mrf.mxu2  ;;  %v569_v29 = vpop.f32.mrf.mxu0 }
  0xff   :  { %v745_v28 = vadd.f32 %v744_v27, %v656_v23  ;;  %v570_v30 = vadd.f32 %v1610_v56, %v569_v29  ;;  %v658_v31 = vpop.f32.mrf.mxu1 }
 0x101   :  { %v808_v32 = vmax.f32 %v745_v28, 0.0  ;;  %v659_v34 = vadd.f32 %v658_v31, %v570_v30 }
 0x103   :  { %v840_v33 = vpack.c.bf16 %v808_v32, %v808_v32  ;;  %v691_v32 = vadd.f32 %v1772_v4, %v602_v9 }
 0x104   :  { %v1793_v35 = vpop.f32.mrf.mxu3 }
 0x105   :  { %873 = vst.msk [vmem:[%s1919_s3 + $0x2c] sm:$0xf] %vm861_vm0, %v840_v33 }
 0x106   :  { %v747_v36 = vpop.f32.mrf.mxu2  ;;  %v571_v40 = vpop.f32.mrf.mxu0 }
 0x107   :  { %v748_v37 = vadd.f32 %v747_v36, %v659_v34  ;;  %v660_v41 = vpop.f32.mrf.mxu1  ;;  %v572_v43 = vadd.f32 %v1610_v56, %v571_v40 }
 0x109   :  { %v809_v42 = vmax.f32 %v748_v37, 0.0  ;;  %v661_v45 = vadd.f32 %v660_v41, %v572_v43 }
 0x10b   :  { %v841_v44 = vpack.c.bf16 %v809_v42, %v809_v42 }
 0x10c   :  { %v1800_v46 = vpop.f32.mrf.mxu3 }
 0x10d   :  { %874 = vst.msk [vmem:[%s1919_s3 + $0x30] sm:$0xf] %vm861_vm0, %v841_v44  ;;  %v605_v44 = vadd.f32 %v1610_v56, %v1675_v39 }
 0x10e   :  { %v749_v47 = vpop.f32.mrf.mxu2  ;;  %v574_v50 = vpop.f32.mrf.mxu0 }
 0x10f   :  { %v750_v49 = vadd.f32 %v749_v47, %v661_v45  ;;  %v575_v51 = vadd.f32 %v1610_v56, %v574_v50  ;;  %v663_v52 = vpop.f32.mrf.mxu1  ;;  %v694_v50 = vadd.f32 %v1779_v15, %v605_v44 }
 0x111   :  { %v810_v53 = vmax.f32 %v750_v49, 0.0  ;;  %v664_v55 = vadd.f32 %v663_v52, %v575_v51 }
 0x113   :  { %v842_v54 = vpack.c.bf16 %v810_v53, %v810_v53 }
 0x114   :  { %v1807_v58 = vpop.f32.mrf.mxu3 }
 0x115   :  { %875 = vst.msk [vmem:[%s1919_s3 + $0x34] sm:$0xf] %vm861_vm0, %v842_v54 }
 0x116   :  { %v752_v60 = vpop.f32.mrf.mxu2  ;;  %v576_v62 = vpop.f32.mrf.mxu0 }
 0x117   :  { %v753_v61 = vadd.f32 %v752_v60, %v664_v55  ;;  %v665_v63 = vpop.f32.mrf.mxu1  ;;  %v577_v1 = vadd.f32 %v1610_v56, %v576_v62  ;;  %v607_v62 = vadd.f32 %v1610_v56, %v1706_v57 }
 0x119   :  { %v811_v0 = vmax.f32 %v753_v61, 0.0  ;;  %v666_v3 = vadd.f32 %v665_v63, %v577_v1  ;;  %v696_v1 = vadd.f32 %v1786_v25, %v607_v62 }
 0x11b   :  { %v843_v2 = vpack.c.bf16 %v811_v0, %v811_v0 }
 0x11c   :  { %v1814_v5 = vpop.f32.mrf.mxu3 }
 0x11d   :  { %876 = vst.msk [vmem:[%s1919_s3 + $0x38] sm:$0xf] %vm861_vm0, %v843_v2 }
 0x11e   :  { %v754_v7 = vpop.f32.mrf.mxu2  ;;  %v579_v10 = vpop.f32.mrf.mxu0 }
 0x11f   :  { %v755_v8 = vadd.f32 %v754_v7, %v666_v3  ;;  %v580_v11 = vadd.f32 %v1610_v56, %v579_v10  ;;  %v668_v12 = vpop.f32.mrf.mxu1 }
 0x121   :  { %v812_v13 = vmax.f32 %v755_v8, 0.0  ;;  %v669_v17 = vadd.f32 %v668_v12, %v580_v11 }
 0x123   :  { %v844_v16 = vpack.c.bf16 %v812_v13, %v812_v13 }
 0x124   :  { %v777_v19 = vpop.f32.mrf.mxu3 }
 0x125   :  { %877 = vst.msk [vmem:[%s1919_s3 + $0x3c] sm:$0xf] %vm861_vm0, %v844_v16  ;;  %v778_v21 = vadd.f32 %v777_v19, %v689_v18  ;;  %v699_v19 = vadd.f32 %v1793_v35, %v610_v14 }
 0x126   :  { %v757_v20 = vpop.f32.mrf.mxu2  ;;  %v581_v23 = vpop.f32.mrf.mxu0 }
 0x127   :  { %v758_v22 = vadd.f32 %v757_v20, %v669_v17  ;;  %v821_v27 = vmax.f32 %v778_v21, 0.0  ;;  %v670_v28 = vpop.f32.mrf.mxu1  ;;  %v582_v30 = vadd.f32 %v1610_v56, %v581_v23 }
 0x129   :  { %v813_v29 = vmax.f32 %v758_v22, 0.0  ;;  %v853_v31 = vpack.c.bf16 %v821_v27, %v821_v27  ;;  %v671_v33 = vadd.f32 %v670_v28, %v582_v30  ;;  %v612_v30 = vadd.f32 %v1610_v56, %v1744_v24 }
 0x12b   :  { %v845_v59 = vpack.c.bf16 %v813_v29, %v813_v29  ;;  %886 = vst.msk [vmem:[%s1919_s3 + $0x60] sm:$0xf] %vm861_vm0, %v853_v31 }
 0x12c   :  { %v779_v34 = vpop.f32.mrf.mxu3 }
 0x12d   :  { %878 = vst.msk [vmem:[%s1919_s3 + $0x40] sm:$0xf] %vm861_vm0, %v845_v59  ;;  %v780_v37 = vadd.f32 %v779_v34, %v691_v32  ;;  %v701_v59 = vadd.f32 %v1800_v46, %v612_v30 }
 0x12e   :  { %v759_v36 = vpop.f32.mrf.mxu2  ;;  %v584_v26 = vpop.f32.mrf.mxu0 }
 0x12f   :  { %v760_v40 = vadd.f32 %v759_v36, %v671_v33  ;;  %v822_v41 = vmax.f32 %v780_v37, 0.0  ;;  %v585_v42 = vadd.f32 %v1610_v56, %v584_v26  ;;  %v673_v4 = vpop.f32.mrf.mxu1 }
 0x131   :  { %v814_v43 = vmax.f32 %v760_v40, 0.0  ;;  %v854_v45 = vpack.c.bf16 %v822_v41, %v822_v41  ;;  %v674_v49 = vadd.f32 %v673_v4, %v585_v42  ;;  %v615_v41 = vadd.f32 %v1610_v56, %v1751_v38 }
 0x133   :  { %v846_v47 = vpack.c.bf16 %v814_v43, %v814_v43  ;;  %887 = vst.msk [vmem:[%s1919_s3 + $0x64] sm:$0xf] %vm861_vm0, %v854_v45  ;;  %v704_v45 = vadd.f32 %v1807_v58, %v615_v41  ;;  %v617_v58 = vadd.f32 %v1610_v56, %v1758_v48 }
 0x134   :  { %v782_v51 = vpop.f32.mrf.mxu3 }
 0x135   :  { %879 = vst.msk [vmem:[%s1919_s3 + $0x44] sm:$0xf] %vm861_vm0, %v846_v47  ;;  %v783_v53 = vadd.f32 %v782_v51, %v694_v50 }
 0x136   :  { %v762_v52 = vpop.f32.mrf.mxu2  ;;  %v586_v39 = vpop.f32.mrf.mxu0 }
 0x137   :  { %v763_v54 = vadd.f32 %v762_v52, %v674_v49  ;;  %v823_v55 = vmax.f32 %v783_v53, 0.0  ;;  %v675_v60 = vpop.f32.mrf.mxu1  ;;  %v587_v15 = vadd.f32 %v1610_v56, %v586_v39 }
 0x139   :  { %v815_v61 = vmax.f32 %v763_v54, 0.0  ;;  %v855_v63 = vpack.c.bf16 %v823_v55, %v823_v55  ;;  %v676_v2 = vadd.f32 %v675_v60, %v587_v15  ;;  %v706_v60 = vadd.f32 %v1814_v5, %v617_v58 }
 0x13b   :  { %v847_v0 = vpack.c.bf16 %v815_v61, %v815_v61  ;;  %888 = vst.msk [vmem:[%s1919_s3 + $0x68] sm:$0xf] %vm861_vm0, %v855_v63 }
 0x13c   :  { %v784_v3 = vpop.f32.mrf.mxu3 }
 0x13d   :  { %880 = vst.msk [vmem:[%s1919_s3 + $0x48] sm:$0xf] %vm861_vm0, %v847_v0  ;;  %v785_v8 = vadd.f32 %v784_v3, %v696_v1 }
 0x13e   :  { %v764_v7 = vpop.f32.mrf.mxu2  ;;  %v589_v57 = vpop.f32.mrf.mxu0 }
 0x13f   :  { %v765_v10 = vadd.f32 %v764_v7, %v676_v2  ;;  %v824_v11 = vmax.f32 %v785_v8, 0.0  ;;  %v590_v12 = vadd.f32 %v1610_v56, %v589_v57  ;;  %v678_v25 = vpop.f32.mrf.mxu1 }
 0x141   :  { %v816_v13 = vmax.f32 %v765_v10, 0.0  ;;  %v856_v16 = vpack.c.bf16 %v824_v11, %v824_v11  ;;  %v679_v18 = vadd.f32 %v678_v25, %v590_v12 }
 0x143   :  { %v848_v17 = vpack.c.bf16 %v816_v13, %v816_v13  ;;  %889 = vst.msk [vmem:[%s1919_s3 + $0x6c] sm:$0xf] %vm861_vm0, %v856_v16 }
 0x144   :  { %v787_v20 = vpop.f32.mrf.mxu3 }
 0x145   :  { %881 = vst.msk [vmem:[%s1919_s3 + $0x4c] sm:$0xf] %vm861_vm0, %v848_v17  ;;  %v788_v22 = vadd.f32 %v787_v20, %v699_v19 }
 0x146   :  { %v767_v21 = vpop.f32.mrf.mxu2  ;;  %v591_v6 = vpop.f32.mrf.mxu0 }
 0x147   :  { %v768_v23 = vadd.f32 %v767_v21, %v679_v18  ;;  %v825_v27 = vmax.f32 %v788_v22, 0.0  ;;  %v680_v28 = vpop.f32.mrf.mxu1  ;;  %v592_v35 = vadd.f32 %v1610_v56, %v591_v6 }
 0x149   :  { %v817_v29 = vmax.f32 %v768_v23, 0.0  ;;  %v857_v9 = vpack.c.bf16 %v825_v27, %v825_v27  ;;  %v681_v32 = vadd.f32 %v680_v28, %v592_v35 }
 0x14b   :  { %v849_v31 = vpack.c.bf16 %v817_v29, %v817_v29  ;;  %890 = vst.msk [vmem:[%s1919_s3 + $0x70] sm:$0xf] %vm861_vm0, %v857_v9 }
 0x14c   :  { %v789_v33 = vpop.f32.mrf.mxu3 }
 0x14d   :  { %882 = vst.msk [vmem:[%s1919_s3 + $0x50] sm:$0xf] %vm861_vm0, %v849_v31  ;;  %v790_v36 = vadd.f32 %v789_v33, %v701_v59 }
 0x14e   :  { %v769_v34 = vpop.f32.mrf.mxu2  ;;  %v594_v24 = vpop.f32.mrf.mxu0 }
 0x14f   :  { %v770_v37 = vadd.f32 %v769_v34, %v681_v32  ;;  %v826_v40 = vmax.f32 %v790_v36, 0.0  ;;  %v595_v26 = vadd.f32 %v1610_v56, %v594_v24  ;;  %v683_v4 = vpop.f32.mrf.mxu1 }
 0x151   :  { %v818_v46 = vmax.f32 %v770_v37, 0.0  ;;  %v858_v42 = vpack.c.bf16 %v826_v40, %v826_v40  ;;  %v684_v44 = vadd.f32 %v683_v4, %v595_v26 }
 0x153   :  { %v850_v43 = vpack.c.bf16 %v818_v46, %v818_v46  ;;  %891 = vst.msk [vmem:[%s1919_s3 + $0x74] sm:$0xf] %vm861_vm0, %v858_v42 }
 0x154   :  { %v792_v47 = vpop.f32.mrf.mxu3 }
 0x155   :  { %883 = vst.msk [vmem:[%s1919_s3 + $0x54] sm:$0xf] %vm861_vm0, %v850_v43  ;;  %v793_v50 = vadd.f32 %v792_v47, %v704_v45 }
 0x156   :  { %v772_v49 = vpop.f32.mrf.mxu2  ;;  %v596_v51 = vpop.f32.mrf.mxu0 }
 0x157   :  { %v773_v38 = vadd.f32 %v772_v49, %v684_v44  ;;  %v827_v52 = vmax.f32 %v793_v50, 0.0  ;;  %v597_v54 = vadd.f32 %v1610_v56, %v596_v51  ;;  %v685_v61 = vpop.f32.mrf.mxu1 }
 0x159   :  { %v819_v53 = vmax.f32 %v773_v38, 0.0  ;;  %v859_v39 = vpack.c.bf16 %v827_v52, %v827_v52  ;;  %v686_v15 = vadd.f32 %v685_v61, %v597_v54 }
 0x15b   :  { %v851_v55 = vpack.c.bf16 %v819_v53, %v819_v53  ;;  %892 = vst.msk [vmem:[%s1919_s3 + $0x78] sm:$0xf] %vm861_vm0, %v859_v39 }
 0x15c   :  { %v794_v62 = vpop.f32.mrf.mxu3 }
 0x15d   :  { %884 = vst.msk [vmem:[%s1919_s3 + $0x58] sm:$0xf] %vm861_vm0, %v851_v55  ;;  %v795_v0 = vadd.f32 %v794_v62, %v706_v60 }
 0x15e   :  { %v774_v63 = vpop.f32.mrf.mxu2 }
 0x15f   :  { %v775_v56 = vadd.f32 %v774_v63, %v686_v15  ;;  %v828_v48 = vmax.f32 %v795_v0, 0.0 }
 0x161   :  { %v820_v1 = vmax.f32 %v775_v56, 0.0  ;;  %v860_v2 = vpack.c.bf16 %v828_v48, %v828_v48 }
 0x163   :  { %v852_v5 = vpack.c.bf16 %v820_v1, %v820_v1  ;;  %893 = vst.msk [vmem:[%s1919_s3 + $0x7c] sm:$0xf] %vm861_vm0, %v860_v2 }
 0x165   :  { %885 = vst.msk [vmem:[%s1919_s3 + $0x5c] sm:$0xf] %vm861_vm0, %v852_v5 }

// kernel: dqn_forward.7
= control target key start
LH: loop header
LB: loop body
LE: loop exit
PB: predicated region body
PF: predicated region fallthrough
CT: control target
= control target key end

     0   :  { %s1270_s1 = inlined_call_operand.vmem [shape: bf16[640,128], index: 1, kind: input, shape index: {}]   ;;  %s1271_s2 = inlined_call_operand.vmem [shape: f32[1,128], index: 2, kind: input, shape index: {}]   ;;  %s1272_s0 = inlined_call_operand.vmem [shape: bf16[64,640], index: 0, kind: input, shape index: {}]   ;;  %s1273_s3 = inlined_call_operand.vmem [shape: bf16[64,128], index: 3, kind: output, shape index: {}]  }
   0x1   :  { %v906_v0 = vld [vmem:[%s1270_s1 + $0x38] sm:$0xff]  ;;  %v905_v2 = vld [vmem:[%s1270_s1 + $0x30] sm:$0xff]  ;;  %v904_v6 = vld [vmem:[%s1270_s1 + $0x28] sm:$0xff] }
   0x2   :  { %v922_v1 = vld [vmem:[%s1270_s1 + $0xb8] sm:$0xff]  ;;  %962 = vmatpush.bf16.msra.mxu1 %v906_v0  ;;  %466 = vmatpush.bf16.msra.mxu0 %v906_v0  ;;  %v921_v3 = vld [vmem:[%s1270_s1 + $0xb0] sm:$0xff]  ;;  %v920_v7 = vld [vmem:[%s1270_s1 + $0xa8] sm:$0xff] }
   0x3   :  { %524 = vmatpush.bf16.msra.mxu2 %v922_v1  ;;  %v930_v4 = vld [vmem:[%s1270_s1 + $0xf8] sm:$0xff]  ;;  %v929_v5 = vld [vmem:[%s1270_s1 + $0xf0] sm:$0xff]  ;;  %v928_v8 = vld [vmem:[%s1270_s1 + $0xe8] sm:$0xff] }
   0x4   :  { %553 = vmatpush.bf16.msra.mxu3 %v930_v4  ;;  %v903_v9 = vld [vmem:[%s1270_s1 + $0x20] sm:$0xff]  ;;  %v902_v12 = vld [vmem:[%s1270_s1 + $0x18] sm:$0xff]  ;;  %v901_v15 = vld [vmem:[%s1270_s1 + $0x10] sm:$0xff] }
   0x5   :  { %v919_v10 = vld [vmem:[%s1270_s1 + $0xa0] sm:$0xff]  ;;  %v918_v13 = vld [vmem:[%s1270_s1 + $0x98] sm:$0xff]  ;;  %v917_v16 = vld [vmem:[%s1270_s1 + $0x90] sm:$0xff] }
   0x6   :  { %963 = vmatpush.bf16.msra.mxu1 %v905_v2  ;;  %467 = vmatpush.bf16.msra.mxu0 %v905_v2  ;;  %v927_v11 = vld [vmem:[%s1270_s1 + $0xe0] sm:$0xff]  ;;  %v926_v14 = vld [vmem:[%s1270_s1 + $0xd8] sm:$0xff]  ;;  %v925_v17 = vld [vmem:[%s1270_s1 + $0xd0] sm:$0xff] }
   0x7   :  { %525 = vmatpush.bf16.msra.mxu2 %v921_v3  ;;  %v900_v18 = vld [vmem:[%s1270_s1 + $0x8] sm:$0xff]  ;;  %v899_v20 = vld [vmem:[%s1270_s1] sm:$0xff]  ;;  %v681_v21 = vld [vmem:[%s1272_s0 + $0x50] sm:$0xf] }
   0x8   :  { %554 = vmatpush.bf16.msra.mxu3 %v929_v5  ;;  %v916_v19 = vld [vmem:[%s1270_s1 + $0x88] sm:$0xff]  ;;  %v891_v22 = vld [vmem:[%s1272_s0 + $0x60] sm:$0xf0]  ;;  %v914_v24 = vld [vmem:[%s1270_s1 + $0x78] sm:$0xff] }
   0x9   :  { %v924_v23 = vld [vmem:[%s1270_s1 + $0xc8] sm:$0xff]  ;;  %v641_v25 = vld [vmem:[%s1272_s0] sm:$0xf]  ;;  %v881_v26 = vld [vmem:[%s1272_s0 + $0x10] sm:$0xf0]  ;;  %v682_v31 = vor.u32 %v891_v22, %v681_v21 }
   0xa   :  { %964 = vmatpush.bf16.msra.mxu1 %v904_v6  ;;  %468 = vmatpush.bf16.msra.mxu0 %v904_v6  ;;  %v915_v27 = vld [vmem:[%s1270_s1 + $0x80] sm:$0xff]  ;;  %v649_v28 = vld [vmem:[%s1272_s0 + $0x8] sm:$0xf]  ;;  %v882_v29 = vld [vmem:[%s1272_s0 + $0x18] sm:$0xf0]  ;;  %v642_v32 = vor.u32 %v881_v26, %v641_v25 }
   0xb   :  { %526 = vmatpush.bf16.msra.mxu2 %v920_v7  ;;  %v938_v30 = vld [vmem:[%s1270_s1 + $0x138] sm:$0xff]  ;;  %v650_v33 = vor.u32 %v882_v29, %v649_v28  ;;  %v923_v34 = vld [vmem:[%s1270_s1 + $0xc0] sm:$0xff]  ;;  %v880_v35 = vld [vmem:[%s1272_s0 + $0xc] sm:$0xf] }
   0xc   :  { %555 = vmatpush.bf16.msra.mxu3 %v928_v8  ;;  %v651_v36 = vld [vmem:[%s1272_s0 + $0x1c] sm:$0xf0]  ;;  %v913_v37 = vld [vmem:[%s1270_s1 + $0x70] sm:$0xff]  ;;  %v912_v40 = vld [vmem:[%s1270_s1 + $0x68] sm:$0xff] }
   0xd   :  { %v937_v38 = vld [vmem:[%s1270_s1 + $0x130] sm:$0xff]  ;;  %v654_v39 = vor.u32 %v880_v35, %v651_v36  ;;  %v936_v41 = vld [vmem:[%s1270_s1 + $0x128] sm:$0xff]  ;;  %v911_v42 = vld [vmem:[%s1270_s1 + $0x60] sm:$0xff] }
   0xe   :  { %965 = vmatpush.bf16.msra.mxu1 %v903_v9  ;;  %469 = vmatpush.bf16.msra.mxu0 %v903_v9  ;;  %v935_v43 = vld [vmem:[%s1270_s1 + $0x120] sm:$0xff]  ;;  %v701_v44 = vld [vmem:[%s1272_s0 + $0x78] sm:$0xf]  ;;  %v896_v45 = vld [vmem:[%s1272_s0 + $0x88] sm:$0xf0] }
   0xf   :  { %527 = vmatpush.bf16.msra.mxu2 %v919_v10  ;;  %v661_v46 = vld [vmem:[%s1272_s0 + $0x28] sm:$0xf]  ;;  %v886_v47 = vld [vmem:[%s1272_s0 + $0x38] sm:$0xf0]  ;;  %v669_v49 = vld [vmem:[%s1272_s0 + $0x30] sm:$0xf]  ;;  %v702_v52 = vor.u32 %v896_v45, %v701_v44 }
  0x10   :  { %556 = vmatpush.bf16.msra.mxu3 %v927_v11  ;;  %v910_v48 = vld [vmem:[%s1270_s1 + $0x58] sm:$0xff]  ;;  %v887_v50 = vld [vmem:[%s1272_s0 + $0x40] sm:$0xf0]  ;;  %v662_v53 = vor.u32 %v886_v47, %v661_v46  ;;  %v885_v55 = vld [vmem:[%s1272_s0 + $0x34] sm:$0xf] }
  0x11   :  { %v934_v51 = vld [vmem:[%s1270_s1 + $0x118] sm:$0xff]  ;;  %v670_v54 = vor.u32 %v887_v50, %v669_v49  ;;  %v671_v56 = vld [vmem:[%s1272_s0 + $0x44] sm:$0xf0]  ;;  %v909_v57 = vld [vmem:[%s1270_s1 + $0x50] sm:$0xff] }
  0x12   :  { %966 = vmatpush.bf16.msra.mxu1 %v902_v12  ;;  %470 = vmatpush.bf16.msra.mxu0 %v902_v12  ;;  %v933_v58 = vld [vmem:[%s1270_s1 + $0x110] sm:$0xff]  ;;  %v674_v59 = vor.u32 %v885_v55, %v671_v56  ;;  %v908_v60 = vld [vmem:[%s1270_s1 + $0x48] sm:$0xff]  ;;  %v907_v62 = vld [vmem:[%s1270_s1 + $0x40] sm:$0xff] }
  0x13   :  { %528 = vmatpush.bf16.msra.mxu2 %v918_v13  ;;  %v932_v61 = vld [vmem:[%s1270_s1 + $0x108] sm:$0xff]  ;;  %v931_v63 = vld [vmem:[%s1270_s1 + $0x100] sm:$0xff]  ;;  %v643_v1 = vld [vmem:[%s1272_s0 + $0x14] sm:$0xf0] }
  0x14   :  { %557 = vmatpush.bf16.msra.mxu3 %v926_v14  ;;  %v879_v0 = vld [vmem:[%s1272_s0 + $0x4] sm:$0xf]  ;;  %v657_v2 = vld [vmem:[%s1272_s0 + $0x10] sm:$0xf]  ;;  %v689_v4 = vld [vmem:[%s1272_s0 + $0x58] sm:$0xf] }
  0x15   :  { %v883_v3 = vld [vmem:[%s1272_s0 + $0x20] sm:$0xf0]  ;;  %v892_v5 = vld [vmem:[%s1272_s0 + $0x68] sm:$0xf0]  ;;  %v646_v6 = vor.u32 %v879_v0, %v643_v1  ;;  %v890_v9 = vld [vmem:[%s1272_s0 + $0x5c] sm:$0xf] }
  0x16   :  { %967 = vmatpush.bf16.msra.mxu1 %v901_v15  ;;  %471 = vmatpush.bf16.msra.mxu0 %v901_v15  ;;  %v658_v7 = vor.u32 %v883_v3, %v657_v2  ;;  %v690_v8 = vor.u32 %v892_v5, %v689_v4  ;;  %v691_v10 = vld [vmem:[%s1272_s0 + $0x6c] sm:$0xf0]  ;;  %v884_v12 = vld [vmem:[%s1272_s0 + $0x2c] sm:$0xf]  ;;  %v663_v13 = vld [vmem:[%s1272_s0 + $0x3c] sm:$0xf0] }
  0x17   :  { %529 = vmatpush.bf16.msra.mxu2 %v917_v16  ;;  %v694_v11 = vor.u32 %v890_v9, %v691_v10  ;;  %v677_v14 = vld [vmem:[%s1272_s0 + $0x38] sm:$0xf]  ;;  %v888_v15 = vld [vmem:[%s1272_s0 + $0x48] sm:$0xf0]  ;;  %v709_v16 = vld [vmem:[%s1272_s0 + $0x80] sm:$0xf] }
  0x18   :  { %558 = vmatpush.bf16.msra.mxu3 %v925_v17  ;;  %v897_v17 = vld [vmem:[%s1272_s0 + $0x90] sm:$0xf0]  ;;  %v895_v21 = vld [vmem:[%s1272_s0 + $0x84] sm:$0xf]  ;;  %v711_v22 = vld [vmem:[%s1272_s0 + $0x94] sm:$0xf0] }
  0x19   :  { %v683_v25 = vld [vmem:[%s1272_s0 + $0x64] sm:$0xf0]  ;;  %v697_v26 = vld [vmem:[%s1272_s0 + $0x60] sm:$0xf]  ;;  %v898_v29 = vld [vmem:[%s1272_s0 + $0x98] sm:$0xf0] }
  0x1a   :  { %968 = vmatpush.bf16.msra.mxu1 %v900_v18  ;;  %472 = vmatpush.bf16.msra.mxu0 %v900_v18  ;;  %v666_v18 = vor.u32 %v884_v12, %v663_v13  ;;  %v717_v28 = vld [vmem:[%s1272_s0 + $0x88] sm:$0xf] }
  0x1b   :  { %530 = vmatpush.bf16.msra.mxu2 %v916_v19  ;;  %v678_v19 = vor.u32 %v888_v15, %v677_v14 }
  0x1c   :  { %559 = vmatpush.bf16.msra.mxu3 %v924_v23  ;;  %v714_v23 = vor.u32 %v895_v21, %v711_v22 }
  0x1e   :  { %969 = vmatpush.bf16.msra.mxu1 %v899_v20  ;;  %473 = vmatpush.bf16.msra.mxu0 %v899_v20  ;;  %v710_v20 = vor.u32 %v897_v17, %v709_v16 }
  0x1f   :  { %531 = vmatpush.bf16.msra.mxu2 %v915_v27  ;;  %v893_v27 = vld [vmem:[%s1272_s0 + $0x70] sm:$0xf0] }
  0x20   :  { %560 = vmatpush.bf16.msra.mxu3 %v923_v34  ;;  %v703_v34 = vld [vmem:[%s1272_s0 + $0x8c] sm:$0xf0] }
  0x21   :  { %484 = vmatmul.bf16.vlgmr.msra.gmra.mxu1 %v682_v31  ;;  %474 = vmatmul.bf16.vlgmr.msra.gmra.mxu0 %v642_v32  ;;  %v698_v31 = vor.u32 %v893_v27, %v697_v26  ;;  %v718_v32 = vor.u32 %v898_v29, %v717_v28 }
  0x22   :  { %495 = vmatpush.bf16.msrb.mxu1 %v914_v24  ;;  %582 = vmatpush.bf16.msrb.mxu0 %v938_v30  ;;  %v889_v24 = vld [vmem:[%s1272_s0 + $0x54] sm:$0xf] }
  0x23   :  { %970 = vmatpush.bf16.msrb.mxu2 %v938_v30  ;;  %561 = vmatmul.bf16.vlgmr.msra.gmra.mxu3 %v654_v39  ;;  %v686_v30 = vor.u32 %v889_v24, %v683_v25 }
  0x24   :  { %532 = vmatmul.bf16.vlgmr.msra.gmra.mxu2 %v650_v33  ;;  %v894_v33 = vld [vmem:[%s1272_s0 + $0x7c] sm:$0xf] }
  0x25   :  { %v706_v35 = vor.u32 %v894_v33, %v703_v34 }
  0x26   :  { %496 = vmatpush.bf16.msrb.mxu1 %v913_v37  ;;  %583 = vmatpush.bf16.msrb.mxu0 %v937_v38 }
  0x27   :  { %971 = vmatpush.bf16.msrb.mxu2 %v937_v38 }
  0x2a   :  { %497 = vmatpush.bf16.msrb.mxu1 %v912_v40  ;;  %584 = vmatpush.bf16.msrb.mxu0 %v936_v41 }
  0x2b   :  { %972 = vmatpush.bf16.msrb.mxu2 %v936_v41 }
  0x2e   :  { %498 = vmatpush.bf16.msrb.mxu1 %v911_v42  ;;  %585 = vmatpush.bf16.msrb.mxu0 %v935_v43 }
  0x2f   :  { %973 = vmatpush.bf16.msrb.mxu2 %v935_v43 }
  0x31   :  { %489 = vmatmul.bf16.gmra.mxu1 %v702_v52  ;;  %479 = vmatmul.bf16.gmra.mxu0 %v662_v53 }
  0x32   :  { %499 = vmatpush.bf16.msrb.mxu1 %v910_v48  ;;  %586 = vmatpush.bf16.msrb.mxu0 %v934_v51  ;;  %v1246_v48 = vld [vmem:[%s1271_s2] ss:$0 sm:$0xff] }
  0x33   :  { %974 = vmatpush.bf16.msrb.mxu2 %v934_v51  ;;  %566 = vmatmul.bf16.gmra.mxu3 %v674_v59 }
  0x34   :  { %537 = vmatmul.bf16.gmra.mxu2 %v670_v54 }
  0x36   :  { %500 = vmatpush.bf16.msrb.mxu1 %v909_v57  ;;  %587 = vmatpush.bf16.msrb.mxu0 %v933_v58 }
  0x37   :  { %975 = vmatpush.bf16.msrb.mxu2 %v933_v58 }
  0x3a   :  { %501 = vmatpush.bf16.msrb.mxu1 %v908_v60  ;;  %588 = vmatpush.bf16.msrb.mxu0 %v932_v61 }
  0x3b   :  { %976 = vmatpush.bf16.msrb.mxu2 %v932_v61 }
  0x3e   :  { %502 = vmatpush.bf16.msrb.mxu1 %v907_v62  ;;  %589 = vmatpush.bf16.msrb.mxu0 %v931_v63 }
  0x3f   :  { %977 = vmatpush.bf16.msrb.mxu2 %v931_v63 }
  0x41   :  { %503 = vmatmul.bf16.vlgmr.msrb.gmra.mxu1 %v646_v6  ;;  %590 = vmatmul.bf16.vlgmr.msrb.gmra.mxu0 %v658_v7 }
  0x43   :  { %571 = vmatmul.bf16.gmra.mxu3 %v694_v11 }
  0x44   :  { %542 = vmatmul.bf16.gmra.mxu2 %v690_v8 }
  0x51   :  { %508 = vmatmul.bf16.gmra.mxu1 %v666_v18  ;;  %595 = vmatmul.bf16.gmra.mxu0 %v678_v19 }
  0x53   :  { %576 = vmatmul.bf16.gmra.mxu3 %v714_v23 }
  0x54   :  { %547 = vmatmul.bf16.gmra.mxu2 %v710_v20 }
  0x61   :  { %513 = vmatmul.bf16.gmra.mxu1 %v686_v30  ;;  %600 = vmatmul.bf16.gmra.mxu0 %v698_v31 }
  0x64   :  { %605 = vmatmul.bf16.vlgmr.msrb.gmra.mxu2 %v718_v32 }
  0x71   :  { %518 = vmatmul.bf16.gmra.mxu1 %v706_v35 }
  0x9e   :  { %v485_v36 = vpop.f32.mrf.mxu1  ;;  %v475_v37 = vpop.f32.mrf.mxu0 }
  0x9f   :  { %v476_v49 = vadd.f32 %v1246_v48, %v475_v37  ;;  %v486_v22 = vadd.f32 %v1246_v48, %v485_v36 }
  0xa6   :  { %v487_v39 = vpop.f32.mrf.mxu1  ;;  %v477_v40 = vpop.f32.mrf.mxu0 }
  0xa7   :  { %v533_v38 = vpop.f32.mrf.mxu2  ;;  %v562_v44 = vpop.f32.mrf.mxu3  ;;  %v478_v56 = vadd.f32 %v1246_v48, %v477_v40  ;;  %v488_v32 = vadd.f32 %v1246_v48, %v487_v39 }
  0xae   :  { %v1239_v42 = vpop.f32.mrf.mxu1  ;;  %v480_v43 = vpop.f32.mrf.mxu0 }
  0xaf   :  { %v535_v41 = vpop.f32.mrf.mxu2  ;;  %v564_v50 = vpop.f32.mrf.mxu3  ;;  %v481_v2 = vadd.f32 %v1246_v48, %v480_v43 }
  0xb6   :  { %v1241_v46 = vpop.f32.mrf.mxu1  ;;  %v482_v47 = vpop.f32.mrf.mxu0 }
  0xb7   :  { %v538_v45 = vpop.f32.mrf.mxu2  ;;  %v567_v61 = vpop.f32.mrf.mxu3  ;;  %v483_v13 = vadd.f32 %v1246_v48, %v482_v47 }
  0xbe   :  { %v504_v51 = vpop.f32.mrf.mxu1  ;;  %v591_v52 = vpop.f32.mrf.mxu0 }
  0xbf   :  { %v505_v53 = vadd.f32 %v504_v51, %v476_v49  ;;  %v540_v54 = vpop.f32.mrf.mxu2  ;;  %v569_v10 = vpop.f32.mrf.mxu3 }
  0xc1   :  { %v534_v55 = vadd.f32 %v533_v38, %v505_v53 }
  0xc3   :  { %v563_v59 = vadd.f32 %v562_v44, %v534_v55  ;;  %v491_v44 = vadd.f32 %v1246_v48, %v1239_v42  ;;  %v493_v55 = vadd.f32 %v1246_v48, %v1241_v46 }
  0xc5   :  { %v592_v0 = vadd.f32 %v591_v52, %v563_v59 }
  0xc6   :  { %v506_v57 = vpop.f32.mrf.mxu1  ;;  %v593_v58 = vpop.f32.mrf.mxu0 }
  0xc7   :  { %v507_v60 = vadd.f32 %v506_v57, %v478_v56  ;;  %v543_v63 = vpop.f32.mrf.mxu2  ;;  %v611_v6 = vmax.f32 %v592_v0, 0.0  ;;  %v572_v21 = vpop.f32.mrf.mxu3 }
  0xc9   :  { %v536_v62 = vadd.f32 %v535_v41, %v507_v60 }
  0xcb   :  { %v565_v1 = vadd.f32 %v564_v50, %v536_v62 }
  0xcd   :  { %v594_v3 = vadd.f32 %v593_v58, %v565_v1 }
  0xce   :  { %v509_v4 = vpop.f32.mrf.mxu1  ;;  %v596_v5 = vpop.f32.mrf.mxu0 }
  0xcf   :  { %v612_v7 = vmax.f32 %v594_v3, 0.0  ;;  %v510_v8 = vadd.f32 %v509_v4, %v481_v2  ;;  %v545_v12 = vpop.f32.mrf.mxu2  ;;  %v574_v33 = vpop.f32.mrf.mxu3 }
  0xd1   :  { %v942_v9 = vpack.c.bf16 %v612_v7, %v611_v6  ;;  %v539_v11 = vadd.f32 %v538_v45, %v510_v8 }
  0xd3   :  { %943 = vst [vmem:[%s1273_s3] sm:$0xff] %v942_v9   ;;  %v568_v16 = vadd.f32 %v567_v61, %v539_v11 }
  0xd5   :  { %v597_v19 = vadd.f32 %v596_v5, %v568_v16 }
  0xd6   :  { %v511_v14 = vpop.f32.mrf.mxu1  ;;  %v598_v15 = vpop.f32.mrf.mxu0 }
  0xd7   :  { %v512_v17 = vadd.f32 %v511_v14, %v483_v13  ;;  %v548_v24 = vpop.f32.mrf.mxu2  ;;  %v613_v26 = vmax.f32 %v597_v19, 0.0  ;;  %v577_v52 = vpop.f32.mrf.mxu3 }
  0xd9   :  { %v541_v18 = vadd.f32 %v540_v54, %v512_v17 }
  0xdb   :  { %v570_v20 = vadd.f32 %v569_v10, %v541_v18 }
  0xdd   :  { %v599_v23 = vadd.f32 %v598_v15, %v570_v20 }
  0xde   :  { %v514_v25 = vpop.f32.mrf.mxu1  ;;  %v601_v29 = vpop.f32.mrf.mxu0 }
  0xdf   :  { %v614_v27 = vmax.f32 %v599_v23, 0.0  ;;  %v515_v28 = vadd.f32 %v514_v25, %v486_v22  ;;  %v550_v36 = vpop.f32.mrf.mxu2  ;;  %v579_v59 = vpop.f32.mrf.mxu3 }
  0xe1   :  { %v947_v30 = vpack.c.bf16 %v614_v27, %v613_v26  ;;  %v544_v31 = vadd.f32 %v543_v63, %v515_v28 }
  0xe3   :  { %959 = vst [vmem:[%s1273_s3 + $0x8] sm:$0xff] %v947_v30   ;;  %v573_v35 = vadd.f32 %v572_v21, %v544_v31 }
  0xe5   :  { %v602_v41 = vadd.f32 %v601_v29, %v573_v35 }
  0xe6   :  { %v516_v34 = vpop.f32.mrf.mxu1  ;;  %v603_v40 = vpop.f32.mrf.mxu0 }
  0xe7   :  { %v517_v37 = vadd.f32 %v516_v34, %v488_v32  ;;  %v615_v49 = vmax.f32 %v602_v41, 0.0  ;;  %v606_v39 = vpop.f32.mrf.mxu2 }
  0xe9   :  { %v546_v38 = vadd.f32 %v545_v12, %v517_v37 }
  0xeb   :  { %v575_v43 = vadd.f32 %v574_v33, %v546_v38 }
  0xed   :  { %v604_v45 = vadd.f32 %v603_v40, %v575_v43 }
  0xee   :  { %v519_v47 = vpop.f32.mrf.mxu1 }
  0xef   :  { %v616_v50 = vmax.f32 %v604_v45, 0.0  ;;  %v520_v51 = vadd.f32 %v519_v47, %v491_v44  ;;  %v608_v62 = vpop.f32.mrf.mxu2 }
  0xf1   :  { %v952_v53 = vpack.c.bf16 %v616_v50, %v615_v49  ;;  %v549_v54 = vadd.f32 %v548_v24, %v520_v51 }
  0xf3   :  { %960 = vst [vmem:[%s1273_s3 + $0x10] sm:$0xff] %v952_v53   ;;  %v578_v57 = vadd.f32 %v577_v52, %v549_v54 }
  0xf5   :  { %v607_v60 = vadd.f32 %v606_v39, %v578_v57 }
  0xf6   :  { %v521_v56 = vpop.f32.mrf.mxu1 }
  0xf7   :  { %v522_v58 = vadd.f32 %v521_v56, %v493_v55  ;;  %v617_v0 = vmax.f32 %v607_v60, 0.0 }
  0xf9   :  { %v551_v42 = vadd.f32 %v550_v36, %v522_v58 }
  0xfb   :  { %v580_v61 = vadd.f32 %v579_v59, %v551_v42 }
  0xfd   :  { %v609_v63 = vadd.f32 %v608_v62, %v580_v61 }
  0xff   :  { %v618_v1 = vmax.f32 %v609_v63, 0.0 }
 0x101   :  { %v957_v2 = vpack.c.bf16 %v618_v1, %v617_v0 }
 0x103   :  { %961 = vst [vmem:[%s1273_s3 + $0x18] sm:$0xff] %v957_v2  }

// kernel: dqn_forward.8
= control target key start
LH: loop header
LB: loop body
LE: loop exit
PB: predicated region body
PF: predicated region fallthrough
CT: control target
= control target key end

     0   :  { %s1493_s1 = inlined_call_operand.vmem [shape: bf16[1152,128], index: 1, kind: input, shape index: {}]   ;;  %s1494_s2 = inlined_call_operand.vmem [shape: f32[1,128], index: 2, kind: input, shape index: {}]   ;;  %s1495_s0 = inlined_call_operand.vmem [shape: bf16[16,1152], index: 0, kind: input, shape index: {}]   ;;  %s1496_s3 = inlined_call_operand.vmem [shape: bf16[16,128], index: 3, kind: output, shape index: {}]  }
   0x1   :  { %v1126_v0 = vld [vmem:[%s1493_s1 + $0x38] sm:$0xff]  ;;  %v1125_v4 = vld [vmem:[%s1493_s1 + $0x30] sm:$0xff]  ;;  %v1124_v8 = vld [vmem:[%s1493_s1 + $0x28] sm:$0xff] }
   0x2   :  { %v1142_v1 = vld [vmem:[%s1493_s1 + $0xb8] sm:$0xff]  ;;  %650 = vmatpush.bf16.msra.mxu0 %v1126_v0  ;;  %v1141_v5 = vld [vmem:[%s1493_s1 + $0xb0] sm:$0xff]  ;;  %v1140_v9 = vld [vmem:[%s1493_s1 + $0xa8] sm:$0xff] }
   0x3   :  { %v1134_v2 = vld [vmem:[%s1493_s1 + $0x78] sm:$0xff]  ;;  %678 = vmatpush.bf16.msra.mxu2 %v1142_v1  ;;  %v1133_v6 = vld [vmem:[%s1493_s1 + $0x70] sm:$0xff]  ;;  %v1132_v10 = vld [vmem:[%s1493_s1 + $0x68] sm:$0xff] }
   0x4   :  { %v1150_v3 = vld [vmem:[%s1493_s1 + $0xf8] sm:$0xff]  ;;  %664 = vmatpush.bf16.msra.mxu1 %v1134_v2  ;;  %v1149_v7 = vld [vmem:[%s1493_s1 + $0xf0] sm:$0xff]  ;;  %v1148_v11 = vld [vmem:[%s1493_s1 + $0xe8] sm:$0xff] }
   0x5   :  { %692 = vmatpush.bf16.msra.mxu3 %v1150_v3  ;;  %v1123_v12 = vld [vmem:[%s1493_s1 + $0x20] sm:$0xff]  ;;  %v1122_v16 = vld [vmem:[%s1493_s1 + $0x18] sm:$0xff]  ;;  %v1121_v20 = vld [vmem:[%s1493_s1 + $0x10] sm:$0xff] }
   0x6   :  { %651 = vmatpush.bf16.msra.mxu0 %v1125_v4  ;;  %v1139_v13 = vld [vmem:[%s1493_s1 + $0xa0] sm:$0xff]  ;;  %v1138_v17 = vld [vmem:[%s1493_s1 + $0x98] sm:$0xff]  ;;  %v1137_v21 = vld [vmem:[%s1493_s1 + $0x90] sm:$0xff] }
   0x7   :  { %679 = vmatpush.bf16.msra.mxu2 %v1141_v5  ;;  %v1131_v14 = vld [vmem:[%s1493_s1 + $0x60] sm:$0xff]  ;;  %v1130_v18 = vld [vmem:[%s1493_s1 + $0x58] sm:$0xff]  ;;  %v1129_v22 = vld [vmem:[%s1493_s1 + $0x50] sm:$0xff] }
   0x8   :  { %665 = vmatpush.bf16.msra.mxu1 %v1133_v6  ;;  %v1147_v15 = vld [vmem:[%s1493_s1 + $0xe0] sm:$0xff]  ;;  %v1146_v19 = vld [vmem:[%s1493_s1 + $0xd8] sm:$0xff]  ;;  %v1145_v23 = vld [vmem:[%s1493_s1 + $0xd0] sm:$0xff] }
   0x9   :  { %693 = vmatpush.bf16.msra.mxu3 %v1149_v7  ;;  %v1120_v24 = vld [vmem:[%s1493_s1 + $0x8] sm:$0xff]  ;;  %v1119_v28 = vld [vmem:[%s1493_s1] sm:$0xff]  ;;  %v1158_v30 = vld [vmem:[%s1493_s1 + $0x138] sm:$0xff] }
   0xa   :  { %652 = vmatpush.bf16.msra.mxu0 %v1124_v8  ;;  %v1136_v25 = vld [vmem:[%s1493_s1 + $0x88] sm:$0xff]  ;;  %v1135_v29 = vld [vmem:[%s1493_s1 + $0x80] sm:$0xff]  ;;  %v1174_v31 = vld [vmem:[%s1493_s1 + $0x1b8] sm:$0xff] }
   0xb   :  { %680 = vmatpush.bf16.msra.mxu2 %v1140_v9  ;;  %v1128_v26 = vld [vmem:[%s1493_s1 + $0x48] sm:$0xff]  ;;  %v1127_v32 = vld [vmem:[%s1493_s1 + $0x40] sm:$0xff]  ;;  %v1166_v38 = vld [vmem:[%s1493_s1 + $0x178] sm:$0xff] }
   0xc   :  { %666 = vmatpush.bf16.msra.mxu1 %v1132_v10  ;;  %v1144_v27 = vld [vmem:[%s1493_s1 + $0xc8] sm:$0xff]  ;;  %v1143_v33 = vld [vmem:[%s1493_s1 + $0xc0] sm:$0xff]  ;;  %v1182_v39 = vld [vmem:[%s1493_s1 + $0x1f8] sm:$0xff] }
   0xd   :  { %694 = vmatpush.bf16.msra.mxu3 %v1148_v11  ;;  %v788_v34 = vld [vmem:[%s1495_s0] sm:$0xf]  ;;  %v1114_v35 = vld [vmem:[%s1495_s0 + $0x20] sm:$0xf0]  ;;  %v796_v36 = vld [vmem:[%s1495_s0 + $0x8] sm:$0xf] }
   0xe   :  { %653 = vmatpush.bf16.msra.mxu0 %v1123_v12  ;;  %v1115_v37 = vld [vmem:[%s1495_s0 + $0x28] sm:$0xf0]  ;;  %v1110_v40 = vld [vmem:[%s1495_s0 + $0x4] sm:$0xf]  ;;  %v790_v41 = vld [vmem:[%s1495_s0 + $0x24] sm:$0xf0]  ;;  %v789_v44 = vor.u32 %v1114_v35, %v788_v34 }
   0xf   :  { %681 = vmatpush.bf16.msra.mxu2 %v1139_v13  ;;  %v1111_v42 = vld [vmem:[%s1495_s0 + $0xc] sm:$0xf]  ;;  %v798_v43 = vld [vmem:[%s1495_s0 + $0x2c] sm:$0xf0]  ;;  %v797_v45 = vor.u32 %v1115_v37, %v796_v36  ;;  %v793_v48 = vor.u32 %v1110_v40, %v790_v41  ;;  %v1155_v56 = vld [vmem:[%s1493_s1 + $0x120] sm:$0xff] }
  0x10   :  { %667 = vmatpush.bf16.msra.mxu1 %v1131_v14  ;;  %v1157_v46 = vld [vmem:[%s1493_s1 + $0x130] sm:$0xff]  ;;  %v801_v49 = vor.u32 %v1111_v42, %v798_v43  ;;  %v1156_v52 = vld [vmem:[%s1493_s1 + $0x128] sm:$0xff]  ;;  %v1171_v57 = vld [vmem:[%s1493_s1 + $0x1a0] sm:$0xff] }
  0x11   :  { %695 = vmatpush.bf16.msra.mxu3 %v1147_v15  ;;  %v1173_v47 = vld [vmem:[%s1493_s1 + $0x1b0] sm:$0xff]  ;;  %v1172_v53 = vld [vmem:[%s1493_s1 + $0x1a8] sm:$0xff]  ;;  %v1163_v58 = vld [vmem:[%s1493_s1 + $0x160] sm:$0xff] }
  0x12   :  { %654 = vmatpush.bf16.msra.mxu0 %v1122_v16  ;;  %v1165_v50 = vld [vmem:[%s1493_s1 + $0x170] sm:$0xff]  ;;  %v1164_v54 = vld [vmem:[%s1493_s1 + $0x168] sm:$0xff]  ;;  %v1179_v59 = vld [vmem:[%s1493_s1 + $0x1e0] sm:$0xff] }
  0x13   :  { %682 = vmatpush.bf16.msra.mxu2 %v1138_v17  ;;  %v1181_v51 = vld [vmem:[%s1493_s1 + $0x1f0] sm:$0xff]  ;;  %v1180_v55 = vld [vmem:[%s1493_s1 + $0x1e8] sm:$0xff]  ;;  %v1154_v60 = vld [vmem:[%s1493_s1 + $0x118] sm:$0xff] }
  0x14   :  { %668 = vmatpush.bf16.msra.mxu1 %v1130_v18  ;;  %v1170_v61 = vld [vmem:[%s1493_s1 + $0x198] sm:$0xff]  ;;  %v1153_v0 = vld [vmem:[%s1493_s1 + $0x110] sm:$0xff]  ;;  %v1152_v4 = vld [vmem:[%s1493_s1 + $0x108] sm:$0xff] }
  0x15   :  { %696 = vmatpush.bf16.msra.mxu3 %v1146_v19  ;;  %v1162_v62 = vld [vmem:[%s1493_s1 + $0x158] sm:$0xff]  ;;  %v1169_v1 = vld [vmem:[%s1493_s1 + $0x190] sm:$0xff]  ;;  %v1168_v5 = vld [vmem:[%s1493_s1 + $0x188] sm:$0xff] }
  0x16   :  { %655 = vmatpush.bf16.msra.mxu0 %v1121_v20  ;;  %v1178_v63 = vld [vmem:[%s1493_s1 + $0x1d8] sm:$0xff]  ;;  %v1161_v2 = vld [vmem:[%s1493_s1 + $0x150] sm:$0xff]  ;;  %v1160_v6 = vld [vmem:[%s1493_s1 + $0x148] sm:$0xff] }
  0x17   :  { %683 = vmatpush.bf16.msra.mxu2 %v1137_v21  ;;  %v1177_v3 = vld [vmem:[%s1493_s1 + $0x1d0] sm:$0xff]  ;;  %v1176_v7 = vld [vmem:[%s1493_s1 + $0x1c8] sm:$0xff]  ;;  %v1151_v8 = vld [vmem:[%s1493_s1 + $0x100] sm:$0xff] }
  0x18   :  { %669 = vmatpush.bf16.msra.mxu1 %v1129_v22  ;;  %v1167_v9 = vld [vmem:[%s1493_s1 + $0x180] sm:$0xff]  ;;  %v1190_v10 = vld [vmem:[%s1493_s1 + $0x238] sm:$0xff]  ;;  %v804_v11 = vld [vmem:[%s1495_s0 + $0x10] sm:$0xf] }
  0x19   :  { %697 = vmatpush.bf16.msra.mxu3 %v1145_v23  ;;  %v1116_v12 = vld [vmem:[%s1495_s0 + $0x30] sm:$0xf0]  ;;  %v812_v13 = vld [vmem:[%s1495_s0 + $0x18] sm:$0xf]  ;;  %v1117_v14 = vld [vmem:[%s1495_s0 + $0x38] sm:$0xf0] }
  0x1a   :  { %656 = vmatpush.bf16.msra.mxu0 %v1120_v24  ;;  %v1159_v15 = vld [vmem:[%s1493_s1 + $0x140] sm:$0xff]  ;;  %v1112_v17 = vld [vmem:[%s1495_s0 + $0x14] sm:$0xf]  ;;  %v806_v18 = vld [vmem:[%s1495_s0 + $0x34] sm:$0xf0]  ;;  %v805_v21 = vor.u32 %v1116_v12, %v804_v11  ;;  %v813_v22 = vor.u32 %v1117_v14, %v812_v13 }
  0x1b   :  { %684 = vmatpush.bf16.msra.mxu2 %v1136_v25  ;;  %v1175_v16 = vld [vmem:[%s1493_s1 + $0x1c0] sm:$0xff]  ;;  %v1113_v19 = vld [vmem:[%s1495_s0 + $0x1c] sm:$0xf]  ;;  %v809_v23 = vor.u32 %v1112_v17, %v806_v18  ;;  %v1189_v25 = vld [vmem:[%s1493_s1 + $0x230] sm:$0xff] }
  0x1c   :  { %670 = vmatpush.bf16.msra.mxu1 %v1128_v26  ;;  %v814_v20 = vld [vmem:[%s1495_s0 + $0x3c] sm:$0xf0]  ;;  %v1188_v26 = vld [vmem:[%s1493_s1 + $0x228] sm:$0xff] }
  0x1d   :  { %698 = vmatpush.bf16.msra.mxu3 %v1144_v27  ;;  %v817_v24 = vor.u32 %v1113_v19, %v814_v20  ;;  %v1187_v27 = vld [vmem:[%s1493_s1 + $0x220] sm:$0xff] }
  0x1e   :  { %657 = vmatpush.bf16.msra.mxu0 %v1119_v28  ;;  %v1186_v28 = vld [vmem:[%s1493_s1 + $0x218] sm:$0xff] }
  0x1f   :  { %685 = vmatpush.bf16.msra.mxu2 %v1135_v29  ;;  %v1185_v29 = vld [vmem:[%s1493_s1 + $0x210] sm:$0xff] }
  0x20   :  { %671 = vmatpush.bf16.msra.mxu1 %v1127_v32  ;;  %v820_v32 = vld [vmem:[%s1495_s0 + $0x20] sm:$0xf] }
  0x21   :  { %699 = vmatpush.bf16.msra.mxu3 %v1143_v33  ;;  %658 = vmatmul.bf16.vlgmr.msra.gmra.mxu0 %v789_v44  ;;  %v1118_v33 = vld [vmem:[%s1495_s0 + $0x40] sm:$0xf0] }
  0x22   :  { %706 = vmatpush.bf16.msrb.mxu0 %v1158_v30  ;;  %686 = vmatmul.bf16.vlgmr.msra.gmra.mxu2 %v797_v45  ;;  %v1184_v30 = vld [vmem:[%s1493_s1 + $0x208] sm:$0xff]  ;;  %v821_v34 = vor.u32 %v1118_v33, %v820_v32 }
  0x23   :  { %734 = vmatpush.bf16.msrb.mxu2 %v1174_v31  ;;  %672 = vmatmul.bf16.vlgmr.msra.gmra.mxu1 %v793_v48  ;;  %v1183_v31 = vld [vmem:[%s1493_s1 + $0x200] sm:$0xff] }
  0x24   :  { %720 = vmatpush.bf16.msrb.mxu1 %v1166_v38  ;;  %700 = vmatmul.bf16.vlgmr.msra.gmra.mxu3 %v801_v49 }
  0x25   :  { %748 = vmatpush.bf16.msrb.mxu3 %v1182_v39  ;;  %v1196_v39 = vld [vmem:[%s1494_s2] ss:$0 sm:$0xff] }
  0x26   :  { %707 = vmatpush.bf16.msrb.mxu0 %v1157_v46 }
  0x27   :  { %735 = vmatpush.bf16.msrb.mxu2 %v1173_v47 }
  0x28   :  { %721 = vmatpush.bf16.msrb.mxu1 %v1165_v50 }
  0x29   :  { %749 = vmatpush.bf16.msrb.mxu3 %v1181_v51 }
  0x2a   :  { %708 = vmatpush.bf16.msrb.mxu0 %v1156_v52 }
  0x2b   :  { %736 = vmatpush.bf16.msrb.mxu2 %v1172_v53 }
  0x2c   :  { %722 = vmatpush.bf16.msrb.mxu1 %v1164_v54 }
  0x2d   :  { %750 = vmatpush.bf16.msrb.mxu3 %v1180_v55 }
  0x2e   :  { %709 = vmatpush.bf16.msrb.mxu0 %v1155_v56 }
  0x2f   :  { %737 = vmatpush.bf16.msrb.mxu2 %v1171_v57 }
  0x30   :  { %723 = vmatpush.bf16.msrb.mxu1 %v1163_v58 }
  0x31   :  { %751 = vmatpush.bf16.msrb.mxu3 %v1179_v59 }
  0x32   :  { %710 = vmatpush.bf16.msrb.mxu0 %v1154_v60 }
  0x33   :  { %738 = vmatpush.bf16.msrb.mxu2 %v1170_v61 }
  0x34   :  { %724 = vmatpush.bf16.msrb.mxu1 %v1162_v62 }
  0x35   :  { %752 = vmatpush.bf16.msrb.mxu3 %v1178_v63 }
  0x36   :  { %711 = vmatpush.bf16.msrb.mxu0 %v1153_v0 }
  0x37   :  { %739 = vmatpush.bf16.msrb.mxu2 %v1169_v1 }
  0x38   :  { %725 = vmatpush.bf16.msrb.mxu1 %v1161_v2 }
  0x39   :  { %753 = vmatpush.bf16.msrb.mxu3 %v1177_v3 }
  0x3a   :  { %712 = vmatpush.bf16.msrb.mxu0 %v1152_v4 }
  0x3b   :  { %740 = vmatpush.bf16.msrb.mxu2 %v1168_v5 }
  0x3c   :  { %726 = vmatpush.bf16.msrb.mxu1 %v1160_v6 }
  0x3d   :  { %754 = vmatpush.bf16.msrb.mxu3 %v1176_v7 }
  0x3e   :  { %713 = vmatpush.bf16.msrb.mxu0 %v1151_v8 }
  0x3f   :  { %741 = vmatpush.bf16.msrb.mxu2 %v1167_v9 }
  0x40   :  { %727 = vmatpush.bf16.msrb.mxu1 %v1159_v15 }
  0x41   :  { %755 = vmatpush.bf16.msrb.mxu3 %v1175_v16  ;;  %714 = vmatmul.bf16.vlgmr.msrb.gmra.mxu0 %v805_v21 }
  0x42   :  { %762 = vmatpush.bf16.msra.mxu0 %v1190_v10  ;;  %742 = vmatmul.bf16.vlgmr.msrb.gmra.mxu2 %v813_v22 }
  0x43   :  { %728 = vmatmul.bf16.vlgmr.msrb.gmra.mxu1 %v809_v23 }
  0x44   :  { %756 = vmatmul.bf16.vlgmr.msrb.gmra.mxu3 %v817_v24 }
  0x46   :  { %763 = vmatpush.bf16.msra.mxu0 %v1189_v25 }
  0x4a   :  { %764 = vmatpush.bf16.msra.mxu0 %v1188_v26 }
  0x4e   :  { %765 = vmatpush.bf16.msra.mxu0 %v1187_v27 }
  0x52   :  { %766 = vmatpush.bf16.msra.mxu0 %v1186_v28 }
  0x56   :  { %767 = vmatpush.bf16.msra.mxu0 %v1185_v29 }
  0x5a   :  { %768 = vmatpush.bf16.msra.mxu0 %v1184_v30 }
  0x5e   :  { %769 = vmatpush.bf16.msra.mxu0 %v1183_v31 }
  0x61   :  { %770 = vmatmul.bf16.vlgmr.msra.gmra.mxu0 %v821_v34 }
  0x9e   :  { %v659_v35 = vpop.f32.mrf.mxu0 }
  0x9f   :  { %v660_v41 = vadd.f32 %v1196_v39, %v659_v35 }
  0xa0   :  { %v673_v36 = vpop.f32.mrf.mxu1 }
  0xa1   :  { %v674_v44 = vadd.f32 %v673_v36, %v660_v41 }
  0xa5   :  { %v687_v37 = vpop.f32.mrf.mxu2 }
  0xa6   :  { %v661_v38 = vpop.f32.mrf.mxu0  ;;  %v688_v48 = vadd.f32 %v687_v37, %v674_v44 }
  0xa7   :  { %v701_v40 = vpop.f32.mrf.mxu3  ;;  %v662_v46 = vadd.f32 %v1196_v39, %v661_v38 }
  0xa8   :  { %v675_v42 = vpop.f32.mrf.mxu1  ;;  %v702_v51 = vadd.f32 %v701_v40, %v688_v48 }
  0xa9   :  { %v676_v49 = vadd.f32 %v675_v42, %v662_v46 }
  0xad   :  { %v689_v43 = vpop.f32.mrf.mxu2 }
  0xae   :  { %v690_v53 = vadd.f32 %v689_v43, %v676_v49 }
  0xaf   :  { %v703_v47 = vpop.f32.mrf.mxu3 }
  0xb0   :  { %v704_v57 = vadd.f32 %v703_v47, %v690_v53 }
  0xbe   :  { %v715_v45 = vpop.f32.mrf.mxu0 }
  0xbf   :  { %v716_v55 = vadd.f32 %v715_v45, %v702_v51 }
  0xc0   :  { %v729_v50 = vpop.f32.mrf.mxu1 }
  0xc1   :  { %v730_v58 = vadd.f32 %v729_v50, %v716_v55 }
  0xc5   :  { %v743_v52 = vpop.f32.mrf.mxu2 }
  0xc6   :  { %v717_v54 = vpop.f32.mrf.mxu0  ;;  %v744_v63 = vadd.f32 %v743_v52, %v730_v58 }
  0xc7   :  { %v757_v56 = vpop.f32.mrf.mxu3  ;;  %v718_v59 = vadd.f32 %v717_v54, %v704_v57 }
  0xc8   :  { %v731_v60 = vpop.f32.mrf.mxu1  ;;  %v758_v3 = vadd.f32 %v757_v56, %v744_v63 }
  0xc9   :  { %v732_v0 = vadd.f32 %v731_v60, %v718_v59 }
  0xcd   :  { %v745_v61 = vpop.f32.mrf.mxu2 }
  0xce   :  { %v746_v1 = vadd.f32 %v745_v61, %v732_v0 }
  0xcf   :  { %v759_v2 = vpop.f32.mrf.mxu3 }
  0xd0   :  { %v760_v4 = vadd.f32 %v759_v2, %v746_v1 }
  0xde   :  { %v771_v62 = vpop.f32.mrf.mxu0 }
  0xdf   :  { %v772_v5 = vadd.f32 %v771_v62, %v758_v3 }
  0xe1   :  { %v776_v8 = vmax.f32 %v772_v5, 0.0 }
  0xe6   :  { %v773_v6 = vpop.f32.mrf.mxu0 }
  0xe7   :  { %v774_v7 = vadd.f32 %v773_v6, %v760_v4 }
  0xe9   :  { %v777_v9 = vmax.f32 %v774_v7, 0.0 }
  0xeb   :  { %v1194_v10 = vpack.c.bf16 %v777_v9, %v776_v8 }
  0xed   :  { %1195 = vst [vmem:[%s1496_s3] sm:$0xff] %v1194_v10  }

// kernel: dqn_forward.9
= control target key start
LH: loop header
LB: loop body
LE: loop exit
PB: predicated region body
PF: predicated region fallthrough
CT: control target
= control target key end

     0   :  { %s1907_s0 = inlined_call_operand.vmem [shape: bf16[2,256], index: 0, kind: input, shape index: {}]   ;;  %s1908_s1 = inlined_call_operand.vmem [shape: bf16[256,512], index: 1, kind: input, shape index: {}]   ;;  %s1909_s2 = inlined_call_operand.vmem [shape: f32[1,512], index: 2, kind: input, shape index: {}]   ;;  %s1910_s3 = inlined_call_operand.vmem [shape: bf16[512,6], index: 3, kind: input, shape index: {}]   ;;  %s1911_s4 = inlined_call_operand.vmem [shape: f32[1,6], index: 4, kind: input, shape index: {}]   ;;  %s1912_s5 = inlined_call_operand.hbm [shape: f32[2,6], index: 5, kind: output, shape index: {}]  }
   0x1   :  { %v978_v0 = vld [vmem:[%s1908_s1 + $0xe0] sm:$0xf]  ;;  %v1278_v1 = vld [vmem:[%s1908_s1 + $0xec] sm:$0xf0]  ;;  %v1276_v5 = vld [vmem:[%s1908_s1 + $0xe4] sm:$0xf] }
   0x2   :  { %v1106_v2 = vld [vmem:[%s1908_s1 + $0x1e0] sm:$0xf]  ;;  %v979_v3 = vor.u32 %v1278_v1, %v978_v0  ;;  %v1310_v4 = vld [vmem:[%s1908_s1 + $0x1ec] sm:$0xf0]  ;;  %v980_v6 = vld [vmem:[%s1908_s1 + $0xf0] sm:$0xf0] }
   0x3   :  { %v1107_v7 = vor.u32 %v1310_v4, %v1106_v2  ;;  %v983_v8 = vor.u32 %v1276_v5, %v980_v6  ;;  %v1308_v9 = vld [vmem:[%s1908_s1 + $0x1e4] sm:$0xf]  ;;  %v1108_v10 = vld [vmem:[%s1908_s1 + $0x1f0] sm:$0xf0]  ;;  %v962_v11 = vld [vmem:[%s1908_s1 + $0xc0] sm:$0xf] }
   0x4   :  { %422 = vmatpush.bf16.msra.mxu0 %v979_v3  ;;  %v1111_v12 = vor.u32 %v1308_v9, %v1108_v10  ;;  %v1274_v13 = vld [vmem:[%s1908_s1 + $0xcc] sm:$0xf0]  ;;  %v1090_v14 = vld [vmem:[%s1908_s1 + $0x1c0] sm:$0xf]  ;;  %v1272_v18 = vld [vmem:[%s1908_s1 + $0xc4] sm:$0xf] }
   0x5   :  { %v1306_v15 = vld [vmem:[%s1908_s1 + $0x1cc] sm:$0xf0]  ;;  %435 = vmatpush.bf16.msra.mxu1 %v1107_v7  ;;  %448 = vmatpush.bf16.msra.mxu2 %v983_v8  ;;  %v963_v16 = vor.u32 %v1274_v13, %v962_v11  ;;  %v964_v19 = vld [vmem:[%s1908_s1 + $0xd0] sm:$0xf0]  ;;  %v1304_v20 = vld [vmem:[%s1908_s1 + $0x1c4] sm:$0xf] }
   0x6   :  { %v1091_v17 = vor.u32 %v1306_v15, %v1090_v14  ;;  %461 = vmatpush.bf16.msra.mxu3 %v1111_v12  ;;  %v967_v21 = vor.u32 %v1272_v18, %v964_v19  ;;  %v1092_v22 = vld [vmem:[%s1908_s1 + $0x1d0] sm:$0xf0]  ;;  %v946_v23 = vld [vmem:[%s1908_s1 + $0xa0] sm:$0xf]  ;;  %v1270_v24 = vld [vmem:[%s1908_s1 + $0xac] sm:$0xf0] }
   0x7   :  { %v1095_v25 = vor.u32 %v1304_v20, %v1092_v22  ;;  %v1074_v26 = vld [vmem:[%s1908_s1 + $0x1a0] sm:$0xf]  ;;  %v1302_v27 = vld [vmem:[%s1908_s1 + $0x1ac] sm:$0xf0]  ;;  %v1268_v28 = vld [vmem:[%s1908_s1 + $0xa4] sm:$0xf]  ;;  %v947_v29 = vor.u32 %v1270_v24, %v946_v23 }
   0x8   :  { %423 = vmatpush.bf16.msra.mxu0 %v963_v16  ;;  %v948_v30 = vld [vmem:[%s1908_s1 + $0xb0] sm:$0xf0]  ;;  %v1300_v31 = vld [vmem:[%s1908_s1 + $0x1a4] sm:$0xf]  ;;  %v1075_v33 = vor.u32 %v1302_v27, %v1074_v26  ;;  %v930_v35 = vld [vmem:[%s1908_s1 + $0x80] sm:$0xf] }
   0x9   :  { %v1076_v32 = vld [vmem:[%s1908_s1 + $0x1b0] sm:$0xf0]  ;;  %436 = vmatpush.bf16.msra.mxu1 %v1091_v17  ;;  %449 = vmatpush.bf16.msra.mxu2 %v967_v21  ;;  %v951_v34 = vor.u32 %v1268_v28, %v948_v30  ;;  %v1266_v36 = vld [vmem:[%s1908_s1 + $0x8c] sm:$0xf0]  ;;  %v1058_v37 = vld [vmem:[%s1908_s1 + $0x180] sm:$0xf] }
   0xa   :  { %462 = vmatpush.bf16.msra.mxu3 %v1095_v25  ;;  %v1079_v38 = vor.u32 %v1300_v31, %v1076_v32  ;;  %v1298_v39 = vld [vmem:[%s1908_s1 + $0x18c] sm:$0xf0]  ;;  %v1264_v40 = vld [vmem:[%s1908_s1 + $0x84] sm:$0xf]  ;;  %v932_v41 = vld [vmem:[%s1908_s1 + $0x90] sm:$0xf0]  ;;  %v931_v44 = vor.u32 %v1266_v36, %v930_v35 }
   0xb   :  { %v1296_v42 = vld [vmem:[%s1908_s1 + $0x184] sm:$0xf]  ;;  %v1060_v43 = vld [vmem:[%s1908_s1 + $0x190] sm:$0xf0]  ;;  %v1059_v45 = vor.u32 %v1298_v39, %v1058_v37  ;;  %v935_v46 = vor.u32 %v1264_v40, %v932_v41  ;;  %v914_v47 = vld [vmem:[%s1908_s1 + $0x60] sm:$0xf] }
   0xc   :  { %424 = vmatpush.bf16.msra.mxu0 %v947_v29  ;;  %v1262_v48 = vld [vmem:[%s1908_s1 + $0x6c] sm:$0xf0]  ;;  %v1042_v49 = vld [vmem:[%s1908_s1 + $0x160] sm:$0xf]  ;;  %v1063_v50 = vor.u32 %v1296_v42, %v1060_v43  ;;  %v1260_v52 = vld [vmem:[%s1908_s1 + $0x64] sm:$0xf] }
   0xd   :  { %437 = vmatpush.bf16.msra.mxu1 %v1075_v33  ;;  %450 = vmatpush.bf16.msra.mxu2 %v951_v34  ;;  %v1294_v51 = vld [vmem:[%s1908_s1 + $0x16c] sm:$0xf0]  ;;  %v916_v53 = vld [vmem:[%s1908_s1 + $0x70] sm:$0xf0]  ;;  %v1292_v54 = vld [vmem:[%s1908_s1 + $0x164] sm:$0xf]  ;;  %v915_v56 = vor.u32 %v1262_v48, %v914_v47 }
   0xe   :  { %463 = vmatpush.bf16.msra.mxu3 %v1079_v38  ;;  %v1044_v55 = vld [vmem:[%s1908_s1 + $0x170] sm:$0xf0]  ;;  %v1043_v57 = vor.u32 %v1294_v51, %v1042_v49  ;;  %v919_v58 = vor.u32 %v1260_v52, %v916_v53  ;;  %v898_v59 = vld [vmem:[%s1908_s1 + $0x40] sm:$0xf]  ;;  %v1258_v60 = vld [vmem:[%s1908_s1 + $0x4c] sm:$0xf0] }
   0xf   :  { %v1026_v61 = vld [vmem:[%s1908_s1 + $0x140] sm:$0xf]  ;;  %v1047_v62 = vor.u32 %v1292_v54, %v1044_v55  ;;  %v1290_v63 = vld [vmem:[%s1908_s1 + $0x14c] sm:$0xf0]  ;;  %v1256_v0 = vld [vmem:[%s1908_s1 + $0x44] sm:$0xf]  ;;  %v899_v4 = vor.u32 %v1258_v60, %v898_v59 }
  0x10   :  { %425 = vmatpush.bf16.msra.mxu0 %v931_v44  ;;  %v900_v1 = vld [vmem:[%s1908_s1 + $0x50] sm:$0xf0]  ;;  %v1288_v2 = vld [vmem:[%s1908_s1 + $0x144] sm:$0xf]  ;;  %v1027_v5 = vor.u32 %v1290_v63, %v1026_v61  ;;  %v882_v7 = vld [vmem:[%s1908_s1 + $0x20] sm:$0xf] }
  0x11   :  { %438 = vmatpush.bf16.msra.mxu1 %v1059_v45  ;;  %451 = vmatpush.bf16.msra.mxu2 %v935_v46  ;;  %v1028_v3 = vld [vmem:[%s1908_s1 + $0x150] sm:$0xf0]  ;;  %v903_v6 = vor.u32 %v1256_v0, %v900_v1  ;;  %v1254_v8 = vld [vmem:[%s1908_s1 + $0x2c] sm:$0xf0]  ;;  %v1010_v9 = vld [vmem:[%s1908_s1 + $0x120] sm:$0xf] }
  0x12   :  { %464 = vmatpush.bf16.msra.mxu3 %v1063_v50  ;;  %v1031_v10 = vor.u32 %v1288_v2, %v1028_v3  ;;  %v1286_v11 = vld [vmem:[%s1908_s1 + $0x12c] sm:$0xf0]  ;;  %v1252_v12 = vld [vmem:[%s1908_s1 + $0x24] sm:$0xf]  ;;  %v884_v13 = vld [vmem:[%s1908_s1 + $0x30] sm:$0xf0]  ;;  %v883_v17 = vor.u32 %v1254_v8, %v882_v7 }
  0x13   :  { %v1284_v14 = vld [vmem:[%s1908_s1 + $0x124] sm:$0xf]  ;;  %v1012_v15 = vld [vmem:[%s1908_s1 + $0x130] sm:$0xf0]  ;;  %v866_v16 = vld [vmem:[%s1908_s1] sm:$0xf]  ;;  %v1011_v21 = vor.u32 %v1286_v11, %v1010_v9  ;;  %v887_v22 = vor.u32 %v1252_v12, %v884_v13 }
  0x14   :  { %426 = vmatpush.bf16.msra.mxu0 %v915_v56  ;;  %v1250_v18 = vld [vmem:[%s1908_s1 + $0xc] sm:$0xf0]  ;;  %v994_v19 = vld [vmem:[%s1908_s1 + $0x100] sm:$0xf]  ;;  %v1248_v23 = vld [vmem:[%s1908_s1 + $0x4] sm:$0xf]  ;;  %v1015_v26 = vor.u32 %v1284_v14, %v1012_v15 }
  0x15   :  { %439 = vmatpush.bf16.msra.mxu1 %v1043_v57  ;;  %452 = vmatpush.bf16.msra.mxu2 %v919_v58  ;;  %v1282_v20 = vld [vmem:[%s1908_s1 + $0x10c] sm:$0xf0]  ;;  %v868_v24 = vld [vmem:[%s1908_s1 + $0x10] sm:$0xf0]  ;;  %v1280_v25 = vld [vmem:[%s1908_s1 + $0x104] sm:$0xf]  ;;  %v867_v33 = vor.u32 %v1250_v18, %v866_v16 }
  0x16   :  { %465 = vmatpush.bf16.msra.mxu3 %v1047_v62  ;;  %v996_v27 = vld [vmem:[%s1908_s1 + $0x110] sm:$0xf0]  ;;  %v986_v28 = vld [vmem:[%s1908_s1 + $0xe8] sm:$0xf]  ;;  %v1279_v29 = vld [vmem:[%s1908_s1 + $0xf4] sm:$0xf0]  ;;  %v995_v36 = vor.u32 %v1282_v20, %v994_v19  ;;  %v871_v37 = vor.u32 %v1248_v23, %v868_v24 }
  0x17   :  { %v1114_v30 = vld [vmem:[%s1908_s1 + $0x1e8] sm:$0xf]  ;;  %v1311_v31 = vld [vmem:[%s1908_s1 + $0x1f4] sm:$0xf0]  ;;  %v21_v32 = vld [vmem:[%s1907_s0] sm:$0x3]  ;;  %v999_v40 = vor.u32 %v1280_v25, %v996_v27  ;;  %v987_v41 = vor.u32 %v1279_v29, %v986_v28 }
  0x18   :  { %427 = vmatpush.bf16.msra.mxu0 %v899_v4  ;;  %v1277_v34 = vld [vmem:[%s1908_s1 + $0xec] sm:$0xf]  ;;  %v988_v35 = vld [vmem:[%s1908_s1 + $0xf8] sm:$0xf0]  ;;  %97 = vst [vmem:[#allocation1] ss:$9 sm:$0xff] %v21_v32  ;;  %v1115_v42 = vor.u32 %v1311_v31, %v1114_v30 }
  0x19   :  { %440 = vmatpush.bf16.msra.mxu1 %v1027_v5  ;;  %453 = vmatpush.bf16.msra.mxu2 %v903_v6  ;;  %v1309_v38 = vld [vmem:[%s1908_s1 + $0x1ec] sm:$0xf]  ;;  %v1116_v39 = vld [vmem:[%s1908_s1 + $0x1f8] sm:$0xf0]  ;;  %v991_v43 = vor.u32 %v1277_v34, %v988_v35  ;;  %v970_v44 = vld [vmem:[%s1908_s1 + $0xc8] sm:$0xf] }
  0x1a   :  { %466 = vmatpush.bf16.msra.mxu3 %v1031_v10  ;;  %v1275_v45 = vld [vmem:[%s1908_s1 + $0xd4] sm:$0xf0]  ;;  %v1098_v46 = vld [vmem:[%s1908_s1 + $0x1c8] sm:$0xf]  ;;  %v1119_v47 = vor.u32 %v1309_v38, %v1116_v39  ;;  %v1273_v49 = vld [vmem:[%s1908_s1 + $0xcc] sm:$0xf] }
  0x1b   :  { %v1307_v48 = vld [vmem:[%s1908_s1 + $0x1d4] sm:$0xf0]  ;;  %v972_v50 = vld [vmem:[%s1908_s1 + $0xd8] sm:$0xf0]  ;;  %v1305_v51 = vld [vmem:[%s1908_s1 + $0x1cc] sm:$0xf]  ;;  %v971_v53 = vor.u32 %v1275_v45, %v970_v44 }
  0x1c   :  { %428 = vmatpush.bf16.msra.mxu0 %v883_v17  ;;  %v1100_v52 = vld [vmem:[%s1908_s1 + $0x1d8] sm:$0xf0]  ;;  %v954_v54 = vld [vmem:[%s1908_s1 + $0xa8] sm:$0xf]  ;;  %v1271_v55 = vld [vmem:[%s1908_s1 + $0xb4] sm:$0xf0]  ;;  %v1099_v56 = vor.u32 %v1307_v48, %v1098_v46  ;;  %v975_v57 = vor.u32 %v1273_v49, %v972_v50 }
  0x1d   :  { %441 = vmatpush.bf16.msra.mxu1 %v1011_v21  ;;  %454 = vmatpush.bf16.msra.mxu2 %v887_v22  ;;  %v1082_v59 = vld [vmem:[%s1908_s1 + $0x1a8] sm:$0xf]  ;;  %v1103_v61 = vor.u32 %v1305_v51, %v1100_v52  ;;  %v1303_v62 = vld [vmem:[%s1908_s1 + $0x1b4] sm:$0xf0]  ;;  %v1269_v63 = vld [vmem:[%s1908_s1 + $0xac] sm:$0xf]  ;;  %v955_v3 = vor.u32 %v1271_v55, %v954_v54 }
  0x1e   :  { %467 = vmatpush.bf16.msra.mxu3 %v1015_v26  ;;  %v956_v0 = vld [vmem:[%s1908_s1 + $0xb8] sm:$0xf0]  ;;  %v1301_v1 = vld [vmem:[%s1908_s1 + $0x1ac] sm:$0xf]  ;;  %v1083_v4 = vor.u32 %v1303_v62, %v1082_v59  ;;  %v938_v6 = vld [vmem:[%s1908_s1 + $0x88] sm:$0xf] }
  0x1f   :  { %v1652_v58 = vld [vmem:[#allocation1] sm:$0xff]  ;;  %v1657_v60 = vld [vmem:[#allocation1 + $0x9] sm:$0xff]  ;;  %v1084_v2 = vld [vmem:[%s1908_s1 + $0x1b8] sm:$0xf0]  ;;  %v959_v5 = vor.u32 %v1269_v63, %v956_v0 }
  0x20   :  { %429 = vmatpush.bf16.msra.mxu0 %v867_v33  ;;  %v1267_v7 = vld [vmem:[%s1908_s1 + $0x94] sm:$0xf0]  ;;  %v1066_v8 = vld [vmem:[%s1908_s1 + $0x188] sm:$0xf]  ;;  %v1087_v9 = vor.u32 %v1301_v1, %v1084_v2  ;;  %v1265_v11 = vld [vmem:[%s1908_s1 + $0x8c] sm:$0xf] }
  0x21   :  { %442 = vmatpush.bf16.msra.mxu1 %v995_v36  ;;  %455 = vmatpush.bf16.msra.mxu2 %v871_v37  ;;  %v1299_v10 = vld [vmem:[%s1908_s1 + $0x194] sm:$0xf0]  ;;  %v940_v12 = vld [vmem:[%s1908_s1 + $0x98] sm:$0xf0]  ;;  %v1297_v13 = vld [vmem:[%s1908_s1 + $0x18c] sm:$0xf]  ;;  %v939_v15 = vor.u32 %v1267_v7, %v938_v6 }
  0x22   :  { %468 = vmatpush.bf16.msra.mxu3 %v999_v40  ;;  %v1068_v14 = vld [vmem:[%s1908_s1 + $0x198] sm:$0xf0]  ;;  %v1067_v16 = vor.u32 %v1299_v10, %v1066_v8  ;;  %v943_v17 = vor.u32 %v1265_v11, %v940_v12  ;;  %v922_v18 = vld [vmem:[%s1908_s1 + $0x68] sm:$0xf]  ;;  %v1263_v19 = vld [vmem:[%s1908_s1 + $0x74] sm:$0xf0] }
  0x23   :  { %430 = vmatmul.bf16.vlgmr.msra.gmra.mxu0 %v1652_v58  ;;  %v1050_v20 = vld [vmem:[%s1908_s1 + $0x168] sm:$0xf]  ;;  %v1071_v21 = vor.u32 %v1297_v13, %v1068_v14  ;;  %v1295_v22 = vld [vmem:[%s1908_s1 + $0x174] sm:$0xf0]  ;;  %v1261_v23 = vld [vmem:[%s1908_s1 + $0x6c] sm:$0xf]  ;;  %v923_v27 = vor.u32 %v1263_v19, %v922_v18 }
  0x24   :  { %474 = vmatpush.bf16.msrb.mxu0 %v987_v41  ;;  %456 = vmatmul.bf16.vlgmr.msra.gmra.mxu2 %v1652_v58  ;;  %v924_v24 = vld [vmem:[%s1908_s1 + $0x78] sm:$0xf0]  ;;  %v1293_v25 = vld [vmem:[%s1908_s1 + $0x16c] sm:$0xf]  ;;  %v906_v28 = vld [vmem:[%s1908_s1 + $0x48] sm:$0xf]  ;;  %v1051_v30 = vor.u32 %v1295_v22, %v1050_v20 }
  0x25   :  { %487 = vmatpush.bf16.msrb.mxu1 %v1115_v42  ;;  %500 = vmatpush.bf16.msrb.mxu2 %v991_v43  ;;  %v1052_v26 = vld [vmem:[%s1908_s1 + $0x178] sm:$0xf0]  ;;  %v1259_v29 = vld [vmem:[%s1908_s1 + $0x54] sm:$0xf0]  ;;  %v927_v31 = vor.u32 %v1261_v23, %v924_v24  ;;  %v1034_v32 = vld [vmem:[%s1908_s1 + $0x148] sm:$0xf] }
  0x26   :  { %513 = vmatpush.bf16.msrb.mxu3 %v1119_v47  ;;  %443 = vmatmul.bf16.vlgmr.msra.gmra.mxu1 %v1657_v60  ;;  %v1291_v33 = vld [vmem:[%s1908_s1 + $0x154] sm:$0xf0]  ;;  %v1257_v34 = vld [vmem:[%s1908_s1 + $0x4c] sm:$0xf]  ;;  %v1055_v35 = vor.u32 %v1293_v25, %v1052_v26  ;;  %v908_v36 = vld [vmem:[%s1908_s1 + $0x58] sm:$0xf0] }
  0x27   :  { %469 = vmatmul.bf16.vlgmr.msra.gmra.mxu3 %v1657_v60 }
  0x28   :  { %475 = vmatpush.bf16.msrb.mxu0 %v971_v53 }
  0x29   :  { %488 = vmatpush.bf16.msrb.mxu1 %v1099_v56  ;;  %501 = vmatpush.bf16.msrb.mxu2 %v975_v57 }
  0x2a   :  { %514 = vmatpush.bf16.msrb.mxu3 %v1103_v61 }
  0x2c   :  { %476 = vmatpush.bf16.msrb.mxu0 %v955_v3 }
  0x2d   :  { %489 = vmatpush.bf16.msrb.mxu1 %v1083_v4  ;;  %502 = vmatpush.bf16.msrb.mxu2 %v959_v5 }
  0x2e   :  { %515 = vmatpush.bf16.msrb.mxu3 %v1087_v9 }
  0x30   :  { %477 = vmatpush.bf16.msrb.mxu0 %v939_v15 }
  0x31   :  { %490 = vmatpush.bf16.msrb.mxu1 %v1067_v16  ;;  %503 = vmatpush.bf16.msrb.mxu2 %v943_v17 }
  0x32   :  { %516 = vmatpush.bf16.msrb.mxu3 %v1071_v21 }
  0x33   :  { %10 = vsyncpa [#allocation3], 0  ;;  %v1289_v37 = vld [vmem:[%s1908_s1 + $0x14c] sm:$0xf]  ;;  %v1036_v38 = vld [vmem:[%s1908_s1 + $0x158] sm:$0xf0]  ;;  %v907_v39 = vor.u32 %v1259_v29, %v906_v28  ;;  %v1035_v40 = vor.u32 %v1291_v33, %v1034_v32  ;;  %v911_v41 = vor.u32 %v1257_v34, %v908_v36 }
  0x34   :  { %478 = vmatpush.bf16.msrb.mxu0 %v923_v27  ;;  %v890_v42 = vld [vmem:[%s1908_s1 + $0x28] sm:$0xf]  ;;  %v1255_v43 = vld [vmem:[%s1908_s1 + $0x34] sm:$0xf0]  ;;  %v1039_v45 = vor.u32 %v1289_v37, %v1036_v38  ;;  %v1253_v47 = vld [vmem:[%s1908_s1 + $0x2c] sm:$0xf] }
  0x35   :  { %491 = vmatpush.bf16.msrb.mxu1 %v1051_v30  ;;  %504 = vmatpush.bf16.msrb.mxu2 %v927_v31  ;;  %v1018_v44 = vld [vmem:[%s1908_s1 + $0x128] sm:$0xf]  ;;  %v1287_v46 = vld [vmem:[%s1908_s1 + $0x134] sm:$0xf0]  ;;  %v892_v48 = vld [vmem:[%s1908_s1 + $0x38] sm:$0xf0]  ;;  %v891_v51 = vor.u32 %v1255_v43, %v890_v42 }
  0x36   :  { %517 = vmatpush.bf16.msrb.mxu3 %v1055_v35  ;;  %v1285_v49 = vld [vmem:[%s1908_s1 + $0x12c] sm:$0xf]  ;;  %v1020_v50 = vld [vmem:[%s1908_s1 + $0x138] sm:$0xf0]  ;;  %v1019_v52 = vor.u32 %v1287_v46, %v1018_v44  ;;  %v895_v53 = vor.u32 %v1253_v47, %v892_v48  ;;  %v874_v54 = vld [vmem:[%s1908_s1 + $0x8] sm:$0xf] }
  0x37   :  { %v1251_v55 = vld [vmem:[%s1908_s1 + $0x14] sm:$0xf0]  ;;  %v1002_v56 = vld [vmem:[%s1908_s1 + $0x108] sm:$0xf]  ;;  %v1023_v57 = vor.u32 %v1285_v49, %v1020_v50  ;;  %v1249_v61 = vld [vmem:[%s1908_s1 + $0xc] sm:$0xf] }
  0x38   :  { %479 = vmatpush.bf16.msrb.mxu0 %v907_v39  ;;  %v1283_v59 = vld [vmem:[%s1908_s1 + $0x114] sm:$0xf0]  ;;  %v876_v62 = vld [vmem:[%s1908_s1 + $0x18] sm:$0xf0]  ;;  %v1281_v63 = vld [vmem:[%s1908_s1 + $0x10c] sm:$0xf]  ;;  %v875_v1 = vor.u32 %v1251_v55, %v874_v54 }
  0x39   :  { %492 = vmatpush.bf16.msrb.mxu1 %v1035_v40  ;;  %505 = vmatpush.bf16.msrb.mxu2 %v911_v41  ;;  %v1004_v0 = vld [vmem:[%s1908_s1 + $0x118] sm:$0xf0]  ;;  %v1003_v2 = vor.u32 %v1283_v59, %v1002_v56  ;;  %v879_v3 = vor.u32 %v1249_v61, %v876_v62  ;;  %v1318_v8 = vld [vmem:[%s1910_s3 + $0x30] sm:$0xff]  ;;  %v1317_v10 = vld [vmem:[%s1910_s3 + $0x28] sm:$0xff]  ;;  %s1372_s7 = smov [#allocation2]   ;;  %s855_s11 = sshll.u32 %s1912_s5, 4  ;;  %s856_s11 = int_to_ptr.hbm [resolvable:$true] %s855_s11 }
  0x3a   :  { %518 = vmatpush.bf16.msrb.mxu3 %v1039_v45  ;;  %v1007_v4 = vor.u32 %v1281_v63, %v1004_v0  ;;  %v1319_v5 = vld [vmem:[%s1910_s3 + $0x38] sm:$0xff]  ;;  %v1326_v9 = vld [vmem:[%s1910_s3 + $0x70] sm:$0xff]  ;;  %v1325_v11 = vld [vmem:[%s1910_s3 + $0x68] sm:$0xff]  ;;  %s853_s8 = sshll.u32 %s1372_s7, 4  ;;  %vm846_vm0 = vcmask 41984   ;;  %s854_s8 = int_to_ptr.vmem [resolvable:$true] %s853_s8 }
  0x3b   :  { %v1327_v6 = vld [vmem:[%s1910_s3 + $0x78] sm:$0xff]  ;;  %v1316_v12 = vld [vmem:[%s1910_s3 + $0x20] sm:$0xff]  ;;  %v1314_v14 = vld [vmem:[%s1910_s3 + $0x10] sm:$0xff] }
  0x3c   :  { %480 = vmatpush.bf16.msrb.mxu0 %v891_v51  ;;  %v1335_v7 = vld [vmem:[%s1910_s3 + $0xb8] sm:$0xff]  ;;  %v1322_v15 = vld [vmem:[%s1910_s3 + $0x50] sm:$0xff]  ;;  %v1313_v17 = vld [vmem:[%s1910_s3 + $0x8] sm:$0xff] }
  0x3d   :  { %493 = vmatpush.bf16.msrb.mxu1 %v1019_v52  ;;  %506 = vmatpush.bf16.msrb.mxu2 %v895_v53  ;;  %v1323_v13 = vld [vmem:[%s1910_s3 + $0x58] sm:$0xff]  ;;  %v1334_v16 = vld [vmem:[%s1910_s3 + $0xb0] sm:$0xff]  ;;  %v1321_v18 = vld [vmem:[%s1910_s3 + $0x48] sm:$0xff] }
  0x3e   :  { %519 = vmatpush.bf16.msrb.mxu3 %v1023_v57  ;;  %v1343_v19 = vld [vmem:[%s1910_s3 + $0xf8] sm:$0xff]  ;;  %v1333_v20 = vld [vmem:[%s1910_s3 + $0xa8] sm:$0xff]  ;;  %v1312_v21 = vld [vmem:[%s1910_s3] sm:$0xff] }
  0x3f   :  { %v1320_v22 = vld [vmem:[%s1910_s3 + $0x40] sm:$0xff]  ;;  %v1342_v23 = vld [vmem:[%s1910_s3 + $0xf0] sm:$0xff]  ;;  %v1341_v25 = vld [vmem:[%s1910_s3 + $0xe8] sm:$0xff] }
  0x40   :  { %481 = vmatpush.bf16.msrb.mxu0 %v875_v1  ;;  %v1332_v24 = vld [vmem:[%s1910_s3 + $0xa0] sm:$0xff]  ;;  %v1331_v26 = vld [vmem:[%s1910_s3 + $0x98] sm:$0xff]  ;;  %v1330_v28 = vld [vmem:[%s1910_s3 + $0x90] sm:$0xff] }
  0x41   :  { %494 = vmatpush.bf16.msrb.mxu1 %v1003_v2  ;;  %507 = vmatpush.bf16.msrb.mxu2 %v879_v3  ;;  %v1340_v27 = vld [vmem:[%s1910_s3 + $0xe0] sm:$0xff]  ;;  %v1339_v30 = vld [vmem:[%s1910_s3 + $0xd8] sm:$0xff]  ;;  %v1329_v32 = vld [vmem:[%s1910_s3 + $0x88] sm:$0xff] }
  0x42   :  { %520 = vmatpush.bf16.msrb.mxu3 %v1007_v4  ;;  %v86_v29 = vld [vmem:[%s1909_s2] sm:$0xf]  ;;  %v1338_v34 = vld [vmem:[%s1910_s3 + $0xd0] sm:$0xff]  ;;  %v1337_v40 = vld [vmem:[%s1910_s3 + $0xc8] sm:$0xff] }
  0x43   :  { %482 = vmatmul.bf16.vlgmr.msrb.gmra.mxu0 %v1652_v58  ;;  %v88_v31 = vperm.slane %v86_v29, 0  ;;  %v89_v37 = vperm.slane %v86_v29, 1  ;;  %v1328_v38 = vld [vmem:[%s1910_s3 + $0x80] sm:$0xff]  ;;  %v90_v54 = vperm.slane %v86_v29, 2  ;;  %v91_v61 = vperm.slane %v86_v29, 3 }
  0x44   :  { %794 = vmatpush.bf16.msra.mxu0 %v1319_v5  ;;  %495 = vmatmul.bf16.vlgmr.msrb.gmra.mxu1 %v1657_v60  ;;  %v1336_v48 = vld [vmem:[%s1910_s3 + $0xc0] sm:$0xff] }
  0x45   :  { %807 = vmatpush.bf16.msra.mxu1 %v1327_v6  ;;  %508 = vmatmul.bf16.vlgmr.msrb.gmra.mxu2 %v1652_v58  ;;  %v1324_v58 = vld [vmem:[%s1910_s3 + $0x60] sm:$0xff] }
  0x46   :  { %521 = vmatmul.bf16.vlgmr.msrb.gmra.mxu3 %v1657_v60  ;;  %820 = vmatpush.bf16.msra.mxu2 %v1335_v7  ;;  %v1315_v60 = vld [vmem:[%s1910_s3 + $0x18] sm:$0xff] }
  0x47   :  { %833 = vmatpush.bf16.msra.mxu3 %v1343_v19 }
  0x48   :  { %795 = vmatpush.bf16.msra.mxu0 %v1318_v8 }
  0x49   :  { %808 = vmatpush.bf16.msra.mxu1 %v1326_v9 }
  0x4a   :  { %821 = vmatpush.bf16.msra.mxu2 %v1334_v16 }
  0x4b   :  { %834 = vmatpush.bf16.msra.mxu3 %v1342_v23 }
  0x4c   :  { %796 = vmatpush.bf16.msra.mxu0 %v1317_v10 }
  0x4d   :  { %809 = vmatpush.bf16.msra.mxu1 %v1325_v11 }
  0x4e   :  { %822 = vmatpush.bf16.msra.mxu2 %v1333_v20 }
  0x4f   :  { %835 = vmatpush.bf16.msra.mxu3 %v1341_v25 }
  0x50   :  { %797 = vmatpush.bf16.msra.mxu0 %v1316_v12 }
  0x51   :  { %810 = vmatpush.bf16.msra.mxu1 %v1324_v58 }
  0x52   :  { %823 = vmatpush.bf16.msra.mxu2 %v1332_v24 }
  0x53   :  { %836 = vmatpush.bf16.msra.mxu3 %v1340_v27 }
  0x54   :  { %798 = vmatpush.bf16.msra.mxu0 %v1315_v60  ;;  %v1345_v60 = vld [vmem:[%s1911_s4] ss:$0 sm:$0xff] }
  0x55   :  { %811 = vmatpush.bf16.msra.mxu1 %v1323_v13 }
  0x56   :  { %824 = vmatpush.bf16.msra.mxu2 %v1331_v26 }
  0x57   :  { %837 = vmatpush.bf16.msra.mxu3 %v1339_v30 }
  0x58   :  { %799 = vmatpush.bf16.msra.mxu0 %v1314_v14 }
  0x59   :  { %812 = vmatpush.bf16.msra.mxu1 %v1322_v15 }
  0x5a   :  { %825 = vmatpush.bf16.msra.mxu2 %v1330_v28 }
  0x5b   :  { %838 = vmatpush.bf16.msra.mxu3 %v1338_v34 }
  0x5c   :  { %800 = vmatpush.bf16.msra.mxu0 %v1313_v17 }
  0x5d   :  { %813 = vmatpush.bf16.msra.mxu1 %v1321_v18 }
  0x5e   :  { %826 = vmatpush.bf16.msra.mxu2 %v1329_v32 }
  0x5f   :  { %839 = vmatpush.bf16.msra.mxu3 %v1337_v40 }
  0x60   :  { %801 = vmatpush.bf16.msra.mxu0 %v1312_v21 }
  0x61   :  { %814 = vmatpush.bf16.msra.mxu1 %v1320_v22 }
  0x62   :  { %827 = vmatpush.bf16.msra.mxu2 %v1328_v38 }
  0x63   :  { %840 = vmatpush.bf16.msra.mxu3 %v1336_v48 }
  0xa0   :  { %v431_v33 = vpop.f32.mrf.mxu0 }
  0xa1   :  { %v432_v35 = vadd.f32 %v431_v33, %v88_v31 }
  0xa3   :  { %v444_v36 = vpop.f32.mrf.mxu1 }
  0xa4   :  { %v445_v39 = vadd.f32 %v444_v36, %v432_v35 }
  0xa6   :  { %v526_v42 = vmax.f32 %v445_v39, 0.0 }
  0xa7   :  { %v457_v41 = vpop.f32.mrf.mxu2 }
  0xa8   :  { %v458_v43 = vadd.f32 %v457_v41, %v89_v37  ;;  %v530_v45 = vpack.c.bf16 %v526_v42, %v526_v42  ;;  %v433_v47 = vpop.f32.mrf.mxu0 }
  0xaa   :  { %v470_v44 = vpop.f32.mrf.mxu3  ;;  %802 = vmatmul.bf16.vlgmr.msra.gmra.mxu0 %v530_v45 }
  0xab   :  { %v471_v46 = vadd.f32 %v470_v44, %v458_v43  ;;  %v446_v49 = vpop.f32.mrf.mxu1 }
  0xad   :  { %v527_v50 = vmax.f32 %v471_v46, 0.0 }
  0xaf   :  { %v531_v51 = vpack.c.bf16 %v527_v50, %v527_v50  ;;  %v459_v52 = vpop.f32.mrf.mxu2 }
  0xb1   :  { %815 = vmatmul.bf16.vlgmr.msra.gmra.mxu1 %v531_v51 }
  0xb2   :  { %v472_v53 = vpop.f32.mrf.mxu3 }
  0xc0   :  { %v483_v55 = vpop.f32.mrf.mxu0 }
  0xc1   :  { %v484_v56 = vadd.f32 %v483_v55, %v90_v54  ;;  %v496_v57 = vpop.f32.mrf.mxu1 }
  0xc3   :  { %v497_v59 = vadd.f32 %v496_v57, %v484_v56 }
  0xc5   :  { %v528_v62 = vmax.f32 %v497_v59, 0.0 }
  0xc7   :  { %v532_v63 = vpack.c.bf16 %v528_v62, %v528_v62 }
  0xc8   :  { %v509_v0 = vpop.f32.mrf.mxu2  ;;  %v485_v3 = vpop.f32.mrf.mxu0 }
  0xc9   :  { %v510_v1 = vadd.f32 %v509_v0, %v91_v61  ;;  %v522_v2 = vpop.f32.mrf.mxu3  ;;  %v498_v4 = vpop.f32.mrf.mxu1  ;;  %828 = vmatmul.bf16.vlgmr.msra.gmra.mxu2 %v532_v63 }
  0xcb   :  { %v523_v5 = vadd.f32 %v522_v2, %v510_v1 }
  0xcd   :  { %v529_v6 = vmax.f32 %v523_v5, 0.0 }
  0xcf   :  { %v533_v7 = vpack.c.bf16 %v529_v6, %v529_v6 }
  0xd0   :  { %v511_v8 = vpop.f32.mrf.mxu2 }
  0xd1   :  { %v524_v9 = vpop.f32.mrf.mxu3  ;;  %841 = vmatmul.bf16.vlgmr.msra.gmra.mxu3 %v533_v7 }
 0x127   :  { %v803_v10 = vpop.f32.mrf.mxu0 }
 0x128   :  { %v804_v13 = vadd.f32 %v1345_v60, %v803_v10 }
 0x12e   :  { %v816_v11 = vpop.f32.mrf.mxu1 }
 0x12f   :  { %v805_v12 = vpop.f32.mrf.mxu0  ;;  %v817_v15 = vadd.f32 %v816_v11, %v804_v13 }
 0x136   :  { %v818_v58 = vpop.f32.mrf.mxu1 }
 0x14c   :  { %v829_v14 = vpop.f32.mrf.mxu2 }
 0x14d   :  { %v830_v16 = vadd.f32 %v829_v14, %v817_v15 }
 0x154   :  { %v842_v17 = vpop.f32.mrf.mxu3  ;;  %v831_v19 = vpop.f32.mrf.mxu2 }
 0x155   :  { %v843_v18 = vadd.f32 %v842_v17, %v830_v16 }
 0x157   :  { %847 = vst.msk [vmem:[#allocation2] sm:$0x3] %vm846_vm0, %v843_v18 }
 0x158   :  { %858 = dma.vmem_to_hbm [thread:$0]  %s854_s8, 32, %s856_s11, [#allocation3]  }
 0x15c   :  { %v844_v20 = vpop.f32.mrf.mxu3 }
 0x15d   :  { %1370 = dma.done.wait [#allocation3], 32  }
 0x15e   :  { %1371 = vsyncadd [#allocation3], 4294967264 }
 0x15f   :  { %863 = vsyncpa [#allocation3], 1 }

</bundles_post_ra>
